<compile_context>
chip_gen: v7x
topology: tpu7x:2x2x1
jax: 0.10.0
libtpu: 0.0.40
codegen_flags: <defaults>
</compile_context>

<pallas_src>
import jax
import jax.numpy as jnp
from jax import lax
from jax.experimental import pallas as pl
from jax.experimental.pallas import tpu as pltpu

_LANE = 128
_VMEM_LIMIT = 32 * 1024 * 1024


def _round_up(x, m):
    return ((x + m - 1) // m) * m


# ----------------------- kernel 1: 1x1 conv + BN + SiLU ----------------------
def _matmul_bias_silu_kernel(x_ref, w_ref, b_ref, o_ref):
    # x_ref: (tm, K) activations, w_ref: (K, Np) BN-folded weights (Np = lane
    # padded Cout), b_ref: (1, Np) folded bias, o_ref: (tm, Np).
    y = jnp.dot(x_ref[...], w_ref[...], preferred_element_type=jnp.float32)
    y = y + b_ref[...]
    # SiLU: exp on the EUP, approximate reciprocal keeps the divide off the VALU.
    sig = pl.reciprocal(1.0 + jnp.exp(-y), approx=True)
    o_ref[...] = (y * sig).astype(o_ref.dtype)


def _fused_matmul_bias_silu(x2d, w_mat, bias, *, tm=512):
    """(M, K) @ (K, Np) + bias -> SiLU, Np already padded to a multiple of 128."""
    M, K = x2d.shape
    Np = w_mat.shape[1]

    tm = min(tm, _round_up(M, 8))
    M_pad = _round_up(M, tm)
    if M_pad != M:
        x2d = jnp.pad(x2d, ((0, M_pad - M), (0, 0)))

    out = pl.pallas_call(
        _matmul_bias_silu_kernel,
        out_shape=jax.ShapeDtypeStruct((M_pad, Np), jnp.float32),
        grid_spec=pltpu.PrefetchScalarGridSpec(
            num_scalar_prefetch=0,
            grid=(M_pad // tm,),
            in_specs=[
                pl.BlockSpec((tm, K), lambda i: (i, 0)),
                pl.BlockSpec((K, Np), lambda i: (0, 0)),
                pl.BlockSpec((1, Np), lambda i: (0, 0)),
            ],
            out_specs=pl.BlockSpec((tm, Np), lambda i: (i, 0)),
        ),
        compiler_params=pltpu.CompilerParams(
            dimension_semantics=("parallel",),
            vmem_limit_bytes=_VMEM_LIMIT),
    )(x2d, w_mat, bias)
    return out[:M]


# -------------- kernel 2: 3x chained MaxPool2d(5,1,2) + concat ---------------
def _pool5_rows(a, h_out):
    m = a[0:h_out]
    for d in range(1, 5):
        m = jnp.maximum(m, a[d:d + h_out])
    return m


def _pool5_cols(a, w_out):
    m = a[:, 0:w_out]
    for d in range(1, 5):
        m = jnp.maximum(m, a[:, d:d + w_out])
    return m


def _mask_border(a, b):
    """Set a border of width b (spatial dims) to -inf: emulates the implicit
    -inf padding MaxPool2d(padding=2) applies before the *next* pool."""
    h, w, c = a.shape
    ih = lax.broadcasted_iota(jnp.int32, (h, w, c), 0)
    iw = lax.broadcasted_iota(jnp.int32, (h, w, c), 1)
    inside = (ih >= b) & (ih < h - b) & (iw >= b) & (iw < w - b)
    return jnp.where(inside, a, -jnp.inf)


def _sppf_pool_concat_kernel(xp_ref, o_ref):
    # xp_ref: (1, H+12, W+12, C)  conv1 output, -inf halo of width 6.
    # o_ref : (1, H, W, 4*C)      concat([x, m(x), m(m(x)), m(m(m(x)))], -1).
    H, W = o_ref.shape[1], o_ref.shape[2]
    C = xp_ref.shape[-1]           # per-block channel width (lane padded)

    x = xp_ref[0]                                        # (H+12, W+12, C)

    # channel block 0: conv1 output itself (interior of the halo block)
    o_ref[0, :, :, 0:C] = x[6:6 + H, 6:6 + W, :]

    # pool #1: valid 5x5 max over the halo block -> (H+8, W+8, C)
    y1 = _pool5_cols(_pool5_rows(x, H + 8), W + 8)
    o_ref[0, :, :, C:2 * C] = y1[4:4 + H, 4:4 + W, :]
    y1 = _mask_border(y1, 4)       # re-apply -inf frame between pools

    # pool #2 -> (H+4, W+4, C)
    y2 = _pool5_cols(_pool5_rows(y1, H + 4), W + 4)
    o_ref[0, :, :, 2 * C:3 * C] = y2[2:2 + H, 2:2 + W, :]
    y2 = _mask_border(y2, 2)

    # pool #3 -> (H, W, C)
    o_ref[0, :, :, 3 * C:4 * C] = _pool5_cols(_pool5_rows(y2, H), W)


# ------------------------------- glue (JAX) ----------------------------------
def _fold_bn_into_1x1(conv_w, gamma, beta, mean, var, eps, cout_pad,
                      in_groups=1, group_in_pad=None):
    """Fold eval-mode BN into a 1x1 conv weight; zero-pad Cout (and optionally
    grouped Cin) up to lane-dense sizes.  Scale is computed on the real
    channels only, so padded columns are exact zeros (no NaN leakage)."""
    cout, cin = conv_w.shape[0], conv_w.shape[1]
    scale = gamma / jnp.sqrt(var + eps)                   # (Cout,)
    w = conv_w.reshape(cout, cin).T * scale[None, :]      # (Cin, Cout)
    b = (beta - mean * scale)[None, :]                    # (1, Cout)
    if in_groups > 1:
        gi = cin // in_groups
        w = w.reshape(in_groups, gi, cout)
        w = jnp.pad(w, ((0, 0), (0, group_in_pad - gi), (0, cout_pad - cout)))
        w = w.reshape(in_groups * group_in_pad, cout_pad)
    else:
        w = jnp.pad(w, ((0, 0), (0, cout_pad - cout)))
    b = jnp.pad(b, ((0, 0), (0, cout_pad - cout)))
    return w.astype(jnp.float32), b.astype(jnp.float32)


def sppf_bottleneck_forward(x_nchw, p, *, eps=1e-5):
    """SPPFBottleneck.forward.  x: NCHW.  Returns NCHW."""
    N, Cin, H, W = x_nchw.shape
    mid = Cin // 2
    Cout = p["conv2_w"].shape[0]
    mid_pad = _round_up(mid, _LANE)
    cout_pad = _round_up(Cout, _LANE)

    # ---- conv1 (1x1 + BN + SiLU) as a lane-dense matmul -------------------
    x2d = jnp.transpose(x_nchw, (0, 2, 3, 1)).reshape(N * H * W, Cin)
    w1, b1 = _fold_bn_into_1x1(p["conv1_w"], p["bn1_gamma"], p["bn1_beta"],
                               p["bn1_mean"], p["bn1_var"], eps, mid_pad)
    h1 = _fused_matmul_bias_silu(x2d, w1, b1).reshape(N, H, W, mid_pad)

    # ---- 3 chained 5x5/s1/p2 max-pools + channel concat, one kernel -------
    hp = jnp.pad(h1, ((0, 0), (6, 6), (6, 6), (0, 0)),
                 constant_values=-jnp.inf)
    pooled = pl.pallas_call(
        _sppf_pool_concat_kernel,
        out_shape=jax.ShapeDtypeStruct((N, H, W, 4 * mid_pad), jnp.float32),
        grid_spec=pltpu.PrefetchScalarGridSpec(
            num_scalar_prefetch=0,
            grid=(N,),
            in_specs=[pl.BlockSpec((1, H + 12, W + 12, mid_pad),
                                   lambda n: (n, 0, 0, 0))],
            out_specs=pl.BlockSpec((1, H, W, 4 * mid_pad),
                                   lambda n: (n, 0, 0, 0)),
        ),
        compiler_params=pltpu.CompilerParams(
            dimension_semantics=("parallel",),
            vmem_limit_bytes=_VMEM_LIMIT),
    )(hp)

    # ---- conv2 (1x1 + BN + SiLU) on the concatenated features -------------
    cat2d = pooled.reshape(N * H * W, 4 * mid_pad)
    w2, b2 = _fold_bn_into_1x1(p["conv2_w"], p["bn2_gamma"], p["bn2_beta"],
                               p["bn2_mean"], p["bn2_var"], eps, cout_pad,
                               in_groups=4, group_in_pad=mid_pad)
    out = _fused_matmul_bias_silu(cat2d, w2, b2)[:, :Cout]
    return jnp.transpose(out.reshape(N, H, W, Cout), (0, 3, 1, 2))


# -------------------------------- reference ----------------------------------
def _base_conv_ref(x, w, gamma, beta, mean, var, eps):
    y = lax.conv_general_dilated(x, w, (1, 1), padding=[(0, 0), (0, 0)],
                                 dimension_numbers=("NCHW", "OIHW", "NCHW"))
    g = gamma.reshape(1, -1, 1, 1); b = beta.reshape(1, -1, 1, 1)
    m = mean.reshape(1, -1, 1, 1); v = var.reshape(1, -1, 1, 1)
    y = g * (y - m) / jnp.sqrt(v + eps) + b
    return y * jax.nn.sigmoid(y)


def _maxpool5_ref(x):
    return lax.reduce_window(x, -jnp.inf, lax.max, (1, 1, 5, 5), (1, 1, 1, 1),
                             [(0, 0), (0, 0), (2, 2), (2, 2)])


def sppf_bottleneck_reference(x, p, *, eps=1e-5):
    x1 = _base_conv_ref(x, p["conv1_w"], p["bn1_gamma"], p["bn1_beta"],
                        p["bn1_mean"], p["bn1_var"], eps)
    y1 = _maxpool5_ref(x1)
    y2 = _maxpool5_ref(y1)
    y3 = _maxpool5_ref(y2)
    cat = jnp.concatenate([x1, y1, y2, y3], axis=1)
    return _base_conv_ref(cat, p["conv2_w"], p["bn2_gamma"], p["bn2_beta"],
                          p["bn2_mean"], p["bn2_var"], eps)


# ----------------------------------- main -------------------------------------
if __name__ == "__main__":
    # SPPFBottleneck(in_channels=4, out_channels=8, kernel_sizes=5, act='silu')
    N, Cin, H, W = 2, 4, 16, 16
    Cout = 8
    mid = Cin // 2

    key = jax.random.PRNGKey(0)
    ks = jax.random.split(key, 11)
    x = jax.random.normal(ks[0], (N, Cin, H, W), jnp.float32)
    p = dict(
        conv1_w=0.1 * jax.random.normal(ks[1], (mid, Cin, 1, 1), jnp.float32),
        bn1_gamma=1.0 + 0.1 * jax.random.normal(ks[2], (mid,), jnp.float32),
        bn1_beta=0.1 * jax.random.normal(ks[3], (mid,), jnp.float32),
        bn1_mean=0.1 * jax.random.normal(ks[4], (mid,), jnp.float32),
        bn1_var=jnp.abs(jax.random.normal(ks[5], (mid,), jnp.float32)) + 0.5,
        conv2_w=0.1 * jax.random.normal(ks[6], (Cout, 4 * mid, 1, 1), jnp.float32),
        bn2_gamma=1.0 + 0.1 * jax.random.normal(ks[7], (Cout,), jnp.float32),
        bn2_beta=0.1 * jax.random.normal(ks[8], (Cout,), jnp.float32),
        bn2_mean=0.1 * jax.random.normal(ks[9], (Cout,), jnp.float32),
        bn2_var=jnp.abs(jax.random.normal(ks[10], (Cout,), jnp.float32)) + 0.5,
    )

    fwd = jax.jit(sppf_bottleneck_forward)
    out = fwd(x, p)
    jax.block_until_ready(out)

    ref = sppf_bottleneck_reference(x, p)
    assert out.shape == (N, Cout, H, W), out.shape
    # Tolerance headroom is solely for the EUP approximate reciprocal inside
    # the SiLU epilogue; with approx=False the kernels match to ~1e-5.
    err = float(jnp.max(jnp.abs(out - ref)))
    assert jnp.allclose(out, ref, atol=2e-2, rtol=2e-2), err
    print("KERNEL_OK")
</pallas_src>

<mosaic_0001>
module attributes {stable_mosaic.version = 11 : i64} {
  func.func @_matmul_bias_silu_kernel(%arg0: i32, %arg1: memref<512x4xf32, #tpu.memory_space<vmem>>, %arg2: memref<4x128xf32, #tpu.memory_space<vmem>>, %arg3: memref<1x128xf32, #tpu.memory_space<vmem>>, %arg4: memref<512x128xf32, #tpu.memory_space<vmem>>) attributes {dimension_semantics = [#tpu.dimension_semantics<parallel>], iteration_bounds = array<i64: 1>, scalar_prefetch = 0 : i64, scratch_operands = 0 : i64, tpu.core_type = #tpu.core_type<tc>, window_params = [{transform_indices = @transform_0, window_bounds = array<i64: 512, 4>}, {pipeline_mode = #tpu.pipeline_mode<synchronous>, transform_indices = @transform_1, window_bounds = array<i64: 4, 128>}, {pipeline_mode = #tpu.pipeline_mode<synchronous>, transform_indices = @transform_2, window_bounds = array<i64: 1, 128>}, {transform_indices = @transform_3, window_bounds = array<i64: 512, 128>}]} {
    %c0 = arith.constant 0 : index
    %c0_0 = arith.constant 0 : index
    %0 = vector.load %arg1[%c0, %c0_0] : memref<512x4xf32, #tpu.memory_space<vmem>>, vector<512x4xf32>
    %c0_1 = arith.constant 0 : index
    %c0_2 = arith.constant 0 : index
    %1 = vector.load %arg2[%c0_1, %c0_2] : memref<4x128xf32, #tpu.memory_space<vmem>>, vector<4x128xf32>
    %cst = arith.constant dense<0.000000e+00> : vector<512x128xf32>
    %2 = tpu.matmul %0, %1, %cst {dimension_numbers = #tpu.dot_dimension_numbers<[1], [0], [0], [1], [0, 0, 1, 1], [], []>} : vector<512x4xf32>, vector<4x128xf32>, vector<512x128xf32> -> vector<512x128xf32>
    %c0_3 = arith.constant 0 : index
    %c0_4 = arith.constant 0 : index
    %3 = vector.load %arg3[%c0_3, %c0_4] : memref<1x128xf32, #tpu.memory_space<vmem>>, vector<1x128xf32>
    %4 = vector.broadcast %3 : vector<1x128xf32> to vector<512x128xf32>
    %5 = arith.addf %2, %4 : vector<512x128xf32>
    %cst_5 = arith.constant 0.000000e+00 : f32
    %6 = vector.broadcast %cst_5 : f32 to vector<512x128xf32>
    %7 = arith.subf %6, %5 : vector<512x128xf32>
    %8 = math.exp %7 : vector<512x128xf32>
    %cst_6 = arith.constant 1.000000e+00 : f32
    %9 = vector.broadcast %cst_6 : f32 to vector<512x128xf32>
    %10 = arith.addf %9, %8 : vector<512x128xf32>
    %11 = tpu.reciprocal %10 {approx = true} : vector<512x128xf32> -> vector<512x128xf32>
    %12 = arith.mulf %5, %11 : vector<512x128xf32>
    %c0_7 = arith.constant 0 : index
    %c0_8 = arith.constant 0 : index
    %13 = vector.load %arg4[%c0_7, %c0_8] : memref<512x128xf32, #tpu.memory_space<vmem>>, vector<512x128xf32>
    tpu.vector_store %arg4[%c0_7, %c0_8], %12 {strides = array<i32>} : memref<512x128xf32, #tpu.memory_space<vmem>>, vector<512x128xf32>,
    return
  }
  func.func @transform_0(%arg0: i32) -> (i32, i32) {
    %c0_i32 = arith.constant 0 : i32
    %c0_i32_0 = arith.constant 0 : i32
    return %arg0, %c0_i32 : i32, i32
  }
  func.func @transform_1(%arg0: i32) -> (i32, i32) {
    %c0_i32 = arith.constant 0 : i32
    %c0_i32_0 = arith.constant 0 : i32
    %c0_i32_1 = arith.constant 0 : i32
    return %c0_i32, %c0_i32_0 : i32, i32
  }
  func.func @transform_2(%arg0: i32) -> (i32, i32) {
    %c0_i32 = arith.constant 0 : i32
    %c0_i32_0 = arith.constant 0 : i32
    %c0_i32_1 = arith.constant 0 : i32
    return %c0_i32, %c0_i32_0 : i32, i32
  }
  func.func @transform_3(%arg0: i32) -> (i32, i32) {
    %c0_i32 = arith.constant 0 : i32
    %c0_i32_0 = arith.constant 0 : i32
    return %arg0, %c0_i32 : i32, i32
  }
}

module attributes {stable_mosaic.version = 11 : i64} {
  func.func @_sppf_pool_concat_kernel(%arg0: i32, %arg1: memref<1x28x28x128xf32, #tpu.memory_space<vmem>>, %arg2: memref<1x16x16x512xf32, #tpu.memory_space<vmem>>) attributes {dimension_semantics = [#tpu.dimension_semantics<parallel>], iteration_bounds = array<i64: 2>, scalar_prefetch = 0 : i64, scratch_operands = 0 : i64, tpu.core_type = #tpu.core_type<tc>, window_params = [{transform_indices = @transform_0, window_bounds = array<i64: 1, 28, 28, 128>}, {transform_indices = @transform_1, window_bounds = array<i64: 1, 16, 16, 512>}]} {
    %c0 = arith.constant 0 : index
    %c0_0 = arith.constant 0 : index
    %c0_1 = arith.constant 0 : index
    %c0_2 = arith.constant 0 : index
    %0 = vector.load %arg1[%c0, %c0_0, %c0_1, %c0_2] : memref<1x28x28x128xf32, #tpu.memory_space<vmem>>, vector<1x28x28x128xf32>
    %1 = vector.shape_cast %0 : vector<1x28x28x128xf32> to vector<28x28x128xf32>
    %2 = vector.extract_strided_slice %1 {offsets = [6, 6, 0], sizes = [16, 16, 128], strides = [1, 1, 1]} : vector<28x28x128xf32> to vector<16x16x128xf32>
    %c0_3 = arith.constant 0 : index
    %c0_4 = arith.constant 0 : index
    %c0_5 = arith.constant 0 : index
    %c0_6 = arith.constant 0 : index
    %3 = vector.load %arg2[%c0_3, %c0_4, %c0_5, %c0_6] : memref<1x16x16x512xf32, #tpu.memory_space<vmem>>, vector<1x16x16x128xf32>
    %4 = vector.shape_cast %3 : vector<1x16x16x128xf32> to vector<16x16x128xf32>
    %5 = vector.shape_cast %2 : vector<16x16x128xf32> to vector<1x16x16x128xf32>
    tpu.vector_store %arg2[%c0_3, %c0_4, %c0_5, %c0_6], %5 {strides = array<i32>} : memref<1x16x16x512xf32, #tpu.memory_space<vmem>>, vector<1x16x16x128xf32>,
    %6 = vector.extract_strided_slice %1 {offsets = [0, 0, 0], sizes = [24, 28, 128], strides = [1, 1, 1]} : vector<28x28x128xf32> to vector<24x28x128xf32>
    %7 = vector.extract_strided_slice %1 {offsets = [1, 0, 0], sizes = [24, 28, 128], strides = [1, 1, 1]} : vector<28x28x128xf32> to vector<24x28x128xf32>
    %8 = arith.maximumf %6, %7 : vector<24x28x128xf32>
    %9 = vector.extract_strided_slice %1 {offsets = [2, 0, 0], sizes = [24, 28, 128], strides = [1, 1, 1]} : vector<28x28x128xf32> to vector<24x28x128xf32>
    %10 = arith.maximumf %8, %9 : vector<24x28x128xf32>
    %11 = vector.extract_strided_slice %1 {offsets = [3, 0, 0], sizes = [24, 28, 128], strides = [1, 1, 1]} : vector<28x28x128xf32> to vector<24x28x128xf32>
    %12 = arith.maximumf %10, %11 : vector<24x28x128xf32>
    %13 = vector.extract_strided_slice %1 {offsets = [4, 0, 0], sizes = [24, 28, 128], strides = [1, 1, 1]} : vector<28x28x128xf32> to vector<24x28x128xf32>
    %14 = arith.maximumf %12, %13 : vector<24x28x128xf32>
    %15 = vector.extract_strided_slice %14 {offsets = [0, 0, 0], sizes = [24, 24, 128], strides = [1, 1, 1]} : vector<24x28x128xf32> to vector<24x24x128xf32>
    %16 = vector.extract_strided_slice %14 {offsets = [0, 1, 0], sizes = [24, 24, 128], strides = [1, 1, 1]} : vector<24x28x128xf32> to vector<24x24x128xf32>
    %17 = arith.maximumf %15, %16 : vector<24x24x128xf32>
    %18 = vector.extract_strided_slice %14 {offsets = [0, 2, 0], sizes = [24, 24, 128], strides = [1, 1, 1]} : vector<24x28x128xf32> to vector<24x24x128xf32>
    %19 = arith.maximumf %17, %18 : vector<24x24x128xf32>
    %20 = vector.extract_strided_slice %14 {offsets = [0, 3, 0], sizes = [24, 24, 128], strides = [1, 1, 1]} : vector<24x28x128xf32> to vector<24x24x128xf32>
    %21 = arith.maximumf %19, %20 : vector<24x24x128xf32>
    %22 = vector.extract_strided_slice %14 {offsets = [0, 4, 0], sizes = [24, 24, 128], strides = [1, 1, 1]} : vector<24x28x128xf32> to vector<24x24x128xf32>
    %23 = arith.maximumf %21, %22 : vector<24x24x128xf32>
    %24 = vector.extract_strided_slice %23 {offsets = [4, 4, 0], sizes = [16, 16, 128], strides = [1, 1, 1]} : vector<24x24x128xf32> to vector<16x16x128xf32>
    %c0_7 = arith.constant 0 : index
    %c0_8 = arith.constant 0 : index
    %c0_9 = arith.constant 0 : index
    %c128 = arith.constant 128 : index
    %25 = vector.load %arg2[%c0_7, %c0_8, %c0_9, %c128] : memref<1x16x16x512xf32, #tpu.memory_space<vmem>>, vector<1x16x16x128xf32>
    %26 = vector.shape_cast %25 : vector<1x16x16x128xf32> to vector<16x16x128xf32>
    %27 = vector.shape_cast %24 : vector<16x16x128xf32> to vector<1x16x16x128xf32>
    tpu.vector_store %arg2[%c0_7, %c0_8, %c0_9, %c128], %27 {strides = array<i32>} : memref<1x16x16x512xf32, #tpu.memory_space<vmem>>, vector<1x16x16x128xf32>,
    %28 = tpu.iota {dimensions = array<i32: 0>} : vector<24x24x128xi32>
    %29 = tpu.iota {dimensions = array<i32: 1>} : vector<24x24x128xi32>
    %c4_i32 = arith.constant 4 : i32
    %30 = vector.broadcast %c4_i32 : i32 to vector<24x24x128xi32>
    %31 = arith.cmpi sge, %28, %30 : vector<24x24x128xi32>
    %c20_i32 = arith.constant 20 : i32
    %32 = vector.broadcast %c20_i32 : i32 to vector<24x24x128xi32>
    %33 = arith.cmpi slt, %28, %32 : vector<24x24x128xi32>
    %34 = arith.andi %31, %33 : vector<24x24x128xi1>
    %c4_i32_10 = arith.constant 4 : i32
    %35 = vector.broadcast %c4_i32_10 : i32 to vector<24x24x128xi32>
    %36 = arith.cmpi sge, %29, %35 : vector<24x24x128xi32>
    %37 = arith.andi %34, %36 : vector<24x24x128xi1>
    %c20_i32_11 = arith.constant 20 : i32
    %38 = vector.broadcast %c20_i32_11 : i32 to vector<24x24x128xi32>
    %39 = arith.cmpi slt, %29, %38 : vector<24x24x128xi32>
    %40 = arith.andi %37, %39 : vector<24x24x128xi1>
    %cst = arith.constant 0xFF800000 : f32
    %41 = vector.broadcast %cst : f32 to vector<24x24x128xf32>
    %42 = arith.select %40, %23, %41 : vector<24x24x128xi1>, vector<24x24x128xf32>
    %43 = vector.extract_strided_slice %42 {offsets = [0, 0, 0], sizes = [20, 24, 128], strides = [1, 1, 1]} : vector<24x24x128xf32> to vector<20x24x128xf32>
    %44 = vector.extract_strided_slice %42 {offsets = [1, 0, 0], sizes = [20, 24, 128], strides = [1, 1, 1]} : vector<24x24x128xf32> to vector<20x24x128xf32>
    %45 = arith.maximumf %43, %44 : vector<20x24x128xf32>
    %46 = vector.extract_strided_slice %42 {offsets = [2, 0, 0], sizes = [20, 24, 128], strides = [1, 1, 1]} : vector<24x24x128xf32> to vector<20x24x128xf32>
    %47 = arith.maximumf %45, %46 : vector<20x24x128xf32>
    %48 = vector.extract_strided_slice %42 {offsets = [3, 0, 0], sizes = [20, 24, 128], strides = [1, 1, 1]} : vector<24x24x128xf32> to vector<20x24x128xf32>
    %49 = arith.maximumf %47, %48 : vector<20x24x128xf32>
    %50 = vector.extract_strided_slice %42 {offsets = [4, 0, 0], sizes = [20, 24, 128], strides = [1, 1, 1]} : vector<24x24x128xf32> to vector<20x24x128xf32>
    %51 = arith.maximumf %49, %50 : vector<20x24x128xf32>
    %52 = vector.extract_strided_slice %51 {offsets = [0, 0, 0], sizes = [20, 20, 128], strides = [1, 1, 1]} : vector<20x24x128xf32> to vector<20x20x128xf32>
    %53 = vector.extract_strided_slice %51 {offsets = [0, 1, 0], sizes = [20, 20, 128], strides = [1, 1, 1]} : vector<20x24x128xf32> to vector<20x20x128xf32>
    %54 = arith.maximumf %52, %53 : vector<20x20x128xf32>
    %55 = vector.extract_strided_slice %51 {offsets = [0, 2, 0], sizes = [20, 20, 128], strides = [1, 1, 1]} : vector<20x24x128xf32> to vector<20x20x128xf32>
    %56 = arith.maximumf %54, %55 : vector<20x20x128xf32>
    %57 = vector.extract_strided_slice %51 {offsets = [0, 3, 0], sizes = [20, 20, 128], strides = [1, 1, 1]} : vector<20x24x128xf32> to vector<20x20x128xf32>
    %58 = arith.maximumf %56, %57 : vector<20x20x128xf32>
    %59 = vector.extract_strided_slice %51 {offsets = [0, 4, 0], sizes = [20, 20, 128], strides = [1, 1, 1]} : vector<20x24x128xf32> to vector<20x20x128xf32>
    %60 = arith.maximumf %58, %59 : vector<20x20x128xf32>
    %61 = vector.extract_strided_slice %60 {offsets = [2, 2, 0], sizes = [16, 16, 128], strides = [1, 1, 1]} : vector<20x20x128xf32> to vector<16x16x128xf32>
    %c0_12 = arith.constant 0 : index
    %c0_13 = arith.constant 0 : index
    %c0_14 = arith.constant 0 : index
    %c256 = arith.constant 256 : index
    %62 = vector.load %arg2[%c0_12, %c0_13, %c0_14, %c256] : memref<1x16x16x512xf32, #tpu.memory_space<vmem>>, vector<1x16x16x128xf32>
    %63 = vector.shape_cast %62 : vector<1x16x16x128xf32> to vector<16x16x128xf32>
    %64 = vector.shape_cast %61 : vector<16x16x128xf32> to vector<1x16x16x128xf32>
    tpu.vector_store %arg2[%c0_12, %c0_13, %c0_14, %c256], %64 {strides = array<i32>} : memref<1x16x16x512xf32, #tpu.memory_space<vmem>>, vector<1x16x16x128xf32>,
    %65 = tpu.iota {dimensions = array<i32: 0>} : vector<20x20x128xi32>
    %66 = tpu.iota {dimensions = array<i32: 1>} : vector<20x20x128xi32>
    %c2_i32 = arith.constant 2 : i32
    %67 = vector.broadcast %c2_i32 : i32 to vector<20x20x128xi32>
    %68 = arith.cmpi sge, %65, %67 : vector<20x20x128xi32>
    %c18_i32 = arith.constant 18 : i32
    %69 = vector.broadcast %c18_i32 : i32 to vector<20x20x128xi32>
    %70 = arith.cmpi slt, %65, %69 : vector<20x20x128xi32>
    %71 = arith.andi %68, %70 : vector<20x20x128xi1>
    %c2_i32_15 = arith.constant 2 : i32
    %72 = vector.broadcast %c2_i32_15 : i32 to vector<20x20x128xi32>
    %73 = arith.cmpi sge, %66, %72 : vector<20x20x128xi32>
    %74 = arith.andi %71, %73 : vector<20x20x128xi1>
    %c18_i32_16 = arith.constant 18 : i32
    %75 = vector.broadcast %c18_i32_16 : i32 to vector<20x20x128xi32>
    %76 = arith.cmpi slt, %66, %75 : vector<20x20x128xi32>
    %77 = arith.andi %74, %76 : vector<20x20x128xi1>
    %cst_17 = arith.constant 0xFF800000 : f32
    %78 = vector.broadcast %cst_17 : f32 to vector<20x20x128xf32>
    %79 = arith.select %77, %60, %78 : vector<20x20x128xi1>, vector<20x20x128xf32>
    %80 = vector.extract_strided_slice %79 {offsets = [0, 0, 0], sizes = [16, 20, 128], strides = [1, 1, 1]} : vector<20x20x128xf32> to vector<16x20x128xf32>
    %81 = vector.extract_strided_slice %79 {offsets = [1, 0, 0], sizes = [16, 20, 128], strides = [1, 1, 1]} : vector<20x20x128xf32> to vector<16x20x128xf32>
    %82 = arith.maximumf %80, %81 : vector<16x20x128xf32>
    %83 = vector.extract_strided_slice %79 {offsets = [2, 0, 0], sizes = [16, 20, 128], strides = [1, 1, 1]} : vector<20x20x128xf32> to vector<16x20x128xf32>
    %84 = arith.maximumf %82, %83 : vector<16x20x128xf32>
    %85 = vector.extract_strided_slice %79 {offsets = [3, 0, 0], sizes = [16, 20, 128], strides = [1, 1, 1]} : vector<20x20x128xf32> to vector<16x20x128xf32>
    %86 = arith.maximumf %84, %85 : vector<16x20x128xf32>
    %87 = vector.extract_strided_slice %79 {offsets = [4, 0, 0], sizes = [16, 20, 128], strides = [1, 1, 1]} : vector<20x20x128xf32> to vector<16x20x128xf32>
    %88 = arith.maximumf %86, %87 : vector<16x20x128xf32>
    %89 = vector.extract_strided_slice %88 {offsets = [0, 0, 0], sizes = [16, 16, 128], strides = [1, 1, 1]} : vector<16x20x128xf32> to vector<16x16x128xf32>
    %90 = vector.extract_strided_slice %88 {offsets = [0, 1, 0], sizes = [16, 16, 128], strides = [1, 1, 1]} : vector<16x20x128xf32> to vector<16x16x128xf32>
    %91 = arith.maximumf %89, %90 : vector<16x16x128xf32>
    %92 = vector.extract_strided_slice %88 {offsets = [0, 2, 0], sizes = [16, 16, 128], strides = [1, 1, 1]} : vector<16x20x128xf32> to vector<16x16x128xf32>
    %93 = arith.maximumf %91, %92 : vector<16x16x128xf32>
    %94 = vector.extract_strided_slice %88 {offsets = [0, 3, 0], sizes = [16, 16, 128], strides = [1, 1, 1]} : vector<16x20x128xf32> to vector<16x16x128xf32>
    %95 = arith.maximumf %93, %94 : vector<16x16x128xf32>
    %96 = vector.extract_strided_slice %88 {offsets = [0, 4, 0], sizes = [16, 16, 128], strides = [1, 1, 1]} : vector<16x20x128xf32> to vector<16x16x128xf32>
    %97 = arith.maximumf %95, %96 : vector<16x16x128xf32>
    %c0_18 = arith.constant 0 : index
    %c0_19 = arith.constant 0 : index
    %c0_20 = arith.constant 0 : index
    %c384 = arith.constant 384 : index
    %98 = vector.load %arg2[%c0_18, %c0_19, %c0_20, %c384] : memref<1x16x16x512xf32, #tpu.memory_space<vmem>>, vector<1x16x16x128xf32>
    %99 = vector.shape_cast %98 : vector<1x16x16x128xf32> to vector<16x16x128xf32>
    %100 = vector.shape_cast %97 : vector<16x16x128xf32> to vector<1x16x16x128xf32>
    tpu.vector_store %arg2[%c0_18, %c0_19, %c0_20, %c384], %100 {strides = array<i32>} : memref<1x16x16x512xf32, #tpu.memory_space<vmem>>, vector<1x16x16x128xf32>,
    return
  }
  func.func @transform_0(%arg0: i32) -> (i32, i32, i32, i32) {
    %c0_i32 = arith.constant 0 : i32
    %c0_i32_0 = arith.constant 0 : i32
    %c0_i32_1 = arith.constant 0 : i32
    %c0_i32_2 = arith.constant 0 : i32
    return %arg0, %c0_i32, %c0_i32_0, %c0_i32_1 : i32, i32, i32, i32
  }
  func.func @transform_1(%arg0: i32) -> (i32, i32, i32, i32) {
    %c0_i32 = arith.constant 0 : i32
    %c0_i32_0 = arith.constant 0 : i32
    %c0_i32_1 = arith.constant 0 : i32
    %c0_i32_2 = arith.constant 0 : i32
    return %arg0, %c0_i32, %c0_i32_0, %c0_i32_1 : i32, i32, i32, i32
  }
}

module attributes {stable_mosaic.version = 11 : i64} {
  func.func @_matmul_bias_silu_kernel(%arg0: i32, %arg1: memref<512x512xf32, #tpu.memory_space<vmem>>, %arg2: memref<512x128xf32, #tpu.memory_space<vmem>>, %arg3: memref<1x128xf32, #tpu.memory_space<vmem>>, %arg4: memref<512x128xf32, #tpu.memory_space<vmem>>) attributes {dimension_semantics = [#tpu.dimension_semantics<parallel>], iteration_bounds = array<i64: 1>, scalar_prefetch = 0 : i64, scratch_operands = 0 : i64, tpu.core_type = #tpu.core_type<tc>, window_params = [{transform_indices = @transform_0, window_bounds = array<i64: 512, 512>}, {pipeline_mode = #tpu.pipeline_mode<synchronous>, transform_indices = @transform_1, window_bounds = array<i64: 512, 128>}, {pipeline_mode = #tpu.pipeline_mode<synchronous>, transform_indices = @transform_2, window_bounds = array<i64: 1, 128>}, {transform_indices = @transform_3, window_bounds = array<i64: 512, 128>}]} {
    %c0 = arith.constant 0 : index
    %c0_0 = arith.constant 0 : index
    %0 = vector.load %arg1[%c0, %c0_0] : memref<512x512xf32, #tpu.memory_space<vmem>>, vector<512x512xf32>
    %c0_1 = arith.constant 0 : index
    %c0_2 = arith.constant 0 : index
    %1 = vector.load %arg2[%c0_1, %c0_2] : memref<512x128xf32, #tpu.memory_space<vmem>>, vector<512x128xf32>
    %cst = arith.constant dense<0.000000e+00> : vector<512x128xf32>
    %2 = tpu.matmul %0, %1, %cst {dimension_numbers = #tpu.dot_dimension_numbers<[1], [0], [0], [1], [0, 0, 1, 1], [], []>} : vector<512x512xf32>, vector<512x128xf32>, vector<512x128xf32> -> vector<512x128xf32>
    %c0_3 = arith.constant 0 : index
    %c0_4 = arith.constant 0 : index
    %3 = vector.load %arg3[%c0_3, %c0_4] : memref<1x128xf32, #tpu.memory_space<vmem>>, vector<1x128xf32>
    %4 = vector.broadcast %3 : vector<1x128xf32> to vector<512x128xf32>
    %5 = arith.addf %2, %4 : vector<512x128xf32>
    %cst_5 = arith.constant 0.000000e+00 : f32
    %6 = vector.broadcast %cst_5 : f32 to vector<512x128xf32>
    %7 = arith.subf %6, %5 : vector<512x128xf32>
    %8 = math.exp %7 : vector<512x128xf32>
    %cst_6 = arith.constant 1.000000e+00 : f32
    %9 = vector.broadcast %cst_6 : f32 to vector<512x128xf32>
    %10 = arith.addf %9, %8 : vector<512x128xf32>
    %11 = tpu.reciprocal %10 {approx = true} : vector<512x128xf32> -> vector<512x128xf32>
    %12 = arith.mulf %5, %11 : vector<512x128xf32>
    %c0_7 = arith.constant 0 : index
    %c0_8 = arith.constant 0 : index
    %13 = vector.load %arg4[%c0_7, %c0_8] : memref<512x128xf32, #tpu.memory_space<vmem>>, vector<512x128xf32>
    tpu.vector_store %arg4[%c0_7, %c0_8], %12 {strides = array<i32>} : memref<512x128xf32, #tpu.memory_space<vmem>>, vector<512x128xf32>,
    return
  }
  func.func @transform_0(%arg0: i32) -> (i32, i32) {
    %c0_i32 = arith.constant 0 : i32
    %c0_i32_0 = arith.constant 0 : i32
    return %arg0, %c0_i32 : i32, i32
  }
  func.func @transform_1(%arg0: i32) -> (i32, i32) {
    %c0_i32 = arith.constant 0 : i32
    %c0_i32_0 = arith.constant 0 : i32
    %c0_i32_1 = arith.constant 0 : i32
    return %c0_i32, %c0_i32_0 : i32, i32
  }
  func.func @transform_2(%arg0: i32) -> (i32, i32) {
    %c0_i32 = arith.constant 0 : i32
    %c0_i32_0 = arith.constant 0 : i32
    %c0_i32_1 = arith.constant 0 : i32
    return %c0_i32, %c0_i32_0 : i32, i32
  }
  func.func @transform_3(%arg0: i32) -> (i32, i32) {
    %c0_i32 = arith.constant 0 : i32
    %c0_i32_0 = arith.constant 0 : i32
    return %arg0, %c0_i32 : i32, i32
  }
}

</mosaic_0001>

<bundles_post_ra>
// kernel: sppf_bottleneck_forward.3
= control target key start
LH: loop header
LB: loop body
LE: loop exit
PB: predicated region body
PF: predicated region fallthrough
CT: control target
= control target key end

     0   :  { %vm279_vm0 = vcmask 1043456   ;;  %vm86_vm1 = vcmask 31744   ;;  %s2515_s1 = inlined_call_operand.vmem [shape: f32[4,128], index: 1, kind: input, shape index: {}]   ;;  %s2516_s0 = inlined_call_operand.vmem [shape: f32[512,4], index: 0, kind: input, shape index: {}]   ;;  %s2517_s2 = inlined_call_operand.vmem [shape: f32[1,128], index: 2, kind: input, shape index: {}]   ;;  %s2518_s3 = inlined_call_operand.vmem [shape: f32[512,128], index: 3, kind: output, shape index: {}]  }
   0x1   :  { %v78_v0 = vld [vmem:[%s2515_s1] sm:$0xf]  ;;  %v15_v3 = vld [vmem:[%s2516_s0 + $0x8] sm:$0xff]  ;;  %v16_v5 = vld [vmem:[%s2516_s0 + $0x10] sm:$0xff] }
   0x2   :  { %v14_v1 = vld [vmem:[%s2516_s0] sm:$0xff]  ;;  %1251 = vmatprep.subr.msk.mxu0 %vm279_vm0, %v78_v0  ;;  %1349 = vmatprep.subr.msk.mxu1 %vm279_vm0, %v78_v0  ;;  %v47_v4 = vld [vmem:[%s2516_s0 + $0x108] sm:$0xff]  ;;  %v48_v6 = vld [vmem:[%s2516_s0 + $0x110] sm:$0xff] }
   0x3   :  { %v46_v2 = vld [vmem:[%s2516_s0 + $0x100] sm:$0xff]  ;;  %1252 = vmatpush3.msk.msra.mxu0 %vm279_vm0, %v78_v0  ;;  %1350 = vmatpush3.msk.msra.mxu1 %vm279_vm0, %v78_v0  ;;  %v17_v7 = vld [vmem:[%s2516_s0 + $0x18] sm:$0xff]  ;;  %v19_v11 = vld [vmem:[%s2516_s0 + $0x28] sm:$0xff] }
   0x4   :  { %1253 = vmatprep.mubr.msk.f32.mxu0 %vm86_vm1, %v14_v1  ;;  %1301 = vmatprep.mubr.msk.f32.mxu1 %vm86_vm1, %v46_v2  ;;  %v49_v8 = vld [vmem:[%s2516_s0 + $0x118] sm:$0xff]  ;;  %v18_v9 = vld [vmem:[%s2516_s0 + $0x20] sm:$0xff]  ;;  %v51_v12 = vld [vmem:[%s2516_s0 + $0x128] sm:$0xff] }
   0x5   :  { %1254 = vmatmul.mubr.msk.f32.vlgmr.msra.gmra.mrb[0].mxu0 %vm86_vm1, %v15_v3  ;;  %1302 = vmatmul.mubr.msk.f32.vlgmr.msra.gmra.mrb[0].mxu1 %vm86_vm1, %v47_v4  ;;  %v50_v10 = vld [vmem:[%s2516_s0 + $0x120] sm:$0xff]  ;;  %v20_v13 = vld [vmem:[%s2516_s0 + $0x30] sm:$0xff]  ;;  %v21_v15 = vld [vmem:[%s2516_s0 + $0x38] sm:$0xff] }
   0x6   :  { %1256 = vmatprep.mubr.msk.f32.mxu0 %vm86_vm1, %v16_v5  ;;  %1304 = vmatprep.mubr.msk.f32.mxu1 %vm86_vm1, %v48_v6  ;;  %v52_v14 = vld [vmem:[%s2516_s0 + $0x130] sm:$0xff]  ;;  %v53_v16 = vld [vmem:[%s2516_s0 + $0x138] sm:$0xff]  ;;  %v22_v17 = vld [vmem:[%s2516_s0 + $0x40] sm:$0xff] }
   0x7   :  { %v54_v18 = vld [vmem:[%s2516_s0 + $0x140] sm:$0xff]  ;;  %v23_v19 = vld [vmem:[%s2516_s0 + $0x48] sm:$0xff]  ;;  %v24_v21 = vld [vmem:[%s2516_s0 + $0x50] sm:$0xff] }
   0x8   :  { %v55_v20 = vld [vmem:[%s2516_s0 + $0x148] sm:$0xff]  ;;  %v56_v22 = vld [vmem:[%s2516_s0 + $0x150] sm:$0xff]  ;;  %v25_v23 = vld [vmem:[%s2516_s0 + $0x58] sm:$0xff] }
   0x9   :  { %1257 = vmatmul.mubr.msk.f32.gmra.mrb[2].mxu0 %vm86_vm1, %v17_v7  ;;  %1305 = vmatmul.mubr.msk.f32.gmra.mrb[2].mxu1 %vm86_vm1, %v49_v8  ;;  %v57_v24 = vld [vmem:[%s2516_s0 + $0x158] sm:$0xff]  ;;  %v26_v25 = vld [vmem:[%s2516_s0 + $0x60] sm:$0xff]  ;;  %v27_v27 = vld [vmem:[%s2516_s0 + $0x68] sm:$0xff] }
   0xa   :  { %1259 = vmatprep.mubr.msk.f32.mxu0 %vm86_vm1, %v18_v9  ;;  %1307 = vmatprep.mubr.msk.f32.mxu1 %vm86_vm1, %v50_v10  ;;  %v58_v26 = vld [vmem:[%s2516_s0 + $0x160] sm:$0xff]  ;;  %v59_v28 = vld [vmem:[%s2516_s0 + $0x168] sm:$0xff]  ;;  %v28_v29 = vld [vmem:[%s2516_s0 + $0x70] sm:$0xff] }
   0xb   :  { %v60_v30 = vld [vmem:[%s2516_s0 + $0x170] sm:$0xff]  ;;  %v29_v31 = vld [vmem:[%s2516_s0 + $0x78] sm:$0xff]  ;;  %v30_v33 = vld [vmem:[%s2516_s0 + $0x80] sm:$0xff] }
   0xc   :  { %v61_v32 = vld [vmem:[%s2516_s0 + $0x178] sm:$0xff]  ;;  %v62_v34 = vld [vmem:[%s2516_s0 + $0x180] sm:$0xff]  ;;  %v31_v35 = vld [vmem:[%s2516_s0 + $0x88] sm:$0xff] }
   0xd   :  { %1260 = vmatmul.mubr.msk.f32.gmra.mrb[4].mxu0 %vm86_vm1, %v19_v11  ;;  %1308 = vmatmul.mubr.msk.f32.gmra.mrb[4].mxu1 %vm86_vm1, %v51_v12  ;;  %v63_v36 = vld [vmem:[%s2516_s0 + $0x188] sm:$0xff]  ;;  %v32_v37 = vld [vmem:[%s2516_s0 + $0x90] sm:$0xff]  ;;  %v33_v39 = vld [vmem:[%s2516_s0 + $0x98] sm:$0xff] }
   0xe   :  { %1262 = vmatprep.mubr.msk.f32.mxu0 %vm86_vm1, %v20_v13  ;;  %1310 = vmatprep.mubr.msk.f32.mxu1 %vm86_vm1, %v52_v14  ;;  %v64_v38 = vld [vmem:[%s2516_s0 + $0x190] sm:$0xff]  ;;  %v65_v40 = vld [vmem:[%s2516_s0 + $0x198] sm:$0xff]  ;;  %v34_v41 = vld [vmem:[%s2516_s0 + $0xa0] sm:$0xff] }
   0xf   :  { %v66_v42 = vld [vmem:[%s2516_s0 + $0x1a0] sm:$0xff]  ;;  %v35_v43 = vld [vmem:[%s2516_s0 + $0xa8] sm:$0xff]  ;;  %v36_v45 = vld [vmem:[%s2516_s0 + $0xb0] sm:$0xff] }
  0x10   :  { %v67_v44 = vld [vmem:[%s2516_s0 + $0x1a8] sm:$0xff]  ;;  %v68_v46 = vld [vmem:[%s2516_s0 + $0x1b0] sm:$0xff]  ;;  %v37_v47 = vld [vmem:[%s2516_s0 + $0xb8] sm:$0xff] }
  0x11   :  { %1263 = vmatmul.mubr.msk.f32.gmra.mrb[6].mxu0 %vm86_vm1, %v21_v15  ;;  %1311 = vmatmul.mubr.msk.f32.gmra.mrb[6].mxu1 %vm86_vm1, %v53_v16  ;;  %v69_v48 = vld [vmem:[%s2516_s0 + $0x1b8] sm:$0xff]  ;;  %v38_v49 = vld [vmem:[%s2516_s0 + $0xc0] sm:$0xff]  ;;  %v39_v51 = vld [vmem:[%s2516_s0 + $0xc8] sm:$0xff] }
  0x12   :  { %1265 = vmatprep.mubr.msk.f32.mxu0 %vm86_vm1, %v22_v17  ;;  %1313 = vmatprep.mubr.msk.f32.mxu1 %vm86_vm1, %v54_v18  ;;  %v70_v50 = vld [vmem:[%s2516_s0 + $0x1c0] sm:$0xff]  ;;  %v71_v52 = vld [vmem:[%s2516_s0 + $0x1c8] sm:$0xff]  ;;  %v40_v53 = vld [vmem:[%s2516_s0 + $0xd0] sm:$0xff] }
  0x13   :  { %v72_v54 = vld [vmem:[%s2516_s0 + $0x1d0] sm:$0xff]  ;;  %v41_v55 = vld [vmem:[%s2516_s0 + $0xd8] sm:$0xff]  ;;  %v42_v57 = vld [vmem:[%s2516_s0 + $0xe0] sm:$0xff] }
  0x14   :  { %v73_v56 = vld [vmem:[%s2516_s0 + $0x1d8] sm:$0xff]  ;;  %v74_v58 = vld [vmem:[%s2516_s0 + $0x1e0] sm:$0xff]  ;;  %v43_v59 = vld [vmem:[%s2516_s0 + $0xe8] sm:$0xff] }
  0x15   :  { %1266 = vmatmul.mubr.msk.f32.gmra.mrb[8].mxu0 %vm86_vm1, %v23_v19  ;;  %1314 = vmatmul.mubr.msk.f32.gmra.mrb[8].mxu1 %vm86_vm1, %v55_v20  ;;  %v75_v60 = vld [vmem:[%s2516_s0 + $0x1e8] sm:$0xff]  ;;  %v44_v61 = vld [vmem:[%s2516_s0 + $0xf0] sm:$0xff]  ;;  %v45_v63 = vld [vmem:[%s2516_s0 + $0xf8] sm:$0xff] }
  0x16   :  { %1268 = vmatprep.mubr.msk.f32.mxu0 %vm86_vm1, %v24_v21  ;;  %1316 = vmatprep.mubr.msk.f32.mxu1 %vm86_vm1, %v56_v22  ;;  %v76_v62 = vld [vmem:[%s2516_s0 + $0x1f0] sm:$0xff]  ;;  %v77_v0 = vld [vmem:[%s2516_s0 + $0x1f8] sm:$0xff]  ;;  %v1890_v1 = vld [vmem:[%s2517_s2] ss:$0 sm:$0xff] }
  0x19   :  { %1269 = vmatmul.mubr.msk.f32.gmra.mrb[10].mxu0 %vm86_vm1, %v25_v23  ;;  %1317 = vmatmul.mubr.msk.f32.gmra.mrb[10].mxu1 %vm86_vm1, %v57_v24 }
  0x1a   :  { %1271 = vmatprep.mubr.msk.f32.mxu0 %vm86_vm1, %v26_v25  ;;  %1319 = vmatprep.mubr.msk.f32.mxu1 %vm86_vm1, %v58_v26 }
  0x1d   :  { %1272 = vmatmul.mubr.msk.f32.gmra.mrb[12].mxu0 %vm86_vm1, %v27_v27  ;;  %1320 = vmatmul.mubr.msk.f32.gmra.mrb[12].mxu1 %vm86_vm1, %v59_v28 }
  0x1e   :  { %1274 = vmatprep.mubr.msk.f32.mxu0 %vm86_vm1, %v28_v29  ;;  %1322 = vmatprep.mubr.msk.f32.mxu1 %vm86_vm1, %v60_v30 }
  0x21   :  { %1275 = vmatmul.mubr.msk.f32.gmra.mrb[14].mxu0 %vm86_vm1, %v29_v31  ;;  %1323 = vmatmul.mubr.msk.f32.gmra.mrb[14].mxu1 %vm86_vm1, %v61_v32 }
  0x22   :  { %1277 = vmatprep.mubr.msk.f32.mxu0 %vm86_vm1, %v30_v33  ;;  %1325 = vmatprep.mubr.msk.f32.mxu1 %vm86_vm1, %v62_v34 }
  0x25   :  { %1278 = vmatmul.mubr.msk.f32.gmra.mrb[16].mxu0 %vm86_vm1, %v31_v35  ;;  %1326 = vmatmul.mubr.msk.f32.gmra.mrb[16].mxu1 %vm86_vm1, %v63_v36 }
  0x26   :  { %1280 = vmatprep.mubr.msk.f32.mxu0 %vm86_vm1, %v32_v37  ;;  %1328 = vmatprep.mubr.msk.f32.mxu1 %vm86_vm1, %v64_v38 }
  0x29   :  { %1281 = vmatmul.mubr.msk.f32.gmra.mrb[18].mxu0 %vm86_vm1, %v33_v39  ;;  %1329 = vmatmul.mubr.msk.f32.gmra.mrb[18].mxu1 %vm86_vm1, %v65_v40 }
  0x2a   :  { %1283 = vmatprep.mubr.msk.f32.mxu0 %vm86_vm1, %v34_v41  ;;  %1331 = vmatprep.mubr.msk.f32.mxu1 %vm86_vm1, %v66_v42 }
  0x2d   :  { %1284 = vmatmul.mubr.msk.f32.gmra.mrb[20].mxu0 %vm86_vm1, %v35_v43  ;;  %1332 = vmatmul.mubr.msk.f32.gmra.mrb[20].mxu1 %vm86_vm1, %v67_v44 }
  0x2e   :  { %1286 = vmatprep.mubr.msk.f32.mxu0 %vm86_vm1, %v36_v45  ;;  %1334 = vmatprep.mubr.msk.f32.mxu1 %vm86_vm1, %v68_v46 }
  0x31   :  { %1287 = vmatmul.mubr.msk.f32.gmra.mrb[22].mxu0 %vm86_vm1, %v37_v47  ;;  %1335 = vmatmul.mubr.msk.f32.gmra.mrb[22].mxu1 %vm86_vm1, %v69_v48 }
  0x32   :  { %1289 = vmatprep.mubr.msk.f32.mxu0 %vm86_vm1, %v38_v49  ;;  %1337 = vmatprep.mubr.msk.f32.mxu1 %vm86_vm1, %v70_v50 }
  0x35   :  { %1290 = vmatmul.mubr.msk.f32.gmra.mrb[24].mxu0 %vm86_vm1, %v39_v51  ;;  %1338 = vmatmul.mubr.msk.f32.gmra.mrb[24].mxu1 %vm86_vm1, %v71_v52 }
  0x36   :  { %1292 = vmatprep.mubr.msk.f32.mxu0 %vm86_vm1, %v40_v53  ;;  %1340 = vmatprep.mubr.msk.f32.mxu1 %vm86_vm1, %v72_v54 }
  0x39   :  { %1293 = vmatmul.mubr.msk.f32.gmra.mrb[26].mxu0 %vm86_vm1, %v41_v55  ;;  %1341 = vmatmul.mubr.msk.f32.gmra.mrb[26].mxu1 %vm86_vm1, %v73_v56 }
  0x3a   :  { %1295 = vmatprep.mubr.msk.f32.mxu0 %vm86_vm1, %v42_v57  ;;  %1343 = vmatprep.mubr.msk.f32.mxu1 %vm86_vm1, %v74_v58 }
  0x3d   :  { %1296 = vmatmul.mubr.msk.f32.gmra.mrb[28].mxu0 %vm86_vm1, %v43_v59  ;;  %1344 = vmatmul.mubr.msk.f32.gmra.mrb[28].mxu1 %vm86_vm1, %v75_v60 }
  0x3e   :  { %1298 = vmatprep.mubr.msk.f32.mxu0 %vm86_vm1, %v44_v61  ;;  %1346 = vmatprep.mubr.msk.f32.mxu1 %vm86_vm1, %v76_v62 }
  0x41   :  { %1299 = vmatmul.mubr.msk.f32.gmra.mrb[30].mxu0 %vm86_vm1, %v45_v63  ;;  %1347 = vmatmul.mubr.msk.f32.gmra.mrb[30].mxu1 %vm86_vm1, %v77_v0 }
  0xd8   :  { %v1255_v2 = vpop.f32.mrb[0].mxu0  ;;  %v1303_v3 = vpop.f32.mrb[0].mxu1 }
  0xd9   :  { %v1893_v4 = vadd.f32 %v1255_v2, %v1890_v1  ;;  %v1896_v5 = vadd.f32 %v1303_v3, %v1890_v1  ;;  %v349_v6 = vpop.f32.mrb[1].mxu0  ;;  %v509_v7 = vpop.f32.mrb[1].mxu1 }
  0xda   :  { %v1899_v8 = vadd.f32 %v1890_v1, %v349_v6  ;;  %v1902_v9 = vadd.f32 %v1890_v1, %v509_v7 }
  0xdb   :  { %v669_v10 = vsub.f32 0.0, %v1893_v4  ;;  %v701_v11 = vsub.f32 0.0, %v1896_v5 }
  0xdc   :  { %v668_v12 = vsub.f32 0.0, %v1899_v8  ;;  %v700_v13 = vsub.f32 0.0, %v1902_v9  ;;  %v1258_v14 = vpop.f32.mrb[2].mxu0  ;;  %v1306_v15 = vpop.f32.mrb[2].mxu1 }
  0xdd   :  { %v734_v16 = vmul.f32 1.442695, %v669_v10  ;;  %v798_v17 = vmul.f32 1.442695, %v701_v11  ;;  %v1909_v18 = vadd.f32 %v1258_v14, %v1890_v1  ;;  %v1912_v19 = vadd.f32 %v1306_v15, %v1890_v1  ;;  %v359_v20 = vpop.f32.mrb[3].mxu0  ;;  %v519_v21 = vpop.f32.mrb[3].mxu1 }
  0xde   :  { %v732_v22 = vmul.f32 1.442695, %v668_v12  ;;  %v796_v23 = vmul.f32 1.442695, %v700_v13  ;;  %v1915_v24 = vadd.f32 %v1890_v1, %v359_v20  ;;  %v1918_v25 = vadd.f32 %v1890_v1, %v519_v21 }
  0xdf   :  { %1351 = vpow2.f32 %v734_v16  ;;  %v671_v26 = vsub.f32 0.0, %v1909_v18  ;;  %v703_v27 = vsub.f32 0.0, %v1912_v19 }
  0xe0   :  { %1353 = vpow2.f32 %v798_v17  ;;  %v670_v28 = vsub.f32 0.0, %v1915_v24  ;;  %v702_v29 = vsub.f32 0.0, %v1918_v25  ;;  %v1261_v30 = vpop.f32.mrb[4].mxu0  ;;  %v1309_v31 = vpop.f32.mrb[4].mxu1 }
  0xe1   :  { %1355 = vpow2.f32 %v732_v22  ;;  %v738_v32 = vmul.f32 1.442695, %v671_v26  ;;  %v802_v33 = vmul.f32 1.442695, %v703_v27  ;;  %v1925_v34 = vadd.f32 %v1261_v30, %v1890_v1  ;;  %v369_v35 = vpop.f32.mrb[5].mxu0  ;;  %v529_v36 = vpop.f32.mrb[5].mxu1 }
  0xe2   :  { %1357 = vpow2.f32 %v796_v23  ;;  %v736_v37 = vmul.f32 1.442695, %v670_v28  ;;  %v800_v38 = vmul.f32 1.442695, %v702_v29  ;;  %v1928_v39 = vadd.f32 %v1309_v31, %v1890_v1 }
  0xe3   :  { %1359 = vpow2.f32 %v738_v32  ;;  %v673_v40 = vsub.f32 0.0, %v1925_v34  ;;  %v1932_v41 = vadd.f32 %v1890_v1, %v369_v35  ;;  %v1935_v42 = vadd.f32 %v1890_v1, %v529_v36 }
  0xe4   :  { %1361 = vpow2.f32 %v802_v33  ;;  %v705_v43 = vsub.f32 0.0, %v1928_v39  ;;  %v1264_v44 = vpop.f32.mrb[6].mxu0  ;;  %v1312_v45 = vpop.f32.mrb[6].mxu1 }
  0xe5   :  { %1363 = vpow2.f32 %v736_v37  ;;  %v742_v46 = vmul.f32 1.442695, %v673_v40  ;;  %v672_v47 = vsub.f32 0.0, %v1932_v41  ;;  %v704_v48 = vsub.f32 0.0, %v1935_v42  ;;  %v379_v49 = vpop.f32.mrb[7].mxu0  ;;  %v539_v50 = vpop.f32.mrb[7].mxu1 }
  0xe6   :  { %1365 = vpow2.f32 %v800_v38  ;;  %v806_v51 = vmul.f32 1.442695, %v705_v43  ;;  %v1941_v54 = vadd.f32 %v1264_v44, %v1890_v1  ;;  %v1944_v58 = vadd.f32 %v1312_v45, %v1890_v1 }
  0xe7   :  { %1367 = vpow2.f32 %v742_v46  ;;  %v740_v52 = vmul.f32 1.442695, %v672_v47  ;;  %v804_v53 = vmul.f32 1.442695, %v704_v48  ;;  %v1947_v2 = vadd.f32 %v1890_v1, %v379_v49 }
  0xe8   :  { %1369 = vpow2.f32 %v806_v51  ;;  %v1267_v55 = vpop.f32.mrb[8].mxu0  ;;  %v1315_v56 = vpop.f32.mrb[8].mxu1  ;;  %v675_v7 = vsub.f32 0.0, %v1941_v54  ;;  %v707_v14 = vsub.f32 0.0, %v1944_v58  ;;  %v1952_v15 = vadd.f32 %v1890_v1, %v539_v50 }
  0xe9   :  { %v1352_v57 = vpop.eup %1351  ;;  %1371 = vpow2.f32 %v740_v52  ;;  %v389_v59 = vpop.f32.mrb[9].mxu0  ;;  %v1955_v21 = vadd.f32 %v1267_v55, %v1890_v1  ;;  %v674_v27 = vsub.f32 0.0, %v1947_v2  ;;  %v1959_v31 = vadd.f32 %v1315_v56, %v1890_v1 }
  0xea   :  { %v549_v60 = vpop.f32.mrb[9].mxu1  ;;  %v1354_v61 = vpop.eup %1353  ;;  %v861_v62 = vadd.f32 1.0, %v1352_v57  ;;  %1373 = vpow2.f32 %v804_v53  ;;  %v746_v30 = vmul.f32 1.442695, %v675_v7  ;;  %v810_v37 = vmul.f32 1.442695, %v707_v14 }
  0xeb   :  { %v1356_v63 = vpop.eup %1355  ;;  %v893_v0 = vadd.f32 1.0, %v1354_v61  ;;  %v706_v38 = vsub.f32 0.0, %v1952_v15  ;;  %v677_v46 = vsub.f32 0.0, %v1955_v21  ;;  %v1970_v47 = vadd.f32 %v1890_v1, %v389_v59 }
  0xec   :  { %v1358_v3 = vpop.eup %1357  ;;  %1375 = vrcp.f32 %v861_v62  ;;  %v860_v6 = vadd.f32 1.0, %v1356_v63  ;;  %v1270_v10 = vpop.f32.mrb[10].mxu0  ;;  %v744_v50 = vmul.f32 1.442695, %v674_v27  ;;  %v1973_v51 = vadd.f32 %v1890_v1, %v549_v60 }
  0xed   :  { %v1318_v11 = vpop.f32.mrb[10].mxu1  ;;  %v1360_v12 = vpop.eup %1359  ;;  %1377 = vrcp.f32 %v893_v0  ;;  %v892_v13 = vadd.f32 1.0, %v1358_v3  ;;  %v709_v55 = vsub.f32 0.0, %v1959_v31  ;;  %v1977_v56 = vadd.f32 %v1270_v10, %v1890_v1 }
  0xee   :  { %v399_v16 = vpop.f32.mrb[11].mxu0  ;;  %v1362_v17 = vpop.eup %1361  ;;  %1379 = vrcp.f32 %v860_v6  ;;  %v863_v20 = vadd.f32 1.0, %v1360_v12  ;;  %v808_v62 = vmul.f32 1.442695, %v706_v38  ;;  %v1984_v63 = vadd.f32 %v1318_v11, %v1890_v1 }
  0xef   :  { %v559_v22 = vpop.f32.mrb[11].mxu1  ;;  %v1364_v23 = vpop.eup %1363  ;;  %1381 = vrcp.f32 %v892_v13  ;;  %v895_v26 = vadd.f32 1.0, %v1362_v17  ;;  %v750_v6 = vmul.f32 1.442695, %v677_v46  ;;  %v676_v7 = vsub.f32 0.0, %v1970_v47 }
  0xf0   :  { %v1366_v28 = vpop.eup %1365  ;;  %1383 = vrcp.f32 %v863_v20  ;;  %v862_v29 = vadd.f32 1.0, %v1364_v23  ;;  %v1273_v32 = vpop.f32.mrb[12].mxu0  ;;  %v1992_v10 = vadd.f32 %v1890_v1, %v399_v16  ;;  %v708_v14 = vsub.f32 0.0, %v1973_v51 }
  0xf1   :  { %v1961_v33 = vpop.f32.mrb[12].mxu1  ;;  %v1368_v35 = vpop.eup %1367  ;;  %1385 = vrcp.f32 %v895_v26  ;;  %v894_v36 = vadd.f32 1.0, %v1366_v28  ;;  %v1997_v11 = vadd.f32 %v1890_v1, %v559_v22  ;;  %v679_v23 = vsub.f32 0.0, %v1977_v56 }
  0xf2   :  { %v1964_v40 = vpop.f32.mrb[13].mxu0  ;;  %v1966_v43 = vpop.f32.mrb[13].mxu1  ;;  %1387 = vrcp.f32 %v862_v29  ;;  %v865_v45 = vadd.f32 1.0, %v1368_v35  ;;  %v2002_v26 = vadd.f32 %v1273_v32, %v1890_v1  ;;  %v814_v28 = vmul.f32 1.442695, %v709_v55 }
  0xf3   :  { %v1370_v44 = vpop.eup %1369  ;;  %1389 = vrcp.f32 %v894_v36  ;;  %v748_v36 = vmul.f32 1.442695, %v676_v7  ;;  %v678_v38 = vsub.f32 0.0, %v1992_v10 }
  0xf4   :  { %v1372_v48 = vpop.eup %1371  ;;  %v897_v49 = vadd.f32 1.0, %v1370_v44  ;;  %1391 = vrcp.f32 %v865_v45  ;;  %v1979_v57 = vpop.f32.mrb[14].mxu0  ;;  %v812_v44 = vmul.f32 1.442695, %v708_v14  ;;  %v710_v45 = vsub.f32 0.0, %v1997_v11 }
  0xf5   :  { %v1374_v52 = vpop.eup %1373  ;;  %v864_v53 = vadd.f32 1.0, %v1372_v48  ;;  %v1981_v61 = vpop.f32.mrb[14].mxu1  ;;  %v754_v48 = vmul.f32 1.442695, %v679_v23 }
  0xf6   :  { %1393 = vrcp.f32 %v897_v49  ;;  %v896_v59 = vadd.f32 1.0, %v1374_v52  ;;  %v1986_v60 = vpop.f32.mrb[15].mxu0  ;;  %v1988_v0 = vpop.f32.mrb[15].mxu1  ;;  %v681_v49 = vsub.f32 0.0, %v2002_v26 }
  0xf7   :  { %v1376_v3 = vpop.eup %1375  ;;  %1395 = vrcp.f32 %v864_v53 }
  0xf8   :  { %v1378_v12 = vpop.eup %1377  ;;  %v989_v13 = vmul.f32 %v1376_v3, %v1893_v4  ;;  %1397 = vrcp.f32 %v896_v59  ;;  %v2004_v16 = vpop.f32.mrb[16].mxu0 }
  0xf9   :  { %v1380_v17 = vpop.eup %1379  ;;  %v1021_v20 = vmul.f32 %v1378_v12, %v1896_v5  ;;  %1399 = vpow2.f32 %v746_v30  ;;  %v2006_v27 = vpop.f32.mrb[16].mxu1  ;;  %v711_v5 = vsub.f32 0.0, %v1984_v63  ;;  %v816_v12 = vmul.f32 1.442695, %v710_v45 }
  0xfa   :  { %v1382_v4 = vpop.eup %1381  ;;  %1053 = vst [vmem:[%s2518_s3 + $0x8] sm:$0xff] %v989_v13  ;;  %v988_v22 = vmul.f32 %v1380_v17, %v1899_v8  ;;  %1401 = vpow2.f32 %v810_v37  ;;  %v2013_v29 = vpop.f32.mrb[17].mxu0 }
  0xfb   :  { %v2015_v30 = vpop.f32.mrb[17].mxu1  ;;  %v1384_v32 = vpop.eup %1383  ;;  %1085 = vst [vmem:[%s2518_s3 + $0x108] sm:$0xff] %v1021_v20  ;;  %v1020_v35 = vmul.f32 %v1382_v4, %v1902_v9  ;;  %1403 = vpow2.f32 %v744_v50  ;;  %v818_v55 = vmul.f32 1.442695, %v711_v5  ;;  %v2074_v5 = vadd.f32 %v1961_v33, %v1890_v1 }
  0xfc   :  { %v1386_v8 = vpop.eup %1385  ;;  %1052 = vst [vmem:[%s2518_s3] sm:$0xff] %v988_v22  ;;  %v991_v37 = vmul.f32 %v1384_v32, %v1909_v18  ;;  %1405 = vpow2.f32 %v808_v62  ;;  %v2032_v50 = vpop.f32.mrb[18].mxu0 }
  0xfd   :  { %v1388_v46 = vpop.eup %1387  ;;  %1084 = vst [vmem:[%s2518_s3 + $0x100] sm:$0xff] %v1020_v35  ;;  %v1023_v9 = vmul.f32 %v1386_v8, %v1912_v19  ;;  %1407 = vpow2.f32 %v750_v6  ;;  %v2034_v52 = vpop.f32.mrb[18].mxu1  ;;  %v752_v6 = vmul.f32 1.442695, %v678_v38  ;;  %v2081_v35 = vadd.f32 %v1890_v1, %v1964_v40 }
  0xfe   :  { %v1390_v18 = vpop.eup %1389  ;;  %1055 = vst [vmem:[%s2518_s3 + $0x18] sm:$0xff] %v991_v37  ;;  %v990_v53 = vmul.f32 %v1388_v46, %v1915_v24  ;;  %1409 = vpow2.f32 %v814_v28  ;;  %v2040_v59 = vpop.f32.mrb[19].mxu0 }
  0xff   :  { %v2042_v19 = vpop.f32.mrb[19].mxu1  ;;  %v1392_v62 = vpop.eup %1391  ;;  %1087 = vst [vmem:[%s2518_s3 + $0x118] sm:$0xff] %v1023_v9  ;;  %v1022_v3 = vmul.f32 %v1390_v18, %v1918_v25  ;;  %1411 = vpow2.f32 %v748_v36  ;;  %v758_v25 = vmul.f32 1.442695, %v681_v49  ;;  %v713_v9 = vsub.f32 0.0, %v2074_v5 }
 0x100   :  { %v1394_v7 = vpop.eup %1393  ;;  %1054 = vst [vmem:[%s2518_s3 + $0x10] sm:$0xff] %v990_v53  ;;  %v993_v24 = vmul.f32 %v1392_v62, %v1925_v34  ;;  %1413 = vpow2.f32 %v812_v44  ;;  %v2056_v17 = vpop.f32.mrb[20].mxu0  ;;  %v2092_v44 = vadd.f32 %v1890_v1, %v1966_v43  ;;  %v2106_v43 = vadd.f32 %v1981_v61, %v1890_v1 }
 0x101   :  { %v1396_v13 = vpop.eup %1395  ;;  %1086 = vst [vmem:[%s2518_s3 + $0x110] sm:$0xff] %v1022_v3  ;;  %v1025_v14 = vmul.f32 %v1394_v7, %v1928_v39  ;;  %1415 = vpow2.f32 %v754_v48  ;;  %v2058_v20 = vpop.f32.mrb[20].mxu1  ;;  %v2099_v48 = vadd.f32 %v1979_v57, %v1890_v1 }
 0x102   :  { %v1398_v23 = vpop.eup %1397  ;;  %1057 = vst [vmem:[%s2518_s3 + $0x28] sm:$0xff] %v993_v24  ;;  %v992_v34 = vmul.f32 %v1396_v13, %v1932_v41  ;;  %1417 = vpow2.f32 %v818_v55  ;;  %v2064_v4 = vpop.f32.mrb[21].mxu0  ;;  %v680_v55 = vsub.f32 0.0, %v2081_v35  ;;  %v712_v13 = vsub.f32 0.0, %v2092_v44 }
 0x103   :  { %v2066_v22 = vpop.f32.mrb[21].mxu1  ;;  %v1400_v28 = vpop.eup %1399  ;;  %1089 = vst [vmem:[%s2518_s3 + $0x128] sm:$0xff] %v1025_v14  ;;  %v1024_v39 = vmul.f32 %v1398_v23, %v1935_v42  ;;  %1419 = vpow2.f32 %v752_v6  ;;  %v2110_v6 = vadd.f32 %v1890_v1, %v1986_v60  ;;  %v683_v60 = vsub.f32 0.0, %v2099_v48 }
 0x104   :  { %v1402_v32 = vpop.eup %1401  ;;  %1056 = vst [vmem:[%s2518_s3 + $0x20] sm:$0xff] %v992_v34  ;;  %v867_v41 = vadd.f32 1.0, %v1400_v28  ;;  %1421 = vpow2.f32 %v816_v12  ;;  %v2086_v33 = vpop.f32.mrb[22].mxu0  ;;  %v822_v34 = vmul.f32 1.442695, %v713_v9 }
 0x105   :  { %v1404_v36 = vpop.eup %1403  ;;  %1088 = vst [vmem:[%s2518_s3 + $0x120] sm:$0xff] %v1024_v39  ;;  %v899_v42 = vadd.f32 1.0, %v1402_v32  ;;  %1423 = vpow2.f32 %v758_v25  ;;  %v2088_v38 = vpop.f32.mrb[22].mxu1  ;;  %v756_v32 = vmul.f32 1.442695, %v680_v55 }
 0x106   :  { %v1406_v8 = vpop.eup %1405  ;;  %1425 = vrcp.f32 %v867_v41  ;;  %v866_v37 = vadd.f32 1.0, %v1404_v36  ;;  %v2094_v40 = vpop.f32.mrb[23].mxu0  ;;  %v715_v41 = vsub.f32 0.0, %v2106_v43 }
 0x107   :  { %v1408_v45 = vpop.eup %1407  ;;  %1427 = vrcp.f32 %v899_v42  ;;  %v898_v46 = vadd.f32 1.0, %v1406_v8  ;;  %v2101_v49 = vpop.f32.mrb[23].mxu1  ;;  %v682_v8 = vsub.f32 0.0, %v2110_v6 }
 0x108   :  { %v1410_v18 = vpop.eup %1409  ;;  %1429 = vrcp.f32 %v866_v37  ;;  %v869_v53 = vadd.f32 1.0, %v1408_v45  ;;  %v2112_v57 = vpop.f32.mrb[24].mxu0  ;;  %v2126_v37 = vadd.f32 %v1890_v1, %v1988_v0  ;;  %v2140_v0 = vadd.f32 %v2006_v27, %v1890_v1 }
 0x109   :  { %v1412_v62 = vpop.eup %1411  ;;  %1431 = vrcp.f32 %v898_v46  ;;  %v901_v3 = vadd.f32 1.0, %v1410_v18  ;;  %v2114_v7 = vpop.f32.mrb[24].mxu1  ;;  %v820_v18 = vmul.f32 1.442695, %v712_v13  ;;  %v2152_v27 = vadd.f32 %v1890_v1, %v2015_v30 }
 0x10a   :  { %v1414_v24 = vpop.eup %1413  ;;  %1433 = vrcp.f32 %v869_v53  ;;  %v868_v12 = vadd.f32 1.0, %v1412_v62  ;;  %v2117_v14 = vpop.f32.mrb[25].mxu0  ;;  %v2132_v53 = vadd.f32 %v2004_v16, %v1890_v1  ;;  %v2146_v16 = vadd.f32 %v1890_v1, %v2013_v29 }
 0x10b   :  { %v2119_v61 = vpop.f32.mrb[25].mxu1  ;;  %v1416_v25 = vpop.eup %1415  ;;  %1435 = vrcp.f32 %v901_v3  ;;  %v900_v23 = vadd.f32 1.0, %v1414_v24 }
 0x10c   :  { %v1418_v28 = vpop.eup %1417  ;;  %1437 = vrcp.f32 %v868_v12  ;;  %v871_v39 = vadd.f32 1.0, %v1416_v25  ;;  %v2128_v45 = vpop.f32.mrb[26].mxu0  ;;  %v762_v12 = vmul.f32 1.442695, %v683_v60  ;;  %v714_v60 = vsub.f32 0.0, %v2126_v37 }
 0x10d   :  { %v1420_v36 = vpop.eup %1419  ;;  %1439 = vrcp.f32 %v900_v23  ;;  %v903_v42 = vadd.f32 1.0, %v1418_v28  ;;  %v2134_v55 = vpop.f32.mrb[26].mxu1  ;;  %v826_v28 = vmul.f32 1.442695, %v715_v41  ;;  %v685_v29 = vsub.f32 0.0, %v2132_v53 }
 0x10e   :  { %v1422_v46 = vpop.eup %1421  ;;  %1441 = vrcp.f32 %v871_v39  ;;  %v870_v9 = vadd.f32 1.0, %v1420_v36  ;;  %v2136_v62 = vpop.f32.mrb[27].mxu0 }
 0x10f   :  { %v1424_v3 = vpop.eup %1423  ;;  %1443 = vrcp.f32 %v903_v42  ;;  %v902_v24 = vadd.f32 1.0, %v1422_v46  ;;  %v2142_v25 = vpop.f32.mrb[27].mxu1 }
 0x110   :  { %v1426_v23 = vpop.eup %1425  ;;  %1445 = vrcp.f32 %v870_v9  ;;  %v873_v13 = vadd.f32 1.0, %v1424_v3  ;;  %v2154_v42 = vpop.f32.mrb[28].mxu0 }
 0x111   :  { %v1428_v39 = vpop.eup %1427  ;;  %v995_v36 = vmul.f32 %v1426_v23, %v1941_v54  ;;  %1447 = vrcp.f32 %v902_v24  ;;  %v2156_v46 = vpop.f32.mrb[28].mxu1  ;;  %v2162_v54 = vadd.f32 %v2032_v50, %v1890_v1 }
 0x112   :  { %v1430_v9 = vpop.eup %1429  ;;  %v1027_v41 = vmul.f32 %v1428_v39, %v1944_v58  ;;  %1449 = vrcp.f32 %v873_v13  ;;  %v2164_v3 = vpop.f32.mrb[29].mxu0  ;;  %v717_v58 = vsub.f32 0.0, %v2140_v0  ;;  %v2175_v13 = vadd.f32 %v2034_v52, %v1890_v1 }
 0x113   :  { %2519 = vst [vmem:[#allocation2_spill] sm:$0xff] %v2164_v3  ;;  %v2166_v24 = vpop.f32.mrb[29].mxu1  ;;  %v1432_v30 = vpop.eup %1431  ;;  %1059 = vst [vmem:[%s2518_s3 + $0x38] sm:$0xff] %v995_v36  ;;  %v994_v23 = vmul.f32 %v1430_v9, %v1947_v2  ;;  %1451 = vpow2.f32 %v822_v34  ;;  %v684_v36 = vsub.f32 0.0, %v2146_v16  ;;  %v824_v52 = vmul.f32 1.442695, %v714_v60 }
 0x114   :  { %2520 = vst [vmem:[#allocation3_spill] sm:$0xff] %v2166_v24  ;;  %v1434_v50 = vpop.eup %1433  ;;  %1091 = vst [vmem:[%s2518_s3 + $0x138] sm:$0xff] %v1027_v41  ;;  %v1026_v39 = vmul.f32 %v1432_v30, %v1952_v15  ;;  %1453 = vpow2.f32 %v756_v32  ;;  %v760_v24 = vmul.f32 1.442695, %v682_v8  ;;  %v716_v34 = vsub.f32 0.0, %v2152_v27  ;;  %v2187_v9 = vpop.f32.mrb[30].mxu0 }
 0x115   :  { %v1436_v3 = vpop.eup %1435  ;;  %1058 = vst [vmem:[%s2518_s3 + $0x30] sm:$0xff] %v994_v23  ;;  %v997_v2 = vmul.f32 %v1434_v50, %v1955_v21  ;;  %1455 = vpow2.f32 %v820_v18  ;;  %v2189_v41 = vpop.f32.mrb[30].mxu1  ;;  %v766_v8 = vmul.f32 1.442695, %v685_v29  ;;  %v687_v30 = vsub.f32 0.0, %v2162_v54 }
 0x116   :  { %v1438_v15 = vpop.eup %1437  ;;  %1090 = vst [vmem:[%s2518_s3 + $0x130] sm:$0xff] %v1026_v39  ;;  %v1029_v32 = vmul.f32 %v1436_v3, %v1959_v31  ;;  %1457 = vpow2.f32 %v762_v12  ;;  %v2196_v21 = vpop.f32.mrb[31].mxu0  ;;  %v830_v50 = vmul.f32 1.442695, %v717_v58  ;;  %v719_v39 = vsub.f32 0.0, %v2175_v13 }
 0x117   :  { %v2198_v18 = vpop.f32.mrb[31].mxu1  ;;  %v1440_v60 = vpop.eup %1439  ;;  %1061 = vst [vmem:[%s2518_s3 + $0x48] sm:$0xff] %v997_v2  ;;  %v996_v23 = vmul.f32 %v1438_v15, %v1970_v47  ;;  %1459 = vpow2.f32 %v826_v28  ;;  %v764_v29 = vmul.f32 1.442695, %v684_v36  ;;  %v828_v28 = vmul.f32 1.442695, %v716_v34 }
 0x118   :  { %v1442_v31 = vpop.eup %1441  ;;  %1093 = vst [vmem:[%s2518_s3 + $0x148] sm:$0xff] %v1029_v32  ;;  %v1028_v12 = vmul.f32 %v1440_v60, %v1973_v51  ;;  %1461 = vpow2.f32 %v760_v24  ;;  %v770_v51 = vmul.f32 1.442695, %v687_v30 }
 0x119   :  { %v1444_v3 = vpop.eup %1443  ;;  %1060 = vst [vmem:[%s2518_s3 + $0x40] sm:$0xff] %v996_v23  ;;  %v999_v47 = vmul.f32 %v1442_v31, %v1977_v56  ;;  %1463 = vpow2.f32 %v824_v52  ;;  %v834_v56 = vmul.f32 1.442695, %v719_v39 }
 0x11a   :  { %v1446_v58 = vpop.eup %1445  ;;  %1092 = vst [vmem:[%s2518_s3 + $0x140] sm:$0xff] %v1028_v12  ;;  %v1031_v2 = vmul.f32 %v1444_v3, %v1984_v63  ;;  %1465 = vpow2.f32 %v766_v8  ;;  %v2254_v12 = vadd.f32 %v1890_v1, %v2064_v4 }
 0x11b   :  { %v1448_v24 = vpop.eup %1447  ;;  %1063 = vst [vmem:[%s2518_s3 + $0x58] sm:$0xff] %v999_v47  ;;  %v998_v36 = vmul.f32 %v1446_v58, %v1992_v10  ;;  %1467 = vpow2.f32 %v830_v50  ;;  %v2231_v10 = vadd.f32 %v1890_v1, %v2040_v59  ;;  %v2245_v59 = vadd.f32 %v2056_v17, %v1890_v1 }
 0x11c   :  { %v1450_v52 = vpop.eup %1449  ;;  %1095 = vst [vmem:[%s2518_s3 + $0x158] sm:$0xff] %v1031_v2  ;;  %v1030_v34 = vmul.f32 %v1448_v24, %v1997_v11  ;;  %1469 = vpow2.f32 %v764_v29  ;;  %v2238_v11 = vadd.f32 %v1890_v1, %v2042_v19  ;;  %v2249_v50 = vadd.f32 %v2058_v20, %v1890_v1 }
 0x11d   :  { %v1452_v63 = vpop.eup %1451  ;;  %1062 = vst [vmem:[%s2518_s3 + $0x50] sm:$0xff] %v998_v36  ;;  %v1001_v15 = vmul.f32 %v1450_v52, %v2002_v26  ;;  %1471 = vpow2.f32 %v828_v28  ;;  %v686_v31 = vsub.f32 0.0, %v2231_v10  ;;  %v689_v20 = vsub.f32 0.0, %v2245_v59 }
 0x11e   :  { %v1454_v32 = vpop.eup %1453  ;;  %1094 = vst [vmem:[%s2518_s3 + $0x150] sm:$0xff] %v1030_v34  ;;  %v905_v8 = vadd.f32 1.0, %v1452_v63  ;;  %1473 = vpow2.f32 %v770_v51  ;;  %v718_v3 = vsub.f32 0.0, %v2238_v11  ;;  %v721_v51 = vsub.f32 0.0, %v2249_v50 }
 0x11f   :  { %v1456_v30 = vpop.eup %1455  ;;  %1065 = vst [vmem:[%s2518_s3 + $0x68] sm:$0xff] %v1001_v15  ;;  %v872_v26 = vadd.f32 1.0, %v1454_v32  ;;  %1475 = vpow2.f32 %v834_v56  ;;  %v768_v4 = vmul.f32 1.442695, %v686_v31  ;;  %v688_v56 = vsub.f32 0.0, %v2254_v12 }
 0x120   :  { %v1458_v60 = vpop.eup %1457  ;;  %1477 = vrcp.f32 %v905_v8  ;;  %v904_v23 = vadd.f32 1.0, %v1456_v30  ;;  %v832_v63 = vmul.f32 1.442695, %v718_v3  ;;  %v2262_v15 = vadd.f32 %v1890_v1, %v2066_v22 }
 0x121   :  { %v1460_v19 = vpop.eup %1459  ;;  %1479 = vrcp.f32 %v872_v26  ;;  %v875_v39 = vadd.f32 1.0, %v1458_v60  ;;  %v774_v30 = vmul.f32 1.442695, %v689_v20  ;;  %v2266_v26 = vadd.f32 %v2086_v33, %v1890_v1 }
 0x122   :  { %v1462_v29 = vpop.eup %1461  ;;  %1481 = vrcp.f32 %v904_v23  ;;  %v907_v17 = vadd.f32 1.0, %v1460_v19  ;;  %v838_v19 = vmul.f32 1.442695, %v721_v51 }
 0x123   :  { %v1464_v47 = vpop.eup %1463  ;;  %1483 = vrcp.f32 %v875_v39  ;;  %v874_v28 = vadd.f32 1.0, %v1462_v29  ;;  %v2270_v39 = vadd.f32 %v2088_v38, %v1890_v1  ;;  %v772_v29 = vmul.f32 1.442695, %v688_v56 }
 0x124   :  { %v1466_v58 = vpop.eup %1465  ;;  %1485 = vrcp.f32 %v907_v17  ;;  %v906_v2 = vadd.f32 1.0, %v1464_v47  ;;  %v2274_v17 = vadd.f32 %v1890_v1, %v2094_v40  ;;  %v720_v47 = vsub.f32 0.0, %v2262_v15 }
 0x125   :  { %v1468_v24 = vpop.eup %1467  ;;  %1487 = vrcp.f32 %v874_v28  ;;  %v877_v36 = vadd.f32 1.0, %v1466_v58  ;;  %v2279_v28 = vadd.f32 %v1890_v1, %v2101_v49  ;;  %v691_v58 = vsub.f32 0.0, %v2266_v26 }
 0x126   :  { %v1470_v52 = vpop.eup %1469  ;;  %1489 = vrcp.f32 %v906_v2  ;;  %v909_v34 = vadd.f32 1.0, %v1468_v24  ;;  %v2285_v2 = vadd.f32 %v2112_v57, %v1890_v1  ;;  %v723_v24 = vsub.f32 0.0, %v2270_v39 }
 0x127   :  { %v1472_v32 = vpop.eup %1471  ;;  %1491 = vrcp.f32 %v877_v36  ;;  %v876_v8 = vadd.f32 1.0, %v1470_v52  ;;  %v2291_v49 = vadd.f32 %v2114_v7, %v1890_v1  ;;  %v690_v57 = vsub.f32 0.0, %v2274_v17 }
 0x128   :  { %v1474_v60 = vpop.eup %1473  ;;  %1493 = vrcp.f32 %v909_v34  ;;  %v908_v23 = vadd.f32 1.0, %v1472_v32  ;;  %v836_v52 = vmul.f32 1.442695, %v720_v47  ;;  %v722_v34 = vsub.f32 0.0, %v2279_v28 }
 0x129   :  { %v1476_v31 = vpop.eup %1475  ;;  %1495 = vrcp.f32 %v876_v8  ;;  %v879_v22 = vadd.f32 1.0, %v1474_v60  ;;  %v725_v60 = vsub.f32 0.0, %v2291_v49 }
 0x12a   :  { %v1478_v3 = vpop.eup %1477  ;;  %1497 = vrcp.f32 %v908_v23  ;;  %v911_v33 = vadd.f32 1.0, %v1476_v31 }
 0x12b   :  { %v1480_v20 = vpop.eup %1479  ;;  %v1033_v38 = vmul.f32 %v1478_v3, %v2074_v5  ;;  %1499 = vrcp.f32 %v879_v22 }
 0x12c   :  { %v1482_v40 = vpop.eup %1481  ;;  %v1000_v51 = vmul.f32 %v1480_v20, %v2081_v35  ;;  %1501 = vrcp.f32 %v911_v33  ;;  %v2300_v35 = vadd.f32 %v1890_v1, %v2117_v14  ;;  %v778_v14 = vmul.f32 1.442695, %v691_v58 }
 0x12d   :  { %v1484_v36 = vpop.eup %1483  ;;  %1097 = vst [vmem:[%s2518_s3 + $0x168] sm:$0xff] %v1033_v38  ;;  %v1032_v5 = vmul.f32 %v1482_v40, %v2092_v44  ;;  %1503 = vpow2.f32 %v768_v4  ;;  %v693_v4 = vsub.f32 0.0, %v2285_v2 }
 0x12e   :  { %v1486_v56 = vpop.eup %1485  ;;  %1064 = vst [vmem:[%s2518_s3 + $0x60] sm:$0xff] %v1000_v51  ;;  %v1003_v7 = vmul.f32 %v1484_v36, %v2099_v48  ;;  %1505 = vpow2.f32 %v832_v63  ;;  %v842_v63 = vmul.f32 1.442695, %v723_v24  ;;  %v692_v31 = vsub.f32 0.0, %v2300_v35 }
 0x12f   :  { %v1488_v32 = vpop.eup %1487  ;;  %1096 = vst [vmem:[%s2518_s3 + $0x160] sm:$0xff] %v1032_v5  ;;  %v1035_v44 = vmul.f32 %v1486_v56, %v2106_v43  ;;  %1507 = vpow2.f32 %v774_v30  ;;  %v776_v30 = vmul.f32 1.442695, %v690_v57 }
 0x130   :  { %v1490_v8 = vpop.eup %1489  ;;  %1067 = vst [vmem:[%s2518_s3 + $0x78] sm:$0xff] %v1003_v7  ;;  %v1002_v48 = vmul.f32 %v1488_v32, %v2110_v6  ;;  %1509 = vpow2.f32 %v838_v19  ;;  %v840_v19 = vmul.f32 1.442695, %v722_v34  ;;  %v2366_v7 = vadd.f32 %v1890_v1, %v2136_v62  ;;  %v1607_v62 = vld [vmem:[%s2517_s2] ss:$0 sm:$0xff] }
 0x131   :  { %v1492_v23 = vpop.eup %1491  ;;  %1099 = vst [vmem:[%s2518_s3 + $0x178] sm:$0xff] %v1035_v44  ;;  %v1034_v43 = vmul.f32 %v1490_v8, %v2126_v37  ;;  %1511 = vpow2.f32 %v772_v29  ;;  %v782_v29 = vmul.f32 1.442695, %v693_v4 }
 0x132   :  { %v1494_v22 = vpop.eup %1493  ;;  %1066 = vst [vmem:[%s2518_s3 + $0x70] sm:$0xff] %v1002_v48  ;;  %v1005_v6 = vmul.f32 %v1492_v23, %v2132_v53  ;;  %1513 = vpow2.f32 %v836_v52  ;;  %v846_v53 = vmul.f32 1.442695, %v725_v60  ;;  %v2376_v60 = vadd.f32 %v1607_v62, %v2142_v25  ;;  %v2521_v25 = vld [vmem:[#allocation2_spill] sm:$0xff] }
 0x133   :  { %v1496_v3 = vpop.eup %1495  ;;  %1098 = vst [vmem:[%s2518_s3 + $0x170] sm:$0xff] %v1034_v43  ;;  %v1037_v37 = vmul.f32 %v1494_v22, %v2140_v0  ;;  %1515 = vpow2.f32 %v778_v14  ;;  %v780_v0 = vmul.f32 1.442695, %v692_v31  ;;  %v2379_v31 = vadd.f32 %v1607_v62, %v2154_v42 }
 0x134   :  { %v1498_v33 = vpop.eup %1497  ;;  %1069 = vst [vmem:[%s2518_s3 + $0x88] sm:$0xff] %v1005_v6  ;;  %v1004_v47 = vmul.f32 %v1496_v3, %v2146_v16  ;;  %1517 = vpow2.f32 %v842_v63  ;;  %v2382_v3 = vadd.f32 %v1607_v62, %v2156_v46  ;;  %v726_v42 = vsub.f32 0.0, %v2376_v60  ;;  %v2522_v46 = vld [vmem:[#allocation3_spill] sm:$0xff] }
 0x135   :  { %v1500_v20 = vpop.eup %1499  ;;  %1101 = vst [vmem:[%s2518_s3 + $0x188] sm:$0xff] %v1037_v37  ;;  %v1036_v38 = vmul.f32 %v1498_v33, %v2152_v27  ;;  %1519 = vpow2.f32 %v776_v30  ;;  %v2348_v27 = vadd.f32 %v1890_v1, %v2119_v61  ;;  %v2362_v61 = vadd.f32 %v2134_v55, %v1890_v1 }
 0x136   :  { %v1502_v58 = vpop.eup %1501  ;;  %1068 = vst [vmem:[%s2518_s3 + $0x80] sm:$0xff] %v1004_v47  ;;  %v1007_v40 = vmul.f32 %v1500_v20, %v2162_v54  ;;  %1521 = vpow2.f32 %v840_v19  ;;  %v2355_v54 = vadd.f32 %v2128_v45, %v1890_v1  ;;  %v694_v1 = vsub.f32 0.0, %v2366_v7 }
 0x137   :  { %v1504_v16 = vpop.eup %1503  ;;  %1100 = vst [vmem:[%s2518_s3 + $0x180] sm:$0xff] %v1036_v38  ;;  %v1039_v51 = vmul.f32 %v1502_v58, %v2175_v13  ;;  %1523 = vpow2.f32 %v782_v29  ;;  %v724_v34 = vsub.f32 0.0, %v2348_v27  ;;  %v727_v8 = vsub.f32 0.0, %v2362_v61 }
 0x138   :  { %v1506_v24 = vpop.eup %1505  ;;  %1071 = vst [vmem:[%s2518_s3 + $0x98] sm:$0xff] %v1007_v40  ;;  %v878_v36 = vadd.f32 1.0, %v1504_v16  ;;  %1525 = vpow2.f32 %v846_v53  ;;  %v695_v14 = vsub.f32 0.0, %v2355_v54  ;;  %v2385_v47 = vadd.f32 %v1607_v62, %v2521_v25 }
 0x139   :  { %v1508_v5 = vpop.eup %1507  ;;  %1103 = vst [vmem:[%s2518_s3 + $0x198] sm:$0xff] %v1039_v51  ;;  %v910_v13 = vadd.f32 1.0, %v1506_v24  ;;  %1527 = vpow2.f32 %v780_v0  ;;  %v844_v30 = vmul.f32 1.442695, %v724_v34  ;;  %v850_v33 = vmul.f32 1.442695, %v727_v8 }
 0x13a   :  { %v1510_v57 = vpop.eup %1509  ;;  %1529 = vrcp.f32 %v878_v36  ;;  %v881_v56 = vadd.f32 1.0, %v1508_v5  ;;  %v786_v19 = vmul.f32 1.442695, %v695_v14  ;;  %v784_v38 = vmul.f32 1.442695, %v694_v1 }
 0x13b   :  { %v1512_v45 = vpop.eup %1511  ;;  %1531 = vrcp.f32 %v910_v13  ;;  %v913_v52 = vadd.f32 1.0, %v1510_v57  ;;  %v697_v40 = vsub.f32 0.0, %v2379_v31  ;;  %v2390_v16 = vadd.f32 %v1607_v62, %v2522_v46 }
 0x13c   :  { %v1514_v32 = vpop.eup %1513  ;;  %1533 = vrcp.f32 %v881_v56  ;;  %v880_v44 = vadd.f32 1.0, %v1512_v45  ;;  %v729_v36 = vsub.f32 0.0, %v2382_v3  ;;  %v2394_v5 = vadd.f32 %v1607_v62, %v2187_v9 }
 0x13d   :  { %v1516_v4 = vpop.eup %1515  ;;  %1535 = vrcp.f32 %v913_v52  ;;  %v912_v55 = vadd.f32 1.0, %v1514_v32  ;;  %v696_v56 = vsub.f32 0.0, %v2385_v47  ;;  %v2399_v45 = vadd.f32 %v1607_v62, %v2189_v41 }
 0x13e   :  { %v1518_v48 = vpop.eup %1517  ;;  %1537 = vrcp.f32 %v880_v44  ;;  %v883_v63 = vadd.f32 1.0, %v1516_v4  ;;  %v848_v32 = vmul.f32 1.442695, %v726_v42  ;;  %v2403_v44 = vadd.f32 %v1607_v62, %v2196_v21 }
 0x13f   :  { %v1520_v23 = vpop.eup %1519  ;;  %1539 = vrcp.f32 %v912_v55  ;;  %v915_v43 = vadd.f32 1.0, %v1518_v48  ;;  %v2411_v41 = vadd.f32 %v1607_v62, %v2198_v18  ;;  %v699_v55 = vsub.f32 0.0, %v2394_v5 }
 0x140   :  { %v1522_v22 = vpop.eup %1521  ;;  %1541 = vrcp.f32 %v883_v63  ;;  %v882_v6 = vadd.f32 1.0, %v1520_v23  ;;  %v854_v18 = vmul.f32 1.442695, %v729_v36  ;;  %v731_v48 = vsub.f32 0.0, %v2399_v45 }
 0x141   :  { %v1524_v37 = vpop.eup %1523  ;;  %1543 = vrcp.f32 %v915_v43  ;;  %v914_v29 = vadd.f32 1.0, %v1522_v22  ;;  %v788_v1 = vmul.f32 1.442695, %v696_v56  ;;  %v698_v62 = vsub.f32 0.0, %v2403_v44 }
 0x142   :  { %v1526_v53 = vpop.eup %1525  ;;  %1545 = vrcp.f32 %v882_v6  ;;  %v885_v20 = vadd.f32 1.0, %v1524_v37  ;;  %v794_v6 = vmul.f32 1.442695, %v699_v55  ;;  %v858_v37 = vmul.f32 1.442695, %v731_v48 }
 0x143   :  { %v1528_v0 = vpop.eup %1527  ;;  %1547 = vrcp.f32 %v914_v29  ;;  %v917_v58 = vadd.f32 1.0, %v1526_v53 }
 0x144   :  { %v1530_v51 = vpop.eup %1529  ;;  %1549 = vrcp.f32 %v885_v20  ;;  %v884_v24 = vadd.f32 1.0, %v1528_v0 }
 0x145   :  { %v1532_v13 = vpop.eup %1531  ;;  %v1006_v57 = vmul.f32 %v1530_v51, %v2231_v10  ;;  %1551 = vrcp.f32 %v917_v58  ;;  %v728_v10 = vsub.f32 0.0, %v2390_v16 }
 0x146   :  { %v1534_v52 = vpop.eup %1533  ;;  %v1038_v34 = vmul.f32 %v1532_v13, %v2238_v11  ;;  %1553 = vrcp.f32 %v884_v24  ;;  %v790_v11 = vmul.f32 1.442695, %v697_v40 }
 0x147   :  { %v1536_v14 = vpop.eup %1535  ;;  %1070 = vst [vmem:[%s2518_s3 + $0x90] sm:$0xff] %v1006_v57  ;;  %v1009_v9 = vmul.f32 %v1534_v52, %v2245_v59  ;;  %1555 = vpow2.f32 %v844_v30  ;;  %v852_v43 = vmul.f32 1.442695, %v728_v10  ;;  %v730_v30 = vsub.f32 0.0, %v2411_v41 }
 0x148   :  { %v1538_v4 = vpop.eup %1537  ;;  %1102 = vst [vmem:[%s2518_s3 + $0x190] sm:$0xff] %v1038_v34  ;;  %v1041_v21 = vmul.f32 %v1536_v14, %v2249_v50  ;;  %1557 = vpow2.f32 %v786_v19 }
 0x149   :  { %v1540_v8 = vpop.eup %1539  ;;  %1073 = vst [vmem:[%s2518_s3 + $0xa8] sm:$0xff] %v1009_v9  ;;  %v1008_v59 = vmul.f32 %v1538_v4, %v2254_v12  ;;  %1559 = vpow2.f32 %v850_v33 }
 0x14a   :  { %v1542_v63 = vpop.eup %1541  ;;  %1105 = vst [vmem:[%s2518_s3 + $0x1a8] sm:$0xff] %v1041_v21  ;;  %v1040_v50 = vmul.f32 %v1540_v8, %v2262_v15  ;;  %1561 = vpow2.f32 %v784_v38 }
 0x14b   :  { %v1544_v23 = vpop.eup %1543  ;;  %1072 = vst [vmem:[%s2518_s3 + $0xa0] sm:$0xff] %v1008_v59  ;;  %v1011_v12 = vmul.f32 %v1542_v63, %v2266_v26  ;;  %1563 = vpow2.f32 %v848_v32 }
 0x14c   :  { %v1546_v22 = vpop.eup %1545  ;;  %1104 = vst [vmem:[%s2518_s3 + $0x1a0] sm:$0xff] %v1040_v50  ;;  %v1043_v15 = vmul.f32 %v1544_v23, %v2270_v39  ;;  %1565 = vpow2.f32 %v790_v11  ;;  %v792_v39 = vmul.f32 1.442695, %v698_v62 }
 0x14d   :  { %v1548_v19 = vpop.eup %1547  ;;  %1075 = vst [vmem:[%s2518_s3 + $0xb8] sm:$0xff] %v1011_v12  ;;  %v1010_v26 = vmul.f32 %v1546_v22, %v2274_v17  ;;  %1567 = vpow2.f32 %v854_v18  ;;  %v856_v17 = vmul.f32 1.442695, %v730_v30 }
 0x14e   :  { %v1550_v29 = vpop.eup %1549  ;;  %1107 = vst [vmem:[%s2518_s3 + $0x1b8] sm:$0xff] %v1043_v15  ;;  %v1042_v33 = vmul.f32 %v1548_v19, %v2279_v28  ;;  %1569 = vpow2.f32 %v788_v1 }
 0x14f   :  { %v1552_v25 = vpop.eup %1551  ;;  %1074 = vst [vmem:[%s2518_s3 + $0xb0] sm:$0xff] %v1010_v26  ;;  %v1013_v53 = vmul.f32 %v1550_v29, %v2285_v2  ;;  %1571 = vpow2.f32 %v852_v43 }
 0x150   :  { %v1554_v20 = vpop.eup %1553  ;;  %1106 = vst [vmem:[%s2518_s3 + $0x1b0] sm:$0xff] %v1042_v33  ;;  %v1045_v38 = vmul.f32 %v1552_v25, %v2291_v49  ;;  %1573 = vpow2.f32 %v794_v6 }
 0x151   :  { %v1556_v28 = vpop.eup %1555  ;;  %1077 = vst [vmem:[%s2518_s3 + $0xc8] sm:$0xff] %v1013_v53  ;;  %v1012_v42 = vmul.f32 %v1554_v20, %v2300_v35  ;;  %1575 = vpow2.f32 %v858_v37 }
 0x152   :  { %v1558_v0 = vpop.eup %1557  ;;  %1109 = vst [vmem:[%s2518_s3 + $0x1c8] sm:$0xff] %v1045_v38  ;;  %v916_v2 = vadd.f32 1.0, %v1556_v28  ;;  %1577 = vpow2.f32 %v792_v39 }
 0x153   :  { %v1560_v58 = vpop.eup %1559  ;;  %1076 = vst [vmem:[%s2518_s3 + $0xc0] sm:$0xff] %v1012_v42  ;;  %v887_v49 = vadd.f32 1.0, %v1558_v0  ;;  %1579 = vpow2.f32 %v856_v17 }
 0x154   :  { %v1562_v40 = vpop.eup %1561  ;;  %1581 = vrcp.f32 %v916_v2  ;;  %v919_v46 = vadd.f32 1.0, %v1560_v58 }
 0x155   :  { %v1564_v51 = vpop.eup %1563  ;;  %1583 = vrcp.f32 %v887_v49  ;;  %v886_v35 = vadd.f32 1.0, %v1562_v40 }
 0x156   :  { %v1566_v24 = vpop.eup %1565  ;;  %1585 = vrcp.f32 %v919_v46  ;;  %v918_v36 = vadd.f32 1.0, %v1564_v51 }
 0x157   :  { %v1568_v13 = vpop.eup %1567  ;;  %1587 = vrcp.f32 %v886_v35  ;;  %v889_v57 = vadd.f32 1.0, %v1566_v24 }
 0x158   :  { %v1570_v56 = vpop.eup %1569  ;;  %1589 = vrcp.f32 %v918_v36  ;;  %v921_v52 = vadd.f32 1.0, %v1568_v13 }
 0x159   :  { %v1572_v34 = vpop.eup %1571  ;;  %1591 = vrcp.f32 %v889_v57  ;;  %v888_v32 = vadd.f32 1.0, %v1570_v56 }
 0x15a   :  { %v1574_v14 = vpop.eup %1573  ;;  %1593 = vrcp.f32 %v921_v52  ;;  %v920_v9 = vadd.f32 1.0, %v1572_v34 }
 0x15b   :  { %v1576_v10 = vpop.eup %1575  ;;  %1595 = vrcp.f32 %v888_v32  ;;  %v891_v4 = vadd.f32 1.0, %v1574_v14 }
 0x15c   :  { %v1578_v21 = vpop.eup %1577  ;;  %1597 = vrcp.f32 %v920_v9  ;;  %v923_v11 = vadd.f32 1.0, %v1576_v10 }
 0x15d   :  { %v1580_v55 = vpop.eup %1579  ;;  %1599 = vrcp.f32 %v891_v4  ;;  %v890_v8 = vadd.f32 1.0, %v1578_v21 }
 0x15e   :  { %v1582_v59 = vpop.eup %1581  ;;  %1601 = vrcp.f32 %v923_v11  ;;  %v922_v18 = vadd.f32 1.0, %v1580_v55 }
 0x15f   :  { %v1584_v48 = vpop.eup %1583  ;;  %v1044_v63 = vmul.f32 %v1582_v59, %v2348_v27  ;;  %1603 = vrcp.f32 %v890_v8 }
 0x160   :  { %v1586_v50 = vpop.eup %1585  ;;  %v1015_v1 = vmul.f32 %v1584_v48, %v2355_v54  ;;  %1605 = vrcp.f32 %v922_v18 }
 0x161   :  { %v1588_v62 = vpop.eup %1587  ;;  %1108 = vst [vmem:[%s2518_s3 + $0x1c0] sm:$0xff] %v1044_v63  ;;  %v1047_v23 = vmul.f32 %v1586_v50, %v2362_v61 }
 0x162   :  { %v1590_v12 = vpop.eup %1589  ;;  %1079 = vst [vmem:[%s2518_s3 + $0xd8] sm:$0xff] %v1015_v1  ;;  %v1014_v43 = vmul.f32 %v1588_v62, %v2366_v7 }
 0x163   :  { %v1592_v27 = vpop.eup %1591  ;;  %1111 = vst [vmem:[%s2518_s3 + $0x1d8] sm:$0xff] %v1047_v23  ;;  %v1046_v54 = vmul.f32 %v1590_v12, %v2376_v60 }
 0x164   :  { %v1594_v30 = vpop.eup %1593  ;;  %1078 = vst [vmem:[%s2518_s3 + $0xd0] sm:$0xff] %v1014_v43  ;;  %v1017_v61 = vmul.f32 %v1592_v27, %v2379_v31 }
 0x165   :  { %v1596_v22 = vpop.eup %1595  ;;  %1110 = vst [vmem:[%s2518_s3 + $0x1d0] sm:$0xff] %v1046_v54  ;;  %v1049_v7 = vmul.f32 %v1594_v30, %v2382_v3 }
 0x166   :  { %v1598_v15 = vpop.eup %1597  ;;  %1081 = vst [vmem:[%s2518_s3 + $0xe8] sm:$0xff] %v1017_v61  ;;  %v1016_v60 = vmul.f32 %v1596_v22, %v2385_v47 }
 0x167   :  { %v1600_v6 = vpop.eup %1599  ;;  %1113 = vst [vmem:[%s2518_s3 + $0x1e8] sm:$0xff] %v1049_v7  ;;  %v1048_v31 = vmul.f32 %v1598_v15, %v2390_v16 }
 0x168   :  { %v1602_v19 = vpop.eup %1601  ;;  %1080 = vst [vmem:[%s2518_s3 + $0xe0] sm:$0xff] %v1016_v60  ;;  %v1019_v3 = vmul.f32 %v1600_v6, %v2394_v5 }
 0x169   :  { %v1604_v26 = vpop.eup %1603  ;;  %1112 = vst [vmem:[%s2518_s3 + $0x1e0] sm:$0xff] %v1048_v31  ;;  %v1051_v47 = vmul.f32 %v1602_v19, %v2399_v45 }
 0x16a   :  { %v1606_v37 = vpop.eup %1605  ;;  %1083 = vst [vmem:[%s2518_s3 + $0xf8] sm:$0xff] %v1019_v3  ;;  %v1018_v16 = vmul.f32 %v1604_v26, %v2403_v44 }
 0x16b   :  { %1115 = vst [vmem:[%s2518_s3 + $0x1f8] sm:$0xff] %v1051_v47  ;;  %v1050_v5 = vmul.f32 %v1606_v37, %v2411_v41 }
 0x16c   :  { %1082 = vst [vmem:[%s2518_s3 + $0xf0] sm:$0xff] %v1018_v16 }
 0x16d   :  { %1114 = vst [vmem:[%s2518_s3 + $0x1f0] sm:$0xff] %v1050_v5 }

// kernel: sppf_bottleneck_forward.5
= control target key start
LH: loop header
LB: loop body
LE: loop exit
PB: predicated region body
PF: predicated region fallthrough
CT: control target
= control target key end

     0   :  { %v2046_v0 = vmov 0.0|0.0   ;;  %s3573_s1 = inlined_call_operand.vmem [shape: f32[512,128], index: 1, kind: input, shape index: {}]   ;;  %s3574_s0 = inlined_call_operand.vmem [shape: f32[512,512], index: 0, kind: input, shape index: {}]   ;;  %s3575_s2 = inlined_call_operand.vmem [shape: f32[1,128], index: 2, kind: input, shape index: {}]   ;;  %s3576_s3 = inlined_call_operand.vmem [shape: f32[512,128], index: 3, kind: output, shape index: {}]  }
   0x1   :  { %1564 = vmatprep.subr.bf16.mxu1 %v2046_v0  ;;  %v270_v1 = vld [vmem:[%s3573_s1] sm:$0xff]  ;;  %v271_v2 = vld [vmem:[%s3573_s1 + $0x8] sm:$0xff]  ;;  %1612 = vmatprep.subr.bf16.mxu0 %v2046_v0  ;;  %v272_v6 = vld [vmem:[%s3573_s1 + $0x10] sm:$0xff] }
   0x2   :  { %v302_v3 = vld [vmem:[%s3573_s1 + $0x100] sm:$0xff]  ;;  %v1565_v4 = vpack.c.bf16 %v271_v2, %v270_v1  ;;  %v303_v5 = vld [vmem:[%s3573_s1 + $0x108] sm:$0xff]  ;;  %v273_v7 = vld [vmem:[%s3573_s1 + $0x18] sm:$0xff] }
   0x3   :  { %v1613_v8 = vpack.c.bf16 %v303_v5, %v302_v3  ;;  %v304_v9 = vld [vmem:[%s3573_s1 + $0x110] sm:$0xff]  ;;  %v305_v10 = vld [vmem:[%s3573_s1 + $0x118] sm:$0xff]  ;;  %v1568_v11 = vpack.c.bf16 %v273_v7, %v272_v6  ;;  %v274_v13 = vld [vmem:[%s3573_s1 + $0x20] sm:$0xff] }
   0x4   :  { %1566 = vmatpush1.bf16.msra.mxu1 %v1565_v4  ;;  %v1616_v12 = vpack.c.bf16 %v305_v10, %v304_v9  ;;  %v275_v14 = vld [vmem:[%s3573_s1 + $0x28] sm:$0xff]  ;;  %v306_v15 = vld [vmem:[%s3573_s1 + $0x120] sm:$0xff]  ;;  %v276_v19 = vld [vmem:[%s3573_s1 + $0x30] sm:$0xff] }
   0x5   :  { %1614 = vmatpush1.bf16.msra.mxu0 %v1613_v8  ;;  %1567 = vmatprep.subr.bf16.mxu1 %v2046_v0  ;;  %v307_v16 = vld [vmem:[%s3573_s1 + $0x128] sm:$0xff]  ;;  %v1571_v17 = vpack.c.bf16 %v275_v14, %v274_v13  ;;  %v277_v20 = vld [vmem:[%s3573_s1 + $0x38] sm:$0xff]  ;;  %v308_v21 = vld [vmem:[%s3573_s1 + $0x130] sm:$0xff] }
   0x6   :  { %1615 = vmatprep.subr.bf16.mxu0 %v2046_v0  ;;  %v1619_v18 = vpack.c.bf16 %v307_v16, %v306_v15  ;;  %v309_v22 = vld [vmem:[%s3573_s1 + $0x138] sm:$0xff]  ;;  %v1574_v23 = vpack.c.bf16 %v277_v20, %v276_v19  ;;  %v278_v25 = vld [vmem:[%s3573_s1 + $0x40] sm:$0xff]  ;;  %v279_v26 = vld [vmem:[%s3573_s1 + $0x48] sm:$0xff] }
   0x7   :  { %v1622_v24 = vpack.c.bf16 %v309_v22, %v308_v21  ;;  %v310_v27 = vld [vmem:[%s3573_s1 + $0x140] sm:$0xff]  ;;  %v311_v28 = vld [vmem:[%s3573_s1 + $0x148] sm:$0xff]  ;;  %v1577_v29 = vpack.c.bf16 %v279_v26, %v278_v25  ;;  %v280_v31 = vld [vmem:[%s3573_s1 + $0x50] sm:$0xff] }
   0x8   :  { %1569 = vmatpush1.bf16.msra.mxu1 %v1568_v11  ;;  %v1625_v30 = vpack.c.bf16 %v311_v28, %v310_v27  ;;  %v281_v32 = vld [vmem:[%s3573_s1 + $0x58] sm:$0xff]  ;;  %v312_v33 = vld [vmem:[%s3573_s1 + $0x150] sm:$0xff]  ;;  %v282_v37 = vld [vmem:[%s3573_s1 + $0x60] sm:$0xff] }
   0x9   :  { %1617 = vmatpush1.bf16.msra.mxu0 %v1616_v12  ;;  %1570 = vmatprep.subr.bf16.mxu1 %v2046_v0  ;;  %v313_v34 = vld [vmem:[%s3573_s1 + $0x158] sm:$0xff]  ;;  %v1580_v35 = vpack.c.bf16 %v281_v32, %v280_v31  ;;  %v283_v38 = vld [vmem:[%s3573_s1 + $0x68] sm:$0xff]  ;;  %v314_v39 = vld [vmem:[%s3573_s1 + $0x160] sm:$0xff] }
   0xa   :  { %1618 = vmatprep.subr.bf16.mxu0 %v2046_v0  ;;  %v1628_v36 = vpack.c.bf16 %v313_v34, %v312_v33  ;;  %v315_v40 = vld [vmem:[%s3573_s1 + $0x168] sm:$0xff]  ;;  %v17_v42 = vld [vmem:[%s3574_s0 + $0x18] sm:$0xff]  ;;  %v1583_v43 = vpack.c.bf16 %v283_v38, %v282_v37  ;;  %v284_v45 = vld [vmem:[%s3573_s1 + $0x70] sm:$0xff] }
   0xb   :  { %v15_v41 = vld [vmem:[%s3574_s0 + $0x8] sm:$0xff]  ;;  %790 = vmatprep.mubr.f32.mxu0 %v17_v42  ;;  %v1631_v44 = vpack.c.bf16 %v315_v40, %v314_v39  ;;  %v285_v46 = vld [vmem:[%s3573_s1 + $0x78] sm:$0xff]  ;;  %v316_v47 = vld [vmem:[%s3573_s1 + $0x170] sm:$0xff] }
   0xc   :  { %1572 = vmatpush1.bf16.msra.mxu1 %v1571_v17  ;;  %405 = vmatprep.mubr.f32.mxu1 %v15_v41  ;;  %v317_v48 = vld [vmem:[%s3573_s1 + $0x178] sm:$0xff]  ;;  %v1586_v49 = vpack.c.bf16 %v285_v46, %v284_v45  ;;  %v286_v51 = vld [vmem:[%s3573_s1 + $0x80] sm:$0xff]  ;;  %v287_v52 = vld [vmem:[%s3573_s1 + $0x88] sm:$0xff] }
   0xd   :  { %1620 = vmatpush1.bf16.msra.mxu0 %v1619_v18  ;;  %1573 = vmatprep.subr.bf16.mxu1 %v2046_v0  ;;  %v1634_v50 = vpack.c.bf16 %v317_v48, %v316_v47  ;;  %v318_v53 = vld [vmem:[%s3573_s1 + $0x180] sm:$0xff]  ;;  %v319_v54 = vld [vmem:[%s3573_s1 + $0x188] sm:$0xff]  ;;  %v1589_v55 = vpack.c.bf16 %v287_v52, %v286_v51  ;;  %v288_v57 = vld [vmem:[%s3573_s1 + $0x90] sm:$0xff] }
   0xe   :  { %1621 = vmatprep.subr.bf16.mxu0 %v2046_v0  ;;  %v1637_v56 = vpack.c.bf16 %v319_v54, %v318_v53  ;;  %v289_v58 = vld [vmem:[%s3573_s1 + $0x98] sm:$0xff]  ;;  %v320_v59 = vld [vmem:[%s3573_s1 + $0x190] sm:$0xff]  ;;  %v290_v63 = vld [vmem:[%s3573_s1 + $0xa0] sm:$0xff] }
   0xf   :  { %v321_v60 = vld [vmem:[%s3573_s1 + $0x198] sm:$0xff]  ;;  %v1592_v61 = vpack.c.bf16 %v289_v58, %v288_v57  ;;  %v291_v1 = vld [vmem:[%s3573_s1 + $0xa8] sm:$0xff]  ;;  %v322_v2 = vld [vmem:[%s3573_s1 + $0x1a0] sm:$0xff] }
  0x10   :  { %1575 = vmatpush1.bf16.msra.mxu1 %v1574_v23  ;;  %v1640_v62 = vpack.c.bf16 %v321_v60, %v320_v59  ;;  %v323_v3 = vld [vmem:[%s3573_s1 + $0x1a8] sm:$0xff]  ;;  %v1595_v4 = vpack.c.bf16 %v291_v1, %v290_v63  ;;  %v292_v6 = vld [vmem:[%s3573_s1 + $0xb0] sm:$0xff]  ;;  %v293_v7 = vld [vmem:[%s3573_s1 + $0xb8] sm:$0xff] }
  0x11   :  { %1623 = vmatpush1.bf16.msra.mxu0 %v1622_v24  ;;  %1576 = vmatprep.subr.bf16.mxu1 %v2046_v0  ;;  %v1643_v5 = vpack.c.bf16 %v323_v3, %v322_v2  ;;  %v324_v8 = vld [vmem:[%s3573_s1 + $0x1b0] sm:$0xff]  ;;  %v325_v9 = vld [vmem:[%s3573_s1 + $0x1b8] sm:$0xff]  ;;  %v1598_v10 = vpack.c.bf16 %v293_v7, %v292_v6  ;;  %v294_v12 = vld [vmem:[%s3573_s1 + $0xc0] sm:$0xff] }
  0x12   :  { %1624 = vmatprep.subr.bf16.mxu0 %v2046_v0  ;;  %v1646_v11 = vpack.c.bf16 %v325_v9, %v324_v8  ;;  %v295_v13 = vld [vmem:[%s3573_s1 + $0xc8] sm:$0xff]  ;;  %v326_v14 = vld [vmem:[%s3573_s1 + $0x1c0] sm:$0xff]  ;;  %v296_v18 = vld [vmem:[%s3573_s1 + $0xd0] sm:$0xff] }
  0x13   :  { %v327_v15 = vld [vmem:[%s3573_s1 + $0x1c8] sm:$0xff]  ;;  %v1601_v16 = vpack.c.bf16 %v295_v13, %v294_v12  ;;  %v297_v19 = vld [vmem:[%s3573_s1 + $0xd8] sm:$0xff]  ;;  %v328_v20 = vld [vmem:[%s3573_s1 + $0x1d0] sm:$0xff] }
  0x14   :  { %1578 = vmatpush1.bf16.msra.mxu1 %v1577_v29  ;;  %v1649_v17 = vpack.c.bf16 %v327_v15, %v326_v14  ;;  %v329_v21 = vld [vmem:[%s3573_s1 + $0x1d8] sm:$0xff]  ;;  %v1604_v22 = vpack.c.bf16 %v297_v19, %v296_v18  ;;  %v298_v24 = vld [vmem:[%s3573_s1 + $0xe0] sm:$0xff]  ;;  %v299_v25 = vld [vmem:[%s3573_s1 + $0xe8] sm:$0xff] }
  0x15   :  { %1626 = vmatpush1.bf16.msra.mxu0 %v1625_v30  ;;  %1579 = vmatprep.subr.bf16.mxu1 %v2046_v0  ;;  %v1652_v23 = vpack.c.bf16 %v329_v21, %v328_v20  ;;  %v330_v26 = vld [vmem:[%s3573_s1 + $0x1e0] sm:$0xff]  ;;  %v331_v27 = vld [vmem:[%s3573_s1 + $0x1e8] sm:$0xff]  ;;  %v1607_v28 = vpack.c.bf16 %v299_v25, %v298_v24  ;;  %v300_v30 = vld [vmem:[%s3573_s1 + $0xf0] sm:$0xff] }
  0x16   :  { %1627 = vmatprep.subr.bf16.mxu0 %v2046_v0  ;;  %v1655_v29 = vpack.c.bf16 %v331_v27, %v330_v26  ;;  %v301_v31 = vld [vmem:[%s3573_s1 + $0xf8] sm:$0xff]  ;;  %v332_v32 = vld [vmem:[%s3573_s1 + $0x1f0] sm:$0xff]  ;;  %v19_v38 = vld [vmem:[%s3574_s0 + $0x28] sm:$0xff] }
  0x17   :  { %v333_v33 = vld [vmem:[%s3573_s1 + $0x1f8] sm:$0xff]  ;;  %v1610_v34 = vpack.c.bf16 %v301_v31, %v300_v30  ;;  %v16_v37 = vld [vmem:[%s3574_s0 + $0x10] sm:$0xff]  ;;  %v23_v41 = vld [vmem:[%s3574_s0 + $0x48] sm:$0xff] }
  0x18   :  { %1581 = vmatpush1.bf16.msra.mxu1 %v1580_v35  ;;  %v1658_v35 = vpack.c.bf16 %v333_v33, %v332_v32  ;;  %v21_v39 = vld [vmem:[%s3574_s0 + $0x38] sm:$0xff]  ;;  %v20_v40 = vld [vmem:[%s3574_s0 + $0x30] sm:$0xff]  ;;  %v27_v45 = vld [vmem:[%s3574_s0 + $0x68] sm:$0xff] }
  0x19   :  { %1629 = vmatpush1.bf16.msra.mxu0 %v1628_v36  ;;  %1582 = vmatprep.subr.bf16.mxu1 %v2046_v0  ;;  %v14_v36 = vld [vmem:[%s3574_s0] sm:$0xff]  ;;  %v25_v42 = vld [vmem:[%s3574_s0 + $0x58] sm:$0xff]  ;;  %v28_v48 = vld [vmem:[%s3574_s0 + $0x70] sm:$0xff] }
  0x1a   :  { %1630 = vmatprep.subr.bf16.mxu0 %v2046_v0  ;;  %v29_v46 = vld [vmem:[%s3574_s0 + $0x78] sm:$0xff]  ;;  %v26_v47 = vld [vmem:[%s3574_s0 + $0x60] sm:$0xff]  ;;  %v32_v52 = vld [vmem:[%s3574_s0 + $0x90] sm:$0xff] }
  0x1b   :  { %v30_v51 = vld [vmem:[%s3574_s0 + $0x80] sm:$0xff]  ;;  %v35_v53 = vld [vmem:[%s3574_s0 + $0xa8] sm:$0xff]  ;;  %v37_v54 = vld [vmem:[%s3574_s0 + $0xb8] sm:$0xff] }
  0x1c   :  { %1584 = vmatpush1.bf16.msra.mxu1 %v1583_v43  ;;  %v22_v43 = vld [vmem:[%s3574_s0 + $0x40] sm:$0xff]  ;;  %v39_v57 = vld [vmem:[%s3574_s0 + $0xc8] sm:$0xff]  ;;  %v41_v58 = vld [vmem:[%s3574_s0 + $0xd8] sm:$0xff] }
  0x1d   :  { %1632 = vmatpush1.bf16.msra.mxu0 %v1631_v44  ;;  %1585 = vmatprep.subr.bf16.mxu1 %v2046_v0  ;;  %v24_v44 = vld [vmem:[%s3574_s0 + $0x50] sm:$0xff]  ;;  %v38_v59 = vld [vmem:[%s3574_s0 + $0xc0] sm:$0xff]  ;;  %v47_v2 = vld [vmem:[%s3574_s0 + $0x108] sm:$0xff] }
  0x1e   :  { %1633 = vmatprep.subr.bf16.mxu0 %v2046_v0  ;;  %v40_v60 = vld [vmem:[%s3574_s0 + $0xd0] sm:$0xff]  ;;  %v42_v63 = vld [vmem:[%s3574_s0 + $0xe0] sm:$0xff]  ;;  %v49_v3 = vld [vmem:[%s3574_s0 + $0x118] sm:$0xff] }
  0x1f   :  { %v44_v1 = vld [vmem:[%s3574_s0 + $0xf0] sm:$0xff]  ;;  %v51_v6 = vld [vmem:[%s3574_s0 + $0x128] sm:$0xff]  ;;  %v53_v7 = vld [vmem:[%s3574_s0 + $0x138] sm:$0xff] }
  0x20   :  { %1587 = vmatpush1.bf16.msra.mxu1 %v1586_v49  ;;  %v31_v49 = vld [vmem:[%s3574_s0 + $0x88] sm:$0xff]  ;;  %v50_v8 = vld [vmem:[%s3574_s0 + $0x120] sm:$0xff]  ;;  %v52_v9 = vld [vmem:[%s3574_s0 + $0x130] sm:$0xff] }
  0x21   :  { %1635 = vmatpush1.bf16.msra.mxu0 %v1634_v50  ;;  %1588 = vmatprep.subr.bf16.mxu1 %v2046_v0  ;;  %v33_v50 = vld [vmem:[%s3574_s0 + $0x98] sm:$0xff]  ;;  %v54_v12 = vld [vmem:[%s3574_s0 + $0x140] sm:$0xff]  ;;  %v56_v13 = vld [vmem:[%s3574_s0 + $0x150] sm:$0xff] }
  0x22   :  { %1636 = vmatprep.subr.bf16.mxu0 %v2046_v0  ;;  %v59_v14 = vld [vmem:[%s3574_s0 + $0x168] sm:$0xff]  ;;  %v61_v15 = vld [vmem:[%s3574_s0 + $0x178] sm:$0xff]  ;;  %v62_v20 = vld [vmem:[%s3574_s0 + $0x180] sm:$0xff] }
  0x23   :  { %v63_v18 = vld [vmem:[%s3574_s0 + $0x188] sm:$0xff]  ;;  %v65_v19 = vld [vmem:[%s3574_s0 + $0x198] sm:$0xff]  ;;  %v64_v21 = vld [vmem:[%s3574_s0 + $0x190] sm:$0xff] }
  0x24   :  { %1590 = vmatpush1.bf16.msra.mxu1 %v1589_v55  ;;  %v34_v55 = vld [vmem:[%s3574_s0 + $0xa0] sm:$0xff]  ;;  %v68_v25 = vld [vmem:[%s3574_s0 + $0x1b0] sm:$0xff]  ;;  %v71_v26 = vld [vmem:[%s3574_s0 + $0x1c8] sm:$0xff] }
  0x25   :  { %1638 = vmatpush1.bf16.msra.mxu0 %v1637_v56  ;;  %1591 = vmatprep.subr.bf16.mxu1 %v2046_v0  ;;  %v36_v56 = vld [vmem:[%s3574_s0 + $0xb0] sm:$0xff]  ;;  %v66_v24 = vld [vmem:[%s3574_s0 + $0x1a0] sm:$0xff]  ;;  %v73_v27 = vld [vmem:[%s3574_s0 + $0x1d8] sm:$0xff] }
  0x26   :  { %1639 = vmatprep.subr.bf16.mxu0 %v2046_v0  ;;  %v75_v30 = vld [vmem:[%s3574_s0 + $0x1e8] sm:$0xff]  ;;  %v77_v31 = vld [vmem:[%s3574_s0 + $0x1f8] sm:$0xff]  ;;  %v74_v32 = vld [vmem:[%s3574_s0 + $0x1e0] sm:$0xff] }
  0x27   :  { %v76_v33 = vld [vmem:[%s3574_s0 + $0x1f0] sm:$0xff] }
  0x28   :  { %1593 = vmatpush1.bf16.msra.mxu1 %v1592_v61  ;;  %v43_v61 = vld [vmem:[%s3574_s0 + $0xe8] sm:$0xff] }
  0x29   :  { %1641 = vmatpush1.bf16.msra.mxu0 %v1640_v62  ;;  %1594 = vmatprep.subr.bf16.mxu1 %v2046_v0  ;;  %v45_v62 = vld [vmem:[%s3574_s0 + $0xf8] sm:$0xff] }
  0x2a   :  { %1642 = vmatprep.subr.bf16.mxu0 %v2046_v0 }
  0x2c   :  { %1596 = vmatpush1.bf16.msra.mxu1 %v1595_v4  ;;  %v46_v4 = vld [vmem:[%s3574_s0 + $0x100] sm:$0xff] }
  0x2d   :  { %1644 = vmatpush1.bf16.msra.mxu0 %v1643_v5  ;;  %1597 = vmatprep.subr.bf16.mxu1 %v2046_v0  ;;  %v48_v5 = vld [vmem:[%s3574_s0 + $0x110] sm:$0xff] }
  0x2e   :  { %1645 = vmatprep.subr.bf16.mxu0 %v2046_v0 }
  0x30   :  { %1599 = vmatpush1.bf16.msra.mxu1 %v1598_v10  ;;  %v55_v10 = vld [vmem:[%s3574_s0 + $0x148] sm:$0xff] }
  0x31   :  { %1647 = vmatpush1.bf16.msra.mxu0 %v1646_v11  ;;  %1600 = vmatprep.subr.bf16.mxu1 %v2046_v0  ;;  %v57_v11 = vld [vmem:[%s3574_s0 + $0x158] sm:$0xff] }
  0x32   :  { %1648 = vmatprep.subr.bf16.mxu0 %v2046_v0 }
  0x34   :  { %1602 = vmatpush1.bf16.msra.mxu1 %v1601_v16  ;;  %v58_v16 = vld [vmem:[%s3574_s0 + $0x160] sm:$0xff] }
  0x35   :  { %1650 = vmatpush1.bf16.msra.mxu0 %v1649_v17  ;;  %1603 = vmatprep.subr.bf16.mxu1 %v2046_v0  ;;  %v60_v17 = vld [vmem:[%s3574_s0 + $0x170] sm:$0xff] }
  0x36   :  { %1651 = vmatprep.subr.bf16.mxu0 %v2046_v0 }
  0x38   :  { %1605 = vmatpush1.bf16.msra.mxu1 %v1604_v22  ;;  %v67_v22 = vld [vmem:[%s3574_s0 + $0x1a8] sm:$0xff] }
  0x39   :  { %1653 = vmatpush1.bf16.msra.mxu0 %v1652_v23  ;;  %1606 = vmatprep.subr.bf16.mxu1 %v2046_v0  ;;  %v69_v23 = vld [vmem:[%s3574_s0 + $0x1b8] sm:$0xff] }
  0x3a   :  { %1654 = vmatprep.subr.bf16.mxu0 %v2046_v0 }
  0x3c   :  { %1608 = vmatpush1.bf16.msra.mxu1 %v1607_v28  ;;  %v70_v28 = vld [vmem:[%s3574_s0 + $0x1c0] sm:$0xff] }
  0x3d   :  { %1656 = vmatpush1.bf16.msra.mxu0 %v1655_v29  ;;  %1609 = vmatprep.subr.bf16.mxu1 %v2046_v0  ;;  %v72_v29 = vld [vmem:[%s3574_s0 + $0x1d0] sm:$0xff] }
  0x3e   :  { %1657 = vmatprep.subr.bf16.mxu0 %v2046_v0  ;;  %v18_v0 = vld [vmem:[%s3574_s0 + $0x20] sm:$0xff] }
  0x40   :  { %1611 = vmatpush1.bf16.msra.mxu1 %v1610_v34  ;;  %v79_v34 = vld [vmem:[%s3574_s0 + $0x208] sm:$0xff] }
  0x41   :  { %1659 = vmatpush1.bf16.msra.mxu0 %v1658_v35  ;;  %v81_v35 = vld [vmem:[%s3574_s0 + $0x218] sm:$0xff] }
  0x43   :  { %406 = vmatmul.mubr.f32.vlgmr.msra.gmra.mrb[0].mxu1 %v14_v36  ;;  %v78_v36 = vld [vmem:[%s3574_s0 + $0x200] sm:$0xff] }
  0x44   :  { %791 = vmatmul.mubr.f32.vlgmr.msra.gmra.mrb[0].mxu0 %v16_v37  ;;  %410 = vmatprep.mubr.f32.mxu1 %v19_v38  ;;  %v80_v37 = vld [vmem:[%s3574_s0 + $0x210] sm:$0xff]  ;;  %v83_v38 = vld [vmem:[%s3574_s0 + $0x228] sm:$0xff] }
  0x45   :  { %795 = vmatprep.mubr.f32.mxu0 %v21_v39  ;;  %v85_v39 = vld [vmem:[%s3574_s0 + $0x238] sm:$0xff] }
  0x47   :  { %411 = vmatmul.mubr.f32.gmra.mrb[2].mxu1 %v18_v0  ;;  %v82_v0 = vld [vmem:[%s3574_s0 + $0x220] sm:$0xff] }
  0x48   :  { %796 = vmatmul.mubr.f32.gmra.mrb[2].mxu0 %v20_v40  ;;  %415 = vmatprep.mubr.f32.mxu1 %v23_v41  ;;  %v84_v40 = vld [vmem:[%s3574_s0 + $0x230] sm:$0xff]  ;;  %v87_v41 = vld [vmem:[%s3574_s0 + $0x248] sm:$0xff] }
  0x49   :  { %800 = vmatprep.mubr.f32.mxu0 %v25_v42  ;;  %v89_v42 = vld [vmem:[%s3574_s0 + $0x258] sm:$0xff] }
  0x4b   :  { %416 = vmatmul.mubr.f32.gmra.mrb[4].mxu1 %v22_v43  ;;  %v86_v43 = vld [vmem:[%s3574_s0 + $0x240] sm:$0xff] }
  0x4c   :  { %801 = vmatmul.mubr.f32.gmra.mrb[4].mxu0 %v24_v44  ;;  %420 = vmatprep.mubr.f32.mxu1 %v27_v45  ;;  %v88_v44 = vld [vmem:[%s3574_s0 + $0x250] sm:$0xff]  ;;  %v91_v45 = vld [vmem:[%s3574_s0 + $0x268] sm:$0xff] }
  0x4d   :  { %805 = vmatprep.mubr.f32.mxu0 %v29_v46  ;;  %v93_v46 = vld [vmem:[%s3574_s0 + $0x278] sm:$0xff] }
  0x4f   :  { %421 = vmatmul.mubr.f32.gmra.mrb[6].mxu1 %v26_v47  ;;  %v90_v47 = vld [vmem:[%s3574_s0 + $0x260] sm:$0xff] }
  0x50   :  { %806 = vmatmul.mubr.f32.gmra.mrb[6].mxu0 %v28_v48  ;;  %425 = vmatprep.mubr.f32.mxu1 %v31_v49  ;;  %v92_v48 = vld [vmem:[%s3574_s0 + $0x270] sm:$0xff]  ;;  %v95_v49 = vld [vmem:[%s3574_s0 + $0x288] sm:$0xff] }
  0x51   :  { %810 = vmatprep.mubr.f32.mxu0 %v33_v50  ;;  %v97_v50 = vld [vmem:[%s3574_s0 + $0x298] sm:$0xff] }
  0x53   :  { %426 = vmatmul.mubr.f32.gmra.mrb[8].mxu1 %v30_v51  ;;  %v94_v51 = vld [vmem:[%s3574_s0 + $0x280] sm:$0xff] }
  0x54   :  { %811 = vmatmul.mubr.f32.gmra.mrb[8].mxu0 %v32_v52  ;;  %430 = vmatprep.mubr.f32.mxu1 %v35_v53  ;;  %v96_v52 = vld [vmem:[%s3574_s0 + $0x290] sm:$0xff]  ;;  %v99_v53 = vld [vmem:[%s3574_s0 + $0x2a8] sm:$0xff] }
  0x55   :  { %815 = vmatprep.mubr.f32.mxu0 %v37_v54  ;;  %v101_v54 = vld [vmem:[%s3574_s0 + $0x2b8] sm:$0xff] }
  0x57   :  { %431 = vmatmul.mubr.f32.gmra.mrb[10].mxu1 %v34_v55  ;;  %v98_v55 = vld [vmem:[%s3574_s0 + $0x2a0] sm:$0xff] }
  0x58   :  { %816 = vmatmul.mubr.f32.gmra.mrb[10].mxu0 %v36_v56  ;;  %435 = vmatprep.mubr.f32.mxu1 %v39_v57  ;;  %v100_v56 = vld [vmem:[%s3574_s0 + $0x2b0] sm:$0xff]  ;;  %v103_v57 = vld [vmem:[%s3574_s0 + $0x2c8] sm:$0xff] }
  0x59   :  { %820 = vmatprep.mubr.f32.mxu0 %v41_v58  ;;  %v105_v58 = vld [vmem:[%s3574_s0 + $0x2d8] sm:$0xff] }
  0x5b   :  { %436 = vmatmul.mubr.f32.gmra.mrb[12].mxu1 %v38_v59  ;;  %v102_v59 = vld [vmem:[%s3574_s0 + $0x2c0] sm:$0xff] }
  0x5c   :  { %821 = vmatmul.mubr.f32.gmra.mrb[12].mxu0 %v40_v60  ;;  %440 = vmatprep.mubr.f32.mxu1 %v43_v61  ;;  %v104_v60 = vld [vmem:[%s3574_s0 + $0x2d0] sm:$0xff]  ;;  %v107_v61 = vld [vmem:[%s3574_s0 + $0x2e8] sm:$0xff] }
  0x5d   :  { %825 = vmatprep.mubr.f32.mxu0 %v45_v62  ;;  %v109_v62 = vld [vmem:[%s3574_s0 + $0x2f8] sm:$0xff] }
  0x5f   :  { %441 = vmatmul.mubr.f32.gmra.mrb[14].mxu1 %v42_v63  ;;  %v106_v63 = vld [vmem:[%s3574_s0 + $0x2e0] sm:$0xff] }
  0x60   :  { %826 = vmatmul.mubr.f32.gmra.mrb[14].mxu0 %v44_v1  ;;  %445 = vmatprep.mubr.f32.mxu1 %v47_v2  ;;  %v108_v1 = vld [vmem:[%s3574_s0 + $0x2f0] sm:$0xff]  ;;  %v111_v2 = vld [vmem:[%s3574_s0 + $0x308] sm:$0xff] }
  0x61   :  { %830 = vmatprep.mubr.f32.mxu0 %v49_v3  ;;  %v113_v3 = vld [vmem:[%s3574_s0 + $0x318] sm:$0xff] }
  0x63   :  { %446 = vmatmul.mubr.f32.gmra.mrb[16].mxu1 %v46_v4  ;;  %v110_v4 = vld [vmem:[%s3574_s0 + $0x300] sm:$0xff] }
  0x64   :  { %831 = vmatmul.mubr.f32.gmra.mrb[16].mxu0 %v48_v5  ;;  %450 = vmatprep.mubr.f32.mxu1 %v51_v6  ;;  %v112_v5 = vld [vmem:[%s3574_s0 + $0x310] sm:$0xff]  ;;  %v115_v6 = vld [vmem:[%s3574_s0 + $0x328] sm:$0xff] }
  0x65   :  { %835 = vmatprep.mubr.f32.mxu0 %v53_v7  ;;  %v117_v7 = vld [vmem:[%s3574_s0 + $0x338] sm:$0xff] }
  0x67   :  { %451 = vmatmul.mubr.f32.gmra.mrb[18].mxu1 %v50_v8  ;;  %v114_v8 = vld [vmem:[%s3574_s0 + $0x320] sm:$0xff] }
  0x68   :  { %836 = vmatmul.mubr.f32.gmra.mrb[18].mxu0 %v52_v9  ;;  %455 = vmatprep.mubr.f32.mxu1 %v55_v10  ;;  %v116_v9 = vld [vmem:[%s3574_s0 + $0x330] sm:$0xff]  ;;  %v119_v10 = vld [vmem:[%s3574_s0 + $0x348] sm:$0xff] }
  0x69   :  { %840 = vmatprep.mubr.f32.mxu0 %v57_v11  ;;  %v121_v11 = vld [vmem:[%s3574_s0 + $0x358] sm:$0xff] }
  0x6b   :  { %456 = vmatmul.mubr.f32.gmra.mrb[20].mxu1 %v54_v12  ;;  %v118_v12 = vld [vmem:[%s3574_s0 + $0x340] sm:$0xff] }
  0x6c   :  { %841 = vmatmul.mubr.f32.gmra.mrb[20].mxu0 %v56_v13  ;;  %460 = vmatprep.mubr.f32.mxu1 %v59_v14  ;;  %v120_v13 = vld [vmem:[%s3574_s0 + $0x350] sm:$0xff]  ;;  %v123_v14 = vld [vmem:[%s3574_s0 + $0x368] sm:$0xff] }
  0x6d   :  { %845 = vmatprep.mubr.f32.mxu0 %v61_v15  ;;  %v125_v15 = vld [vmem:[%s3574_s0 + $0x378] sm:$0xff] }
  0x6f   :  { %461 = vmatmul.mubr.f32.gmra.mrb[22].mxu1 %v58_v16  ;;  %v122_v16 = vld [vmem:[%s3574_s0 + $0x360] sm:$0xff] }
  0x70   :  { %846 = vmatmul.mubr.f32.gmra.mrb[22].mxu0 %v60_v17  ;;  %465 = vmatprep.mubr.f32.mxu1 %v63_v18  ;;  %v124_v17 = vld [vmem:[%s3574_s0 + $0x370] sm:$0xff]  ;;  %v127_v18 = vld [vmem:[%s3574_s0 + $0x388] sm:$0xff] }
  0x71   :  { %850 = vmatprep.mubr.f32.mxu0 %v65_v19  ;;  %v129_v19 = vld [vmem:[%s3574_s0 + $0x398] sm:$0xff] }
  0x73   :  { %466 = vmatmul.mubr.f32.gmra.mrb[24].mxu1 %v62_v20  ;;  %v126_v20 = vld [vmem:[%s3574_s0 + $0x380] sm:$0xff] }
  0x74   :  { %851 = vmatmul.mubr.f32.gmra.mrb[24].mxu0 %v64_v21  ;;  %470 = vmatprep.mubr.f32.mxu1 %v67_v22  ;;  %v128_v21 = vld [vmem:[%s3574_s0 + $0x390] sm:$0xff]  ;;  %v131_v22 = vld [vmem:[%s3574_s0 + $0x3a8] sm:$0xff] }
  0x75   :  { %855 = vmatprep.mubr.f32.mxu0 %v69_v23  ;;  %v133_v23 = vld [vmem:[%s3574_s0 + $0x3b8] sm:$0xff] }
  0x77   :  { %471 = vmatmul.mubr.f32.gmra.mrb[26].mxu1 %v66_v24  ;;  %v130_v24 = vld [vmem:[%s3574_s0 + $0x3a0] sm:$0xff] }
  0x78   :  { %856 = vmatmul.mubr.f32.gmra.mrb[26].mxu0 %v68_v25  ;;  %475 = vmatprep.mubr.f32.mxu1 %v71_v26  ;;  %v132_v25 = vld [vmem:[%s3574_s0 + $0x3b0] sm:$0xff]  ;;  %v135_v26 = vld [vmem:[%s3574_s0 + $0x3c8] sm:$0xff] }
  0x79   :  { %860 = vmatprep.mubr.f32.mxu0 %v73_v27  ;;  %v137_v27 = vld [vmem:[%s3574_s0 + $0x3d8] sm:$0xff] }
  0x7b   :  { %476 = vmatmul.mubr.f32.gmra.mrb[28].mxu1 %v70_v28  ;;  %v134_v28 = vld [vmem:[%s3574_s0 + $0x3c0] sm:$0xff] }
  0x7c   :  { %861 = vmatmul.mubr.f32.gmra.mrb[28].mxu0 %v72_v29  ;;  %480 = vmatprep.mubr.f32.mxu1 %v75_v30  ;;  %v136_v29 = vld [vmem:[%s3574_s0 + $0x3d0] sm:$0xff]  ;;  %v139_v30 = vld [vmem:[%s3574_s0 + $0x3e8] sm:$0xff] }
  0x7d   :  { %865 = vmatprep.mubr.f32.mxu0 %v77_v31  ;;  %v141_v31 = vld [vmem:[%s3574_s0 + $0x3f8] sm:$0xff] }
  0x7f   :  { %481 = vmatmul.mubr.f32.gmra.mrb[30].mxu1 %v74_v32  ;;  %v138_v32 = vld [vmem:[%s3574_s0 + $0x3e0] sm:$0xff] }
  0x80   :  { %866 = vmatmul.mubr.f32.gmra.mrb[30].mxu0 %v76_v33  ;;  %485 = vmatprep.mubr.f32.mxu1 %v79_v34  ;;  %v140_v33 = vld [vmem:[%s3574_s0 + $0x3f0] sm:$0xff]  ;;  %v143_v34 = vld [vmem:[%s3574_s0 + $0x408] sm:$0xff] }
  0x81   :  { %870 = vmatprep.mubr.f32.mxu0 %v81_v35  ;;  %v145_v35 = vld [vmem:[%s3574_s0 + $0x418] sm:$0xff] }
  0x83   :  { %486 = vmatmul.mubr.f32.gmra.mrb[32].mxu1 %v78_v36  ;;  %v142_v36 = vld [vmem:[%s3574_s0 + $0x400] sm:$0xff] }
  0x84   :  { %871 = vmatmul.mubr.f32.gmra.mrb[32].mxu0 %v80_v37  ;;  %490 = vmatprep.mubr.f32.mxu1 %v83_v38  ;;  %v144_v37 = vld [vmem:[%s3574_s0 + $0x410] sm:$0xff]  ;;  %v147_v38 = vld [vmem:[%s3574_s0 + $0x428] sm:$0xff] }
  0x85   :  { %875 = vmatprep.mubr.f32.mxu0 %v85_v39  ;;  %v149_v39 = vld [vmem:[%s3574_s0 + $0x438] sm:$0xff] }
  0x87   :  { %491 = vmatmul.mubr.f32.gmra.mrb[34].mxu1 %v82_v0  ;;  %v146_v0 = vld [vmem:[%s3574_s0 + $0x420] sm:$0xff] }
  0x88   :  { %876 = vmatmul.mubr.f32.gmra.mrb[34].mxu0 %v84_v40  ;;  %495 = vmatprep.mubr.f32.mxu1 %v87_v41  ;;  %v148_v40 = vld [vmem:[%s3574_s0 + $0x430] sm:$0xff]  ;;  %v151_v41 = vld [vmem:[%s3574_s0 + $0x448] sm:$0xff] }
  0x89   :  { %880 = vmatprep.mubr.f32.mxu0 %v89_v42  ;;  %v153_v42 = vld [vmem:[%s3574_s0 + $0x458] sm:$0xff] }
  0x8b   :  { %496 = vmatmul.mubr.f32.gmra.mrb[36].mxu1 %v86_v43  ;;  %v150_v43 = vld [vmem:[%s3574_s0 + $0x440] sm:$0xff] }
  0x8c   :  { %881 = vmatmul.mubr.f32.gmra.mrb[36].mxu0 %v88_v44  ;;  %500 = vmatprep.mubr.f32.mxu1 %v91_v45  ;;  %v152_v44 = vld [vmem:[%s3574_s0 + $0x450] sm:$0xff]  ;;  %v155_v45 = vld [vmem:[%s3574_s0 + $0x468] sm:$0xff] }
  0x8d   :  { %885 = vmatprep.mubr.f32.mxu0 %v93_v46  ;;  %v157_v46 = vld [vmem:[%s3574_s0 + $0x478] sm:$0xff] }
  0x8f   :  { %501 = vmatmul.mubr.f32.gmra.mrb[38].mxu1 %v90_v47  ;;  %v154_v47 = vld [vmem:[%s3574_s0 + $0x460] sm:$0xff] }
  0x90   :  { %886 = vmatmul.mubr.f32.gmra.mrb[38].mxu0 %v92_v48  ;;  %505 = vmatprep.mubr.f32.mxu1 %v95_v49  ;;  %v156_v48 = vld [vmem:[%s3574_s0 + $0x470] sm:$0xff]  ;;  %v159_v49 = vld [vmem:[%s3574_s0 + $0x488] sm:$0xff] }
  0x91   :  { %890 = vmatprep.mubr.f32.mxu0 %v97_v50  ;;  %v161_v50 = vld [vmem:[%s3574_s0 + $0x498] sm:$0xff] }
  0x93   :  { %506 = vmatmul.mubr.f32.gmra.mrb[40].mxu1 %v94_v51  ;;  %v158_v51 = vld [vmem:[%s3574_s0 + $0x480] sm:$0xff] }
  0x94   :  { %891 = vmatmul.mubr.f32.gmra.mrb[40].mxu0 %v96_v52  ;;  %510 = vmatprep.mubr.f32.mxu1 %v99_v53  ;;  %v160_v52 = vld [vmem:[%s3574_s0 + $0x490] sm:$0xff]  ;;  %v163_v53 = vld [vmem:[%s3574_s0 + $0x4a8] sm:$0xff] }
  0x95   :  { %895 = vmatprep.mubr.f32.mxu0 %v101_v54  ;;  %v165_v54 = vld [vmem:[%s3574_s0 + $0x4b8] sm:$0xff] }
  0x97   :  { %511 = vmatmul.mubr.f32.gmra.mrb[42].mxu1 %v98_v55  ;;  %v162_v55 = vld [vmem:[%s3574_s0 + $0x4a0] sm:$0xff] }
  0x98   :  { %896 = vmatmul.mubr.f32.gmra.mrb[42].mxu0 %v100_v56  ;;  %515 = vmatprep.mubr.f32.mxu1 %v103_v57  ;;  %v164_v56 = vld [vmem:[%s3574_s0 + $0x4b0] sm:$0xff]  ;;  %v167_v57 = vld [vmem:[%s3574_s0 + $0x4c8] sm:$0xff] }
  0x99   :  { %900 = vmatprep.mubr.f32.mxu0 %v105_v58  ;;  %v169_v58 = vld [vmem:[%s3574_s0 + $0x4d8] sm:$0xff] }
  0x9b   :  { %516 = vmatmul.mubr.f32.gmra.mrb[44].mxu1 %v102_v59  ;;  %v166_v59 = vld [vmem:[%s3574_s0 + $0x4c0] sm:$0xff] }
  0x9c   :  { %901 = vmatmul.mubr.f32.gmra.mrb[44].mxu0 %v104_v60  ;;  %520 = vmatprep.mubr.f32.mxu1 %v107_v61  ;;  %v168_v60 = vld [vmem:[%s3574_s0 + $0x4d0] sm:$0xff]  ;;  %v171_v61 = vld [vmem:[%s3574_s0 + $0x4e8] sm:$0xff] }
  0x9d   :  { %905 = vmatprep.mubr.f32.mxu0 %v109_v62  ;;  %v173_v62 = vld [vmem:[%s3574_s0 + $0x4f8] sm:$0xff] }
  0x9f   :  { %521 = vmatmul.mubr.f32.gmra.mrb[46].mxu1 %v106_v63  ;;  %v170_v63 = vld [vmem:[%s3574_s0 + $0x4e0] sm:$0xff] }
  0xa0   :  { %906 = vmatmul.mubr.f32.gmra.mrb[46].mxu0 %v108_v1  ;;  %525 = vmatprep.mubr.f32.mxu1 %v111_v2  ;;  %v172_v1 = vld [vmem:[%s3574_s0 + $0x4f0] sm:$0xff]  ;;  %v175_v2 = vld [vmem:[%s3574_s0 + $0x508] sm:$0xff] }
  0xa1   :  { %910 = vmatprep.mubr.f32.mxu0 %v113_v3  ;;  %v177_v3 = vld [vmem:[%s3574_s0 + $0x518] sm:$0xff] }
  0xa3   :  { %526 = vmatmul.mubr.f32.gmra.mrb[48].mxu1 %v110_v4  ;;  %v174_v4 = vld [vmem:[%s3574_s0 + $0x500] sm:$0xff] }
  0xa4   :  { %911 = vmatmul.mubr.f32.gmra.mrb[48].mxu0 %v112_v5  ;;  %530 = vmatprep.mubr.f32.mxu1 %v115_v6  ;;  %v176_v5 = vld [vmem:[%s3574_s0 + $0x510] sm:$0xff]  ;;  %v179_v6 = vld [vmem:[%s3574_s0 + $0x528] sm:$0xff] }
  0xa5   :  { %915 = vmatprep.mubr.f32.mxu0 %v117_v7  ;;  %v181_v7 = vld [vmem:[%s3574_s0 + $0x538] sm:$0xff] }
  0xa7   :  { %531 = vmatmul.mubr.f32.gmra.mrb[50].mxu1 %v114_v8  ;;  %v178_v8 = vld [vmem:[%s3574_s0 + $0x520] sm:$0xff] }
  0xa8   :  { %916 = vmatmul.mubr.f32.gmra.mrb[50].mxu0 %v116_v9  ;;  %535 = vmatprep.mubr.f32.mxu1 %v119_v10  ;;  %v180_v9 = vld [vmem:[%s3574_s0 + $0x530] sm:$0xff]  ;;  %v183_v10 = vld [vmem:[%s3574_s0 + $0x548] sm:$0xff] }
  0xa9   :  { %920 = vmatprep.mubr.f32.mxu0 %v121_v11  ;;  %v185_v11 = vld [vmem:[%s3574_s0 + $0x558] sm:$0xff] }
  0xab   :  { %536 = vmatmul.mubr.f32.gmra.mrb[52].mxu1 %v118_v12  ;;  %v182_v12 = vld [vmem:[%s3574_s0 + $0x540] sm:$0xff] }
  0xac   :  { %921 = vmatmul.mubr.f32.gmra.mrb[52].mxu0 %v120_v13  ;;  %540 = vmatprep.mubr.f32.mxu1 %v123_v14  ;;  %v184_v13 = vld [vmem:[%s3574_s0 + $0x550] sm:$0xff]  ;;  %v187_v14 = vld [vmem:[%s3574_s0 + $0x568] sm:$0xff] }
  0xad   :  { %925 = vmatprep.mubr.f32.mxu0 %v125_v15  ;;  %v189_v15 = vld [vmem:[%s3574_s0 + $0x578] sm:$0xff] }
  0xaf   :  { %541 = vmatmul.mubr.f32.gmra.mrb[54].mxu1 %v122_v16  ;;  %v186_v16 = vld [vmem:[%s3574_s0 + $0x560] sm:$0xff] }
  0xb0   :  { %926 = vmatmul.mubr.f32.gmra.mrb[54].mxu0 %v124_v17  ;;  %545 = vmatprep.mubr.f32.mxu1 %v127_v18  ;;  %v188_v17 = vld [vmem:[%s3574_s0 + $0x570] sm:$0xff]  ;;  %v191_v18 = vld [vmem:[%s3574_s0 + $0x588] sm:$0xff] }
  0xb1   :  { %930 = vmatprep.mubr.f32.mxu0 %v129_v19  ;;  %v193_v19 = vld [vmem:[%s3574_s0 + $0x598] sm:$0xff] }
  0xb3   :  { %546 = vmatmul.mubr.f32.gmra.mrb[56].mxu1 %v126_v20  ;;  %v190_v20 = vld [vmem:[%s3574_s0 + $0x580] sm:$0xff] }
  0xb4   :  { %931 = vmatmul.mubr.f32.gmra.mrb[56].mxu0 %v128_v21  ;;  %550 = vmatprep.mubr.f32.mxu1 %v131_v22  ;;  %v192_v21 = vld [vmem:[%s3574_s0 + $0x590] sm:$0xff]  ;;  %v195_v22 = vld [vmem:[%s3574_s0 + $0x5a8] sm:$0xff] }
  0xb5   :  { %935 = vmatprep.mubr.f32.mxu0 %v133_v23  ;;  %v197_v23 = vld [vmem:[%s3574_s0 + $0x5b8] sm:$0xff] }
  0xb7   :  { %551 = vmatmul.mubr.f32.gmra.mrb[58].mxu1 %v130_v24  ;;  %v194_v24 = vld [vmem:[%s3574_s0 + $0x5a0] sm:$0xff] }
  0xb8   :  { %936 = vmatmul.mubr.f32.gmra.mrb[58].mxu0 %v132_v25  ;;  %555 = vmatprep.mubr.f32.mxu1 %v135_v26  ;;  %v196_v25 = vld [vmem:[%s3574_s0 + $0x5b0] sm:$0xff]  ;;  %v199_v26 = vld [vmem:[%s3574_s0 + $0x5c8] sm:$0xff] }
  0xb9   :  { %940 = vmatprep.mubr.f32.mxu0 %v137_v27  ;;  %v201_v27 = vld [vmem:[%s3574_s0 + $0x5d8] sm:$0xff] }
  0xbb   :  { %556 = vmatmul.mubr.f32.gmra.mrb[60].mxu1 %v134_v28  ;;  %v198_v28 = vld [vmem:[%s3574_s0 + $0x5c0] sm:$0xff] }
  0xbc   :  { %941 = vmatmul.mubr.f32.gmra.mrb[60].mxu0 %v136_v29  ;;  %560 = vmatprep.mubr.f32.mxu1 %v139_v30  ;;  %v200_v29 = vld [vmem:[%s3574_s0 + $0x5d0] sm:$0xff]  ;;  %v203_v30 = vld [vmem:[%s3574_s0 + $0x5e8] sm:$0xff] }
  0xbd   :  { %945 = vmatprep.mubr.f32.mxu0 %v141_v31  ;;  %v205_v31 = vld [vmem:[%s3574_s0 + $0x5f8] sm:$0xff] }
  0xbf   :  { %561 = vmatmul.mubr.f32.gmra.mrb[62].mxu1 %v138_v32  ;;  %v202_v32 = vld [vmem:[%s3574_s0 + $0x5e0] sm:$0xff] }
  0xc0   :  { %946 = vmatmul.mubr.f32.gmra.mrb[62].mxu0 %v140_v33  ;;  %565 = vmatprep.mubr.f32.mxu1 %v143_v34  ;;  %v204_v33 = vld [vmem:[%s3574_s0 + $0x5f0] sm:$0xff]  ;;  %v207_v34 = vld [vmem:[%s3574_s0 + $0x608] sm:$0xff] }
  0xc1   :  { %950 = vmatprep.mubr.f32.mxu0 %v145_v35  ;;  %v209_v35 = vld [vmem:[%s3574_s0 + $0x618] sm:$0xff] }
  0xc3   :  { %566 = vmatmul.mubr.f32.gmra.mrb[64].mxu1 %v142_v36  ;;  %v206_v36 = vld [vmem:[%s3574_s0 + $0x600] sm:$0xff] }
  0xc4   :  { %951 = vmatmul.mubr.f32.gmra.mrb[64].mxu0 %v144_v37  ;;  %570 = vmatprep.mubr.f32.mxu1 %v147_v38  ;;  %v208_v37 = vld [vmem:[%s3574_s0 + $0x610] sm:$0xff]  ;;  %v211_v38 = vld [vmem:[%s3574_s0 + $0x628] sm:$0xff] }
  0xc5   :  { %955 = vmatprep.mubr.f32.mxu0 %v149_v39  ;;  %v213_v39 = vld [vmem:[%s3574_s0 + $0x638] sm:$0xff] }
  0xc7   :  { %571 = vmatmul.mubr.f32.gmra.mrb[66].mxu1 %v146_v0  ;;  %v210_v0 = vld [vmem:[%s3574_s0 + $0x620] sm:$0xff] }
  0xc8   :  { %956 = vmatmul.mubr.f32.gmra.mrb[66].mxu0 %v148_v40  ;;  %575 = vmatprep.mubr.f32.mxu1 %v151_v41  ;;  %v212_v40 = vld [vmem:[%s3574_s0 + $0x630] sm:$0xff]  ;;  %v215_v41 = vld [vmem:[%s3574_s0 + $0x648] sm:$0xff] }
  0xc9   :  { %960 = vmatprep.mubr.f32.mxu0 %v153_v42  ;;  %v217_v42 = vld [vmem:[%s3574_s0 + $0x658] sm:$0xff] }
  0xcb   :  { %576 = vmatmul.mubr.f32.gmra.mrb[68].mxu1 %v150_v43  ;;  %v214_v43 = vld [vmem:[%s3574_s0 + $0x640] sm:$0xff] }
  0xcc   :  { %961 = vmatmul.mubr.f32.gmra.mrb[68].mxu0 %v152_v44  ;;  %580 = vmatprep.mubr.f32.mxu1 %v155_v45  ;;  %v216_v44 = vld [vmem:[%s3574_s0 + $0x650] sm:$0xff]  ;;  %v219_v45 = vld [vmem:[%s3574_s0 + $0x668] sm:$0xff] }
  0xcd   :  { %965 = vmatprep.mubr.f32.mxu0 %v157_v46  ;;  %v221_v46 = vld [vmem:[%s3574_s0 + $0x678] sm:$0xff] }
  0xcf   :  { %581 = vmatmul.mubr.f32.gmra.mrb[70].mxu1 %v154_v47  ;;  %v218_v47 = vld [vmem:[%s3574_s0 + $0x660] sm:$0xff] }
  0xd0   :  { %966 = vmatmul.mubr.f32.gmra.mrb[70].mxu0 %v156_v48  ;;  %585 = vmatprep.mubr.f32.mxu1 %v159_v49  ;;  %v220_v48 = vld [vmem:[%s3574_s0 + $0x670] sm:$0xff]  ;;  %v223_v49 = vld [vmem:[%s3574_s0 + $0x688] sm:$0xff] }
  0xd1   :  { %970 = vmatprep.mubr.f32.mxu0 %v161_v50  ;;  %v225_v50 = vld [vmem:[%s3574_s0 + $0x698] sm:$0xff] }
  0xd3   :  { %586 = vmatmul.mubr.f32.gmra.mrb[72].mxu1 %v158_v51  ;;  %v222_v51 = vld [vmem:[%s3574_s0 + $0x680] sm:$0xff] }
  0xd4   :  { %971 = vmatmul.mubr.f32.gmra.mrb[72].mxu0 %v160_v52  ;;  %590 = vmatprep.mubr.f32.mxu1 %v163_v53  ;;  %v224_v52 = vld [vmem:[%s3574_s0 + $0x690] sm:$0xff]  ;;  %v227_v53 = vld [vmem:[%s3574_s0 + $0x6a8] sm:$0xff] }
  0xd5   :  { %975 = vmatprep.mubr.f32.mxu0 %v165_v54  ;;  %v229_v54 = vld [vmem:[%s3574_s0 + $0x6b8] sm:$0xff] }
  0xd7   :  { %591 = vmatmul.mubr.f32.gmra.mrb[74].mxu1 %v162_v55  ;;  %v2936_v55 = vld [vmem:[%s3575_s2] ss:$0 sm:$0xff] }
  0xd8   :  { %976 = vmatmul.mubr.f32.gmra.mrb[74].mxu0 %v164_v56  ;;  %595 = vmatprep.mubr.f32.mxu1 %v167_v57  ;;  %v226_v56 = vld [vmem:[%s3574_s0 + $0x6a0] sm:$0xff]  ;;  %v228_v57 = vld [vmem:[%s3574_s0 + $0x6b0] sm:$0xff] }
  0xd9   :  { %980 = vmatprep.mubr.f32.mxu0 %v169_v58  ;;  %v231_v58 = vld [vmem:[%s3574_s0 + $0x6c8] sm:$0xff] }
  0xdb   :  { %596 = vmatmul.mubr.f32.gmra.mrb[76].mxu1 %v166_v59 }
  0xdc   :  { %981 = vmatmul.mubr.f32.gmra.mrb[76].mxu0 %v168_v60  ;;  %600 = vmatprep.mubr.f32.mxu1 %v171_v61  ;;  %v233_v60 = vld [vmem:[%s3574_s0 + $0x6d8] sm:$0xff] }
  0xdd   :  { %985 = vmatprep.mubr.f32.mxu0 %v173_v62 }
  0xdf   :  { %601 = vmatmul.mubr.f32.gmra.mrb[78].mxu1 %v170_v63 }
  0xe0   :  { %986 = vmatmul.mubr.f32.gmra.mrb[78].mxu0 %v172_v1  ;;  %605 = vmatprep.mubr.f32.mxu1 %v175_v2  ;;  %v230_v2 = vld [vmem:[%s3574_s0 + $0x6c0] sm:$0xff] }
  0xe1   :  { %990 = vmatprep.mubr.f32.mxu0 %v177_v3 }
  0xe3   :  { %606 = vmatmul.mubr.f32.gmra.mrb[80].mxu1 %v174_v4  ;;  %v232_v4 = vld [vmem:[%s3574_s0 + $0x6d0] sm:$0xff] }
  0xe4   :  { %991 = vmatmul.mubr.f32.gmra.mrb[80].mxu0 %v176_v5  ;;  %610 = vmatprep.mubr.f32.mxu1 %v179_v6  ;;  %v235_v5 = vld [vmem:[%s3574_s0 + $0x6e8] sm:$0xff] }
  0xe5   :  { %995 = vmatprep.mubr.f32.mxu0 %v181_v7  ;;  %v237_v7 = vld [vmem:[%s3574_s0 + $0x6f8] sm:$0xff] }
  0xe7   :  { %611 = vmatmul.mubr.f32.gmra.mrb[82].mxu1 %v178_v8 }
  0xe8   :  { %996 = vmatmul.mubr.f32.gmra.mrb[82].mxu0 %v180_v9  ;;  %615 = vmatprep.mubr.f32.mxu1 %v183_v10 }
  0xe9   :  { %1000 = vmatprep.mubr.f32.mxu0 %v185_v11 }
  0xeb   :  { %616 = vmatmul.mubr.f32.gmra.mrb[84].mxu1 %v182_v12 }
  0xec   :  { %1001 = vmatmul.mubr.f32.gmra.mrb[84].mxu0 %v184_v13  ;;  %620 = vmatprep.mubr.f32.mxu1 %v187_v14  ;;  %v234_v13 = vld [vmem:[%s3574_s0 + $0x6e0] sm:$0xff] }
  0xed   :  { %1005 = vmatprep.mubr.f32.mxu0 %v189_v15 }
  0xef   :  { %621 = vmatmul.mubr.f32.gmra.mrb[86].mxu1 %v186_v16  ;;  %v236_v16 = vld [vmem:[%s3574_s0 + $0x6f0] sm:$0xff] }
  0xf0   :  { %1006 = vmatmul.mubr.f32.gmra.mrb[86].mxu0 %v188_v17  ;;  %625 = vmatprep.mubr.f32.mxu1 %v191_v18  ;;  %v239_v17 = vld [vmem:[%s3574_s0 + $0x708] sm:$0xff] }
  0xf1   :  { %1010 = vmatprep.mubr.f32.mxu0 %v193_v19  ;;  %v241_v19 = vld [vmem:[%s3574_s0 + $0x718] sm:$0xff] }
  0xf3   :  { %626 = vmatmul.mubr.f32.gmra.mrb[88].mxu1 %v190_v20 }
  0xf4   :  { %1011 = vmatmul.mubr.f32.gmra.mrb[88].mxu0 %v192_v21  ;;  %630 = vmatprep.mubr.f32.mxu1 %v195_v22 }
  0xf5   :  { %1015 = vmatprep.mubr.f32.mxu0 %v197_v23 }
  0xf7   :  { %631 = vmatmul.mubr.f32.gmra.mrb[90].mxu1 %v194_v24 }
  0xf8   :  { %1016 = vmatmul.mubr.f32.gmra.mrb[90].mxu0 %v196_v25  ;;  %635 = vmatprep.mubr.f32.mxu1 %v199_v26  ;;  %v238_v25 = vld [vmem:[%s3574_s0 + $0x700] sm:$0xff] }
  0xf9   :  { %1020 = vmatprep.mubr.f32.mxu0 %v201_v27 }
  0xfb   :  { %636 = vmatmul.mubr.f32.gmra.mrb[92].mxu1 %v198_v28  ;;  %v240_v28 = vld [vmem:[%s3574_s0 + $0x710] sm:$0xff] }
  0xfc   :  { %1021 = vmatmul.mubr.f32.gmra.mrb[92].mxu0 %v200_v29  ;;  %640 = vmatprep.mubr.f32.mxu1 %v203_v30  ;;  %v243_v29 = vld [vmem:[%s3574_s0 + $0x728] sm:$0xff] }
  0xfd   :  { %1025 = vmatprep.mubr.f32.mxu0 %v205_v31  ;;  %v245_v31 = vld [vmem:[%s3574_s0 + $0x738] sm:$0xff] }
  0xff   :  { %641 = vmatmul.mubr.f32.gmra.mrb[94].mxu1 %v202_v32 }
 0x100   :  { %1026 = vmatmul.mubr.f32.gmra.mrb[94].mxu0 %v204_v33  ;;  %645 = vmatprep.mubr.f32.mxu1 %v207_v34 }
 0x101   :  { %1030 = vmatprep.mubr.f32.mxu0 %v209_v35 }
 0x103   :  { %646 = vmatmul.mubr.f32.gmra.mrb[96].mxu1 %v206_v36 }
 0x104   :  { %1031 = vmatmul.mubr.f32.gmra.mrb[96].mxu0 %v208_v37  ;;  %650 = vmatprep.mubr.f32.mxu1 %v211_v38  ;;  %v242_v37 = vld [vmem:[%s3574_s0 + $0x720] sm:$0xff] }
 0x105   :  { %1035 = vmatprep.mubr.f32.mxu0 %v213_v39 }
 0x107   :  { %651 = vmatmul.mubr.f32.gmra.mrb[98].mxu1 %v210_v0  ;;  %v244_v0 = vld [vmem:[%s3574_s0 + $0x730] sm:$0xff] }
 0x108   :  { %1036 = vmatmul.mubr.f32.gmra.mrb[98].mxu0 %v212_v40  ;;  %655 = vmatprep.mubr.f32.mxu1 %v215_v41  ;;  %v247_v40 = vld [vmem:[%s3574_s0 + $0x748] sm:$0xff] }
 0x109   :  { %1040 = vmatprep.mubr.f32.mxu0 %v217_v42  ;;  %v249_v42 = vld [vmem:[%s3574_s0 + $0x758] sm:$0xff] }
 0x10b   :  { %656 = vmatmul.mubr.f32.gmra.mrb[100].mxu1 %v214_v43 }
 0x10c   :  { %1041 = vmatmul.mubr.f32.gmra.mrb[100].mxu0 %v216_v44  ;;  %660 = vmatprep.mubr.f32.mxu1 %v219_v45 }
 0x10d   :  { %1045 = vmatprep.mubr.f32.mxu0 %v221_v46 }
 0x10f   :  { %661 = vmatmul.mubr.f32.gmra.mrb[102].mxu1 %v218_v47 }
 0x110   :  { %1046 = vmatmul.mubr.f32.gmra.mrb[102].mxu0 %v220_v48  ;;  %665 = vmatprep.mubr.f32.mxu1 %v223_v49  ;;  %v246_v48 = vld [vmem:[%s3574_s0 + $0x740] sm:$0xff] }
 0x111   :  { %1050 = vmatprep.mubr.f32.mxu0 %v225_v50 }
 0x113   :  { %666 = vmatmul.mubr.f32.gmra.mrb[104].mxu1 %v222_v51 }
 0x114   :  { %1051 = vmatmul.mubr.f32.gmra.mrb[104].mxu0 %v224_v52  ;;  %670 = vmatprep.mubr.f32.mxu1 %v227_v53  ;;  %v248_v52 = vld [vmem:[%s3574_s0 + $0x750] sm:$0xff]  ;;  %v251_v53 = vld [vmem:[%s3574_s0 + $0x768] sm:$0xff] }
 0x115   :  { %1055 = vmatprep.mubr.f32.mxu0 %v229_v54 }
 0x116   :  { %v407_v59 = vpop.f32.mrb[0].mxu1 }
 0x117   :  { %v408_v61 = vadd.f32 %v2936_v55, %v407_v59  ;;  %v409_v62 = vpop.f32.mrb[1].mxu1  ;;  %671 = vmatmul.mubr.f32.gmra.mrb[106].mxu1 %v226_v56  ;;  %v792_v63 = vpop.f32.mrb[0].mxu0 }
 0x118   :  { %v794_v1 = vpop.f32.mrb[1].mxu0  ;;  %1056 = vmatmul.mubr.f32.gmra.mrb[106].mxu0 %v228_v57  ;;  %675 = vmatprep.mubr.f32.mxu1 %v231_v58  ;;  %v253_v57 = vld [vmem:[%s3574_s0 + $0x778] sm:$0xff] }
 0x119   :  { %v2954_v3 = vadd.f32 %v792_v63, %v408_v61  ;;  %1060 = vmatprep.mubr.f32.mxu0 %v233_v60  ;;  %v250_v63 = vld [vmem:[%s3574_s0 + $0x760] sm:$0xff] }
 0x11a   :  { %v412_v6 = vpop.f32.mrb[2].mxu1 }
 0x11b   :  { %v1111_v8 = vsub.f32 0.0, %v2954_v3  ;;  %v413_v9 = vadd.f32 %v2936_v55, %v412_v6  ;;  %v414_v10 = vpop.f32.mrb[3].mxu1  ;;  %676 = vmatmul.mubr.f32.gmra.mrb[108].mxu1 %v230_v2  ;;  %v797_v11 = vpop.f32.mrb[2].mxu0  ;;  %v255_v6 = vld [vmem:[%s3574_s0 + $0x788] sm:$0xff] }
 0x11c   :  { %v799_v12 = vpop.f32.mrb[3].mxu0  ;;  %1061 = vmatmul.mubr.f32.gmra.mrb[108].mxu0 %v232_v4  ;;  %680 = vmatprep.mubr.f32.mxu1 %v235_v5  ;;  %v252_v5 = vld [vmem:[%s3574_s0 + $0x770] sm:$0xff] }
 0x11d   :  { %v1175_v14 = vmul.f32 1.442695, %v1111_v8  ;;  %v2970_v15 = vadd.f32 %v797_v11, %v413_v9  ;;  %1065 = vmatprep.mubr.f32.mxu0 %v237_v7  ;;  %v257_v9 = vld [vmem:[%s3574_s0 + $0x798] sm:$0xff] }
 0x11e   :  { %v417_v18 = vpop.f32.mrb[4].mxu1 }
 0x11f   :  { %1789 = vpow2.f32 %v1175_v14  ;;  %v1112_v20 = vsub.f32 0.0, %v2970_v15  ;;  %v418_v21 = vadd.f32 %v2936_v55, %v417_v18  ;;  %v419_v22 = vpop.f32.mrb[5].mxu1  ;;  %681 = vmatmul.mubr.f32.gmra.mrb[110].mxu1 %v234_v13  ;;  %v802_v23 = vpop.f32.mrb[4].mxu0 }
 0x120   :  { %v804_v24 = vpop.f32.mrb[5].mxu0  ;;  %1066 = vmatmul.mubr.f32.gmra.mrb[110].mxu0 %v236_v16  ;;  %685 = vmatprep.mubr.f32.mxu1 %v239_v17  ;;  %v254_v16 = vld [vmem:[%s3574_s0 + $0x780] sm:$0xff] }
 0x121   :  { %v1177_v26 = vmul.f32 1.442695, %v1112_v20  ;;  %v2986_v27 = vadd.f32 %v802_v23, %v418_v21  ;;  %1070 = vmatprep.mubr.f32.mxu0 %v241_v19  ;;  %v256_v20 = vld [vmem:[%s3574_s0 + $0x790] sm:$0xff]  ;;  %v259_v21 = vld [vmem:[%s3574_s0 + $0x7a8] sm:$0xff]  ;;  %v261_v24 = vld [vmem:[%s3574_s0 + $0x7b8] sm:$0xff] }
 0x122   :  { %v422_v30 = vpop.f32.mrb[6].mxu1 }
 0x123   :  { %1791 = vpow2.f32 %v1177_v26  ;;  %v1113_v32 = vsub.f32 0.0, %v2986_v27  ;;  %v423_v33 = vadd.f32 %v2936_v55, %v422_v30  ;;  %v424_v34 = vpop.f32.mrb[7].mxu1  ;;  %686 = vmatmul.mubr.f32.gmra.mrb[112].mxu1 %v238_v25  ;;  %v807_v35 = vpop.f32.mrb[6].mxu0 }
 0x124   :  { %v809_v36 = vpop.f32.mrb[7].mxu0  ;;  %1071 = vmatmul.mubr.f32.gmra.mrb[112].mxu0 %v240_v28  ;;  %690 = vmatprep.mubr.f32.mxu1 %v243_v29 }
 0x125   :  { %v1179_v38 = vmul.f32 1.442695, %v1113_v32  ;;  %v3002_v39 = vadd.f32 %v807_v35, %v423_v33  ;;  %1075 = vmatprep.mubr.f32.mxu0 %v245_v31  ;;  %v258_v31 = vld [vmem:[%s3574_s0 + $0x7a0] sm:$0xff]  ;;  %v260_v35 = vld [vmem:[%s3574_s0 + $0x7b0] sm:$0xff]  ;;  %v263_v36 = vld [vmem:[%s3574_s0 + $0x7c8] sm:$0xff] }
 0x126   :  { %v427_v41 = vpop.f32.mrb[8].mxu1 }
 0x127   :  { %1793 = vpow2.f32 %v1179_v38  ;;  %v1114_v43 = vsub.f32 0.0, %v3002_v39  ;;  %v428_v44 = vadd.f32 %v2936_v55, %v427_v41  ;;  %v429_v45 = vpop.f32.mrb[9].mxu1  ;;  %691 = vmatmul.mubr.f32.gmra.mrb[114].mxu1 %v242_v37  ;;  %v812_v46 = vpop.f32.mrb[8].mxu0 }
 0x128   :  { %v814_v47 = vpop.f32.mrb[9].mxu0  ;;  %1076 = vmatmul.mubr.f32.gmra.mrb[114].mxu0 %v244_v0  ;;  %695 = vmatprep.mubr.f32.mxu1 %v247_v40  ;;  %v265_v40 = vld [vmem:[%s3574_s0 + $0x7d8] sm:$0xff] }
 0x129   :  { %v1790_v49 = vpop.eup %1789  ;;  %v1181_v50 = vmul.f32 1.442695, %v1114_v43  ;;  %v3018_v51 = vadd.f32 %v812_v46, %v428_v44  ;;  %1080 = vmatprep.mubr.f32.mxu0 %v249_v42  ;;  %v262_v47 = vld [vmem:[%s3574_s0 + $0x7c0] sm:$0xff] }
 0x12a   :  { %v1303_v54 = vadd.f32 1.0, %v1790_v49  ;;  %v432_v56 = vpop.f32.mrb[10].mxu1 }
 0x12b   :  { %1795 = vpow2.f32 %v1181_v50  ;;  %v1115_v58 = vsub.f32 0.0, %v3018_v51  ;;  %v433_v59 = vadd.f32 %v2936_v55, %v432_v56  ;;  %v434_v60 = vpop.f32.mrb[11].mxu1  ;;  %696 = vmatmul.mubr.f32.gmra.mrb[116].mxu1 %v246_v48  ;;  %v817_v61 = vpop.f32.mrb[10].mxu0  ;;  %v264_v50 = vld [vmem:[%s3574_s0 + $0x7d0] sm:$0xff] }
 0x12c   :  { %1797 = vrcp.f32 %v1303_v54  ;;  %v819_v62 = vpop.f32.mrb[11].mxu0  ;;  %1081 = vmatmul.mubr.f32.gmra.mrb[116].mxu0 %v248_v52  ;;  %700 = vmatprep.mubr.f32.mxu1 %v251_v53  ;;  %v267_v52 = vld [vmem:[%s3574_s0 + $0x7e8] sm:$0xff] }
 0x12d   :  { %v1792_v1 = vpop.eup %1791  ;;  %v1183_v2 = vmul.f32 1.442695, %v1115_v58  ;;  %v3034_v4 = vadd.f32 %v817_v61, %v433_v59  ;;  %1085 = vmatprep.mubr.f32.mxu0 %v253_v57  ;;  %v269_v57 = vld [vmem:[%s3574_s0 + $0x7f8] sm:$0xff] }
 0x12e   :  { %v1304_v7 = vadd.f32 1.0, %v1792_v1  ;;  %v437_v8 = vpop.f32.mrb[12].mxu1  ;;  %v266_v1 = vld [vmem:[%s3574_s0 + $0x7e0] sm:$0xff] }
 0x12f   :  { %1799 = vpow2.f32 %v1183_v2  ;;  %v1116_v10 = vsub.f32 0.0, %v3034_v4  ;;  %v438_v11 = vadd.f32 %v2936_v55, %v437_v8  ;;  %v439_v12 = vpop.f32.mrb[13].mxu1  ;;  %701 = vmatmul.mubr.f32.gmra.mrb[118].mxu1 %v250_v63  ;;  %v822_v13 = vpop.f32.mrb[12].mxu0 }
 0x130   :  { %1801 = vrcp.f32 %v1304_v7  ;;  %v824_v14 = vpop.f32.mrb[13].mxu0  ;;  %1086 = vmatmul.mubr.f32.gmra.mrb[118].mxu0 %v252_v5  ;;  %705 = vmatprep.mubr.f32.mxu1 %v255_v6  ;;  %v268_v6 = vld [vmem:[%s3574_s0 + $0x7f0] sm:$0xff] }
 0x131   :  { %v1794_v17 = vpop.eup %1793  ;;  %v1185_v18 = vmul.f32 1.442695, %v1116_v10  ;;  %v3050_v19 = vadd.f32 %v822_v13, %v438_v11  ;;  %1090 = vmatprep.mubr.f32.mxu0 %v257_v9 }
 0x132   :  { %v1305_v22 = vadd.f32 1.0, %v1794_v17  ;;  %v442_v23 = vpop.f32.mrb[14].mxu1 }
 0x133   :  { %1803 = vpow2.f32 %v1185_v18  ;;  %v1117_v25 = vsub.f32 0.0, %v3050_v19  ;;  %v443_v26 = vadd.f32 %v2936_v55, %v442_v23  ;;  %v444_v28 = vpop.f32.mrb[15].mxu1  ;;  %706 = vmatmul.mubr.f32.gmra.mrb[120].mxu1 %v254_v16  ;;  %v827_v29 = vpop.f32.mrb[14].mxu0 }
 0x134   :  { %1805 = vrcp.f32 %v1305_v22  ;;  %v829_v30 = vpop.f32.mrb[15].mxu0  ;;  %1091 = vmatmul.mubr.f32.gmra.mrb[120].mxu0 %v256_v20  ;;  %710 = vmatprep.mubr.f32.mxu1 %v259_v21 }
 0x135   :  { %v1796_v32 = vpop.eup %1795  ;;  %v1187_v33 = vmul.f32 1.442695, %v1117_v25  ;;  %v3066_v34 = vadd.f32 %v827_v29, %v443_v26  ;;  %1095 = vmatprep.mubr.f32.mxu0 %v261_v24 }
 0x136   :  { %v1798_v37 = vpop.eup %1797  ;;  %v1306_v38 = vadd.f32 1.0, %v1796_v32  ;;  %v447_v0 = vpop.f32.mrb[16].mxu1 }
 0x137   :  { %v1431_v41 = vmul.f32 %v1798_v37, %v2954_v3  ;;  %1807 = vpow2.f32 %v1187_v33  ;;  %v1118_v42 = vsub.f32 0.0, %v3066_v34  ;;  %v448_v43 = vadd.f32 %v2936_v55, %v447_v0  ;;  %v449_v44 = vpop.f32.mrb[17].mxu1  ;;  %711 = vmatmul.mubr.f32.gmra.mrb[122].mxu1 %v258_v31  ;;  %v832_v45 = vpop.f32.mrb[16].mxu0 }
 0x138   :  { %1809 = vrcp.f32 %v1306_v38  ;;  %v834_v46 = vpop.f32.mrb[17].mxu0  ;;  %1096 = vmatmul.mubr.f32.gmra.mrb[122].mxu0 %v260_v35  ;;  %715 = vmatprep.mubr.f32.mxu1 %v263_v36 }
 0x139   :  { %v1800_v48 = vpop.eup %1799  ;;  %1495 = vst [vmem:[%s3576_s3] sm:$0xff] %v1431_v41  ;;  %v1189_v3 = vmul.f32 1.442695, %v1118_v42  ;;  %v3086_v49 = vadd.f32 %v832_v45, %v448_v43  ;;  %1100 = vmatprep.mubr.f32.mxu0 %v265_v40 }
 0x13a   :  { %v1802_v53 = vpop.eup %1801  ;;  %v1307_v54 = vadd.f32 1.0, %v1800_v48  ;;  %v452_v56 = vpop.f32.mrb[18].mxu1 }
 0x13b   :  { %v1432_v58 = vmul.f32 %v1802_v53, %v2970_v15  ;;  %1811 = vpow2.f32 %v1189_v3  ;;  %v1119_v59 = vsub.f32 0.0, %v3086_v49  ;;  %v453_v60 = vadd.f32 %v2936_v55, %v452_v56  ;;  %v454_v61 = vpop.f32.mrb[19].mxu1  ;;  %716 = vmatmul.mubr.f32.gmra.mrb[124].mxu1 %v262_v47  ;;  %v837_v62 = vpop.f32.mrb[18].mxu0 }
 0x13c   :  { %1813 = vrcp.f32 %v1307_v54  ;;  %v839_v63 = vpop.f32.mrb[19].mxu0  ;;  %1101 = vmatmul.mubr.f32.gmra.mrb[124].mxu0 %v264_v50  ;;  %720 = vmatprep.mubr.f32.mxu1 %v267_v52 }
 0x13d   :  { %v1804_v2 = vpop.eup %1803  ;;  %1496 = vst [vmem:[%s3576_s3 + $0x8] sm:$0xff] %v1432_v58  ;;  %v1191_v15 = vmul.f32 1.442695, %v1119_v59  ;;  %v3106_v5 = vadd.f32 %v837_v62, %v453_v60  ;;  %1105 = vmatprep.mubr.f32.mxu0 %v269_v57 }
 0x13e   :  { %v1806_v7 = vpop.eup %1805  ;;  %v1308_v8 = vadd.f32 1.0, %v1804_v2  ;;  %v457_v9 = vpop.f32.mrb[20].mxu1 }
 0x13f   :  { %v1433_v10 = vmul.f32 %v1806_v7, %v2986_v27  ;;  %1815 = vpow2.f32 %v1191_v15  ;;  %v1120_v11 = vsub.f32 0.0, %v3106_v5  ;;  %v458_v12 = vadd.f32 %v2936_v55, %v457_v9  ;;  %v459_v13 = vpop.f32.mrb[21].mxu1  ;;  %721 = vmatmul.mubr.f32.gmra.mrb[126].mxu1 %v266_v1  ;;  %v842_v14 = vpop.f32.mrb[20].mxu0 }
 0x140   :  { %1817 = vrcp.f32 %v1308_v8  ;;  %v844_v16 = vpop.f32.mrb[21].mxu0  ;;  %1106 = vmatmul.mubr.f32.gmra.mrb[126].mxu0 %v268_v6 }
 0x141   :  { %v1808_v17 = vpop.eup %1807  ;;  %1497 = vst [vmem:[%s3576_s3 + $0x10] sm:$0xff] %v1433_v10  ;;  %v1193_v18 = vmul.f32 1.442695, %v1120_v11  ;;  %v3117_v20 = vadd.f32 %v842_v14, %v458_v12 }
 0x142   :  { %v1810_v27 = vpop.eup %1809  ;;  %v1309_v21 = vadd.f32 1.0, %v1808_v17  ;;  %v462_v22 = vpop.f32.mrb[22].mxu1 }
 0x143   :  { %v1434_v23 = vmul.f32 %v1810_v27, %v3002_v39  ;;  %1819 = vpow2.f32 %v1193_v18  ;;  %v1121_v24 = vsub.f32 0.0, %v3117_v20  ;;  %v463_v25 = vadd.f32 %v2936_v55, %v462_v22  ;;  %v464_v26 = vpop.f32.mrb[23].mxu1  ;;  %v847_v28 = vpop.f32.mrb[22].mxu0 }
 0x144   :  { %1821 = vrcp.f32 %v1309_v21  ;;  %v849_v29 = vpop.f32.mrb[23].mxu0 }
 0x145   :  { %v1812_v30 = vpop.eup %1811  ;;  %1498 = vst [vmem:[%s3576_s3 + $0x18] sm:$0xff] %v1434_v23  ;;  %v1195_v31 = vmul.f32 1.442695, %v1121_v24  ;;  %v3125_v32 = vadd.f32 %v847_v28, %v463_v25 }
 0x146   :  { %v1814_v33 = vpop.eup %1813  ;;  %v1310_v35 = vadd.f32 1.0, %v1812_v30  ;;  %v467_v39 = vpop.f32.mrb[24].mxu1 }
 0x147   :  { %v1435_v36 = vmul.f32 %v1814_v33, %v3018_v51  ;;  %1823 = vpow2.f32 %v1195_v31  ;;  %v1122_v37 = vsub.f32 0.0, %v3125_v32  ;;  %v468_v38 = vadd.f32 %v2936_v55, %v467_v39  ;;  %v469_v0 = vpop.f32.mrb[25].mxu1  ;;  %v852_v40 = vpop.f32.mrb[24].mxu0 }
 0x148   :  { %1825 = vrcp.f32 %v1310_v35  ;;  %v854_v41 = vpop.f32.mrb[25].mxu0 }
 0x149   :  { %v1816_v42 = vpop.eup %1815  ;;  %1499 = vst [vmem:[%s3576_s3 + $0x20] sm:$0xff] %v1435_v36  ;;  %v1197_v43 = vmul.f32 1.442695, %v1122_v37  ;;  %v3133_v44 = vadd.f32 %v852_v40, %v468_v38 }
 0x14a   :  { %v1818_v45 = vpop.eup %1817  ;;  %v1311_v46 = vadd.f32 1.0, %v1816_v42  ;;  %v472_v51 = vpop.f32.mrb[26].mxu1 }
 0x14b   :  { %v1436_v47 = vmul.f32 %v1818_v45, %v3034_v4  ;;  %1827 = vpow2.f32 %v1197_v43  ;;  %v1123_v48 = vsub.f32 0.0, %v3133_v44  ;;  %v473_v3 = vadd.f32 %v2936_v55, %v472_v51  ;;  %v474_v50 = vpop.f32.mrb[27].mxu1  ;;  %v857_v52 = vpop.f32.mrb[26].mxu0 }
 0x14c   :  { %1829 = vrcp.f32 %v1311_v46  ;;  %v859_v53 = vpop.f32.mrb[27].mxu0 }
 0x14d   :  { %v1820_v54 = vpop.eup %1819  ;;  %1500 = vst [vmem:[%s3576_s3 + $0x28] sm:$0xff] %v1436_v47  ;;  %v1199_v56 = vmul.f32 1.442695, %v1123_v48  ;;  %v3141_v57 = vadd.f32 %v857_v52, %v473_v3 }
 0x14e   :  { %v1822_v58 = vpop.eup %1821  ;;  %v1312_v59 = vadd.f32 1.0, %v1820_v54  ;;  %v477_v4 = vpop.f32.mrb[28].mxu1 }
 0x14f   :  { %v1437_v60 = vmul.f32 %v1822_v58, %v3050_v19  ;;  %1831 = vpow2.f32 %v1199_v56  ;;  %v1124_v61 = vsub.f32 0.0, %v3141_v57  ;;  %v478_v62 = vadd.f32 %v2936_v55, %v477_v4  ;;  %v479_v63 = vpop.f32.mrb[29].mxu1  ;;  %v862_v1 = vpop.f32.mrb[28].mxu0 }
 0x150   :  { %1833 = vrcp.f32 %v1312_v59  ;;  %v864_v2 = vpop.f32.mrb[29].mxu0 }
 0x151   :  { %v1824_v15 = vpop.eup %1823  ;;  %1501 = vst [vmem:[%s3576_s3 + $0x30] sm:$0xff] %v1437_v60  ;;  %v1201_v6 = vmul.f32 1.442695, %v1124_v61  ;;  %v3149_v7 = vadd.f32 %v862_v1, %v478_v62 }
 0x152   :  { %v1826_v8 = vpop.eup %1825  ;;  %v1313_v9 = vadd.f32 1.0, %v1824_v15  ;;  %v482_v19 = vpop.f32.mrb[30].mxu1 }
 0x153   :  { %v1438_v10 = vmul.f32 %v1826_v8, %v3066_v34  ;;  %1835 = vpow2.f32 %v1201_v6  ;;  %v1125_v11 = vsub.f32 0.0, %v3149_v7  ;;  %v483_v12 = vadd.f32 %v2936_v55, %v482_v19  ;;  %v484_v13 = vpop.f32.mrb[31].mxu1  ;;  %v867_v14 = vpop.f32.mrb[30].mxu0 }
 0x154   :  { %1837 = vrcp.f32 %v1313_v9  ;;  %v869_v16 = vpop.f32.mrb[31].mxu0 }
 0x155   :  { %v1828_v17 = vpop.eup %1827  ;;  %1502 = vst [vmem:[%s3576_s3 + $0x38] sm:$0xff] %v1438_v10  ;;  %v1203_v18 = vmul.f32 1.442695, %v1125_v11  ;;  %v3157_v27 = vadd.f32 %v867_v14, %v483_v12 }
 0x156   :  { %v1830_v21 = vpop.eup %1829  ;;  %v1314_v22 = vadd.f32 1.0, %v1828_v17  ;;  %v487_v34 = vpop.f32.mrb[32].mxu1 }
 0x157   :  { %v1439_v23 = vmul.f32 %v1830_v21, %v3086_v49  ;;  %1839 = vpow2.f32 %v1203_v18  ;;  %v1126_v24 = vsub.f32 0.0, %v3157_v27  ;;  %v488_v25 = vadd.f32 %v2936_v55, %v487_v34  ;;  %v489_v26 = vpop.f32.mrb[33].mxu1  ;;  %v872_v28 = vpop.f32.mrb[32].mxu0 }
 0x158   :  { %1841 = vrcp.f32 %v1314_v22  ;;  %v874_v29 = vpop.f32.mrb[33].mxu0 }
 0x159   :  { %v1832_v30 = vpop.eup %1831  ;;  %1503 = vst [vmem:[%s3576_s3 + $0x40] sm:$0xff] %v1439_v23  ;;  %v1205_v31 = vmul.f32 1.442695, %v1126_v24  ;;  %v3165_v33 = vadd.f32 %v872_v28, %v488_v25 }
 0x15a   :  { %v1834_v35 = vpop.eup %1833  ;;  %v1315_v39 = vadd.f32 1.0, %v1832_v30  ;;  %v492_v49 = vpop.f32.mrb[34].mxu1 }
 0x15b   :  { %v1440_v36 = vmul.f32 %v1834_v35, %v3106_v5  ;;  %1843 = vpow2.f32 %v1205_v31  ;;  %v1127_v37 = vsub.f32 0.0, %v3165_v33  ;;  %v493_v38 = vadd.f32 %v2936_v55, %v492_v49  ;;  %v494_v0 = vpop.f32.mrb[35].mxu1  ;;  %v877_v40 = vpop.f32.mrb[34].mxu0 }
 0x15c   :  { %1845 = vrcp.f32 %v1315_v39  ;;  %v879_v41 = vpop.f32.mrb[35].mxu0 }
 0x15d   :  { %v1836_v42 = vpop.eup %1835  ;;  %1504 = vst [vmem:[%s3576_s3 + $0x48] sm:$0xff] %v1440_v36  ;;  %v1207_v43 = vmul.f32 1.442695, %v1127_v37  ;;  %v3173_v45 = vadd.f32 %v877_v40, %v493_v38 }
 0x15e   :  { %v1838_v46 = vpop.eup %1837  ;;  %v1316_v51 = vadd.f32 1.0, %v1836_v42  ;;  %v497_v5 = vpop.f32.mrb[36].mxu1 }
 0x15f   :  { %v1441_v47 = vmul.f32 %v1838_v46, %v3117_v20  ;;  %1847 = vpow2.f32 %v1207_v43  ;;  %v1128_v48 = vsub.f32 0.0, %v3173_v45  ;;  %v498_v3 = vadd.f32 %v2936_v55, %v497_v5  ;;  %v499_v50 = vpop.f32.mrb[37].mxu1  ;;  %v882_v52 = vpop.f32.mrb[36].mxu0 }
 0x160   :  { %1849 = vrcp.f32 %v1316_v51  ;;  %v884_v53 = vpop.f32.mrb[37].mxu0 }
 0x161   :  { %v1840_v54 = vpop.eup %1839  ;;  %1505 = vst [vmem:[%s3576_s3 + $0x50] sm:$0xff] %v1441_v47  ;;  %v1209_v56 = vmul.f32 1.442695, %v1128_v48  ;;  %v3181_v58 = vadd.f32 %v882_v52, %v498_v3 }
 0x162   :  { %v1842_v59 = vpop.eup %1841  ;;  %v1317_v4 = vadd.f32 1.0, %v1840_v54  ;;  %v502_v20 = vpop.f32.mrb[38].mxu1 }
 0x163   :  { %v1442_v60 = vmul.f32 %v1842_v59, %v3125_v32  ;;  %1851 = vpow2.f32 %v1209_v56  ;;  %v1129_v61 = vsub.f32 0.0, %v3181_v58  ;;  %v503_v62 = vadd.f32 %v2936_v55, %v502_v20  ;;  %v504_v63 = vpop.f32.mrb[39].mxu1  ;;  %v887_v1 = vpop.f32.mrb[38].mxu0 }
 0x164   :  { %1853 = vrcp.f32 %v1317_v4  ;;  %v889_v2 = vpop.f32.mrb[39].mxu0 }
 0x165   :  { %v1844_v15 = vpop.eup %1843  ;;  %1506 = vst [vmem:[%s3576_s3 + $0x58] sm:$0xff] %v1442_v60  ;;  %v1211_v6 = vmul.f32 1.442695, %v1129_v61  ;;  %v3189_v8 = vadd.f32 %v887_v1, %v503_v62 }
 0x166   :  { %v1846_v9 = vpop.eup %1845  ;;  %v1318_v19 = vadd.f32 1.0, %v1844_v15  ;;  %v507_v32 = vpop.f32.mrb[40].mxu1 }
 0x167   :  { %v1443_v10 = vmul.f32 %v1846_v9, %v3133_v44  ;;  %1855 = vpow2.f32 %v1211_v6  ;;  %v1130_v11 = vsub.f32 0.0, %v3189_v8  ;;  %v508_v12 = vadd.f32 %v2936_v55, %v507_v32  ;;  %v509_v13 = vpop.f32.mrb[41].mxu1  ;;  %v892_v14 = vpop.f32.mrb[40].mxu0 }
 0x168   :  { %1857 = vrcp.f32 %v1318_v19  ;;  %v894_v16 = vpop.f32.mrb[41].mxu0 }
 0x169   :  { %v1848_v17 = vpop.eup %1847  ;;  %1507 = vst [vmem:[%s3576_s3 + $0x60] sm:$0xff] %v1443_v10  ;;  %v1213_v18 = vmul.f32 1.442695, %v1130_v11  ;;  %v3197_v21 = vadd.f32 %v892_v14, %v508_v12 }
 0x16a   :  { %v1850_v22 = vpop.eup %1849  ;;  %v1319_v34 = vadd.f32 1.0, %v1848_v17  ;;  %v512_v44 = vpop.f32.mrb[42].mxu1 }
 0x16b   :  { %v1444_v23 = vmul.f32 %v1850_v22, %v3141_v57  ;;  %1859 = vpow2.f32 %v1213_v18  ;;  %v1131_v24 = vsub.f32 0.0, %v3197_v21  ;;  %v513_v25 = vadd.f32 %v2936_v55, %v512_v44  ;;  %v514_v26 = vpop.f32.mrb[43].mxu1  ;;  %v897_v28 = vpop.f32.mrb[42].mxu0 }
 0x16c   :  { %1861 = vrcp.f32 %v1319_v34  ;;  %v899_v29 = vpop.f32.mrb[43].mxu0 }
 0x16d   :  { %v1852_v30 = vpop.eup %1851  ;;  %1508 = vst [vmem:[%s3576_s3 + $0x68] sm:$0xff] %v1444_v23  ;;  %v1215_v31 = vmul.f32 1.442695, %v1131_v24  ;;  %v3205_v35 = vadd.f32 %v897_v28, %v513_v25 }
 0x16e   :  { %v1854_v39 = vpop.eup %1853  ;;  %v1320_v49 = vadd.f32 1.0, %v1852_v30  ;;  %v517_v57 = vpop.f32.mrb[44].mxu1 }
 0x16f   :  { %v1445_v36 = vmul.f32 %v1854_v39, %v3149_v7  ;;  %1863 = vpow2.f32 %v1215_v31  ;;  %v1132_v37 = vsub.f32 0.0, %v3205_v35  ;;  %v518_v38 = vadd.f32 %v2936_v55, %v517_v57  ;;  %v519_v0 = vpop.f32.mrb[45].mxu1  ;;  %v902_v40 = vpop.f32.mrb[44].mxu0 }
 0x170   :  { %1865 = vrcp.f32 %v1320_v49  ;;  %v904_v41 = vpop.f32.mrb[45].mxu0 }
 0x171   :  { %v1856_v42 = vpop.eup %1855  ;;  %1509 = vst [vmem:[%s3576_s3 + $0x70] sm:$0xff] %v1445_v36  ;;  %v1217_v43 = vmul.f32 1.442695, %v1132_v37  ;;  %v3213_v46 = vadd.f32 %v902_v40, %v518_v38 }
 0x172   :  { %v1858_v51 = vpop.eup %1857  ;;  %v1321_v5 = vadd.f32 1.0, %v1856_v42  ;;  %v522_v7 = vpop.f32.mrb[46].mxu1 }
 0x173   :  { %v1446_v47 = vmul.f32 %v1858_v51, %v3157_v27  ;;  %1867 = vpow2.f32 %v1217_v43  ;;  %v1133_v48 = vsub.f32 0.0, %v3213_v46  ;;  %v523_v3 = vadd.f32 %v2936_v55, %v522_v7  ;;  %v524_v50 = vpop.f32.mrb[47].mxu1  ;;  %v907_v52 = vpop.f32.mrb[46].mxu0 }
 0x174   :  { %1869 = vrcp.f32 %v1321_v5  ;;  %v909_v53 = vpop.f32.mrb[47].mxu0 }
 0x175   :  { %v1860_v54 = vpop.eup %1859  ;;  %1510 = vst [vmem:[%s3576_s3 + $0x78] sm:$0xff] %v1446_v47  ;;  %v1219_v56 = vmul.f32 1.442695, %v1133_v48  ;;  %v3221_v59 = vadd.f32 %v907_v52, %v523_v3 }
 0x176   :  { %v1862_v4 = vpop.eup %1861  ;;  %v1322_v20 = vadd.f32 1.0, %v1860_v54  ;;  %v527_v27 = vpop.f32.mrb[48].mxu1 }
 0x177   :  { %v1447_v60 = vmul.f32 %v1862_v4, %v3165_v33  ;;  %1871 = vpow2.f32 %v1219_v56  ;;  %v1134_v61 = vsub.f32 0.0, %v3221_v59  ;;  %v528_v62 = vadd.f32 %v2936_v55, %v527_v27  ;;  %v529_v63 = vpop.f32.mrb[49].mxu1  ;;  %v912_v1 = vpop.f32.mrb[48].mxu0 }
 0x178   :  { %1873 = vrcp.f32 %v1322_v20  ;;  %v914_v2 = vpop.f32.mrb[49].mxu0 }
 0x179   :  { %v1864_v15 = vpop.eup %1863  ;;  %1511 = vst [vmem:[%s3576_s3 + $0x80] sm:$0xff] %v1447_v60  ;;  %v1221_v6 = vmul.f32 1.442695, %v1134_v61  ;;  %v3229_v9 = vadd.f32 %v912_v1, %v528_v62 }
 0x17a   :  { %v1866_v19 = vpop.eup %1865  ;;  %v1323_v32 = vadd.f32 1.0, %v1864_v15  ;;  %v532_v33 = vpop.f32.mrb[50].mxu1 }
 0x17b   :  { %v1448_v10 = vmul.f32 %v1866_v19, %v3173_v45  ;;  %1875 = vpow2.f32 %v1221_v6  ;;  %v1135_v11 = vsub.f32 0.0, %v3229_v9  ;;  %v533_v12 = vadd.f32 %v2936_v55, %v532_v33  ;;  %v534_v13 = vpop.f32.mrb[51].mxu1  ;;  %v917_v14 = vpop.f32.mrb[50].mxu0 }
 0x17c   :  { %1877 = vrcp.f32 %v1323_v32  ;;  %v919_v16 = vpop.f32.mrb[51].mxu0 }
 0x17d   :  { %v1868_v17 = vpop.eup %1867  ;;  %1512 = vst [vmem:[%s3576_s3 + $0x88] sm:$0xff] %v1448_v10  ;;  %v1223_v18 = vmul.f32 1.442695, %v1135_v11  ;;  %v3237_v22 = vadd.f32 %v917_v14, %v533_v12 }
 0x17e   :  { %v1870_v34 = vpop.eup %1869  ;;  %v1324_v44 = vadd.f32 1.0, %v1868_v17  ;;  %v537_v45 = vpop.f32.mrb[52].mxu1 }
 0x17f   :  { %v1449_v23 = vmul.f32 %v1870_v34, %v3181_v58  ;;  %1879 = vpow2.f32 %v1223_v18  ;;  %v1136_v24 = vsub.f32 0.0, %v3237_v22  ;;  %v538_v25 = vadd.f32 %v2936_v55, %v537_v45  ;;  %v539_v26 = vpop.f32.mrb[53].mxu1  ;;  %v922_v28 = vpop.f32.mrb[52].mxu0 }
 0x180   :  { %1881 = vrcp.f32 %v1324_v44  ;;  %v924_v29 = vpop.f32.mrb[53].mxu0 }
 0x181   :  { %v1872_v30 = vpop.eup %1871  ;;  %1513 = vst [vmem:[%s3576_s3 + $0x90] sm:$0xff] %v1449_v23  ;;  %v1225_v31 = vmul.f32 1.442695, %v1136_v24  ;;  %v3245_v39 = vadd.f32 %v922_v28, %v538_v25  ;;  %v3284_v24 = vld [vmem:[%s3575_s2] ss:$0 sm:$0xff] }
 0x182   :  { %v1874_v49 = vpop.eup %1873  ;;  %v1325_v57 = vadd.f32 1.0, %v1872_v30  ;;  %v542_v58 = vpop.f32.mrb[54].mxu1 }
 0x183   :  { %v1450_v36 = vmul.f32 %v1874_v49, %v3189_v8  ;;  %1883 = vpow2.f32 %v1225_v31  ;;  %v1137_v37 = vsub.f32 0.0, %v3245_v39  ;;  %v543_v38 = vadd.f32 %v2936_v55, %v542_v58  ;;  %v544_v0 = vpop.f32.mrb[55].mxu1  ;;  %v927_v40 = vpop.f32.mrb[54].mxu0 }
 0x184   :  { %1885 = vrcp.f32 %v1325_v57  ;;  %v929_v41 = vpop.f32.mrb[55].mxu0 }
 0x185   :  { %v1876_v42 = vpop.eup %1875  ;;  %1514 = vst [vmem:[%s3576_s3 + $0x98] sm:$0xff] %v1450_v36  ;;  %v1227_v43 = vmul.f32 1.442695, %v1137_v37  ;;  %v3253_v51 = vadd.f32 %v927_v40, %v543_v38 }
 0x186   :  { %v1878_v5 = vpop.eup %1877  ;;  %v1326_v7 = vadd.f32 1.0, %v1876_v42  ;;  %v547_v8 = vpop.f32.mrb[56].mxu1 }
 0x187   :  { %v1451_v47 = vmul.f32 %v1878_v5, %v3197_v21  ;;  %1887 = vpow2.f32 %v1227_v43  ;;  %v1138_v48 = vsub.f32 0.0, %v3253_v51  ;;  %v548_v3 = vadd.f32 %v2936_v55, %v547_v8  ;;  %v549_v50 = vpop.f32.mrb[57].mxu1  ;;  %v932_v52 = vpop.f32.mrb[56].mxu0 }
 0x188   :  { %1889 = vrcp.f32 %v1326_v7  ;;  %v934_v53 = vpop.f32.mrb[57].mxu0 }
 0x189   :  { %v1880_v54 = vpop.eup %1879  ;;  %1515 = vst [vmem:[%s3576_s3 + $0xa0] sm:$0xff] %v1451_v47  ;;  %v1229_v56 = vmul.f32 1.442695, %v1138_v48  ;;  %v3261_v4 = vadd.f32 %v932_v52, %v548_v3 }
 0x18a   :  { %v1882_v20 = vpop.eup %1881  ;;  %v1327_v27 = vadd.f32 1.0, %v1880_v54  ;;  %v552_v21 = vpop.f32.mrb[58].mxu1 }
 0x18b   :  { %v1452_v60 = vmul.f32 %v1882_v20, %v3205_v35  ;;  %1891 = vpow2.f32 %v1229_v56  ;;  %v1139_v61 = vsub.f32 0.0, %v3261_v4  ;;  %v553_v62 = vadd.f32 %v2936_v55, %v552_v21  ;;  %v554_v63 = vpop.f32.mrb[59].mxu1  ;;  %v937_v1 = vpop.f32.mrb[58].mxu0 }
 0x18c   :  { %1893 = vrcp.f32 %v1327_v27  ;;  %v939_v2 = vpop.f32.mrb[59].mxu0 }
 0x18d   :  { %v1884_v15 = vpop.eup %1883  ;;  %1516 = vst [vmem:[%s3576_s3 + $0xa8] sm:$0xff] %v1452_v60  ;;  %v1231_v6 = vmul.f32 1.442695, %v1139_v61  ;;  %v3269_v19 = vadd.f32 %v937_v1, %v553_v62 }
 0x18e   :  { %v1886_v32 = vpop.eup %1885  ;;  %v1328_v33 = vadd.f32 1.0, %v1884_v15  ;;  %v557_v35 = vpop.f32.mrb[60].mxu1 }
 0x18f   :  { %v1453_v10 = vmul.f32 %v1886_v32, %v3213_v46  ;;  %1895 = vpow2.f32 %v1231_v6  ;;  %v1140_v11 = vsub.f32 0.0, %v3269_v19  ;;  %v558_v12 = vadd.f32 %v2936_v55, %v557_v35  ;;  %v559_v13 = vpop.f32.mrb[61].mxu1  ;;  %v942_v14 = vpop.f32.mrb[60].mxu0 }
 0x190   :  { %1897 = vrcp.f32 %v1328_v33  ;;  %v944_v16 = vpop.f32.mrb[61].mxu0 }
 0x191   :  { %v1888_v17 = vpop.eup %1887  ;;  %1517 = vst [vmem:[%s3576_s3 + $0xb0] sm:$0xff] %v1453_v10  ;;  %v1233_v18 = vmul.f32 1.442695, %v1140_v11  ;;  %v3277_v34 = vadd.f32 %v942_v14, %v558_v12 }
 0x192   :  { %v1890_v44 = vpop.eup %1889  ;;  %v1329_v45 = vadd.f32 1.0, %v1888_v17  ;;  %v562_v46 = vpop.f32.mrb[62].mxu1 }
 0x193   :  { %v1454_v23 = vmul.f32 %v1890_v44, %v3221_v59  ;;  %1899 = vpow2.f32 %v1233_v18  ;;  %v1141_v55 = vsub.f32 0.0, %v3277_v34  ;;  %v563_v25 = vadd.f32 %v3284_v24, %v562_v46  ;;  %v564_v26 = vpop.f32.mrb[63].mxu1  ;;  %v947_v28 = vpop.f32.mrb[62].mxu0 }
 0x194   :  { %1901 = vrcp.f32 %v1329_v45  ;;  %v949_v29 = vpop.f32.mrb[63].mxu0 }
 0x195   :  { %v1892_v30 = vpop.eup %1891  ;;  %1518 = vst [vmem:[%s3576_s3 + $0xb8] sm:$0xff] %v1454_v23  ;;  %v1235_v59 = vmul.f32 1.442695, %v1141_v55  ;;  %v3290_v31 = vadd.f32 %v947_v28, %v563_v25 }
 0x196   :  { %v1894_v49 = vpop.eup %1893  ;;  %v1330_v57 = vadd.f32 1.0, %v1892_v30  ;;  %v567_v58 = vpop.f32.mrb[64].mxu1 }
 0x197   :  { %v1455_v36 = vmul.f32 %v1894_v49, %v3229_v9  ;;  %1903 = vpow2.f32 %v1235_v59  ;;  %v1142_v37 = vsub.f32 0.0, %v3290_v31  ;;  %v568_v38 = vadd.f32 %v3284_v24, %v567_v58  ;;  %v569_v0 = vpop.f32.mrb[65].mxu1  ;;  %v952_v40 = vpop.f32.mrb[64].mxu0 }
 0x198   :  { %1905 = vrcp.f32 %v1330_v57  ;;  %v954_v41 = vpop.f32.mrb[65].mxu0 }
 0x199   :  { %v1896_v42 = vpop.eup %1895  ;;  %1519 = vst [vmem:[%s3576_s3 + $0xc0] sm:$0xff] %v1455_v36  ;;  %v1237_v43 = vmul.f32 1.442695, %v1142_v37  ;;  %v3298_v5 = vadd.f32 %v952_v40, %v568_v38 }
 0x19a   :  { %v1898_v7 = vpop.eup %1897  ;;  %v1331_v8 = vadd.f32 1.0, %v1896_v42  ;;  %v572_v9 = vpop.f32.mrb[66].mxu1 }
 0x19b   :  { %v1456_v47 = vmul.f32 %v1898_v7, %v3237_v22  ;;  %1907 = vpow2.f32 %v1237_v43  ;;  %v1143_v48 = vsub.f32 0.0, %v3298_v5  ;;  %v573_v3 = vadd.f32 %v3284_v24, %v572_v9  ;;  %v574_v50 = vpop.f32.mrb[67].mxu1  ;;  %v957_v52 = vpop.f32.mrb[66].mxu0 }
 0x19c   :  { %1909 = vrcp.f32 %v1331_v8  ;;  %v959_v53 = vpop.f32.mrb[67].mxu0 }
 0x19d   :  { %v1900_v54 = vpop.eup %1899  ;;  %1520 = vst [vmem:[%s3576_s3 + $0xc8] sm:$0xff] %v1456_v47  ;;  %v1239_v56 = vmul.f32 1.442695, %v1143_v48  ;;  %v3306_v20 = vadd.f32 %v957_v52, %v573_v3 }
 0x19e   :  { %v1902_v27 = vpop.eup %1901  ;;  %v1332_v21 = vadd.f32 1.0, %v1900_v54  ;;  %v577_v22 = vpop.f32.mrb[68].mxu1 }
 0x19f   :  { %v1457_v60 = vmul.f32 %v1902_v27, %v3245_v39  ;;  %1911 = vpow2.f32 %v1239_v56  ;;  %v1144_v61 = vsub.f32 0.0, %v3306_v20  ;;  %v578_v62 = vadd.f32 %v3284_v24, %v577_v22  ;;  %v579_v63 = vpop.f32.mrb[69].mxu1  ;;  %v962_v1 = vpop.f32.mrb[68].mxu0 }
 0x1a0   :  { %1913 = vrcp.f32 %v1332_v21  ;;  %v964_v2 = vpop.f32.mrb[69].mxu0 }
 0x1a1   :  { %v1904_v15 = vpop.eup %1903  ;;  %1521 = vst [vmem:[%s3576_s3 + $0xd0] sm:$0xff] %v1457_v60  ;;  %v1241_v6 = vmul.f32 1.442695, %v1144_v61  ;;  %v3314_v32 = vadd.f32 %v962_v1, %v578_v62 }
 0x1a2   :  { %v1906_v33 = vpop.eup %1905  ;;  %v1333_v35 = vadd.f32 1.0, %v1904_v15  ;;  %v582_v39 = vpop.f32.mrb[70].mxu1 }
 0x1a3   :  { %v1458_v10 = vmul.f32 %v1906_v33, %v3253_v51  ;;  %1915 = vpow2.f32 %v1241_v6  ;;  %v1145_v11 = vsub.f32 0.0, %v3314_v32  ;;  %v583_v12 = vadd.f32 %v3284_v24, %v582_v39  ;;  %v584_v13 = vpop.f32.mrb[71].mxu1  ;;  %v967_v14 = vpop.f32.mrb[70].mxu0 }
 0x1a4   :  { %1917 = vrcp.f32 %v1333_v35  ;;  %v969_v16 = vpop.f32.mrb[71].mxu0 }
 0x1a5   :  { %v1908_v17 = vpop.eup %1907  ;;  %1522 = vst [vmem:[%s3576_s3 + $0xd8] sm:$0xff] %v1458_v10  ;;  %v1243_v18 = vmul.f32 1.442695, %v1145_v11  ;;  %v3322_v44 = vadd.f32 %v967_v14, %v583_v12 }
 0x1a6   :  { %v1910_v45 = vpop.eup %1909  ;;  %v1334_v46 = vadd.f32 1.0, %v1908_v17  ;;  %v587_v51 = vpop.f32.mrb[72].mxu1 }
 0x1a7   :  { %v1459_v23 = vmul.f32 %v1910_v45, %v3261_v4  ;;  %1919 = vpow2.f32 %v1243_v18  ;;  %v1146_v55 = vsub.f32 0.0, %v3322_v44  ;;  %v588_v25 = vadd.f32 %v3284_v24, %v587_v51  ;;  %v589_v26 = vpop.f32.mrb[73].mxu1  ;;  %v972_v28 = vpop.f32.mrb[72].mxu0 }
 0x1a8   :  { %1921 = vrcp.f32 %v1334_v46  ;;  %v974_v29 = vpop.f32.mrb[73].mxu0 }
 0x1a9   :  { %v1912_v30 = vpop.eup %1911  ;;  %1523 = vst [vmem:[%s3576_s3 + $0xe0] sm:$0xff] %v1459_v23  ;;  %v1245_v59 = vmul.f32 1.442695, %v1146_v55  ;;  %v3330_v49 = vadd.f32 %v972_v28, %v588_v25 }
 0x1aa   :  { %v1914_v57 = vpop.eup %1913  ;;  %v1335_v58 = vadd.f32 1.0, %v1912_v30  ;;  %v592_v4 = vpop.f32.mrb[74].mxu1 }
 0x1ab   :  { %v1460_v36 = vmul.f32 %v1914_v57, %v3269_v19  ;;  %1923 = vpow2.f32 %v1245_v59  ;;  %v1147_v37 = vsub.f32 0.0, %v3330_v49  ;;  %v593_v38 = vadd.f32 %v3284_v24, %v592_v4  ;;  %v594_v0 = vpop.f32.mrb[75].mxu1  ;;  %v977_v40 = vpop.f32.mrb[74].mxu0 }
 0x1ac   :  { %1925 = vrcp.f32 %v1335_v58  ;;  %v979_v41 = vpop.f32.mrb[75].mxu0 }
 0x1ad   :  { %v1916_v42 = vpop.eup %1915  ;;  %1524 = vst [vmem:[%s3576_s3 + $0xe8] sm:$0xff] %v1460_v36  ;;  %v1247_v43 = vmul.f32 1.442695, %v1147_v37  ;;  %v3338_v7 = vadd.f32 %v977_v40, %v593_v38 }
 0x1ae   :  { %v1918_v8 = vpop.eup %1917  ;;  %v1336_v9 = vadd.f32 1.0, %v1916_v42  ;;  %v597_v19 = vpop.f32.mrb[76].mxu1 }
 0x1af   :  { %v1461_v47 = vmul.f32 %v1918_v8, %v3277_v34  ;;  %1927 = vpow2.f32 %v1247_v43  ;;  %v1148_v48 = vsub.f32 0.0, %v3338_v7  ;;  %v598_v3 = vadd.f32 %v3284_v24, %v597_v19  ;;  %v599_v50 = vpop.f32.mrb[77].mxu1  ;;  %v982_v52 = vpop.f32.mrb[76].mxu0 }
 0x1b0   :  { %1929 = vrcp.f32 %v1336_v9  ;;  %v984_v53 = vpop.f32.mrb[77].mxu0 }
 0x1b1   :  { %v1920_v54 = vpop.eup %1919  ;;  %1525 = vst [vmem:[%s3576_s3 + $0xf0] sm:$0xff] %v1461_v47  ;;  %v1249_v56 = vmul.f32 1.442695, %v1148_v48  ;;  %v3346_v27 = vadd.f32 %v982_v52, %v598_v3 }
 0x1b2   :  { %v1922_v21 = vpop.eup %1921  ;;  %v1337_v22 = vadd.f32 1.0, %v1920_v54  ;;  %v602_v34 = vpop.f32.mrb[78].mxu1 }
 0x1b3   :  { %v1462_v60 = vmul.f32 %v1922_v21, %v3290_v31  ;;  %1931 = vpow2.f32 %v1249_v56  ;;  %v1149_v61 = vsub.f32 0.0, %v3346_v27  ;;  %v603_v62 = vadd.f32 %v3284_v24, %v602_v34  ;;  %v604_v63 = vpop.f32.mrb[79].mxu1  ;;  %v987_v1 = vpop.f32.mrb[78].mxu0 }
 0x1b4   :  { %1933 = vrcp.f32 %v1337_v22  ;;  %v989_v2 = vpop.f32.mrb[79].mxu0 }
 0x1b5   :  { %v1924_v15 = vpop.eup %1923  ;;  %1526 = vst [vmem:[%s3576_s3 + $0xf8] sm:$0xff] %v1462_v60  ;;  %v1251_v6 = vmul.f32 1.442695, %v1149_v61  ;;  %v3354_v33 = vadd.f32 %v987_v1, %v603_v62 }
 0x1b6   :  { %v1926_v35 = vpop.eup %1925  ;;  %v1338_v39 = vadd.f32 1.0, %v1924_v15  ;;  %v607_v31 = vpop.f32.mrb[80].mxu1 }
 0x1b7   :  { %v1463_v10 = vmul.f32 %v1926_v35, %v3298_v5  ;;  %1935 = vpow2.f32 %v1251_v6  ;;  %v1150_v11 = vsub.f32 0.0, %v3354_v33  ;;  %v608_v12 = vadd.f32 %v3284_v24, %v607_v31  ;;  %v609_v13 = vpop.f32.mrb[81].mxu1  ;;  %v992_v14 = vpop.f32.mrb[80].mxu0 }
 0x1b8   :  { %1937 = vrcp.f32 %v1338_v39  ;;  %v994_v16 = vpop.f32.mrb[81].mxu0 }
 0x1b9   :  { %v1928_v17 = vpop.eup %1927  ;;  %1527 = vst [vmem:[%s3576_s3 + $0x100] sm:$0xff] %v1463_v10  ;;  %v1253_v18 = vmul.f32 1.442695, %v1150_v11  ;;  %v3362_v45 = vadd.f32 %v992_v14, %v608_v12 }
 0x1ba   :  { %v1930_v46 = vpop.eup %1929  ;;  %v1339_v51 = vadd.f32 1.0, %v1928_v17  ;;  %v612_v5 = vpop.f32.mrb[82].mxu1 }
 0x1bb   :  { %v1464_v23 = vmul.f32 %v1930_v46, %v3306_v20  ;;  %1939 = vpow2.f32 %v1253_v18  ;;  %v1151_v55 = vsub.f32 0.0, %v3362_v45  ;;  %v613_v25 = vadd.f32 %v3284_v24, %v612_v5  ;;  %v614_v26 = vpop.f32.mrb[83].mxu1  ;;  %v997_v28 = vpop.f32.mrb[82].mxu0 }
 0x1bc   :  { %1941 = vrcp.f32 %v1339_v51  ;;  %v999_v29 = vpop.f32.mrb[83].mxu0 }
 0x1bd   :  { %v1932_v30 = vpop.eup %1931  ;;  %1528 = vst [vmem:[%s3576_s3 + $0x108] sm:$0xff] %v1464_v23  ;;  %v1255_v59 = vmul.f32 1.442695, %v1151_v55  ;;  %v3370_v57 = vadd.f32 %v997_v28, %v613_v25 }
 0x1be   :  { %v1934_v58 = vpop.eup %1933  ;;  %v1340_v4 = vadd.f32 1.0, %v1932_v30  ;;  %v617_v20 = vpop.f32.mrb[84].mxu1 }
 0x1bf   :  { %v1465_v36 = vmul.f32 %v1934_v58, %v3314_v32  ;;  %1943 = vpow2.f32 %v1255_v59  ;;  %v1152_v37 = vsub.f32 0.0, %v3370_v57  ;;  %v618_v38 = vadd.f32 %v3284_v24, %v617_v20  ;;  %v619_v0 = vpop.f32.mrb[85].mxu1  ;;  %v1002_v40 = vpop.f32.mrb[84].mxu0 }
 0x1c0   :  { %1945 = vrcp.f32 %v1340_v4  ;;  %v1004_v41 = vpop.f32.mrb[85].mxu0 }
 0x1c1   :  { %v1936_v42 = vpop.eup %1935  ;;  %1529 = vst [vmem:[%s3576_s3 + $0x110] sm:$0xff] %v1465_v36  ;;  %v1257_v43 = vmul.f32 1.442695, %v1152_v37  ;;  %v3378_v8 = vadd.f32 %v1002_v40, %v618_v38 }
 0x1c2   :  { %v1938_v9 = vpop.eup %1937  ;;  %v1341_v19 = vadd.f32 1.0, %v1936_v42  ;;  %v622_v32 = vpop.f32.mrb[86].mxu1 }
 0x1c3   :  { %v1466_v47 = vmul.f32 %v1938_v9, %v3322_v44  ;;  %1947 = vpow2.f32 %v1257_v43  ;;  %v1153_v48 = vsub.f32 0.0, %v3378_v8  ;;  %v623_v3 = vadd.f32 %v3284_v24, %v622_v32  ;;  %v624_v50 = vpop.f32.mrb[87].mxu1  ;;  %v1007_v52 = vpop.f32.mrb[86].mxu0 }
 0x1c4   :  { %1949 = vrcp.f32 %v1341_v19  ;;  %v1009_v53 = vpop.f32.mrb[87].mxu0 }
 0x1c5   :  { %v1940_v54 = vpop.eup %1939  ;;  %1530 = vst [vmem:[%s3576_s3 + $0x118] sm:$0xff] %v1466_v47  ;;  %v1259_v56 = vmul.f32 1.442695, %v1153_v48  ;;  %v3386_v21 = vadd.f32 %v1007_v52, %v623_v3 }
 0x1c6   :  { %v1942_v22 = vpop.eup %1941  ;;  %v1342_v34 = vadd.f32 1.0, %v1940_v54  ;;  %v627_v44 = vpop.f32.mrb[88].mxu1 }
 0x1c7   :  { %v1467_v60 = vmul.f32 %v1942_v22, %v3330_v49  ;;  %1951 = vpow2.f32 %v1259_v56  ;;  %v1154_v61 = vsub.f32 0.0, %v3386_v21  ;;  %v628_v62 = vadd.f32 %v3284_v24, %v627_v44  ;;  %v629_v63 = vpop.f32.mrb[89].mxu1  ;;  %v1012_v1 = vpop.f32.mrb[88].mxu0 }
 0x1c8   :  { %1953 = vrcp.f32 %v1342_v34  ;;  %v1014_v2 = vpop.f32.mrb[89].mxu0 }
 0x1c9   :  { %v1944_v15 = vpop.eup %1943  ;;  %1531 = vst [vmem:[%s3576_s3 + $0x120] sm:$0xff] %v1467_v60  ;;  %v1261_v6 = vmul.f32 1.442695, %v1154_v61  ;;  %v3394_v35 = vadd.f32 %v1012_v1, %v628_v62 }
 0x1ca   :  { %v1946_v39 = vpop.eup %1945  ;;  %v1343_v31 = vadd.f32 1.0, %v1944_v15  ;;  %v632_v49 = vpop.f32.mrb[90].mxu1 }
 0x1cb   :  { %v1468_v10 = vmul.f32 %v1946_v39, %v3338_v7  ;;  %1955 = vpow2.f32 %v1261_v6  ;;  %v1155_v11 = vsub.f32 0.0, %v3394_v35  ;;  %v633_v12 = vadd.f32 %v3284_v24, %v632_v49  ;;  %v634_v13 = vpop.f32.mrb[91].mxu1  ;;  %v1017_v14 = vpop.f32.mrb[90].mxu0 }
 0x1cc   :  { %1957 = vrcp.f32 %v1343_v31  ;;  %v1019_v16 = vpop.f32.mrb[91].mxu0 }
 0x1cd   :  { %v1948_v17 = vpop.eup %1947  ;;  %1532 = vst [vmem:[%s3576_s3 + $0x128] sm:$0xff] %v1468_v10  ;;  %v1263_v18 = vmul.f32 1.442695, %v1155_v11  ;;  %v3402_v46 = vadd.f32 %v1017_v14, %v633_v12 }
 0x1ce   :  { %v1950_v51 = vpop.eup %1949  ;;  %v1344_v5 = vadd.f32 1.0, %v1948_v17  ;;  %v637_v7 = vpop.f32.mrb[92].mxu1 }
 0x1cf   :  { %v1469_v23 = vmul.f32 %v1950_v51, %v3346_v27  ;;  %1959 = vpow2.f32 %v1263_v18  ;;  %v1156_v55 = vsub.f32 0.0, %v3402_v46  ;;  %v638_v25 = vadd.f32 %v3284_v24, %v637_v7  ;;  %v639_v26 = vpop.f32.mrb[93].mxu1  ;;  %v1022_v28 = vpop.f32.mrb[92].mxu0 }
 0x1d0   :  { %1961 = vrcp.f32 %v1344_v5  ;;  %v1024_v29 = vpop.f32.mrb[93].mxu0 }
 0x1d1   :  { %v1952_v30 = vpop.eup %1951  ;;  %1533 = vst [vmem:[%s3576_s3 + $0x130] sm:$0xff] %v1469_v23  ;;  %v1265_v59 = vmul.f32 1.442695, %v1156_v55  ;;  %v3410_v58 = vadd.f32 %v1022_v28, %v638_v25 }
 0x1d2   :  { %v1954_v4 = vpop.eup %1953  ;;  %v1345_v20 = vadd.f32 1.0, %v1952_v30  ;;  %v642_v27 = vpop.f32.mrb[94].mxu1 }
 0x1d3   :  { %v1470_v36 = vmul.f32 %v1954_v4, %v3354_v33  ;;  %1963 = vpow2.f32 %v1265_v59  ;;  %v1157_v37 = vsub.f32 0.0, %v3410_v58  ;;  %v643_v38 = vadd.f32 %v3284_v24, %v642_v27  ;;  %v644_v0 = vpop.f32.mrb[95].mxu1  ;;  %v1027_v40 = vpop.f32.mrb[94].mxu0 }
 0x1d4   :  { %1965 = vrcp.f32 %v1345_v20  ;;  %v1029_v41 = vpop.f32.mrb[95].mxu0 }
 0x1d5   :  { %v1956_v42 = vpop.eup %1955  ;;  %1534 = vst [vmem:[%s3576_s3 + $0x138] sm:$0xff] %v1470_v36  ;;  %v1267_v43 = vmul.f32 1.442695, %v1157_v37  ;;  %v3418_v9 = vadd.f32 %v1027_v40, %v643_v38 }
 0x1d6   :  { %v1958_v19 = vpop.eup %1957  ;;  %v1346_v32 = vadd.f32 1.0, %v1956_v42  ;;  %v647_v33 = vpop.f32.mrb[96].mxu1 }
 0x1d7   :  { %v1471_v47 = vmul.f32 %v1958_v19, %v3362_v45  ;;  %1967 = vpow2.f32 %v1267_v43  ;;  %v1158_v48 = vsub.f32 0.0, %v3418_v9  ;;  %v648_v3 = vadd.f32 %v3284_v24, %v647_v33  ;;  %v649_v50 = vpop.f32.mrb[97].mxu1  ;;  %v1032_v52 = vpop.f32.mrb[96].mxu0 }
 0x1d8   :  { %1969 = vrcp.f32 %v1346_v32  ;;  %v1034_v53 = vpop.f32.mrb[97].mxu0 }
 0x1d9   :  { %v1960_v54 = vpop.eup %1959  ;;  %1535 = vst [vmem:[%s3576_s3 + $0x140] sm:$0xff] %v1471_v47  ;;  %v1269_v56 = vmul.f32 1.442695, %v1158_v48  ;;  %v3426_v22 = vadd.f32 %v1032_v52, %v648_v3 }
 0x1da   :  { %v1962_v34 = vpop.eup %1961  ;;  %v1347_v44 = vadd.f32 1.0, %v1960_v54  ;;  %v652_v45 = vpop.f32.mrb[98].mxu1 }
 0x1db   :  { %v1472_v60 = vmul.f32 %v1962_v34, %v3370_v57  ;;  %1971 = vpow2.f32 %v1269_v56  ;;  %v1159_v61 = vsub.f32 0.0, %v3426_v22  ;;  %v653_v62 = vadd.f32 %v3284_v24, %v652_v45  ;;  %v654_v63 = vpop.f32.mrb[99].mxu1  ;;  %v1037_v1 = vpop.f32.mrb[98].mxu0 }
 0x1dc   :  { %1973 = vrcp.f32 %v1347_v44  ;;  %v1039_v2 = vpop.f32.mrb[99].mxu0 }
 0x1dd   :  { %v1964_v15 = vpop.eup %1963  ;;  %1536 = vst [vmem:[%s3576_s3 + $0x148] sm:$0xff] %v1472_v60  ;;  %v1271_v6 = vmul.f32 1.442695, %v1159_v61  ;;  %v3434_v39 = vadd.f32 %v1037_v1, %v653_v62 }
 0x1de   :  { %v1966_v31 = vpop.eup %1965  ;;  %v1348_v49 = vadd.f32 1.0, %v1964_v15  ;;  %v657_v57 = vpop.f32.mrb[100].mxu1 }
 0x1df   :  { %v1473_v10 = vmul.f32 %v1966_v31, %v3378_v8  ;;  %1975 = vpow2.f32 %v1271_v6  ;;  %v1160_v11 = vsub.f32 0.0, %v3434_v39  ;;  %v658_v12 = vadd.f32 %v3284_v24, %v657_v57  ;;  %v659_v13 = vpop.f32.mrb[101].mxu1  ;;  %v1042_v14 = vpop.f32.mrb[100].mxu0 }
 0x1e0   :  { %1977 = vrcp.f32 %v1348_v49  ;;  %v1044_v16 = vpop.f32.mrb[101].mxu0 }
 0x1e1   :  { %v1968_v17 = vpop.eup %1967  ;;  %1537 = vst [vmem:[%s3576_s3 + $0x150] sm:$0xff] %v1473_v10  ;;  %v1273_v18 = vmul.f32 1.442695, %v1160_v11  ;;  %v3442_v51 = vadd.f32 %v1042_v14, %v658_v12 }
 0x1e2   :  { %v1970_v5 = vpop.eup %1969  ;;  %v1349_v7 = vadd.f32 1.0, %v1968_v17  ;;  %v662_v8 = vpop.f32.mrb[102].mxu1 }
 0x1e3   :  { %v1474_v23 = vmul.f32 %v1970_v5, %v3386_v21  ;;  %1979 = vpow2.f32 %v1273_v18  ;;  %v1161_v55 = vsub.f32 0.0, %v3442_v51  ;;  %v663_v25 = vadd.f32 %v3284_v24, %v662_v8  ;;  %v664_v26 = vpop.f32.mrb[103].mxu1  ;;  %v1047_v28 = vpop.f32.mrb[102].mxu0 }
 0x1e4   :  { %1981 = vrcp.f32 %v1349_v7  ;;  %v1049_v29 = vpop.f32.mrb[103].mxu0 }
 0x1e5   :  { %v1972_v30 = vpop.eup %1971  ;;  %1538 = vst [vmem:[%s3576_s3 + $0x158] sm:$0xff] %v1474_v23  ;;  %v1275_v59 = vmul.f32 1.442695, %v1161_v55  ;;  %v3450_v4 = vadd.f32 %v1047_v28, %v663_v25 }
 0x1e6   :  { %v1974_v20 = vpop.eup %1973  ;;  %v1350_v27 = vadd.f32 1.0, %v1972_v30  ;;  %v667_v21 = vpop.f32.mrb[104].mxu1 }
 0x1e7   :  { %v1475_v36 = vmul.f32 %v1974_v20, %v3394_v35  ;;  %1983 = vpow2.f32 %v1275_v59  ;;  %v1162_v37 = vsub.f32 0.0, %v3450_v4  ;;  %v668_v38 = vadd.f32 %v3284_v24, %v667_v21  ;;  %v669_v0 = vpop.f32.mrb[105].mxu1  ;;  %v1052_v40 = vpop.f32.mrb[104].mxu0 }
 0x1e8   :  { %1985 = vrcp.f32 %v1350_v27  ;;  %v1054_v41 = vpop.f32.mrb[105].mxu0 }
 0x1e9   :  { %v1976_v42 = vpop.eup %1975  ;;  %1539 = vst [vmem:[%s3576_s3 + $0x160] sm:$0xff] %v1475_v36  ;;  %v1277_v43 = vmul.f32 1.442695, %v1162_v37  ;;  %v3458_v19 = vadd.f32 %v1052_v40, %v668_v38 }
 0x1ea   :  { %v1978_v32 = vpop.eup %1977  ;;  %v1351_v33 = vadd.f32 1.0, %v1976_v42  ;;  %v672_v35 = vpop.f32.mrb[106].mxu1 }
 0x1eb   :  { %v1476_v47 = vmul.f32 %v1978_v32, %v3402_v46  ;;  %1987 = vpow2.f32 %v1277_v43  ;;  %v1163_v48 = vsub.f32 0.0, %v3458_v19  ;;  %v673_v3 = vadd.f32 %v3284_v24, %v672_v35  ;;  %v674_v50 = vpop.f32.mrb[107].mxu1  ;;  %v1057_v52 = vpop.f32.mrb[106].mxu0 }
 0x1ec   :  { %1989 = vrcp.f32 %v1351_v33  ;;  %v1059_v53 = vpop.f32.mrb[107].mxu0 }
 0x1ed   :  { %v1980_v54 = vpop.eup %1979  ;;  %1540 = vst [vmem:[%s3576_s3 + $0x168] sm:$0xff] %v1476_v47  ;;  %v1279_v56 = vmul.f32 1.442695, %v1163_v48  ;;  %v3466_v34 = vadd.f32 %v1057_v52, %v673_v3 }
 0x1ee   :  { %v1982_v44 = vpop.eup %1981  ;;  %v1352_v45 = vadd.f32 1.0, %v1980_v54  ;;  %v677_v46 = vpop.f32.mrb[108].mxu1 }
 0x1ef   :  { %v1477_v60 = vmul.f32 %v1982_v44, %v3410_v58  ;;  %1991 = vpow2.f32 %v1279_v56  ;;  %v1164_v61 = vsub.f32 0.0, %v3466_v34  ;;  %v678_v62 = vadd.f32 %v3284_v24, %v677_v46  ;;  %v679_v63 = vpop.f32.mrb[109].mxu1  ;;  %v1062_v1 = vpop.f32.mrb[108].mxu0 }
 0x1f0   :  { %1993 = vrcp.f32 %v1352_v45  ;;  %v1064_v2 = vpop.f32.mrb[109].mxu0 }
 0x1f1   :  { %v1984_v15 = vpop.eup %1983  ;;  %1541 = vst [vmem:[%s3576_s3 + $0x170] sm:$0xff] %v1477_v60  ;;  %v1281_v6 = vmul.f32 1.442695, %v1164_v61  ;;  %v3474_v31 = vadd.f32 %v1062_v1, %v678_v62 }
 0x1f2   :  { %v1986_v49 = vpop.eup %1985  ;;  %v1353_v57 = vadd.f32 1.0, %v1984_v15  ;;  %v682_v58 = vpop.f32.mrb[110].mxu1 }
 0x1f3   :  { %v1478_v10 = vmul.f32 %v1986_v49, %v3418_v9  ;;  %1995 = vpow2.f32 %v1281_v6  ;;  %v1165_v11 = vsub.f32 0.0, %v3474_v31  ;;  %v683_v12 = vadd.f32 %v3284_v24, %v682_v58  ;;  %v684_v13 = vpop.f32.mrb[111].mxu1  ;;  %v1067_v14 = vpop.f32.mrb[110].mxu0 }
 0x1f4   :  { %1997 = vrcp.f32 %v1353_v57  ;;  %v1069_v16 = vpop.f32.mrb[111].mxu0 }
 0x1f5   :  { %v1988_v17 = vpop.eup %1987  ;;  %1542 = vst [vmem:[%s3576_s3 + $0x178] sm:$0xff] %v1478_v10  ;;  %v1283_v18 = vmul.f32 1.442695, %v1165_v11  ;;  %v3482_v5 = vadd.f32 %v1067_v14, %v683_v12 }
 0x1f6   :  { %v1990_v7 = vpop.eup %1989  ;;  %v1354_v8 = vadd.f32 1.0, %v1988_v17  ;;  %v687_v9 = vpop.f32.mrb[112].mxu1 }
 0x1f7   :  { %v1479_v23 = vmul.f32 %v1990_v7, %v3426_v22  ;;  %1999 = vpow2.f32 %v1283_v18  ;;  %v1166_v55 = vsub.f32 0.0, %v3482_v5  ;;  %v688_v25 = vadd.f32 %v3284_v24, %v687_v9  ;;  %v689_v26 = vpop.f32.mrb[113].mxu1  ;;  %v1072_v28 = vpop.f32.mrb[112].mxu0 }
 0x1f8   :  { %2001 = vrcp.f32 %v1354_v8  ;;  %v1074_v29 = vpop.f32.mrb[113].mxu0 }
 0x1f9   :  { %v1992_v30 = vpop.eup %1991  ;;  %1543 = vst [vmem:[%s3576_s3 + $0x180] sm:$0xff] %v1479_v23  ;;  %v1285_v59 = vmul.f32 1.442695, %v1166_v55  ;;  %v3490_v20 = vadd.f32 %v1072_v28, %v688_v25 }
 0x1fa   :  { %v1994_v27 = vpop.eup %1993  ;;  %v1355_v21 = vadd.f32 1.0, %v1992_v30  ;;  %v692_v22 = vpop.f32.mrb[114].mxu1 }
 0x1fb   :  { %v1480_v36 = vmul.f32 %v1994_v27, %v3434_v39  ;;  %2003 = vpow2.f32 %v1285_v59  ;;  %v1167_v37 = vsub.f32 0.0, %v3490_v20  ;;  %v693_v38 = vadd.f32 %v3284_v24, %v692_v22  ;;  %v694_v0 = vpop.f32.mrb[115].mxu1  ;;  %v1077_v40 = vpop.f32.mrb[114].mxu0 }
 0x1fc   :  { %2005 = vrcp.f32 %v1355_v21  ;;  %v1079_v41 = vpop.f32.mrb[115].mxu0 }
 0x1fd   :  { %v1996_v42 = vpop.eup %1995  ;;  %1544 = vst [vmem:[%s3576_s3 + $0x188] sm:$0xff] %v1480_v36  ;;  %v1287_v43 = vmul.f32 1.442695, %v1167_v37  ;;  %v3498_v32 = vadd.f32 %v1077_v40, %v693_v38 }
 0x1fe   :  { %v1998_v33 = vpop.eup %1997  ;;  %v1356_v35 = vadd.f32 1.0, %v1996_v42  ;;  %v697_v39 = vpop.f32.mrb[116].mxu1 }
 0x1ff   :  { %v1481_v47 = vmul.f32 %v1998_v33, %v3442_v51  ;;  %2007 = vpow2.f32 %v1287_v43  ;;  %v1168_v48 = vsub.f32 0.0, %v3498_v32  ;;  %v698_v3 = vadd.f32 %v3284_v24, %v697_v39  ;;  %v699_v50 = vpop.f32.mrb[117].mxu1  ;;  %v1082_v52 = vpop.f32.mrb[116].mxu0 }
 0x200   :  { %2009 = vrcp.f32 %v1356_v35  ;;  %v1084_v53 = vpop.f32.mrb[117].mxu0 }
 0x201   :  { %v2000_v54 = vpop.eup %1999  ;;  %1545 = vst [vmem:[%s3576_s3 + $0x190] sm:$0xff] %v1481_v47  ;;  %v1289_v56 = vmul.f32 1.442695, %v1168_v48  ;;  %v3506_v44 = vadd.f32 %v1082_v52, %v698_v3 }
 0x202   :  { %v2002_v45 = vpop.eup %2001  ;;  %v1357_v46 = vadd.f32 1.0, %v2000_v54  ;;  %v702_v51 = vpop.f32.mrb[118].mxu1 }
 0x203   :  { %v1482_v60 = vmul.f32 %v2002_v45, %v3450_v4  ;;  %2011 = vpow2.f32 %v1289_v56  ;;  %v1169_v61 = vsub.f32 0.0, %v3506_v44  ;;  %v703_v62 = vadd.f32 %v3284_v24, %v702_v51  ;;  %v704_v63 = vpop.f32.mrb[119].mxu1  ;;  %v1087_v1 = vpop.f32.mrb[118].mxu0 }
 0x204   :  { %2013 = vrcp.f32 %v1357_v46  ;;  %v1089_v2 = vpop.f32.mrb[119].mxu0 }
 0x205   :  { %v2004_v15 = vpop.eup %2003  ;;  %1546 = vst [vmem:[%s3576_s3 + $0x198] sm:$0xff] %v1482_v60  ;;  %v1291_v6 = vmul.f32 1.442695, %v1169_v61  ;;  %v3514_v49 = vadd.f32 %v1087_v1, %v703_v62 }
 0x206   :  { %v2006_v57 = vpop.eup %2005  ;;  %v1358_v58 = vadd.f32 1.0, %v2004_v15  ;;  %v707_v4 = vpop.f32.mrb[120].mxu1 }
 0x207   :  { %v1483_v10 = vmul.f32 %v2006_v57, %v3458_v19  ;;  %2015 = vpow2.f32 %v1291_v6  ;;  %v1170_v11 = vsub.f32 0.0, %v3514_v49  ;;  %v708_v12 = vadd.f32 %v3284_v24, %v707_v4  ;;  %v709_v13 = vpop.f32.mrb[121].mxu1  ;;  %v1092_v14 = vpop.f32.mrb[120].mxu0 }
 0x208   :  { %2017 = vrcp.f32 %v1358_v58  ;;  %v1094_v16 = vpop.f32.mrb[121].mxu0 }
 0x209   :  { %v2008_v17 = vpop.eup %2007  ;;  %1547 = vst [vmem:[%s3576_s3 + $0x1a0] sm:$0xff] %v1483_v10  ;;  %v1293_v18 = vmul.f32 1.442695, %v1170_v11  ;;  %v3522_v7 = vadd.f32 %v1092_v14, %v708_v12 }
 0x20a   :  { %v2010_v8 = vpop.eup %2009  ;;  %v1359_v9 = vadd.f32 1.0, %v2008_v17  ;;  %v712_v19 = vpop.f32.mrb[122].mxu1 }
 0x20b   :  { %v1484_v23 = vmul.f32 %v2010_v8, %v3466_v34  ;;  %2019 = vpow2.f32 %v1293_v18  ;;  %v1171_v55 = vsub.f32 0.0, %v3522_v7  ;;  %v713_v25 = vadd.f32 %v3284_v24, %v712_v19  ;;  %v714_v26 = vpop.f32.mrb[123].mxu1  ;;  %v1097_v28 = vpop.f32.mrb[122].mxu0 }
 0x20c   :  { %2021 = vrcp.f32 %v1359_v9  ;;  %v1099_v29 = vpop.f32.mrb[123].mxu0 }
 0x20d   :  { %v2012_v30 = vpop.eup %2011  ;;  %1548 = vst [vmem:[%s3576_s3 + $0x1a8] sm:$0xff] %v1484_v23  ;;  %v1295_v59 = vmul.f32 1.442695, %v1171_v55  ;;  %v3530_v27 = vadd.f32 %v1097_v28, %v713_v25 }
 0x20e   :  { %v2014_v21 = vpop.eup %2013  ;;  %v1360_v22 = vadd.f32 1.0, %v2012_v30  ;;  %v717_v34 = vpop.f32.mrb[124].mxu1 }
 0x20f   :  { %v1485_v36 = vmul.f32 %v2014_v21, %v3474_v31  ;;  %2023 = vpow2.f32 %v1295_v59  ;;  %v1172_v37 = vsub.f32 0.0, %v3530_v27  ;;  %v718_v38 = vadd.f32 %v3284_v24, %v717_v34  ;;  %v719_v0 = vpop.f32.mrb[125].mxu1  ;;  %v1102_v40 = vpop.f32.mrb[124].mxu0 }
 0x210   :  { %2025 = vrcp.f32 %v1360_v22  ;;  %v1104_v41 = vpop.f32.mrb[125].mxu0 }
 0x211   :  { %v2016_v42 = vpop.eup %2015  ;;  %1549 = vst [vmem:[%s3576_s3 + $0x1b0] sm:$0xff] %v1485_v36  ;;  %v1297_v43 = vmul.f32 1.442695, %v1172_v37  ;;  %v1103_v33 = vadd.f32 %v1102_v40, %v718_v38 }
 0x212   :  { %v2018_v35 = vpop.eup %2017  ;;  %v1361_v39 = vadd.f32 1.0, %v2016_v42  ;;  %v722_v47 = vpop.f32.mrb[126].mxu1 }
 0x213   :  { %v1486_v31 = vmul.f32 %v2018_v35, %v3482_v5  ;;  %2027 = vpow2.f32 %v1297_v43  ;;  %v1173_v48 = vsub.f32 0.0, %v1103_v33  ;;  %v723_v3 = vadd.f32 %v3284_v24, %v722_v47  ;;  %v724_v50 = vpop.f32.mrb[127].mxu1  ;;  %v1107_v52 = vpop.f32.mrb[126].mxu0 }
 0x214   :  { %2029 = vrcp.f32 %v1361_v39  ;;  %v1109_v53 = vpop.f32.mrb[127].mxu0 }
 0x215   :  { %v2020_v54 = vpop.eup %2019  ;;  %1550 = vst [vmem:[%s3576_s3 + $0x1b8] sm:$0xff] %v1486_v31  ;;  %v1299_v56 = vmul.f32 1.442695, %v1173_v48  ;;  %v1108_v45 = vadd.f32 %v1107_v52, %v723_v3 }
 0x216   :  { %v2022_v46 = vpop.eup %2021  ;;  %v1362_v51 = vadd.f32 1.0, %v2020_v54 }
 0x217   :  { %v1487_v60 = vmul.f32 %v2022_v46, %v3490_v20  ;;  %2031 = vpow2.f32 %v1299_v56  ;;  %v1174_v5 = vsub.f32 0.0, %v1108_v45 }
 0x218   :  { %2033 = vrcp.f32 %v1362_v51 }
 0x219   :  { %v2024_v61 = vpop.eup %2023  ;;  %1551 = vst [vmem:[%s3576_s3 + $0x1c0] sm:$0xff] %v1487_v60  ;;  %v1301_v24 = vmul.f32 1.442695, %v1174_v5 }
 0x21a   :  { %v2026_v62 = vpop.eup %2025  ;;  %v1363_v63 = vadd.f32 1.0, %v2024_v61 }
 0x21b   :  { %v1488_v1 = vmul.f32 %v2026_v62, %v3498_v32  ;;  %2035 = vpow2.f32 %v1301_v24 }
 0x21c   :  { %2037 = vrcp.f32 %v1363_v63 }
 0x21d   :  { %v2028_v2 = vpop.eup %2027  ;;  %1552 = vst [vmem:[%s3576_s3 + $0x1c8] sm:$0xff] %v1488_v1 }
 0x21e   :  { %v2030_v20 = vpop.eup %2029  ;;  %v1364_v15 = vadd.f32 1.0, %v2028_v2 }
 0x21f   :  { %v1489_v6 = vmul.f32 %v2030_v20, %v3506_v44 }
 0x220   :  { %2039 = vrcp.f32 %v1364_v15 }
 0x221   :  { %v2032_v57 = vpop.eup %2031  ;;  %1553 = vst [vmem:[%s3576_s3 + $0x1d0] sm:$0xff] %v1489_v6 }
 0x222   :  { %v2034_v58 = vpop.eup %2033  ;;  %v1365_v4 = vadd.f32 1.0, %v2032_v57 }
 0x223   :  { %v1490_v32 = vmul.f32 %v2034_v58, %v3514_v49 }
 0x224   :  { %2041 = vrcp.f32 %v1365_v4 }
 0x225   :  { %v2036_v10 = vpop.eup %2035  ;;  %1554 = vst [vmem:[%s3576_s3 + $0x1d8] sm:$0xff] %v1490_v32 }
 0x226   :  { %v2038_v11 = vpop.eup %2037  ;;  %v1366_v12 = vadd.f32 1.0, %v2036_v10 }
 0x227   :  { %v1491_v44 = vmul.f32 %v2038_v11, %v3522_v7 }
 0x228   :  { %2043 = vrcp.f32 %v1366_v12 }
 0x229   :  { %1555 = vst [vmem:[%s3576_s3 + $0x1e0] sm:$0xff] %v1491_v44 }
 0x22a   :  { %v2040_v13 = vpop.eup %2039 }
 0x22b   :  { %v1492_v14 = vmul.f32 %v2040_v13, %v3530_v27 }
 0x22d   :  { %1556 = vst [vmem:[%s3576_s3 + $0x1e8] sm:$0xff] %v1492_v14 }
 0x22e   :  { %v2042_v49 = vpop.eup %2041 }
 0x22f   :  { %v1493_v16 = vmul.f32 %v2042_v49, %v1103_v33 }
 0x231   :  { %1557 = vst [vmem:[%s3576_s3 + $0x1f0] sm:$0xff] %v1493_v16 }
 0x232   :  { %v2044_v17 = vpop.eup %2043 }
 0x233   :  { %v1494_v18 = vmul.f32 %v2044_v17, %v1108_v45 }
 0x235   :  { %1558 = vst [vmem:[%s3576_s3 + $0x1f8] sm:$0xff] %v1494_v18 }

// kernel: sppf_bottleneck_forward.4
= control target key start
LH: loop header
LB: loop body
LE: loop exit
PB: predicated region body
PF: predicated region fallthrough
CT: control target
= control target key end

     0   :  { %s4831_s6 = smov 0   ;;  %s7972_s0 = inlined_call_operand.vmem [shape: f32[2,28,28,128], index: 0, kind: input, shape index: {}]   ;;  %s7973_s1 = inlined_call_operand.vmem [shape: f32[2,16,16,512], index: 1, kind: output, shape index: {}]  }
   0x1 LB: > { %s4793_s7 = sadd.s32 4294967295, %s4819_s6   ;;  %p4797_p0 = scmp.ge.s32.totalorder %s4819_s6, 1  ;;  %s4819_s6 = sphi %s4831_s6, %s11_s6  }
   0x2   : > { %p87_p1 = scmp.lt.s32.totalorder %s4819_s6, 3 }
   0x4   : > { %p88_p2 = pnand %p4797_p0, %p87_p1 }
   0x6   : > { %91 = sbr.rel (%p88_p2) target bundleno = 670 (0x29e), region = 24 }
   0xd   : > { %p107_p3 = scmp.lt.s32.totalorder %s4793_s7, 1  ;;  %v2346_v0 = vlaneseq  ;;  %vm277_vm0 = vcmask 1041408   ;;  %vm902_vm1 = vcmask 1046528   ;;  %vm1215_vm2 = vcmask 1045504  }
   0xe   : > { %vm1528_vm3 = vcmask 1044480   ;;  %vm1841_vm4 = vcmask 1043456  }
   0xf   : > { %s8367_s7 = smov (!%p107_p3, %s4793_s7), 1  ;;  %v4839_v1 = vshrl.u32 %v2346_v0, 7 }
  0x10   : > { %s4804_s8 = smul.u32 896, %s8367_s7  ;;  %s4803_s12 = sshll.u32 %s8367_s7, 10 }
  0x11   : > { %v4853_v9 = vadd.s32 16, %v4839_v1  ;;  %s4858_s15 = scalar_lea.vmem %s7973_s1, %s4803_s12  ;;  %vm2350_vm5 = vcmp.ge.s32.totalorder %v4839_v1, 4  ;;  %vm3812_vm7 = vcmp.ge.s32.totalorder %v4839_v1, 2 }
  0x12   : > { %s4844_s11 = scalar_lea.vmem %s7972_s0, %s4804_s8 }
  0x13   : > { %v133_v2 = vld [vmem:[%s4844_s11 + $0x80] sm:$0xff]  ;;  %v134_v3 = vld [vmem:[%s4844_s11 + $0x88] sm:$0xff]  ;;  %v135_v14 = vld [vmem:[%s4844_s11 + $0x90] sm:$0xff]  ;;  %vm2361_vm6 = vcmp.lt.s32.totalorder %v4853_v9, 20  ;;  %vm3823_vm8 = vcmp.lt.s32.totalorder %v4853_v9, 18 }
  0x14   : > { %v137_v4 = vld [vmem:[%s4844_s11 + $0xa0] sm:$0xff]  ;;  %v138_v5 = vld [vmem:[%s4844_s11 + $0xa8] sm:$0xff]  ;;  %v139_v15 = vld [vmem:[%s4844_s11 + $0xb0] sm:$0xff] }
  0x15   : > { %v141_v6 = vld [vmem:[%s4844_s11 + $0xc0] sm:$0xff]  ;;  %v142_v7 = vld [vmem:[%s4844_s11 + $0xc8] sm:$0xff]  ;;  %v438_v8 = vmax.f32 %v133_v2, %v137_v4  ;;  %v439_v12 = vmax.f32 %v134_v3, %v138_v5  ;;  %v143_v16 = vld [vmem:[%s4844_s11 + $0xd0] sm:$0xff]  ;;  %v440_v20 = vmax.f32 %v135_v14, %v139_v15 }
  0x16   : > { %v278_v10 = vrot.slane %v141_v6, 6  ;;  %v279_v11 = vrot.slane %v142_v7, 6  ;;  %v442_v13 = vmax.f32 %v137_v4, %v141_v6  ;;  %v443_v17 = vmax.f32 %v138_v5, %v142_v7  ;;  %v145_v21 = vld [vmem:[%s4844_s11 + $0xe0] sm:$0xff]  ;;  %v146_v22 = vld [vmem:[%s4844_s11 + $0xe8] sm:$0xff]  ;;  %v147_v27 = vld [vmem:[%s4844_s11 + $0xf0] sm:$0xff] }
  0x17   : > { %v534_v18 = vmax.f32 %v438_v8, %v141_v6  ;;  %v281_v19 = vrot.slane %v143_v16, 6  ;;  %v535_v24 = vmax.f32 %v439_v12, %v142_v7  ;;  %v444_v25 = vmax.f32 %v139_v15, %v143_v16  ;;  %v149_v36 = vld [vmem:[%s4844_s11 + $0x100] sm:$0xff]  ;;  %v150_v37 = vld [vmem:[%s4844_s11 + $0x108] sm:$0xff]  ;;  %v151_v46 = vld [vmem:[%s4844_s11 + $0x110] sm:$0xff] }
  0x18   : > { %v280_v23 = vsel %vm277_vm0, %v278_v10, %v279_v11  ;;  %v283_v26 = vrot.slane %v145_v21, 6  ;;  %v536_v29 = vmax.f32 %v440_v20, %v143_v16  ;;  %v284_v30 = vrot.slane %v146_v22, 6  ;;  %v153_v55 = vld [vmem:[%s4844_s11 + $0x120] sm:$0xff]  ;;  %v154_v56 = vld [vmem:[%s4844_s11 + $0x128] sm:$0xff] }
  0x19   : > { %390 = vst [vmem:[%s4858_s15] sm:$0xff] %v280_v23  ;;  %v282_v28 = vsel %vm277_vm0, %v279_v11, %v281_v19  ;;  %v446_v31 = vmax.f32 %v141_v6, %v145_v21  ;;  %v447_v32 = vmax.f32 %v142_v7, %v146_v22  ;;  %v538_v33 = vmax.f32 %v442_v13, %v145_v21  ;;  %v155_v6 = vld [vmem:[%s4844_s11 + $0x130] sm:$0xff]  ;;  %v157_v12 = vld [vmem:[%s4844_s11 + $0x140] sm:$0xff] }
  0x1a   : > { %391 = vst [vmem:[%s4858_s15 + $0x20] sm:$0xff] %v282_v28  ;;  %v539_v34 = vmax.f32 %v443_v17, %v146_v22  ;;  %v630_v35 = vmax.f32 %v534_v18, %v145_v21  ;;  %v285_v38 = vsel %vm277_vm0, %v283_v26, %v284_v30  ;;  %v631_v39 = vmax.f32 %v535_v24, %v146_v22  ;;  %v158_v17 = vld [vmem:[%s4844_s11 + $0x148] sm:$0xff]  ;;  %v159_v26 = vld [vmem:[%s4844_s11 + $0x150] sm:$0xff] }
  0x1b   : > { %v286_v40 = vrot.slane %v147_v27, 6  ;;  %v448_v41 = vmax.f32 %v143_v16, %v147_v27  ;;  %392 = vst [vmem:[%s4858_s15 + $0x40] sm:$0xff] %v285_v38  ;;  %v540_v42 = vmax.f32 %v444_v25, %v147_v27  ;;  %v632_v43 = vmax.f32 %v536_v29, %v147_v27 }
  0x1c   : > { %v288_v44 = vrot.slane %v149_v36, 6  ;;  %v289_v45 = vrot.slane %v150_v37, 6  ;;  %v450_v48 = vmax.f32 %v145_v21, %v149_v36  ;;  %v451_v49 = vmax.f32 %v146_v22, %v150_v37 }
  0x1d   : > { %v287_v47 = vsel %vm277_vm0, %v284_v30, %v286_v40  ;;  %v542_v50 = vmax.f32 %v446_v31, %v149_v36  ;;  %v543_v52 = vmax.f32 %v447_v32, %v150_v37  ;;  %v634_v53 = vmax.f32 %v538_v33, %v149_v36  ;;  %v4904_v31 = vld [vmem:[%s4844_s11 + $0x160] sm:$0xff] }
  0x1e   : > { %393 = vst [vmem:[%s4858_s15 + $0x60] sm:$0xff] %v287_v47  ;;  %v290_v51 = vsel %vm277_vm0, %v288_v44, %v289_v45  ;;  %v635_v54 = vmax.f32 %v539_v34, %v150_v37  ;;  %v4881_v57 = vmax.f32 %v630_v35, %v149_v36  ;;  %v4883_v58 = vmax.f32 %v631_v39, %v150_v37 }
  0x1f   : > { %394 = vst [vmem:[%s4858_s15 + $0x80] sm:$0xff] %v290_v51  ;;  %v291_v59 = vrot.slane %v151_v46, 6  ;;  %v452_v60 = vmax.f32 %v147_v27, %v151_v46  ;;  %v544_v61 = vmax.f32 %v448_v41, %v151_v46  ;;  %v636_v62 = vmax.f32 %v540_v42, %v151_v46 }
  0x20   : > { %v4885_v63 = vmax.f32 %v632_v43, %v151_v46  ;;  %v293_v0 = vrot.slane %v153_v55, 6  ;;  %v294_v3 = vrot.slane %v154_v56, 6  ;;  %v454_v4 = vmax.f32 %v149_v36, %v153_v55  ;;  %v162_v36 = vld [vmem:[%s4844_s11 + $0x168] sm:$0xff] }
  0x21   : > { %v292_v2 = vsel %vm277_vm0, %v289_v45, %v291_v59  ;;  %v455_v5 = vmax.f32 %v150_v37, %v154_v56  ;;  %v546_v7 = vmax.f32 %v450_v48, %v153_v55  ;;  %v547_v8 = vmax.f32 %v451_v49, %v154_v56  ;;  %v163_v45 = vld [vmem:[%s4844_s11 + $0x170] sm:$0xff] }
  0x22   : > { %395 = vst [vmem:[%s4858_s15 + $0xa0] sm:$0xff] %v292_v2  ;;  %v638_v10 = vmax.f32 %v542_v50, %v153_v55  ;;  %v639_v11 = vmax.f32 %v543_v52, %v154_v56  ;;  %v295_v13 = vsel %vm277_vm0, %v293_v0, %v294_v3  ;;  %v4892_v14 = vmax.f32 %v634_v53, %v153_v55 }
  0x23   : > { %v4894_v15 = vmax.f32 %v635_v54, %v154_v56  ;;  %v296_v16 = vrot.slane %v155_v6, 6  ;;  %396 = vst [vmem:[%s4858_s15 + $0xc0] sm:$0xff] %v295_v13  ;;  %v456_v18 = vmax.f32 %v151_v46, %v155_v6  ;;  %v548_v19 = vmax.f32 %v452_v60, %v155_v6  ;;  %v165_v54 = vld [vmem:[%s4844_s11 + $0x180] sm:$0xff] }
  0x24   : > { %v640_v20 = vmax.f32 %v544_v61, %v155_v6  ;;  %v4898_v21 = vmax.f32 %v636_v62, %v155_v6  ;;  %v298_v23 = vrot.slane %v157_v12, 6  ;;  %v299_v24 = vrot.slane %v158_v17, 6 }
  0x25   : > { %v297_v22 = vsel %vm277_vm0, %v294_v3, %v296_v16  ;;  %v458_v25 = vmax.f32 %v153_v55, %v157_v12  ;;  %v459_v27 = vmax.f32 %v154_v56, %v158_v17  ;;  %v550_v28 = vmax.f32 %v454_v4, %v157_v12  ;;  %v166_v55 = vld [vmem:[%s4844_s11 + $0x188] sm:$0xff]  ;;  %v167_v4 = vld [vmem:[%s4844_s11 + $0x190] sm:$0xff]  ;;  %v169_v16 = vld [vmem:[%s4844_s11 + $0x1a0] sm:$0xff] }
  0x26   : > { %397 = vst [vmem:[%s4858_s15 + $0xe0] sm:$0xff] %v297_v22  ;;  %v551_v29 = vmax.f32 %v455_v5, %v158_v17  ;;  %v642_v30 = vmax.f32 %v546_v7, %v157_v12  ;;  %v300_v32 = vsel %vm277_vm0, %v298_v23, %v299_v24  ;;  %v643_v33 = vmax.f32 %v547_v8, %v158_v17 }
  0x27   : > { %v4907_v34 = vmax.f32 %v638_v10, %v157_v12  ;;  %v4909_v35 = vmax.f32 %v639_v11, %v158_v17  ;;  %398 = vst [vmem:[%s4858_s15 + $0x100] sm:$0xff] %v300_v32  ;;  %v301_v37 = vrot.slane %v159_v26, 6  ;;  %v460_v38 = vmax.f32 %v155_v6, %v159_v26 }
  0x28   : > { %v552_v39 = vmax.f32 %v456_v18, %v159_v26  ;;  %v644_v40 = vmax.f32 %v548_v19, %v159_v26  ;;  %v4913_v41 = vmax.f32 %v640_v20, %v159_v26  ;;  %v303_v42 = vrot.slane %v4904_v31, 6 }
  0x29   : > { %v304_v43 = vrot.slane %v162_v36, 6  ;;  %v462_v44 = vmax.f32 %v157_v12, %v4904_v31  ;;  %v302_v46 = vsel %vm277_vm0, %v299_v24, %v301_v37  ;;  %v463_v47 = vmax.f32 %v158_v17, %v162_v36  ;;  %v170_v17 = vld [vmem:[%s4844_s11 + $0x1a8] sm:$0xff] }
  0x2a   : > { %v554_v48 = vmax.f32 %v458_v25, %v4904_v31  ;;  %v555_v49 = vmax.f32 %v459_v27, %v162_v36  ;;  %399 = vst [vmem:[%s4858_s15 + $0x120] sm:$0xff] %v302_v46  ;;  %v646_v51 = vmax.f32 %v550_v28, %v4904_v31  ;;  %v647_v52 = vmax.f32 %v551_v29, %v162_v36 }
  0x2b   : > { %v305_v50 = vsel %vm277_vm0, %v303_v42, %v304_v43  ;;  %v4924_v53 = vmax.f32 %v642_v30, %v4904_v31  ;;  %v4929_v56 = vmax.f32 %v643_v33, %v162_v36  ;;  %v306_v59 = vrot.slane %v163_v45, 6 }
  0x2c   : > { %400 = vst [vmem:[%s4858_s15 + $0x140] sm:$0xff] %v305_v50  ;;  %v464_v60 = vmax.f32 %v159_v26, %v163_v45  ;;  %v556_v61 = vmax.f32 %v460_v38, %v163_v45  ;;  %v648_v62 = vmax.f32 %v552_v39, %v163_v45  ;;  %v4931_v0 = vmax.f32 %v644_v40, %v163_v45  ;;  %v173_v38 = vld [vmem:[%s4844_s11 + $0x1c0] sm:$0xff] }
  0x2d   : > { %v308_v2 = vrot.slane %v165_v54, 6  ;;  %v309_v3 = vrot.slane %v166_v55, 6  ;;  %v307_v5 = vsel %vm277_vm0, %v304_v43, %v306_v59  ;;  %v466_v6 = vmax.f32 %v4904_v31, %v165_v54  ;;  %v171_v31 = vld [vmem:[%s4844_s11 + $0x1b0] sm:$0xff] }
  0x2e   : > { %v467_v7 = vmax.f32 %v162_v36, %v166_v55  ;;  %v558_v8 = vmax.f32 %v462_v44, %v165_v54  ;;  %401 = vst [vmem:[%s4858_s15 + $0x160] sm:$0xff] %v307_v5  ;;  %v559_v11 = vmax.f32 %v463_v47, %v166_v55  ;;  %v650_v12 = vmax.f32 %v554_v48, %v165_v54  ;;  %v174_v44 = vld [vmem:[%s4844_s11 + $0x1c8] sm:$0xff] }
  0x2f   : > { %v310_v10 = vsel %vm277_vm0, %v308_v2, %v309_v3  ;;  %v651_v13 = vmax.f32 %v555_v49, %v166_v55  ;;  %v4941_v18 = vmax.f32 %v646_v51, %v165_v54  ;;  %v4943_v19 = vmax.f32 %v647_v52, %v166_v55 }
  0x30   : > { %402 = vst [vmem:[%s4858_s15 + $0x180] sm:$0xff] %v310_v10  ;;  %v311_v20 = vrot.slane %v167_v4, 6  ;;  %v468_v22 = vmax.f32 %v163_v45, %v167_v4  ;;  %v560_v23 = vmax.f32 %v464_v60, %v167_v4  ;;  %v652_v24 = vmax.f32 %v556_v61, %v167_v4 }
  0x31   : > { %v4945_v25 = vmax.f32 %v648_v62, %v167_v4  ;;  %v313_v26 = vrot.slane %v169_v16, 6  ;;  %v314_v28 = vrot.slane %v170_v17, 6  ;;  %v470_v29 = vmax.f32 %v165_v54, %v169_v16  ;;  %v175_v54 = vld [vmem:[%s4844_s11 + $0x1d0] sm:$0xff]  ;;  %v4964_v62 = vld [vmem:[%s4844_s11 + $0x1e0] sm:$0xff] }
  0x32   : > { %v312_v27 = vsel %vm277_vm0, %v309_v3, %v311_v20  ;;  %v471_v30 = vmax.f32 %v166_v55, %v170_v17  ;;  %v562_v32 = vmax.f32 %v466_v6, %v169_v16  ;;  %v563_v33 = vmax.f32 %v467_v7, %v170_v17  ;;  %v178_v6 = vld [vmem:[%s4844_s11 + $0x1e8] sm:$0xff]  ;;  %v179_v20 = vld [vmem:[%s4844_s11 + $0x1f0] sm:$0xff] }
  0x33   : > { %403 = vst [vmem:[%s4858_s15 + $0x1a0] sm:$0xff] %v312_v27  ;;  %v654_v36 = vmax.f32 %v558_v8, %v169_v16  ;;  %v655_v37 = vmax.f32 %v559_v11, %v170_v17  ;;  %v315_v39 = vsel %vm277_vm0, %v313_v26, %v314_v28  ;;  %v4952_v40 = vmax.f32 %v650_v12, %v169_v16 }
  0x34   : > { %v4954_v42 = vmax.f32 %v651_v13, %v170_v17  ;;  %v316_v43 = vrot.slane %v171_v31, 6  ;;  %404 = vst [vmem:[%s4858_s15 + $0x1c0] sm:$0xff] %v315_v39  ;;  %v472_v45 = vmax.f32 %v167_v4, %v171_v31  ;;  %v564_v46 = vmax.f32 %v468_v22, %v171_v31 }
  0x35   : > { %v656_v47 = vmax.f32 %v560_v23, %v171_v31  ;;  %v4958_v48 = vmax.f32 %v652_v24, %v171_v31  ;;  %v318_v50 = vrot.slane %v173_v38, 6  ;;  %v319_v51 = vrot.slane %v174_v44, 6 }
  0x36   : > { %v317_v49 = vsel %vm277_vm0, %v314_v28, %v316_v43  ;;  %v474_v52 = vmax.f32 %v169_v16, %v173_v38  ;;  %v475_v55 = vmax.f32 %v170_v17, %v174_v44  ;;  %v566_v59 = vmax.f32 %v470_v29, %v173_v38 }
  0x37   : > { %405 = vst [vmem:[%s4858_s15 + $0x1e0] sm:$0xff] %v317_v49  ;;  %v567_v60 = vmax.f32 %v471_v30, %v174_v44  ;;  %v658_v61 = vmax.f32 %v562_v32, %v173_v38  ;;  %v320_v2 = vsel %vm277_vm0, %v318_v50, %v319_v51  ;;  %v659_v3 = vmax.f32 %v563_v33, %v174_v44  ;;  %v4990_v32 = vld [vmem:[%s4844_s11 + $0x208] sm:$0xff] }
  0x38   : > { %v4967_v4 = vmax.f32 %v654_v36, %v173_v38  ;;  %v4969_v5 = vmax.f32 %v655_v37, %v174_v44  ;;  %406 = vst [vmem:[%s4858_s15 + $0x200] sm:$0xff] %v320_v2  ;;  %v321_v7 = vrot.slane %v175_v54, 6  ;;  %v476_v8 = vmax.f32 %v171_v31, %v175_v54  ;;  %v4987_v31 = vld [vmem:[%s4844_s11 + $0x200] sm:$0xff] }
  0x39   : > { %v568_v10 = vmax.f32 %v472_v45, %v175_v54  ;;  %v660_v11 = vmax.f32 %v564_v46, %v175_v54  ;;  %v4973_v12 = vmax.f32 %v656_v47, %v175_v54  ;;  %v323_v13 = vrot.slane %v4964_v62, 6  ;;  %v5000_v46 = vld [vmem:[%s4844_s11 + $0x210] sm:$0xff] }
  0x3a   : > { %v324_v16 = vrot.slane %v178_v6, 6  ;;  %v478_v17 = vmax.f32 %v173_v38, %v4964_v62  ;;  %v322_v22 = vsel %vm277_vm0, %v319_v51, %v321_v7  ;;  %v479_v23 = vmax.f32 %v174_v44, %v178_v6 }
  0x3b   : > { %v570_v24 = vmax.f32 %v474_v52, %v4964_v62  ;;  %v571_v26 = vmax.f32 %v475_v55, %v178_v6  ;;  %407 = vst [vmem:[%s4858_s15 + $0x220] sm:$0xff] %v322_v22  ;;  %v662_v28 = vmax.f32 %v566_v59, %v4964_v62  ;;  %v663_v29 = vmax.f32 %v567_v60, %v178_v6  ;;  %v5013_v60 = vld [vmem:[%s4844_s11 + $0x220] sm:$0xff]  ;;  %v5040_v22 = vld [vmem:[%s4844_s11 + $0x230] sm:$0xff] }
  0x3c   : > { %v325_v27 = vsel %vm277_vm0, %v323_v13, %v324_v16  ;;  %v4984_v30 = vmax.f32 %v658_v61, %v4964_v62  ;;  %v4993_v33 = vmax.f32 %v659_v3, %v178_v6  ;;  %v326_v36 = vrot.slane %v179_v20, 6  ;;  %v5016_v61 = vld [vmem:[%s4844_s11 + $0x228] sm:$0xff] }
  0x3d   : > { %408 = vst [vmem:[%s4858_s15 + $0x240] sm:$0xff] %v325_v27  ;;  %v480_v37 = vmax.f32 %v175_v54, %v179_v20  ;;  %v572_v38 = vmax.f32 %v476_v8, %v179_v20  ;;  %v664_v39 = vmax.f32 %v568_v10, %v179_v20  ;;  %v4995_v43 = vmax.f32 %v660_v11, %v179_v20 }
  0x3e   : > { %v328_v44 = vrot.slane %v4987_v31, 6  ;;  %v329_v45 = vrot.slane %v4990_v32, 6  ;;  %v327_v47 = vsel %vm277_vm0, %v324_v16, %v326_v36  ;;  %v482_v49 = vmax.f32 %v4964_v62, %v4987_v31 }
  0x3f   : > { %v483_v50 = vmax.f32 %v178_v6, %v4990_v32  ;;  %v574_v51 = vmax.f32 %v478_v17, %v4987_v31  ;;  %409 = vst [vmem:[%s4858_s15 + $0x260] sm:$0xff] %v327_v47  ;;  %v575_v54 = vmax.f32 %v479_v23, %v4990_v32  ;;  %v666_v55 = vmax.f32 %v570_v24, %v4987_v31  ;;  %v5070_v47 = vld [vmem:[%s4844_s11 + $0x250] sm:$0xff] }
  0x40   : > { %v330_v52 = vsel %vm277_vm0, %v328_v44, %v329_v45  ;;  %v667_v59 = vmax.f32 %v571_v26, %v4990_v32  ;;  %v5020_v62 = vmax.f32 %v662_v28, %v4987_v31  ;;  %v5023_v2 = vmax.f32 %v663_v29, %v4990_v32  ;;  %v5048_v28 = vld [vmem:[%s4844_s11 + $0x240] sm:$0xff] }
  0x41   : > { %410 = vst [vmem:[%s4858_s15 + $0x280] sm:$0xff] %v330_v52  ;;  %v331_v3 = vrot.slane %v5000_v46, 6  ;;  %v484_v6 = vmax.f32 %v179_v20, %v5000_v46  ;;  %v576_v7 = vmax.f32 %v480_v37, %v5000_v46  ;;  %v668_v8 = vmax.f32 %v572_v38, %v5000_v46  ;;  %v5059_v37 = vld [vmem:[%s4844_s11 + $0x248] sm:$0xff] }
  0x42   : > { %v5030_v10 = vmax.f32 %v664_v39, %v5000_v46  ;;  %v333_v11 = vrot.slane %v5013_v60, 6  ;;  %v334_v16 = vrot.slane %v5016_v61, 6  ;;  %v486_v17 = vmax.f32 %v4987_v31, %v5013_v60 }
  0x43   : > { %v332_v13 = vsel %vm277_vm0, %v329_v45, %v331_v3  ;;  %v487_v20 = vmax.f32 %v4990_v32, %v5016_v61  ;;  %v578_v23 = vmax.f32 %v482_v49, %v5013_v60  ;;  %v579_v24 = vmax.f32 %v483_v50, %v5016_v61 }
  0x44   : > { %411 = vst [vmem:[%s4858_s15 + $0x2a0] sm:$0xff] %v332_v13  ;;  %v670_v26 = vmax.f32 %v574_v51, %v5013_v60  ;;  %v671_v27 = vmax.f32 %v575_v54, %v5016_v61  ;;  %v335_v29 = vsel %vm277_vm0, %v333_v11, %v334_v16  ;;  %v5052_v31 = vmax.f32 %v666_v55, %v5013_v60  ;;  %v5080_v54 = vld [vmem:[%s4844_s11 + $0x268] sm:$0xff] }
  0x45   : > { %v5055_v32 = vmax.f32 %v667_v59, %v5016_v61  ;;  %v336_v36 = vrot.slane %v5040_v22, 6  ;;  %412 = vst [vmem:[%s4858_s15 + $0x2c0] sm:$0xff] %v335_v29  ;;  %v488_v38 = vmax.f32 %v5000_v46, %v5040_v22  ;;  %v580_v39 = vmax.f32 %v484_v6, %v5040_v22  ;;  %v5077_v46 = vld [vmem:[%s4844_s11 + $0x260] sm:$0xff] }
  0x46   : > { %v672_v44 = vmax.f32 %v576_v7, %v5040_v22  ;;  %v5067_v45 = vmax.f32 %v668_v8, %v5040_v22  ;;  %v338_v50 = vrot.slane %v5048_v28, 6  ;;  %v339_v51 = vrot.slane %v5059_v37, 6  ;;  %v5092_v7 = vld [vmem:[%s4844_s11 + $0x270] sm:$0xff]  ;;  %v197_v29 = vld [vmem:[%s4844_s11 + $0x280] sm:$0xff] }
  0x47   : > { %v337_v49 = vsel %vm277_vm0, %v334_v16, %v336_v36  ;;  %v674_v52 = vmax.f32 %v578_v23, %v5048_v28  ;;  %v675_v55 = vmax.f32 %v579_v24, %v5059_v37  ;;  %v5085_v59 = vmax.f32 %v670_v26, %v5048_v28  ;;  %v5111_v36 = vld [vmem:[%s4844_s11 + $0x288] sm:$0xff] }
  0x48   : > { %413 = vst [vmem:[%s4858_s15 + $0x2e0] sm:$0xff] %v337_v49  ;;  %v5088_v3 = vmax.f32 %v671_v27, %v5059_v37  ;;  %v341_v6 = vrot.slane %v5070_v47, 6  ;;  %v340_v8 = vsel %vm277_vm0, %v338_v50, %v339_v51  ;;  %v676_v11 = vmax.f32 %v580_v39, %v5070_v47 }
  0x49   : > { %8118 = vst [vmem:[#allocation2_spill] sm:$0xff] %v5085_v59  ;;  %v5097_v13 = vmax.f32 %v672_v44, %v5070_v47  ;;  %v343_v16 = vrot.slane %v5077_v46, 6  ;;  %414 = vst [vmem:[%s4858_s15 + $0x300] sm:$0xff] %v340_v8  ;;  %v344_v24 = vrot.slane %v5080_v54, 6  ;;  %v5104_v26 = vmax.f32 %v674_v52, %v5077_v46 }
  0x4a   : > { %8119 = vst [vmem:[#allocation3_spill] sm:$0xff] %v5088_v3  ;;  %v342_v23 = vsel %vm277_vm0, %v339_v51, %v341_v6  ;;  %v5107_v27 = vmax.f32 %v675_v55, %v5080_v54  ;;  %v346_v39 = vrot.slane %v5092_v7, 6  ;;  %v5116_v44 = vmax.f32 %v676_v11, %v5092_v7  ;;  %v5120_v51 = vld [vmem:[%s4844_s11 + $0x290] sm:$0xff] }
  0x4b   : > { %8120 = vst [vmem:[#allocation4_spill] sm:$0xff] %v5097_v13  ;;  %8121 = vst [vmem:[#allocation5_spill] sm:$0xff] %v5104_v26  ;;  %v348_v49 = vrot.slane %v197_v29, 6  ;;  %v349_v50 = vrot.slane %v5111_v36, 6  ;;  %v345_v52 = vsel %vm277_vm0, %v343_v16, %v344_v24  ;;  %v582_v55 = vmax.f32 %v486_v17, %v5048_v28  ;;  %v202_v26 = vld [vmem:[%s4844_s11 + $0x2a8] sm:$0xff] }
  0x4c   : > { %8122 = vst [vmem:[#allocation6_spill] sm:$0xff] %v5107_v27  ;;  %415 = vst [vmem:[%s4858_s15 + $0x320] sm:$0xff] %v342_v23  ;;  %v583_v6 = vmax.f32 %v487_v20, %v5059_v37  ;;  %v351_v8 = vrot.slane %v5120_v51, 6  ;;  %v201_v23 = vld [vmem:[%s4844_s11 + $0x2a0] sm:$0xff]  ;;  %v347_v11 = vsel %vm277_vm0, %v344_v24, %v346_v39  ;;  %v584_v27 = vmax.f32 %v488_v38, %v5070_v47 }
  0x4d   : > { %8123 = vst [vmem:[#allocation7_spill] sm:$0xff] %v5116_v44  ;;  %416 = vst [vmem:[%s4858_s15 + $0x340] sm:$0xff] %v345_v52  ;;  %v350_v44 = vsel %vm277_vm0, %v348_v49, %v349_v50  ;;  %v353_v13 = vrot.slane %v201_v23, 6  ;;  %v678_v17 = vmax.f32 %v582_v55, %v5077_v46  ;;  %v354_v3 = vrot.slane %v202_v26, 6 }
  0x4e   : > { %417 = vst [vmem:[%s4858_s15 + $0x360] sm:$0xff] %v347_v11  ;;  %418 = vst [vmem:[%s4858_s15 + $0x380] sm:$0xff] %v350_v44  ;;  %v679_v16 = vmax.f32 %v583_v6, %v5080_v54  ;;  %v352_v20 = vsel %vm277_vm0, %v349_v50, %v351_v8  ;;  %v680_v24 = vmax.f32 %v584_v27, %v5092_v7  ;;  %v203_v6 = vld [vmem:[%s4844_s11 + $0x2b0] sm:$0xff]  ;;  %v205_v8 = vld [vmem:[%s4844_s11 + $0x2c0] sm:$0xff] }
  0x4f   : > { %419 = vst [vmem:[%s4858_s15 + $0x3a0] sm:$0xff] %v352_v20  ;;  %v490_v38 = vmax.f32 %v5013_v60, %v5048_v28  ;;  %v491_v39 = vmax.f32 %v5016_v61, %v5059_v37  ;;  %v494_v44 = vmax.f32 %v5048_v28, %v5077_v46  ;;  %v5145_v49 = vmax.f32 %v678_v17, %v197_v29  ;;  %v206_v11 = vld [vmem:[%s4844_s11 + $0x2c8] sm:$0xff] }
  0x50   : > { %v5148_v50 = vmax.f32 %v679_v16, %v5111_v36  ;;  %v355_v52 = vsel %vm277_vm0, %v353_v13, %v354_v3  ;;  %v495_v27 = vmax.f32 %v5059_v37, %v5080_v54  ;;  %v5154_v55 = vmax.f32 %v680_v24, %v5120_v51 }
  0x51   : > { %8124 = vst [vmem:[#allocation8_spill] sm:$0xff] %v5145_v49  ;;  %420 = vst [vmem:[%s4858_s15 + $0x3c0] sm:$0xff] %v355_v52  ;;  %v498_v60 = vmax.f32 %v5077_v46, %v197_v29  ;;  %v499_v61 = vmax.f32 %v5080_v54, %v5111_v36  ;;  %v586_v28 = vmax.f32 %v490_v38, %v5077_v46  ;;  %v356_v16 = vrot.slane %v203_v6, 6  ;;  %v210_v49 = vld [vmem:[%s4844_s11 + $0x2e8] sm:$0xff] }
  0x52   : > { %8125 = vst [vmem:[#allocation9_spill] sm:$0xff] %v5148_v50  ;;  %8126 = vst [vmem:[#allocation10_spill] sm:$0xff] %v5154_v55  ;;  %v587_v13 = vmax.f32 %v491_v39, %v5080_v54  ;;  %v590_v17 = vmax.f32 %v494_v44, %v197_v29  ;;  %v591_v37 = vmax.f32 %v495_v27, %v5111_v36  ;;  %v209_v50 = vld [vmem:[%s4844_s11 + $0x2e0] sm:$0xff] }
  0x53   : > { %v594_v20 = vmax.f32 %v498_v60, %v201_v23  ;;  %v595_v24 = vmax.f32 %v499_v61, %v202_v26  ;;  %v682_v52 = vmax.f32 %v586_v28, %v197_v29  ;;  %v492_v55 = vmax.f32 %v5040_v22, %v5070_v47 }
  0x54   : > { %v683_v46 = vmax.f32 %v587_v13, %v5111_v36  ;;  %v686_v38 = vmax.f32 %v590_v17, %v201_v23  ;;  %v687_v59 = vmax.f32 %v591_v37, %v202_v26  ;;  %v357_v54 = vsel %vm277_vm0, %v354_v3, %v356_v16 }
  0x55   : > { %v690_v39 = vmax.f32 %v594_v20, %v205_v8  ;;  %v691_v44 = vmax.f32 %v595_v24, %v206_v11  ;;  %v5172_v27 = vmax.f32 %v682_v52, %v201_v23  ;;  %421 = vst [vmem:[%s4858_s15 + $0x3e0] sm:$0xff] %v357_v54  ;;  %v496_v29 = vmax.f32 %v5070_v47, %v5092_v7  ;;  %v207_v23 = vld [vmem:[%s4844_s11 + $0x2d0] sm:$0xff] }
  0x56   : > { %v5177_v22 = vmax.f32 %v683_v46, %v202_v26  ;;  %v5179_v60 = vmax.f32 %v686_v38, %v205_v8  ;;  %v5181_v36 = vmax.f32 %v687_v59, %v206_v11  ;;  %v500_v61 = vmax.f32 %v5092_v7, %v5120_v51  ;;  %v211_v11 = vld [vmem:[%s4844_s11 + $0x2f0] sm:$0xff] }
  0x57   : > { %v5185_v3 = vmax.f32 %v690_v39, %v209_v50  ;;  %v5187_v28 = vmax.f32 %v691_v44, %v210_v49  ;;  %v588_v13 = vmax.f32 %v492_v55, %v5092_v7  ;;  %v592_v17 = vmax.f32 %v496_v29, %v5120_v51 }
  0x58   : > { %v596_v47 = vmax.f32 %v500_v61, %v203_v6  ;;  %v931_v26 = vrot.slane %v4881_v57, 1  ;;  %v932_v8 = vrot.slane %v4883_v58, 1  ;;  %v7987_v59 = vrot.slane %v4885_v63, 1 }
  0x59   : > { %8127 = vst [vmem:[#allocation11_spill] sm:$0xff] %v5185_v3  ;;  %8128 = vst [vmem:[#allocation12_spill] sm:$0xff] %v5187_v28  ;;  %v684_v37 = vmax.f32 %v588_v13, %v5120_v51  ;;  %v688_v50 = vmax.f32 %v592_v17, %v203_v6  ;;  %v939_v49 = vrot.slane %v4894_v15, 1  ;;  %v7984_v16 = vrot.slane %v4898_v21, 1 }
  0x5a   : > { %v692_v20 = vmax.f32 %v596_v47, %v207_v23  ;;  %v933_v7 = vsel %vm902_vm1, %v931_v26, %v932_v8  ;;  %v935_v55 = vsel %vm902_vm1, %v932_v8, %v7987_v59  ;;  %v7992_v24 = vrot.slane %v4909_v35, 1 }
  0x5b   : > { %v5204_v52 = vmax.f32 %v684_v37, %v203_v6  ;;  %v5206_v46 = vmax.f32 %v688_v50, %v207_v23  ;;  %v942_v51 = vsel %vm902_vm1, %v939_v49, %v7984_v16  ;;  %v7983_v38 = vrot.slane %v4913_v41, 1 }
  0x5c   : > { %v5214_v54 = vmax.f32 %v692_v20, %v211_v11  ;;  %v1155_v39 = vmax.f32 %v4881_v57, %v933_v7  ;;  %v1156_v44 = vmax.f32 %v4883_v58, %v935_v55  ;;  %v1159_v6 = vmax.f32 %v4894_v15, %v942_v51 }
  0x5d   : > { %v949_v61 = vsel %vm902_vm1, %v7992_v24, %v7983_v38  ;;  %v1244_v23 = vrot.slane %v4881_v57, 2  ;;  %v1245_v13 = vrot.slane %v4883_v58, 2  ;;  %v7985_v47 = vrot.slane %v4885_v63, 2 }
  0x5e   : > { %8129 = vst [vmem:[#allocation13_spill] sm:$0xff] %v5214_v54  ;;  %v1162_v17 = vmax.f32 %v4909_v35, %v949_v61  ;;  %v1252_v26 = vrot.slane %v4894_v15, 2  ;;  %v7986_v8 = vrot.slane %v4898_v21, 2  ;;  %v7990_v37 = vrot.slane %v4909_v35, 2 }
  0x5f   : > { %v1246_v11 = vsel %vm1215_vm2, %v1244_v23, %v1245_v13  ;;  %v7988_v50 = vrot.slane %v4913_v41, 2  ;;  %v1557_v20 = vrot.slane %v4881_v57, 3  ;;  %v1248_v7 = vsel %vm1215_vm2, %v1245_v13, %v7985_v47 }
  0x60   : > { %v1255_v55 = vsel %vm1215_vm2, %v1252_v26, %v7986_v8  ;;  %v1468_v51 = vmax.f32 %v1155_v39, %v1246_v11  ;;  %v1558_v61 = vrot.slane %v4883_v58, 3  ;;  %v1469_v29 = vmax.f32 %v1156_v44, %v1248_v7 }
  0x61   : > { %v1262_v23 = vsel %vm1215_vm2, %v7990_v37, %v7988_v50  ;;  %v1472_v38 = vmax.f32 %v1159_v6, %v1255_v55  ;;  %v7989_v16 = vrot.slane %v4885_v63, 3  ;;  %v1565_v8 = vrot.slane %v4894_v15, 3  ;;  %v136_v55 = vld [vmem:[%s4844_s11 + $0x98] sm:$0xf] }
  0x62   : > { %v1475_v13 = vmax.f32 %v1162_v17, %v1262_v23  ;;  %v1559_v47 = vsel %vm1528_vm3, %v1557_v20, %v1558_v61  ;;  %v7991_v39 = vrot.slane %v4898_v21, 3  ;;  %v7997_v59 = vrot.slane %v4909_v35, 3  ;;  %v140_v23 = vld [vmem:[%s4844_s11 + $0xb8] sm:$0xf] }
  0x63   : > { %v1561_v11 = vsel %vm1528_vm3, %v1558_v61, %v7989_v16  ;;  %v7993_v50 = vrot.slane %v4913_v41, 3  ;;  %v1781_v44 = vmax.f32 %v1468_v51, %v1559_v47  ;;  %v1870_v20 = vrot.slane %v4881_v57, 4 }
  0x64   : > { %v1568_v6 = vsel %vm1528_vm3, %v1565_v8, %v7991_v39  ;;  %v1782_v17 = vmax.f32 %v1469_v29, %v1561_v11  ;;  %v1871_v7 = vrot.slane %v4883_v58, 4  ;;  %v1873_v47 = vrot.slane %v4885_v63, 4 }
  0x65   : > { %v1575_v61 = vsel %vm1528_vm3, %v7997_v59, %v7993_v50  ;;  %v1785_v16 = vmax.f32 %v1472_v38, %v1568_v6  ;;  %v1878_v51 = vrot.slane %v4894_v15, 4  ;;  %v7994_v57 = vrot.slane %v4898_v21, 4 }
  0x66   : > { %v1788_v37 = vmax.f32 %v1475_v13, %v1575_v61  ;;  %v1872_v29 = vsel %vm1841_vm4, %v1870_v20, %v1871_v7  ;;  %v7996_v58 = vrot.slane %v4909_v35, 4  ;;  %v1874_v11 = vsel %vm1841_vm4, %v1871_v7, %v1873_v47 }
  0x67   : > { %v7995_v39 = vrot.slane %v4913_v41, 4  ;;  %v2094_v24 = vmax.f32 %v1781_v44, %v1872_v29  ;;  %v441_v50 = vmax.f32 %v136_v55, %v140_v23  ;;  %v1881_v38 = vsel %vm1841_vm4, %v1878_v51, %v7994_v57 }
  0x68   : > { %v5279_v6 = vmax.f32 %v1782_v17, %v1874_v11  ;;  %v938_v13 = vrot.slane %v4892_v14, 1  ;;  %v1251_v20 = vrot.slane %v4892_v14, 2  ;;  %v5288_v61 = vmax.f32 %v1785_v16, %v1881_v38  ;;  %v5295_v17 = vld [vmem:[%s4844_s11 + $0xd8] sm:$0xf] }
  0x69   : > { %v1888_v7 = vsel %vm1841_vm4, %v7996_v58, %v7995_v39  ;;  %v2202_v44 = vrot.slane %v2094_v24, 4  ;;  %v5292_v55 = vsel %vm2350_vm5, %v2094_v24, -inf  ;;  %v537_v57 = vmax.f32 %v441_v50, %v5295_v17  ;;  %v5307_v39 = vld [vmem:[%s4844_s11 + $0xf8] sm:$0xf] }
  0x6a   : > { %8130 = vst [vmem:[#allocation14_spill] sm:$0xff] %v5288_v61  ;;  %v5297_v29 = vmax.f32 %v1788_v37, %v1888_v7  ;;  %v7998_v11 = vrot.slane %v5279_v6, 4  ;;  %v940_v16 = vsel %vm902_vm1, %v938_v13, %v939_v49  ;;  %v2453_v38 = vmax.f32 %v5279_v6, %v5288_v61 }
  0x6b   : > { %v1158_v24 = vmax.f32 %v4892_v14, %v940_v16  ;;  %v1253_v58 = vsel %vm1215_vm2, %v1251_v20, %v1252_v26  ;;  %v1564_v37 = vrot.slane %v4892_v14, 3  ;;  %v633_v49 = vmax.f32 %v537_v57, %v5307_v39  ;;  %v5324_v16 = vld [vmem:[%s4844_s11 + $0x118] sm:$0xf] }
  0x6c   : > { %8131 = vst [vmem:[#allocation15_spill] sm:$0xff] %v5297_v29  ;;  %v2204_v7 = vsel %vm1841_vm4, %v2202_v44, %v7998_v11  ;;  %v1877_v50 = vrot.slane %v4892_v14, 4  ;;  %v5321_v13 = vmax.f32 %v2453_v38, %v5297_v29  ;;  %v445_v15 = vmax.f32 %v140_v23, %v5295_v17 }
  0x6d   : > { %2314 = vst [vmem:[%s4858_s15 + $0x8] sm:$0xff] %v2204_v7  ;;  %v1471_v26 = vmax.f32 %v1158_v24, %v1253_v58  ;;  %v1566_v20 = vsel %vm1528_vm3, %v1564_v37, %v1565_v8  ;;  %v729_v44 = vmax.f32 %v633_v49, %v5324_v16  ;;  %v945_v57 = vrot.slane %v4907_v34, 1 }
  0x6e   : > { %8132 = vst [vmem:[#allocation16_spill] sm:$0xff] %v5321_v13  ;;  %v1879_v11 = vsel %vm1841_vm4, %v1877_v50, %v1878_v51  ;;  %v1258_v7 = vrot.slane %v4907_v34, 2  ;;  %v1571_v38 = vrot.slane %v4907_v34, 3  ;;  %v1884_v54 = vrot.slane %v4907_v34, 4 }
  0x6f   : > { %v1784_v14 = vmax.f32 %v1471_v26, %v1566_v20  ;;  %v936_v58 = vrot.slane %v729_v44, 1  ;;  %v1249_v24 = vrot.slane %v729_v44, 2  ;;  %v1562_v8 = vrot.slane %v729_v44, 3 }
  0x70   : > { %v1875_v37 = vrot.slane %v729_v44, 4  ;;  %v541_v51 = vmax.f32 %v445_v15, %v5307_v39  ;;  %v8133_v23 = vrot.slane %v4909_v35, 1  ;;  %v8134_v26 = vrot.slane %v4909_v35, 2 }
  0x71   : > { %v2097_v49 = vmax.f32 %v1784_v14, %v1879_v11  ;;  %v8135_v59 = vrot.slane %v4885_v63, 1  ;;  %v8136_v3 = vrot.slane %v4885_v63, 2  ;;  %v8137_v11 = vrot.slane %v4885_v63, 3 }
  0x72   : > { %v947_v50 = vsel %vm902_vm1, %v945_v57, %v8133_v23  ;;  %v1260_v20 = vsel %vm1215_vm2, %v1258_v7, %v8134_v26  ;;  %v1876_v14 = vsel %vm1841_vm4, %v1873_v47, %v1875_v37 }
  0x73   : > { %v937_v28 = vsel %vm902_vm1, %v8135_v59, %v936_v58  ;;  %v1250_v44 = vsel %vm1215_vm2, %v8136_v3, %v1249_v24  ;;  %v1563_v15 = vsel %vm1528_vm3, %v8137_v11, %v1562_v8  ;;  %v2207_v23 = vrot.slane %v2097_v49, 4  ;;  %v5362_v3 = vld [vmem:[%s4844_s11 + $0x138] sm:$0xf] }
  0x74   : > { %v1157_v57 = vmax.f32 %v4885_v63, %v937_v28  ;;  %v5356_v7 = vsel %vm2350_vm5, %v2097_v49, -inf  ;;  %v637_v59 = vmax.f32 %v541_v51, %v5324_v16  ;;  %v1161_v24 = vmax.f32 %v4907_v34, %v947_v50 }
  0x75   : > { %v2452_v58 = vmax.f32 %v5292_v55, %v5356_v7  ;;  %v8138_v8 = vrot.slane %v4909_v35, 3  ;;  %v8139_v63 = vrot.slane %v4909_v35, 4  ;;  %v8140_v49 = vrot.slane %v5288_v61, 4 }
  0x76   : > { %v1470_v37 = vmax.f32 %v1157_v57, %v1250_v44  ;;  %v733_v26 = vmax.f32 %v637_v59, %v5362_v3  ;;  %v2213_v55 = vrot.slane %v5297_v29, 4  ;;  %v1474_v11 = vmax.f32 %v1161_v24, %v1260_v20 }
  0x77   : > { %v1573_v47 = vsel %vm1528_vm3, %v1571_v38, %v8138_v8  ;;  %v1886_v28 = vsel %vm1841_vm4, %v1884_v54, %v8139_v63  ;;  %v2209_v51 = vsel %vm1841_vm4, %v2207_v23, %v8140_v49  ;;  %v449_v34 = vmax.f32 %v5295_v17, %v5307_v39 }
  0x78   : > { %2316 = vst [vmem:[%s4858_s15 + $0x48] sm:$0xff] %v2209_v51  ;;  %v952_v38 = vrot.slane %v4924_v53, 1  ;;  %v953_v35 = vrot.slane %v4929_v56, 1  ;;  %v1783_v50 = vmax.f32 %v1470_v37, %v1563_v15  ;;  %v943_v54 = vrot.slane %v733_v26, 1 }
  0x79   : > { %v1256_v44 = vrot.slane %v733_v26, 2  ;;  %v1569_v57 = vrot.slane %v733_v26, 3  ;;  %v1882_v8 = vrot.slane %v733_v26, 4  ;;  %v1787_v23 = vmax.f32 %v1474_v11, %v1573_v47 }
  0x7a   : > { %v545_v59 = vmax.f32 %v449_v34, %v5324_v16  ;;  %v954_v63 = vsel %vm902_vm1, %v952_v38, %v953_v35  ;;  %v2096_v49 = vmax.f32 %v1783_v50, %v1876_v14  ;;  %v8141_v20 = vrot.slane %v4898_v21, 1 }
  0x7b   : > { %v8142_v24 = vrot.slane %v4898_v21, 2  ;;  %v8143_v15 = vrot.slane %v4898_v21, 3  ;;  %v8144_v47 = vrot.slane %v4898_v21, 4  ;;  %v2100_v14 = vmax.f32 %v1787_v23, %v1886_v28 }
  0x7c   : > { %v944_v17 = vsel %vm902_vm1, %v8141_v20, %v943_v54  ;;  %v641_v34 = vmax.f32 %v545_v59, %v5362_v3  ;;  %v2205_v38 = vrot.slane %v2096_v49, 4  ;;  %v5399_v50 = vsel %vm2361_vm6, %v2096_v49, -inf  ;;  %v5402_v54 = vld [vmem:[%s4844_s11 + $0x158] sm:$0xf] }
  0x7d   : > { %v1257_v51 = vsel %vm1215_vm2, %v8142_v24, %v1256_v44  ;;  %v1570_v37 = vsel %vm1528_vm3, %v8143_v15, %v1569_v57  ;;  %v1160_v26 = vmax.f32 %v4898_v21, %v944_v17  ;;  %v1883_v11 = vsel %vm1841_vm4, %v8144_v47, %v1882_v8 }
  0x7e   : > { %v8002_v44 = vrot.slane %v4931_v0, 1  ;;  %v1164_v57 = vmax.f32 %v4924_v53, %v954_v63  ;;  %v2212_v21 = vrot.slane %v2100_v14, 4  ;;  %v5408_v8 = vsel %vm2350_vm5, %v2100_v14, -inf }
  0x7f   : > { %v1473_v20 = vmax.f32 %v1160_v26, %v1257_v51  ;;  %v737_v28 = vmax.f32 %v641_v34, %v5402_v54  ;;  %v8145_v23 = vrot.slane %v5279_v6, 4  ;;  %v5417_v17 = vmax.f32 %v2452_v58, %v5408_v8 }
  0x80   : > { %v956_v63 = vsel %vm902_vm1, %v953_v35, %v8002_v44  ;;  %v2214_v51 = vsel %vm1841_vm4, %v2212_v21, %v2213_v55  ;;  %v1265_v58 = vrot.slane %v4924_v53, 2  ;;  %v1266_v21 = vrot.slane %v4929_v56, 2 }
  0x81   : > { %v2206_v59 = vsel %vm1841_vm4, %v8145_v23, %v2205_v38  ;;  %8146 = vst [vmem:[#allocation17_spill] sm:$0xff] %v5417_v17  ;;  %v1786_v24 = vmax.f32 %v1473_v20, %v1570_v37  ;;  %v950_v15 = vrot.slane %v737_v28, 1  ;;  %v1263_v6 = vrot.slane %v737_v28, 2  ;;  %2318 = vst [vmem:[%s4858_s15 + $0x88] sm:$0xff] %v2214_v51 }
  0x82   : > { %2315 = vst [vmem:[%s4858_s15 + $0x28] sm:$0xff] %v2206_v59  ;;  %v1576_v26 = vrot.slane %v737_v28, 3  ;;  %v1889_v47 = vrot.slane %v737_v28, 4  ;;  %v1165_v14 = vmax.f32 %v4929_v56, %v956_v63  ;;  %v8147_v38 = vrot.slane %v4913_v41, 1 }
  0x83   : > { %v2099_v34 = vmax.f32 %v1786_v24, %v1883_v11  ;;  %v8148_v37 = vrot.slane %v4913_v41, 2  ;;  %v8149_v59 = vrot.slane %v4913_v41, 3  ;;  %v8150_v63 = vrot.slane %v4913_v41, 4 }
  0x84   : > { %v951_v35 = vsel %vm902_vm1, %v8147_v38, %v950_v15  ;;  %v1268_v24 = vrot.slane %v4931_v0, 2  ;;  %v1578_v38 = vrot.slane %v4924_v53, 3  ;;  %v1891_v49 = vrot.slane %v4924_v53, 4 }
  0x85   : > { %v1264_v20 = vsel %vm1215_vm2, %v8148_v37, %v1263_v6  ;;  %v1163_v23 = vmax.f32 %v4913_v41, %v951_v35  ;;  %v1577_v28 = vsel %vm1528_vm3, %v8149_v59, %v1576_v26  ;;  %v1890_v11 = vsel %vm1841_vm4, %v8150_v63, %v1889_v47 }
  0x86   : > { %v2210_v51 = vrot.slane %v2099_v34, 4  ;;  %v5446_v15 = vsel %vm2361_vm6, %v2099_v34, -inf  ;;  %v1267_v6 = vsel %vm1215_vm2, %v1265_v58, %v1266_v21  ;;  %v1269_v41 = vsel %vm1215_vm2, %v1266_v21, %v1268_v24 }
  0x87   : > { %v2454_v35 = vmax.f32 %v5399_v50, %v5446_v15  ;;  %v1476_v37 = vmax.f32 %v1163_v23, %v1264_v20  ;;  %v1477_v26 = vmax.f32 %v1164_v57, %v1267_v6  ;;  %v8151_v47 = vrot.slane %v5288_v61, 4 }
  0x88   : > { %v1478_v63 = vmax.f32 %v1165_v14, %v1269_v41  ;;  %v1579_v34 = vrot.slane %v4929_v56, 3  ;;  %v1581_v58 = vrot.slane %v4931_v0, 3  ;;  %v1892_v50 = vrot.slane %v4929_v56, 4 }
  0x89   : > { %v2211_v59 = vsel %vm1841_vm4, %v8151_v47, %v2210_v51  ;;  %v1789_v44 = vmax.f32 %v1476_v37, %v1577_v28  ;;  %v1894_v20 = vrot.slane %v4931_v0, 4  ;;  %v453_v23 = vmax.f32 %v5307_v39, %v5324_v16 }
  0x8a   : > { %2317 = vst [vmem:[%s4858_s15 + $0x68] sm:$0xff] %v2211_v59  ;;  %v1580_v21 = vsel %vm1528_vm3, %v1578_v38, %v1579_v34  ;;  %v1582_v57 = vsel %vm1528_vm3, %v1579_v34, %v1581_v58  ;;  %v959_v14 = vrot.slane %v4941_v18, 1  ;;  %v1893_v28 = vsel %vm1841_vm4, %v1891_v49, %v1892_v50 }
  0x8b   : > { %v2102_v51 = vmax.f32 %v1789_v44, %v1890_v11  ;;  %v1790_v6 = vmax.f32 %v1477_v26, %v1580_v21  ;;  %v1791_v41 = vmax.f32 %v1478_v63, %v1582_v57  ;;  %v1895_v53 = vsel %vm1841_vm4, %v1892_v50, %v1894_v20 }
  0x8c   : > { %v549_v56 = vmax.f32 %v453_v23, %v5362_v3  ;;  %v960_v37 = vrot.slane %v4943_v19, 1  ;;  %v8004_v38 = vrot.slane %v4945_v25, 1  ;;  %v1585_v49 = vrot.slane %v4941_v18, 3 }
  0x8d   : > { %v2215_v47 = vrot.slane %v2102_v51, 4  ;;  %v5476_v39 = vsel %vm2361_vm6, %v2102_v51, -inf  ;;  %v2103_v44 = vmax.f32 %v1790_v6, %v1893_v28  ;;  %v5478_v11 = vmax.f32 %v1791_v41, %v1895_v53  ;;  %v5511_v6 = vld [vmem:[%s4844_s11 + $0x178] sm:$0xf] }
  0x8e   : > { %v5483_v26 = vmax.f32 %v2454_v35, %v5476_v39  ;;  %v645_v59 = vmax.f32 %v549_v56, %v5402_v54  ;;  %v961_v63 = vsel %vm902_vm1, %v959_v14, %v960_v37  ;;  %v8153_v14 = vmax.f32 %v5356_v7, %v5408_v8 }
  0x8f   : > { %8152 = vst [vmem:[#allocation18_spill] sm:$0xff] %v5478_v11  ;;  %v2216_v34 = vsel %vm1841_vm4, %v2213_v55, %v2215_v47  ;;  %v2217_v50 = vrot.slane %v2103_v44, 4  ;;  %v8003_v21 = vrot.slane %v5478_v11, 4  ;;  %v5493_v57 = vsel %vm2350_vm5, %v2103_v44, -inf }
  0x90   : > { %2319 = vst [vmem:[%s4858_s15 + $0xa8] sm:$0xff] %v2216_v34  ;;  %v2458_v35 = vmax.f32 %v5408_v8, %v5493_v57  ;;  %v5504_v51 = vmax.f32 %v8153_v14, %v5493_v57  ;;  %v5508_v55 = vmax.f32 %v5417_v17, %v5493_v57  ;;  %v5518_v28 = vmax.f32 %v5321_v13, %v5478_v11 }
  0x91   : > { %v2219_v41 = vsel %vm1841_vm4, %v2217_v50, %v8003_v21  ;;  %v741_v53 = vmax.f32 %v645_v59, %v5511_v6  ;;  %v963_v7 = vsel %vm902_vm1, %v960_v37, %v8004_v38  ;;  %v1167_v8 = vmax.f32 %v4941_v18, %v961_v63 }
  0x92   : > { %8154 = vst [vmem:[#allocation19_spill] sm:$0xff] %v5508_v55  ;;  %2320 = vst [vmem:[%s4858_s15 + $0xc8] sm:$0xff] %v2219_v41  ;;  %v1168_v56 = vmax.f32 %v4943_v19, %v963_v7  ;;  %v1272_v47 = vrot.slane %v4941_v18, 2  ;;  %v1273_v44 = vrot.slane %v4943_v19, 2  ;;  %v8014_v59 = vrot.slane %v4945_v25, 2 }
  0x93   : > { %v957_v34 = vrot.slane %v741_v53, 1  ;;  %v1270_v50 = vrot.slane %v741_v53, 2  ;;  %v1583_v14 = vrot.slane %v741_v53, 3  ;;  %v1896_v23 = vrot.slane %v741_v53, 4 }
  0x94   : > { %v1274_v21 = vsel %vm1215_vm2, %v1272_v47, %v1273_v44  ;;  %v1586_v37 = vrot.slane %v4943_v19, 3  ;;  %v8155_v63 = vrot.slane %v4931_v0, 1  ;;  %v1276_v29 = vsel %vm1215_vm2, %v1273_v44, %v8014_v59 }
  0x95   : > { %v1271_v7 = vsel %vm1215_vm2, %v1268_v24, %v1270_v50  ;;  %v1584_v38 = vsel %vm1528_vm3, %v1581_v58, %v1583_v14  ;;  %v1897_v53 = vsel %vm1841_vm4, %v1894_v20, %v1896_v23  ;;  %v1480_v61 = vmax.f32 %v1167_v8, %v1274_v21 }
  0x96   : > { %v958_v41 = vsel %vm902_vm1, %v8155_v63, %v957_v34  ;;  %v1587_v13 = vsel %vm1528_vm3, %v1585_v49, %v1586_v37  ;;  %v1481_v17 = vmax.f32 %v1168_v56, %v1276_v29  ;;  %v1588_v34 = vrot.slane %v4945_v25, 3 }
  0x97   : > { %v1166_v47 = vmax.f32 %v4931_v0, %v958_v41  ;;  %v1898_v63 = vrot.slane %v4941_v18, 4  ;;  %v1899_v24 = vrot.slane %v4943_v19, 4  ;;  %v1793_v58 = vmax.f32 %v1480_v61, %v1587_v13 }
  0x98   : > { %v1901_v20 = vrot.slane %v4945_v25, 4  ;;  %v457_v0 = vmax.f32 %v5324_v16, %v5362_v3  ;;  %v1589_v23 = vsel %vm1528_vm3, %v1586_v37, %v1588_v34  ;;  %v966_v49 = vrot.slane %v4952_v40, 1 }
  0x99   : > { %v1479_v50 = vmax.f32 %v1166_v47, %v1271_v7  ;;  %v1900_v21 = vsel %vm1841_vm4, %v1898_v63, %v1899_v24  ;;  %v967_v29 = vrot.slane %v4954_v42, 1  ;;  %v1794_v56 = vmax.f32 %v1481_v17, %v1589_v23 }
  0x9a   : > { %v1902_v18 = vsel %vm1841_vm4, %v1899_v24, %v1901_v20  ;;  %v2106_v19 = vmax.f32 %v1793_v58, %v1900_v21  ;;  %v553_v61 = vmax.f32 %v457_v0, %v5402_v54  ;;  %v8013_v44 = vrot.slane %v4958_v48, 1 }
  0x9b   : > { %v1792_v8 = vmax.f32 %v1479_v50, %v1584_v38  ;;  %v968_v13 = vsel %vm902_vm1, %v966_v49, %v967_v29  ;;  %v1279_v16 = vrot.slane %v4952_v40, 2  ;;  %v5561_v37 = vmax.f32 %v1794_v56, %v1902_v18 }
  0x9c   : > { %v2222_v41 = vrot.slane %v2106_v19, 4  ;;  %v5565_v38 = vsel %vm2350_vm5, %v2106_v19, -inf  ;;  %v8157_v0 = vmax.f32 %v5446_v15, %v5476_v39  ;;  %v649_v49 = vmax.f32 %v553_v61, %v5511_v6  ;;  %v5607_v19 = vld [vmem:[%s4844_s11 + $0x198] sm:$0xf] }
  0x9d   : > { %v2105_v14 = vmax.f32 %v1792_v8, %v1897_v53  ;;  %v5570_v7 = vmax.f32 %v2458_v35, %v5565_v38  ;;  %v5576_v53 = vmax.f32 %v5508_v55, %v5565_v38  ;;  %v8012_v50 = vrot.slane %v5561_v37, 4 }
  0x9e   : > { %v5585_v35 = vmax.f32 %v5518_v28, %v5561_v37  ;;  %v8158_v8 = vrot.slane %v5478_v11, 4  ;;  %v970_v15 = vsel %vm902_vm1, %v967_v29, %v8013_v44  ;;  %v745_v61 = vmax.f32 %v649_v49, %v5607_v19 }
  0x9f   : > { %8156 = vst [vmem:[#allocation20_spill] sm:$0xff] %v5576_v53  ;;  %v2220_v63 = vrot.slane %v2105_v14, 4  ;;  %v5580_v24 = vsel %vm2361_vm6, %v2105_v14, -inf  ;;  %v2224_v18 = vsel %vm1841_vm4, %v2222_v41, %v8012_v50  ;;  %v1170_v14 = vmax.f32 %v4952_v40, %v968_v13 }
  0xa0   : > { %v5593_v23 = vmax.f32 %v8157_v0, %v5580_v24  ;;  %v5597_v21 = vmax.f32 %v5483_v26, %v5580_v24  ;;  %2322 = vst [vmem:[%s4858_s15 + $0x108] sm:$0xff] %v2224_v18  ;;  %v1171_v0 = vmax.f32 %v4954_v42, %v970_v15  ;;  %v1592_v41 = vrot.slane %v4952_v40, 3 }
  0xa1   : > { %v2221_v56 = vsel %vm1841_vm4, %v8158_v8, %v2220_v63  ;;  %v1280_v63 = vrot.slane %v4954_v42, 2  ;;  %v8018_v8 = vrot.slane %v4958_v48, 2  ;;  %v1593_v50 = vrot.slane %v4954_v42, 3 }
  0xa2   : > { %2321 = vst [vmem:[%s4858_s15 + $0xe8] sm:$0xff] %v2221_v56  ;;  %v8021_v58 = vrot.slane %v4958_v48, 3  ;;  %v1905_v29 = vrot.slane %v4952_v40, 4  ;;  %v964_v44 = vrot.slane %v745_v61, 1  ;;  %v1277_v13 = vrot.slane %v745_v61, 2 }
  0xa3   : > { %v1590_v56 = vrot.slane %v745_v61, 3  ;;  %v1903_v18 = vrot.slane %v745_v61, 4  ;;  %v1281_v49 = vsel %vm1215_vm2, %v1279_v16, %v1280_v63  ;;  %v1283_v15 = vsel %vm1215_vm2, %v1280_v63, %v8018_v8 }
  0xa4   : > { %v1594_v47 = vsel %vm1528_vm3, %v1592_v41, %v1593_v50  ;;  %v1596_v17 = vsel %vm1528_vm3, %v1593_v50, %v8021_v58  ;;  %v8159_v59 = vrot.slane %v4945_v25, 1  ;;  %v8160_v11 = vrot.slane %v4945_v25, 2 }
  0xa5   : > { %v1591_v16 = vsel %vm1528_vm3, %v1588_v34, %v1590_v56  ;;  %v1904_v53 = vsel %vm1841_vm4, %v1901_v20, %v1903_v18  ;;  %v1483_v8 = vmax.f32 %v1170_v14, %v1281_v49  ;;  %v1484_v41 = vmax.f32 %v1171_v0, %v1283_v15 }
  0xa6   : > { %v965_v40 = vsel %vm902_vm1, %v8159_v59, %v964_v44  ;;  %v1278_v61 = vsel %vm1215_vm2, %v8160_v11, %v1277_v13  ;;  %v1906_v55 = vrot.slane %v4954_v42, 4  ;;  %v1908_v50 = vrot.slane %v4958_v48, 4 }
  0xa7   : > { %v1169_v63 = vmax.f32 %v4945_v25, %v965_v40  ;;  %v461_v58 = vmax.f32 %v5362_v3, %v5402_v54  ;;  %v973_v59 = vrot.slane %v4967_v4, 1  ;;  %v974_v44 = vrot.slane %v4969_v5, 1 }
  0xa8   : > { %v1796_v13 = vmax.f32 %v1483_v8, %v1594_v47  ;;  %v1797_v34 = vmax.f32 %v1484_v41, %v1596_v17  ;;  %v1907_v20 = vsel %vm1841_vm4, %v1905_v29, %v1906_v55  ;;  %v1909_v25 = vsel %vm1841_vm4, %v1906_v55, %v1908_v50 }
  0xa9   : > { %v1482_v11 = vmax.f32 %v1169_v63, %v1278_v61  ;;  %v557_v14 = vmax.f32 %v461_v58, %v5511_v6  ;;  %v975_v42 = vsel %vm902_vm1, %v973_v59, %v974_v44  ;;  %v8022_v0 = vrot.slane %v4973_v12, 1 }
  0xaa   : > { %v2109_v3 = vmax.f32 %v1796_v13, %v1907_v20  ;;  %v5651_v18 = vmax.f32 %v1797_v34, %v1909_v25  ;;  %v1173_v49 = vmax.f32 %v4967_v4, %v975_v42  ;;  %v1286_v55 = vrot.slane %v4967_v4, 2 }
  0xab   : > { %v1795_v56 = vmax.f32 %v1482_v11, %v1591_v16  ;;  %v653_v47 = vmax.f32 %v557_v14, %v5607_v19  ;;  %v977_v17 = vsel %vm902_vm1, %v974_v44, %v8022_v0  ;;  %v1287_v58 = vrot.slane %v4969_v5, 2  ;;  %v5682_v44 = vld [vmem:[%s4844_s11 + $0x1b8] sm:$0xf] }
  0xac   : > { %8161 = vst [vmem:[#allocation21_spill] sm:$0xff] %v5651_v18  ;;  %v2227_v29 = vrot.slane %v2109_v3, 4  ;;  %v2228_v15 = vrot.slane %v5651_v18, 4  ;;  %v5663_v40 = vsel %vm2350_vm5, %v2109_v3, -inf  ;;  %v8162_v16 = vmax.f32 %v5493_v57, %v5565_v38 }
  0xad   : > { %v2108_v8 = vmax.f32 %v1795_v56, %v1904_v53  ;;  %v2464_v61 = vmax.f32 %v5565_v38, %v5663_v40  ;;  %v8163_v41 = vmax.f32 %v5504_v51, %v5565_v38  ;;  %v749_v34 = vmax.f32 %v653_v47, %v5682_v44 }
  0xae   : > { %v5671_v63 = vmax.f32 %v8162_v16, %v5663_v40  ;;  %v2229_v57 = vsel %vm1841_vm4, %v2227_v29, %v2228_v15  ;;  %v8164_v51 = vmax.f32 %v5476_v39, %v5580_v24  ;;  %v8165_v56 = vrot.slane %v5561_v37, 4 }
  0xaf   : > { %v5679_v59 = vmax.f32 %v8163_v41, %v5663_v40  ;;  %v2225_v11 = vrot.slane %v2108_v8, 4  ;;  %v5686_v13 = vsel %vm2361_vm6, %v2108_v8, -inf  ;;  %2324 = vst [vmem:[%s4858_s15 + $0x148] sm:$0xff] %v2229_v57  ;;  %v971_v47 = vrot.slane %v749_v34, 1 }
  0xb0   : > { %v2463_v20 = vmax.f32 %v5580_v24, %v5686_v13  ;;  %v5698_v25 = vmax.f32 %v8164_v51, %v5686_v13  ;;  %v2577_v14 = vmax.f32 %v5593_v23, %v5686_v13  ;;  %v5704_v42 = vmax.f32 %v5597_v21, %v5686_v13 }
  0xb1   : > { %v2226_v3 = vsel %vm1841_vm4, %v8165_v56, %v2225_v11  ;;  %v1284_v8 = vrot.slane %v749_v34, 2  ;;  %v1597_v29 = vrot.slane %v749_v34, 3  ;;  %v1910_v16 = vrot.slane %v749_v34, 4 }
  0xb2   : > { %2323 = vst [vmem:[%s4858_s15 + $0x128] sm:$0xff] %v2226_v3  ;;  %v1174_v23 = vmax.f32 %v4969_v5, %v977_v17  ;;  %v8166_v41 = vrot.slane %v4958_v48, 1  ;;  %v8167_v57 = vrot.slane %v4958_v48, 2  ;;  %v8168_v11 = vrot.slane %v4958_v48, 3 }
  0xb3   : > { %v1288_v3 = vsel %vm1215_vm2, %v1286_v55, %v1287_v58  ;;  %v1911_v34 = vsel %vm1841_vm4, %v1908_v50, %v1910_v16  ;;  %v8023_v17 = vrot.slane %v4973_v12, 2  ;;  %v1599_v53 = vrot.slane %v4967_v4, 3 }
  0xb4   : > { %v972_v51 = vsel %vm902_vm1, %v8166_v41, %v971_v47  ;;  %v1285_v0 = vsel %vm1215_vm2, %v8167_v57, %v1284_v8  ;;  %v1598_v56 = vsel %vm1528_vm3, %v8168_v11, %v1597_v29  ;;  %v1486_v24 = vmax.f32 %v1173_v49, %v1288_v3 }
  0xb5   : > { %v1172_v39 = vmax.f32 %v4958_v48, %v972_v51  ;;  %v1600_v47 = vrot.slane %v4969_v5, 3  ;;  %v1602_v41 = vrot.slane %v4973_v12, 3  ;;  %v1912_v8 = vrot.slane %v4967_v4, 4 }
  0xb6   : > { %v1290_v55 = vsel %vm1215_vm2, %v1287_v58, %v8023_v17  ;;  %v1913_v48 = vrot.slane %v4969_v5, 4  ;;  %v1915_v50 = vrot.slane %v4973_v12, 4  ;;  %v465_v51 = vmax.f32 %v5402_v54, %v5511_v6 }
  0xb7   : > { %v1485_v57 = vmax.f32 %v1172_v39, %v1285_v0  ;;  %v1487_v29 = vmax.f32 %v1174_v23, %v1290_v55  ;;  %v1601_v49 = vsel %vm1528_vm3, %v1599_v53, %v1600_v47  ;;  %v1603_v16 = vsel %vm1528_vm3, %v1600_v47, %v1602_v41 }
  0xb8   : > { %v1799_v3 = vmax.f32 %v1486_v24, %v1601_v49  ;;  %v1914_v4 = vsel %vm1841_vm4, %v1912_v8, %v1913_v48  ;;  %v1916_v0 = vsel %vm1841_vm4, %v1913_v48, %v1915_v50  ;;  %v561_v58 = vmax.f32 %v465_v51, %v5607_v19 }
  0xb9   : > { %v1798_v11 = vmax.f32 %v1485_v57, %v1598_v56  ;;  %v1800_v39 = vmax.f32 %v1487_v29, %v1603_v16  ;;  %v980_v5 = vrot.slane %v4984_v30, 1  ;;  %v981_v23 = vrot.slane %v4993_v33, 1 }
  0xba   : > { %v2112_v53 = vmax.f32 %v1799_v3, %v1914_v4  ;;  %v8024_v47 = vrot.slane %v4995_v43, 1  ;;  %v1293_v17 = vrot.slane %v4984_v30, 2  ;;  %v657_v24 = vmax.f32 %v561_v58, %v5682_v44 }
  0xbb   : > { %v2111_v55 = vmax.f32 %v1798_v11, %v1911_v34  ;;  %v5747_v54 = vmax.f32 %v1800_v39, %v1916_v0  ;;  %v982_v56 = vsel %vm902_vm1, %v980_v5, %v981_v23  ;;  %v1294_v8 = vrot.slane %v4993_v33, 2  ;;  %v5783_v39 = vld [vmem:[%s4844_s11 + $0x1d8] sm:$0xf] }
  0xbc   : > { %v2232_v34 = vrot.slane %v2112_v53, 4  ;;  %v5758_v29 = vsel %vm2350_vm5, %v2112_v53, -inf  ;;  %v753_v5 = vmax.f32 %v657_v24, %v5783_v39  ;;  %v984_v38 = vsel %vm902_vm1, %v981_v23, %v8024_v47 }
  0xbd   : > { %v2230_v57 = vrot.slane %v2111_v55, 4  ;;  %v5754_v48 = vsel %vm2361_vm6, %v2111_v55, -inf  ;;  %v8025_v4 = vrot.slane %v5747_v54, 4  ;;  %v2467_v0 = vmax.f32 %v5663_v40, %v5758_v29 }
  0xbe   : > { %v5763_v16 = vmax.f32 %v2463_v20, %v5754_v48  ;;  %v5768_v11 = vmax.f32 %v2577_v14, %v5754_v48  ;;  %v5780_v20 = vmax.f32 %v2464_v61, %v5758_v29  ;;  %v2581_v14 = vmax.f32 %v5671_v63, %v5758_v29 }
  0xbf   : > { %v2231_v3 = vsel %vm1841_vm4, %v2228_v15, %v2230_v57  ;;  %v8169_v15 = vmax.f32 %v5570_v7, %v5663_v40  ;;  %v2234_v61 = vsel %vm1841_vm4, %v2232_v34, %v8025_v4  ;;  %v1176_v55 = vmax.f32 %v4984_v30, %v982_v56 }
  0xc0   : > { %2325 = vst [vmem:[%s4858_s15 + $0x168] sm:$0xff] %v2231_v3  ;;  %v1177_v63 = vmax.f32 %v4993_v33, %v984_v38  ;;  %v1295_v53 = vsel %vm1215_vm2, %v1293_v17, %v1294_v8  ;;  %2326 = vst [vmem:[%s4858_s15 + $0x188] sm:$0xff] %v2234_v61  ;;  %v978_v7 = vrot.slane %v753_v5, 1  ;;  %v1291_v40 = vrot.slane %v753_v5, 2 }
  0xc1   : > { %v5792_v58 = vmax.f32 %v8169_v15, %v5758_v29  ;;  %v1604_v57 = vrot.slane %v753_v5, 3  ;;  %v1917_v3 = vrot.slane %v753_v5, 4  ;;  %v1296_v24 = vrot.slane %v4995_v43, 2 }
  0xc2   : > { %v1489_v15 = vmax.f32 %v1176_v55, %v1295_v53  ;;  %v1606_v23 = vrot.slane %v4984_v30, 3  ;;  %v1607_v47 = vrot.slane %v4993_v33, 3  ;;  %v8171_v34 = vrot.slane %v4973_v12, 1 }
  0xc3   : > { %8170 = vst [vmem:[#allocation22_spill] sm:$0xff] %v5792_v58  ;;  %v8172_v38 = vrot.slane %v4973_v12, 2  ;;  %v1605_v61 = vsel %vm1528_vm3, %v1602_v41, %v1604_v57  ;;  %v1918_v4 = vsel %vm1841_vm4, %v1915_v50, %v1917_v3  ;;  %v1297_v55 = vsel %vm1215_vm2, %v1294_v8, %v1296_v24 }
  0xc4   : > { %v979_v56 = vsel %vm902_vm1, %v8171_v34, %v978_v7  ;;  %v1608_v53 = vsel %vm1528_vm3, %v1606_v23, %v1607_v47  ;;  %v1609_v51 = vrot.slane %v4995_v43, 3  ;;  %v1490_v49 = vmax.f32 %v1177_v63, %v1297_v55  ;;  %v5850_v55 = vld [vmem:[%s4844_s11 + $0x1f8] sm:$0xf] }
  0xc5   : > { %v1292_v17 = vsel %vm1215_vm2, %v8172_v38, %v1291_v40  ;;  %v1175_v5 = vmax.f32 %v4973_v12, %v979_v56  ;;  %v1802_v58 = vmax.f32 %v1489_v15, %v1608_v53  ;;  %v1919_v7 = vrot.slane %v4984_v30, 4 }
  0xc6   : > { %v1920_v34 = vrot.slane %v4993_v33, 4  ;;  %v1610_v40 = vsel %vm1528_vm3, %v1607_v47, %v1609_v51  ;;  %v1922_v41 = vrot.slane %v4995_v43, 4  ;;  %v469_v12 = vmax.f32 %v5511_v6, %v5607_v19 }
  0xc7   : > { %v1488_v18 = vmax.f32 %v1175_v5, %v1292_v17  ;;  %v1803_v50 = vmax.f32 %v1490_v49, %v1610_v40  ;;  %v987_v57 = vrot.slane %v5020_v62, 1  ;;  %v988_v63 = vrot.slane %v5023_v2, 1 }
  0xc8   : > { %v1921_v8 = vsel %vm1841_vm4, %v1919_v7, %v1920_v34  ;;  %v1923_v30 = vsel %vm1841_vm4, %v1920_v34, %v1922_v41  ;;  %v565_v15 = vmax.f32 %v469_v12, %v5682_v44  ;;  %v990_v6 = vrot.slane %v5030_v10, 1 }
  0xc9   : > { %v1801_v3 = vmax.f32 %v1488_v18, %v1605_v61  ;;  %v2115_v33 = vmax.f32 %v1802_v58, %v1921_v8  ;;  %v5831_v47 = vmax.f32 %v1803_v50, %v1923_v30  ;;  %v989_v23 = vsel %vm902_vm1, %v987_v57, %v988_v63 }
  0xca   : > { %v1300_v49 = vrot.slane %v5020_v62, 2  ;;  %v661_v18 = vmax.f32 %v565_v15, %v5783_v39  ;;  %v8173_v12 = vmax.f32 %v5686_v13, %v5754_v48  ;;  %v8174_v57 = vmax.f32 %v5698_v25, %v5754_v48 }
  0xcb   : > { %v2114_v56 = vmax.f32 %v1801_v3, %v1918_v4  ;;  %v2237_v38 = vrot.slane %v2115_v33, 4  ;;  %v5838_v17 = vsel %vm2350_vm5, %v2115_v33, -inf  ;;  %v2238_v58 = vrot.slane %v5831_v47, 4 }
  0xcc   : > { %v2470_v61 = vmax.f32 %v5758_v29, %v5838_v17  ;;  %v5845_v5 = vmax.f32 %v2467_v0, %v5838_v17  ;;  %v2584_v4 = vmax.f32 %v5780_v20, %v5838_v17  ;;  %v5857_v34 = vmax.f32 %v2581_v14, %v5838_v17 }
  0xcd   : > { %v2235_v53 = vrot.slane %v2114_v56, 4  ;;  %v5854_v7 = vsel %vm2361_vm6, %v2114_v56, -inf  ;;  %v757_v40 = vmax.f32 %v661_v18, %v5850_v55  ;;  %v8175_v3 = vrot.slane %v5747_v54, 4 }
  0xce   : > { %v2469_v0 = vmax.f32 %v5754_v48, %v5854_v7  ;;  %v5866_v50 = vmax.f32 %v8173_v12, %v5854_v7  ;;  %v2583_v8 = vmax.f32 %v5763_v16, %v5854_v7  ;;  %v5874_v14 = vmax.f32 %v8174_v57, %v5854_v7 }
  0xcf   : > { %v2236_v30 = vsel %vm1841_vm4, %v8175_v3, %v2235_v53  ;;  %v2239_v33 = vsel %vm1841_vm4, %v2237_v38, %v2238_v58  ;;  %v985_v13 = vrot.slane %v757_v40, 1  ;;  %v1298_v15 = vrot.slane %v757_v40, 2 }
  0xd0   : > { %2327 = vst [vmem:[%s4858_s15 + $0x1a8] sm:$0xff] %v2236_v30  ;;  %2328 = vst [vmem:[%s4858_s15 + $0x1c8] sm:$0xff] %v2239_v33  ;;  %v1611_v56 = vrot.slane %v757_v40, 3  ;;  %v1924_v16 = vrot.slane %v757_v40, 4  ;;  %v991_v25 = vsel %vm902_vm1, %v988_v63, %v990_v6  ;;  %v1179_v48 = vmax.f32 %v5020_v62, %v989_v23 }
  0xd1   : > { %v8176_v18 = vrot.slane %v4995_v43, 1  ;;  %v1299_v12 = vsel %vm1215_vm2, %v1296_v24, %v1298_v15  ;;  %v1180_v38 = vmax.f32 %v5023_v2, %v991_v25  ;;  %v1301_v57 = vrot.slane %v5023_v2, 2 }
  0xd2   : > { %v1612_v40 = vsel %vm1528_vm3, %v1609_v51, %v1611_v56  ;;  %v1925_v30 = vsel %vm1841_vm4, %v1922_v41, %v1924_v16  ;;  %v1303_v63 = vrot.slane %v5030_v10, 2  ;;  %v1613_v33 = vrot.slane %v5020_v62, 3 }
  0xd3   : > { %v986_v53 = vsel %vm902_vm1, %v8176_v18, %v985_v13  ;;  %v1302_v23 = vsel %vm1215_vm2, %v1300_v49, %v1301_v57  ;;  %v1614_v13 = vrot.slane %v5023_v2, 3  ;;  %v1616_v24 = vrot.slane %v5030_v10, 3 }
  0xd4   : > { %v1178_v3 = vmax.f32 %v4995_v43, %v986_v53  ;;  %v1304_v25 = vsel %vm1215_vm2, %v1301_v57, %v1303_v63  ;;  %v1492_v43 = vmax.f32 %v1179_v48, %v1302_v23  ;;  %v1926_v51 = vrot.slane %v5020_v62, 4 }
  0xd5   : > { %v1493_v56 = vmax.f32 %v1180_v38, %v1304_v25  ;;  %v1615_v41 = vsel %vm1528_vm3, %v1613_v33, %v1614_v13  ;;  %v1617_v49 = vsel %vm1528_vm3, %v1614_v13, %v1616_v24  ;;  %v1927_v16 = vrot.slane %v5023_v2, 4 }
  0xd6   : > { %v1491_v15 = vmax.f32 %v1178_v3, %v1299_v12  ;;  %v1805_v53 = vmax.f32 %v1492_v43, %v1615_v41  ;;  %v1929_v12 = vrot.slane %v5030_v10, 4  ;;  %v473_v3 = vmax.f32 %v5607_v19, %v5682_v44 }
  0xd7   : > { %v1806_v57 = vmax.f32 %v1493_v56, %v1617_v49  ;;  %v1928_v48 = vsel %vm1841_vm4, %v1926_v51, %v1927_v16  ;;  %v994_v62 = vrot.slane %v5052_v31, 1  ;;  %v995_v38 = vrot.slane %v5055_v32, 1 }
  0xd8   : > { %v1804_v18 = vmax.f32 %v1491_v15, %v1612_v40  ;;  %v1930_v33 = vsel %vm1841_vm4, %v1927_v16, %v1929_v12  ;;  %v2118_v13 = vmax.f32 %v1805_v53, %v1928_v48  ;;  %v569_v2 = vmax.f32 %v473_v3, %v5783_v39 }
  0xd9   : > { %v5919_v40 = vmax.f32 %v1806_v57, %v1930_v33  ;;  %v996_v15 = vsel %vm902_vm1, %v994_v62, %v995_v38  ;;  %v8029_v19 = vrot.slane %v5067_v45, 1  ;;  %v1307_v25 = vrot.slane %v5052_v31, 2 }
  0xda   : > { %v2117_v23 = vmax.f32 %v1804_v18, %v1925_v30  ;;  %v2242_v30 = vrot.slane %v2118_v13, 4  ;;  %v5930_v56 = vsel %vm2350_vm5, %v2118_v13, -inf  ;;  %v665_v48 = vmax.f32 %v569_v2, %v5850_v55 }
  0xdb   : > { %8177 = vst [vmem:[#allocation23_spill] sm:$0xff] %v5919_v40  ;;  %v8030_v3 = vrot.slane %v5919_v40, 4  ;;  %v2473_v57 = vmax.f32 %v5838_v17, %v5930_v56  ;;  %v998_v62 = vsel %vm902_vm1, %v995_v38, %v8029_v19  ;;  %v1308_v20 = vrot.slane %v5055_v32, 2 }
  0xdc   : > { %v2240_v43 = vrot.slane %v2117_v23, 4  ;;  %v5926_v51 = vsel %vm2361_vm6, %v2117_v23, -inf  ;;  %v1183_v23 = vmax.f32 %v5055_v32, %v998_v62  ;;  %v1620_v33 = vrot.slane %v5052_v31, 3 }
  0xdd   : > { %v5935_v49 = vmax.f32 %v2469_v0, %v5926_v51  ;;  %v5940_v18 = vmax.f32 %v2583_v8, %v5926_v51  ;;  %v5952_v0 = vmax.f32 %v2470_v61, %v5930_v56  ;;  %v2587_v8 = vmax.f32 %v5845_v5, %v5930_v56  ;;  %v5971_v61 = vld [vmem:[%s4844_s11 + $0x218] sm:$0xf] }
  0xde   : > { %v2241_v53 = vsel %vm1841_vm4, %v2238_v58, %v2240_v43  ;;  %v5961_v58 = vmax.f32 %v2584_v4, %v5930_v56  ;;  %v2244_v29 = vsel %vm1841_vm4, %v2242_v30, %v8030_v3  ;;  %v1182_v5 = vmax.f32 %v5052_v31, %v996_v15 }
  0xdf   : > { %2329 = vst [vmem:[%s4858_s15 + $0x1e8] sm:$0xff] %v2241_v53  ;;  %2330 = vst [vmem:[%s4858_s15 + $0x208] sm:$0xff] %v2244_v29  ;;  %v761_v17 = vmax.f32 %v665_v48, %v5971_v61  ;;  %v8032_v4 = vrot.slane %v5067_v45, 2  ;;  %v1621_v38 = vrot.slane %v5055_v32, 3  ;;  %v1309_v13 = vsel %vm1215_vm2, %v1307_v25, %v1308_v20 }
  0xe0   : > { %v8031_v2 = vrot.slane %v5067_v45, 3  ;;  %v1933_v43 = vrot.slane %v5052_v31, 4  ;;  %v1934_v15 = vrot.slane %v5055_v32, 4  ;;  %v1495_v19 = vmax.f32 %v1182_v5, %v1309_v13 }
  0xe1   : > { %v992_v30 = vrot.slane %v761_v17, 1  ;;  %v1305_v53 = vrot.slane %v761_v17, 2  ;;  %v1618_v62 = vrot.slane %v761_v17, 3  ;;  %v1931_v29 = vrot.slane %v761_v17, 4 }
  0xe2   : > { %v1311_v48 = vsel %vm1215_vm2, %v1308_v20, %v8032_v4  ;;  %v1622_v3 = vsel %vm1528_vm3, %v1620_v33, %v1621_v38  ;;  %v1624_v25 = vsel %vm1528_vm3, %v1621_v38, %v8031_v2  ;;  %v1935_v38 = vsel %vm1841_vm4, %v1933_v43, %v1934_v15 }
  0xe3   : > { %v993_v31 = vsel %vm902_vm1, %v990_v6, %v992_v30  ;;  %v1306_v32 = vsel %vm1215_vm2, %v1303_v63, %v1305_v53  ;;  %v1619_v17 = vsel %vm1528_vm3, %v1616_v24, %v1618_v62  ;;  %v1932_v5 = vsel %vm1841_vm4, %v1929_v12, %v1931_v29  ;;  %v8178_v30 = vld [vmem:[#allocation2_spill] sm:$0xff]  ;;  %v8179_v63 = vld [vmem:[#allocation3_spill] sm:$0xff]  ;;  %v8180_v62 = vld [vmem:[#allocation4_spill] sm:$0xff] }
  0xe4   : > { %v1181_v20 = vmax.f32 %v5030_v10, %v993_v31  ;;  %v1496_v33 = vmax.f32 %v1183_v23, %v1311_v48  ;;  %v1808_v13 = vmax.f32 %v1495_v19, %v1622_v3  ;;  %v1936_v2 = vrot.slane %v5067_v45, 4 }
  0xe5   : > { %v477_v6 = vmax.f32 %v5682_v44, %v5783_v39  ;;  %v1001_v4 = vrot.slane %v8178_v30, 1  ;;  %v1002_v53 = vrot.slane %v8179_v63, 1  ;;  %v8033_v12 = vrot.slane %v8180_v62, 1 }
  0xe6   : > { %v1494_v16 = vmax.f32 %v1181_v20, %v1306_v32  ;;  %v1809_v41 = vmax.f32 %v1496_v33, %v1624_v25  ;;  %v2121_v24 = vmax.f32 %v1808_v13, %v1935_v38  ;;  %v1937_v10 = vsel %vm1841_vm4, %v1934_v15, %v1936_v2  ;;  %v6036_v20 = vld [vmem:[%s4844_s11 + $0x238] sm:$0xf] }
  0xe7   : > { %v573_v19 = vmax.f32 %v477_v6, %v5850_v55  ;;  %v1003_v3 = vsel %vm902_vm1, %v1001_v4, %v1002_v53  ;;  %v1314_v23 = vrot.slane %v8178_v30, 2 }
  0xe8   : > { %v1807_v43 = vmax.f32 %v1494_v16, %v1619_v17  ;;  %v6014_v44 = vmax.f32 %v1809_v41, %v1937_v10  ;;  %v2247_v29 = vrot.slane %v2121_v24, 4  ;;  %v6018_v48 = vsel %vm2350_vm5, %v2121_v24, -inf }
  0xe9   : > { %v6023_v15 = vmax.f32 %v2473_v57, %v6018_v48  ;;  %v6028_v4 = vmax.f32 %v2587_v8, %v6018_v48  ;;  %v669_v32 = vmax.f32 %v573_v19, %v5971_v61  ;;  %v1005_v17 = vsel %vm902_vm1, %v1002_v53, %v8033_v12 }
  0xea   : > { %8181 = vst [vmem:[#allocation2_spill] sm:$0xff] %v6014_v44  ;;  %v2120_v16 = vmax.f32 %v1807_v43, %v1932_v5  ;;  %v8035_v41 = vrot.slane %v6014_v44, 4  ;;  %v1185_v57 = vmax.f32 %v8178_v30, %v1003_v3  ;;  %v1186_v33 = vmax.f32 %v8179_v63, %v1005_v17 }
  0xeb   : > { %8182 = vst [vmem:[#allocation3_spill] sm:$0xff] %v6028_v4  ;;  %v1315_v8 = vrot.slane %v8179_v63, 2  ;;  %v8034_v5 = vrot.slane %v8180_v62, 2  ;;  %v765_v53 = vmax.f32 %v669_v32, %v6036_v20  ;;  %v8183_v10 = vmax.f32 %v5854_v7, %v5926_v51 }
  0xec   : > { %v2245_v13 = vrot.slane %v2120_v16, 4  ;;  %v6044_v38 = vsel %vm2361_vm6, %v2120_v16, -inf  ;;  %v2249_v6 = vsel %vm1841_vm4, %v2247_v29, %v8035_v41  ;;  %v8184_v43 = vmax.f32 %v5866_v50, %v5926_v51 }
  0xed   : > { %v2475_v24 = vmax.f32 %v5926_v51, %v6044_v38  ;;  %v6056_v19 = vmax.f32 %v8183_v10, %v6044_v38  ;;  %v2589_v3 = vmax.f32 %v5935_v49, %v6044_v38  ;;  %2332 = vst [vmem:[%s4858_s15 + $0x248] sm:$0xff] %v2249_v6  ;;  %v8186_v29 = vrot.slane %v5919_v40, 4 }
  0xee   : > { %v6064_v16 = vmax.f32 %v8184_v43, %v6044_v38  ;;  %v999_v17 = vrot.slane %v765_v53, 1  ;;  %v1312_v12 = vrot.slane %v765_v53, 2  ;;  %v1625_v31 = vrot.slane %v765_v53, 3 }
  0xef   : > { %v2246_v32 = vsel %vm1841_vm4, %v8186_v29, %v2245_v13  ;;  %v1938_v7 = vrot.slane %v765_v53, 4  ;;  %v1316_v10 = vsel %vm1215_vm2, %v1314_v23, %v1315_v8  ;;  %v1318_v49 = vsel %vm1215_vm2, %v1315_v8, %v8034_v5 }
  0xf0   : > { %8185 = vst [vmem:[#allocation4_spill] sm:$0xff] %v6064_v16  ;;  %2331 = vst [vmem:[%s4858_s15 + $0x228] sm:$0xff] %v2246_v32  ;;  %v1627_v50 = vrot.slane %v8178_v30, 3  ;;  %v8187_v51 = vrot.slane %v5067_v45, 1  ;;  %v8188_v43 = vrot.slane %v5067_v45, 2  ;;  %v8189_v29 = vrot.slane %v5067_v45, 3 }
  0xf1   : > { %v1498_v32 = vmax.f32 %v1185_v57, %v1316_v10  ;;  %v1939_v25 = vsel %vm1841_vm4, %v1936_v2, %v1938_v7  ;;  %v1499_v8 = vmax.f32 %v1186_v33, %v1318_v49  ;;  %v1628_v5 = vrot.slane %v8179_v63, 3 }
  0xf2   : > { %v1000_v6 = vsel %vm902_vm1, %v8187_v51, %v999_v17  ;;  %v1313_v13 = vsel %vm1215_vm2, %v8188_v43, %v1312_v12  ;;  %v1626_v53 = vsel %vm1528_vm3, %v8189_v29, %v1625_v31  ;;  %v1630_v41 = vrot.slane %v8180_v62, 3 }
  0xf3   : > { %v1184_v23 = vmax.f32 %v5067_v45, %v1000_v6  ;;  %v1940_v17 = vrot.slane %v8178_v30, 4  ;;  %v1941_v51 = vrot.slane %v8179_v63, 4  ;;  %v1943_v12 = vrot.slane %v8180_v62, 4  ;;  %v8190_v45 = vld [vmem:[#allocation5_spill] sm:$0xff]  ;;  %v8191_v6 = vld [vmem:[#allocation6_spill] sm:$0xff] }
  0xf4   : > { %v1629_v4 = vsel %vm1528_vm3, %v1627_v50, %v1628_v5  ;;  %v481_v31 = vmax.f32 %v5783_v39, %v5850_v55  ;;  %v1008_v57 = vrot.slane %v8190_v45, 1  ;;  %v1631_v2 = vsel %vm1528_vm3, %v1628_v5, %v1630_v41  ;;  %v8192_v50 = vld [vmem:[#allocation7_spill] sm:$0xff] }
  0xf5   : > { %v1497_v43 = vmax.f32 %v1184_v23, %v1313_v13  ;;  %v1811_v33 = vmax.f32 %v1498_v32, %v1629_v4  ;;  %v1942_v7 = vsel %vm1841_vm4, %v1940_v17, %v1941_v51  ;;  %v1944_v10 = vsel %vm1841_vm4, %v1941_v51, %v1943_v12 }
  0xf6   : > { %v1812_v49 = vmax.f32 %v1499_v8, %v1631_v2  ;;  %v577_v63 = vmax.f32 %v481_v31, %v5971_v61  ;;  %v1009_v13 = vrot.slane %v8191_v6, 1  ;;  %v8040_v23 = vrot.slane %v8192_v50, 1 }
  0xf7   : > { %v1810_v30 = vmax.f32 %v1497_v43, %v1626_v53  ;;  %v2124_v29 = vmax.f32 %v1811_v33, %v1942_v7  ;;  %v1321_v39 = vrot.slane %v8190_v45, 2  ;;  %v1322_v40 = vrot.slane %v8191_v6, 2 }
  0xf8   : > { %v6104_v5 = vmax.f32 %v1812_v49, %v1944_v10  ;;  %v673_v4 = vmax.f32 %v577_v63, %v6036_v20  ;;  %v1010_v32 = vsel %vm902_vm1, %v1008_v57, %v1009_v13  ;;  %v1012_v17 = vsel %vm902_vm1, %v1009_v13, %v8040_v23 }
  0xf9   : > { %v2123_v16 = vmax.f32 %v1810_v30, %v1939_v25  ;;  %v2252_v53 = vrot.slane %v2124_v29, 4  ;;  %v6110_v8 = vsel %vm2350_vm5, %v2124_v29, -inf  ;;  %v1188_v25 = vmax.f32 %v8190_v45, %v1010_v32  ;;  %v6148_v29 = vld [vmem:[%s4844_s11 + $0x258] sm:$0xf] }
  0xfa   : > { %8193 = vst [vmem:[#allocation5_spill] sm:$0xff] %v6104_v5  ;;  %v8041_v31 = vrot.slane %v6104_v5, 4  ;;  %v2479_v57 = vmax.f32 %v6018_v48, %v6110_v8  ;;  %v8195_v63 = vmax.f32 %v5930_v56, %v6018_v48  ;;  %v2593_v13 = vmax.f32 %v6023_v15, %v6110_v8 }
  0xfb   : > { %v2250_v51 = vrot.slane %v2123_v16, 4  ;;  %v6118_v43 = vsel %vm2361_vm6, %v2123_v16, -inf  ;;  %v8194_v16 = vrot.slane %v6014_v44, 4  ;;  %v1323_v56 = vsel %vm1215_vm2, %v1321_v39, %v1322_v40 }
  0xfc   : > { %v6126_v33 = vmax.f32 %v2475_v24, %v6118_v43  ;;  %v6131_v10 = vmax.f32 %v2589_v3, %v6118_v43  ;;  %v2254_v49 = vsel %vm1841_vm4, %v2252_v53, %v8041_v31  ;;  %v6143_v24 = vmax.f32 %v8195_v63, %v6110_v8 }
  0xfd   : > { %v2251_v30 = vsel %vm1841_vm4, %v8194_v16, %v2250_v51  ;;  %2334 = vst [vmem:[%s4858_s15 + $0x288] sm:$0xff] %v2254_v49  ;;  %v8196_v3 = vmax.f32 %v5952_v0, %v6018_v48  ;;  %v769_v53 = vmax.f32 %v673_v4, %v6148_v29  ;;  %v1189_v51 = vmax.f32 %v8191_v6, %v1012_v17 }
  0xfe   : > { %2333 = vst [vmem:[%s4858_s15 + $0x268] sm:$0xff] %v2251_v30  ;;  %v8042_v16 = vrot.slane %v8192_v50, 2  ;;  %v1501_v63 = vmax.f32 %v1188_v25, %v1323_v56  ;;  %v1634_v15 = vrot.slane %v8190_v45, 3  ;;  %v1635_v30 = vrot.slane %v8191_v6, 3 }
  0xff   : > { %v6156_v32 = vmax.f32 %v8196_v3, %v6110_v8  ;;  %v1006_v49 = vrot.slane %v769_v53, 1  ;;  %v1319_v23 = vrot.slane %v769_v53, 2  ;;  %v1632_v31 = vrot.slane %v769_v53, 3 }
 0x100   : > { %v1945_v7 = vrot.slane %v769_v53, 4  ;;  %v1325_v0 = vsel %vm1215_vm2, %v1322_v40, %v8042_v16  ;;  %v1636_v48 = vsel %vm1528_vm3, %v1634_v15, %v1635_v30  ;;  %v1637_v4 = vrot.slane %v8192_v50, 3 }
 0x101   : > { %8197 = vst [vmem:[#allocation6_spill] sm:$0xff] %v6156_v32  ;;  %v1947_v39 = vrot.slane %v8190_v45, 4  ;;  %v8198_v17 = vrot.slane %v8180_v62, 1  ;;  %v8199_v3 = vrot.slane %v8180_v62, 2  ;;  %v1633_v53 = vsel %vm1528_vm3, %v1630_v41, %v1632_v31  ;;  %v8201_v31 = vld [vmem:[#allocation9_spill] sm:$0xff] }
 0x102   : > { %v1946_v2 = vsel %vm1841_vm4, %v1943_v12, %v1945_v7  ;;  %v1502_v16 = vmax.f32 %v1189_v51, %v1325_v0  ;;  %v1638_v15 = vsel %vm1528_vm3, %v1635_v30, %v1637_v4  ;;  %v1814_v32 = vmax.f32 %v1501_v63, %v1636_v48  ;;  %v8202_v7 = vld [vmem:[#allocation10_spill] sm:$0xff] }
 0x103   : > { %v1007_v25 = vsel %vm902_vm1, %v8198_v17, %v1006_v49  ;;  %v1320_v56 = vsel %vm1215_vm2, %v8199_v3, %v1319_v23  ;;  %v1948_v45 = vrot.slane %v8191_v6, 4  ;;  %v1950_v44 = vrot.slane %v8192_v50, 4  ;;  %v8200_v17 = vld [vmem:[#allocation8_spill] sm:$0xff] }
 0x104   : > { %v1187_v40 = vmax.f32 %v8180_v62, %v1007_v25  ;;  %v485_v49 = vmax.f32 %v5850_v55, %v5971_v61  ;;  %v1015_v23 = vrot.slane %v8200_v17, 1  ;;  %v1815_v41 = vmax.f32 %v1502_v16, %v1638_v15 }
 0x105   : > { %v1016_v12 = vrot.slane %v8201_v31, 1  ;;  %v8046_v62 = vrot.slane %v8202_v7, 1  ;;  %v1949_v51 = vsel %vm1841_vm4, %v1947_v39, %v1948_v45  ;;  %v1951_v63 = vsel %vm1841_vm4, %v1948_v45, %v1950_v44 }
 0x106   : > { %v1500_v3 = vmax.f32 %v1187_v40, %v1320_v56  ;;  %v581_v6 = vmax.f32 %v485_v49, %v6036_v20  ;;  %v1328_v30 = vrot.slane %v8200_v17, 2  ;;  %v2127_v48 = vmax.f32 %v1814_v32, %v1949_v51  ;;  %v6195_v56 = vld [vmem:[%s4844_s11 + $0x278] sm:$0xf] }
 0x107   : > { %v6191_v25 = vmax.f32 %v1815_v41, %v1951_v63  ;;  %v1017_v55 = vsel %vm902_vm1, %v1015_v23, %v1016_v12  ;;  %v1019_v39 = vsel %vm902_vm1, %v1016_v12, %v8046_v62  ;;  %v1329_v15 = vrot.slane %v8201_v31, 2 }
 0x108   : > { %v1813_v0 = vmax.f32 %v1500_v3, %v1633_v53  ;;  %v677_v16 = vmax.f32 %v581_v6, %v6148_v29  ;;  %v1191_v40 = vmax.f32 %v8200_v17, %v1017_v55  ;;  %v2257_v53 = vrot.slane %v2127_v48, 4 }
 0x109   : > { %v8047_v32 = vrot.slane %v6191_v25, 4  ;;  %v6206_v49 = vsel %vm2350_vm5, %v2127_v48, -inf  ;;  %v8204_v55 = vmax.f32 %v6056_v19, %v6118_v43  ;;  %v8206_v19 = vrot.slane %v8192_v50, 1 }
 0x10a   : > { %v2126_v45 = vmax.f32 %v1813_v0, %v1946_v2  ;;  %v6211_v3 = vmax.f32 %v2479_v57, %v6206_v49  ;;  %v6216_v2 = vmax.f32 %v2593_v13, %v6206_v49  ;;  %v773_v6 = vmax.f32 %v677_v16, %v6195_v56 }
 0x10b   : > { %v2259_v63 = vsel %vm1841_vm4, %v2257_v53, %v8047_v32  ;;  %v8203_v0 = vmax.f32 %v6044_v38, %v6118_v43  ;;  %v8205_v16 = vrot.slane %v6104_v5, 4  ;;  %v8050_v32 = vrot.slane %v8202_v7, 2 }
 0x10c   : > { %v2255_v12 = vrot.slane %v2126_v45, 4  ;;  %v6220_v51 = vsel %vm2361_vm6, %v2126_v45, -inf  ;;  %2336 = vst [vmem:[%s4858_s15 + $0x2c8] sm:$0xff] %v2259_v63  ;;  %v1013_v62 = vrot.slane %v773_v6, 1  ;;  %v1326_v41 = vrot.slane %v773_v6, 2 }
 0x10d   : > { %v2481_v57 = vmax.f32 %v6118_v43, %v6220_v51  ;;  %v6232_v13 = vmax.f32 %v8203_v0, %v6220_v51  ;;  %v2595_v48 = vmax.f32 %v6126_v33, %v6220_v51  ;;  %v6240_v45 = vmax.f32 %v8204_v55, %v6220_v51 }
 0x10e   : > { %v2256_v53 = vsel %vm1841_vm4, %v8205_v16, %v2255_v12  ;;  %v1639_v23 = vrot.slane %v773_v6, 3  ;;  %v1952_v38 = vrot.slane %v773_v6, 4  ;;  %v1192_v0 = vmax.f32 %v8201_v31, %v1019_v39 }
 0x10f   : > { %2335 = vst [vmem:[%s4858_s15 + $0x2a8] sm:$0xff] %v2256_v53  ;;  %v1330_v33 = vsel %vm1215_vm2, %v1328_v30, %v1329_v15  ;;  %v1014_v43 = vsel %vm902_vm1, %v8206_v19, %v1013_v62  ;;  %v8207_v63 = vrot.slane %v8192_v50, 2  ;;  %v1332_v30 = vsel %vm1215_vm2, %v1329_v15, %v8050_v32 }
 0x110   : > { %v1640_v12 = vsel %vm1528_vm3, %v1637_v4, %v1639_v23  ;;  %v1504_v16 = vmax.f32 %v1191_v40, %v1330_v33  ;;  %v1190_v53 = vmax.f32 %v8192_v50, %v1014_v43  ;;  %v1953_v6 = vsel %vm1841_vm4, %v1950_v44, %v1952_v38 }
 0x111   : > { %v1327_v55 = vsel %vm1215_vm2, %v8207_v63, %v1326_v41  ;;  %v1641_v39 = vrot.slane %v8200_v17, 3  ;;  %v1505_v5 = vmax.f32 %v1192_v0, %v1332_v30  ;;  %v1642_v62 = vrot.slane %v8201_v31, 3 }
 0x112   : > { %v1644_v19 = vrot.slane %v8202_v7, 3  ;;  %v1954_v41 = vrot.slane %v8200_v17, 4  ;;  %v1503_v63 = vmax.f32 %v1190_v53, %v1327_v55  ;;  %v1955_v4 = vrot.slane %v8201_v31, 4 }
 0x113   : > { %v1957_v50 = vrot.slane %v8202_v7, 4  ;;  %v489_v44 = vmax.f32 %v5971_v61, %v6036_v20  ;;  %v1643_v40 = vsel %vm1528_vm3, %v1641_v39, %v1642_v62  ;;  %v1022_v23 = vrot.slane %v5172_v27, 1 }
 0x114   : > { %v1645_v15 = vsel %vm1528_vm3, %v1642_v62, %v1644_v19  ;;  %v1023_v38 = vrot.slane %v5177_v22, 1  ;;  %v1816_v0 = vmax.f32 %v1503_v63, %v1640_v12  ;;  %v1817_v33 = vmax.f32 %v1504_v16, %v1643_v40  ;;  %v6285_v16 = vld [vmem:[%s4844_s11 + $0x298] sm:$0xf] }
 0x115   : > { %v1818_v17 = vmax.f32 %v1505_v5, %v1645_v15  ;;  %v1956_v43 = vsel %vm1841_vm4, %v1954_v41, %v1955_v4  ;;  %v1958_v31 = vsel %vm1841_vm4, %v1955_v4, %v1957_v50  ;;  %v585_v55 = vmax.f32 %v489_v44, %v6148_v29 }
 0x116   : > { %v1024_v61 = vsel %vm902_vm1, %v1022_v23, %v1023_v38  ;;  %v8208_v53 = vrot.slane %v5204_v52, 1  ;;  %v2129_v39 = vmax.f32 %v1816_v0, %v1953_v6  ;;  %v2130_v62 = vmax.f32 %v1817_v33, %v1956_v43 }
 0x117   : > { %v6281_v32 = vmax.f32 %v1818_v17, %v1958_v31  ;;  %v1194_v12 = vmax.f32 %v5172_v27, %v1024_v61  ;;  %v681_v5 = vmax.f32 %v585_v55, %v6195_v56  ;;  %v1335_v63 = vrot.slane %v5172_v27, 2 }
 0x118   : > { %v1026_v30 = vsel %vm902_vm1, %v1023_v38, %v8208_v53  ;;  %v1336_v4 = vrot.slane %v5177_v22, 2  ;;  %v2260_v44 = vrot.slane %v2129_v39, 4  ;;  %v6293_v6 = vsel %vm2361_vm6, %v2129_v39, -inf }
 0x119   : > { %v1195_v41 = vmax.f32 %v5177_v22, %v1026_v30  ;;  %v2262_v40 = vrot.slane %v2130_v62, 4  ;;  %v8051_v15 = vrot.slane %v6281_v32, 4  ;;  %v6299_v38 = vmax.f32 %v2481_v57, %v6293_v6 }
 0x11a   : > { %v6304_v33 = vmax.f32 %v2595_v48, %v6293_v6  ;;  %v8210_v17 = vrot.slane %v6191_v25, 4  ;;  %v6314_v55 = vsel %vm2350_vm5, %v2130_v62, -inf  ;;  %v777_v57 = vmax.f32 %v681_v5, %v6285_v16 }
 0x11b   : > { %v2264_v31 = vsel %vm1841_vm4, %v2262_v40, %v8051_v15  ;;  %v8211_v61 = vmax.f32 %v6110_v8, %v6206_v49  ;;  %v2599_v30 = vmax.f32 %v6211_v3, %v6314_v55  ;;  %v8212_v39 = vmax.f32 %v6143_v24, %v6206_v49 }
 0x11c   : > { %8209 = vst [vmem:[#allocation7_spill] sm:$0xff] %v6304_v33  ;;  %v2261_v43 = vsel %vm1841_vm4, %v8210_v17, %v2260_v44  ;;  %2338 = vst [vmem:[%s4858_s15 + $0x308] sm:$0xff] %v2264_v31  ;;  %v1020_v5 = vrot.slane %v777_v57, 1  ;;  %v1333_v44 = vrot.slane %v777_v57, 2  ;;  %v1646_v40 = vrot.slane %v777_v57, 3 }
 0x11d   : > { %2337 = vst [vmem:[%s4858_s15 + $0x2e8] sm:$0xff] %v2261_v43  ;;  %v6325_v53 = vmax.f32 %v8211_v61, %v6314_v55  ;;  %v6333_v62 = vmax.f32 %v8212_v39, %v6314_v55  ;;  %v1959_v17 = vrot.slane %v777_v57, 4  ;;  %v1337_v43 = vsel %vm1215_vm2, %v1335_v63, %v1336_v4 }
 0x11e   : > { %v1338_v31 = vrot.slane %v5204_v52, 2  ;;  %v1648_v8 = vrot.slane %v5172_v27, 3  ;;  %v1649_v61 = vrot.slane %v5177_v22, 3  ;;  %v8214_v3 = vrot.slane %v8202_v7, 1 }
 0x11f   : > { %8213 = vst [vmem:[#allocation8_spill] sm:$0xff] %v6333_v62  ;;  %v8215_v24 = vrot.slane %v8202_v7, 2  ;;  %v1647_v15 = vsel %vm1528_vm3, %v1644_v19, %v1646_v40  ;;  %v1960_v57 = vsel %vm1841_vm4, %v1957_v50, %v1959_v17  ;;  %v1507_v23 = vmax.f32 %v1194_v12, %v1337_v43 }
 0x120   : > { %v1021_v48 = vsel %vm902_vm1, %v8214_v3, %v1020_v5  ;;  %v1339_v0 = vsel %vm1215_vm2, %v1336_v4, %v1338_v31  ;;  %v1650_v62 = vsel %vm1528_vm3, %v1648_v8, %v1649_v61  ;;  %v1651_v5 = vrot.slane %v5204_v52, 3 }
 0x121   : > { %v1334_v39 = vsel %vm1215_vm2, %v8215_v24, %v1333_v44  ;;  %v1193_v63 = vmax.f32 %v8202_v7, %v1021_v48  ;;  %v1508_v33 = vmax.f32 %v1195_v41, %v1339_v0  ;;  %v1961_v3 = vrot.slane %v5172_v27, 4 }
 0x122   : > { %v1962_v44 = vrot.slane %v5177_v22, 4  ;;  %v1820_v19 = vmax.f32 %v1507_v23, %v1650_v62  ;;  %v1964_v50 = vrot.slane %v5204_v52, 4  ;;  %v493_v7 = vmax.f32 %v6036_v20, %v6148_v29 }
 0x123   : > { %v1506_v24 = vmax.f32 %v1193_v63, %v1334_v39  ;;  %v1652_v48 = vsel %vm1528_vm3, %v1649_v61, %v1651_v5  ;;  %v1029_v41 = vrot.slane %v5179_v60, 1  ;;  %v1030_v4 = vrot.slane %v5181_v36, 1 }
 0x124   : > { %v1963_v12 = vsel %vm1841_vm4, %v1961_v3, %v1962_v44  ;;  %v1821_v27 = vmax.f32 %v1508_v33, %v1652_v48  ;;  %v1965_v22 = vsel %vm1841_vm4, %v1962_v44, %v1964_v50  ;;  %v589_v23 = vmax.f32 %v493_v7, %v6195_v56  ;;  %v6377_v33 = vld [vmem:[%s4844_s11 + $0x2b8] sm:$0xf] }
 0x125   : > { %v1819_v0 = vmax.f32 %v1506_v24, %v1647_v15  ;;  %v2133_v40 = vmax.f32 %v1820_v19, %v1963_v12  ;;  %v1031_v62 = vsel %vm902_vm1, %v1029_v41, %v1030_v4  ;;  %v8054_v20 = vrot.slane %v5206_v46, 1 }
 0x126   : > { %v1342_v17 = vrot.slane %v5179_v60, 2  ;;  %v6367_v8 = vmax.f32 %v1821_v27, %v1965_v22  ;;  %v685_v63 = vmax.f32 %v589_v23, %v6285_v16  ;;  %v1197_v3 = vmax.f32 %v5179_v60, %v1031_v62 }
 0x127   : > { %v2132_v43 = vmax.f32 %v1819_v0, %v1960_v57  ;;  %v2267_v61 = vrot.slane %v2133_v40, 4  ;;  %v6371_v39 = vsel %vm2350_vm5, %v2133_v40, -inf  ;;  %v1033_v57 = vsel %vm902_vm1, %v1030_v4, %v8054_v20 }
 0x128   : > { %v6374_v15 = vmax.f32 %v2599_v30, %v6371_v39  ;;  %v8055_v30 = vrot.slane %v6367_v8, 4  ;;  %v1198_v19 = vmax.f32 %v5181_v36, %v1033_v57  ;;  %v8216_v48 = vmax.f32 %v6220_v51, %v6293_v6 }
 0x129   : > { %v2265_v44 = vrot.slane %v2132_v43, 4  ;;  %v6386_v24 = vsel %vm2361_vm6, %v2132_v43, -inf  ;;  %v8217_v4 = vmax.f32 %v6232_v13, %v6293_v6  ;;  %v8218_v27 = vrot.slane %v6281_v32, 4 }
 0x12a   : > { %v6396_v12 = vmax.f32 %v8216_v48, %v6386_v24  ;;  %v2601_v41 = vmax.f32 %v6299_v38, %v6386_v24  ;;  %v2269_v40 = vsel %vm1841_vm4, %v2267_v61, %v8055_v30  ;;  %v781_v51 = vmax.f32 %v685_v63, %v6377_v33 }
 0x12b   : > { %v6404_v0 = vmax.f32 %v8217_v4, %v6386_v24  ;;  %v2266_v22 = vsel %vm1841_vm4, %v8218_v27, %v2265_v44  ;;  %v1343_v23 = vrot.slane %v5181_v36, 2  ;;  %2340 = vst [vmem:[%s4858_s15 + $0x348] sm:$0xff] %v2269_v40  ;;  %v8056_v38 = vrot.slane %v5206_v46, 2 }
 0x12c   : > { %2339 = vst [vmem:[%s4858_s15 + $0x328] sm:$0xff] %v2266_v22  ;;  %v1655_v13 = vrot.slane %v5179_v60, 3  ;;  %v1656_v62 = vrot.slane %v5181_v36, 3  ;;  %v8057_v43 = vrot.slane %v5206_v46, 3  ;;  %v1027_v57 = vrot.slane %v781_v51, 1 }
 0x12d   : > { %v1340_v44 = vrot.slane %v781_v51, 2  ;;  %v1653_v48 = vrot.slane %v781_v51, 3  ;;  %v1966_v4 = vrot.slane %v781_v51, 4  ;;  %v1344_v61 = vsel %vm1215_vm2, %v1342_v17, %v1343_v23 }
 0x12e   : > { %v1346_v63 = vsel %vm1215_vm2, %v1343_v23, %v8056_v38  ;;  %v1657_v27 = vsel %vm1528_vm3, %v1655_v13, %v1656_v62  ;;  %v1659_v22 = vsel %vm1528_vm3, %v1656_v62, %v8057_v43  ;;  %v8219_v40 = vrot.slane %v5204_v52, 1 }
 0x12f   : > { %v1341_v51 = vsel %vm1215_vm2, %v1338_v31, %v1340_v44  ;;  %v1654_v17 = vsel %vm1528_vm3, %v1651_v5, %v1653_v48  ;;  %v1967_v30 = vsel %vm1841_vm4, %v1964_v50, %v1966_v4  ;;  %v1510_v38 = vmax.f32 %v1197_v3, %v1344_v61  ;;  %v8222_v61 = vld [vmem:[#allocation12_spill] sm:$0xff] }
 0x130   : > { %v1028_v20 = vsel %vm902_vm1, %v8219_v40, %v1027_v57  ;;  %v1511_v13 = vmax.f32 %v1198_v19, %v1346_v63  ;;  %v1968_v7 = vrot.slane %v5179_v60, 4  ;;  %v1969_v62 = vrot.slane %v5181_v36, 4  ;;  %v8221_v19 = vld [vmem:[#allocation11_spill] sm:$0xff] }
 0x131   : > { %v1196_v23 = vmax.f32 %v5204_v52, %v1028_v20  ;;  %v1971_v43 = vrot.slane %v5206_v46, 4  ;;  %v2488_v57 = vmax.f32 %v6314_v55, %v6371_v39  ;;  %v8220_v31 = vmax.f32 %v6206_v49, %v6314_v55 }
 0x132   : > { %v1823_v44 = vmax.f32 %v1510_v38, %v1657_v27  ;;  %v1824_v52 = vmax.f32 %v1511_v13, %v1659_v22  ;;  %v2602_v20 = vmax.f32 %v6325_v53, %v6371_v39  ;;  %v1970_v60 = vsel %vm1841_vm4, %v1968_v7, %v1969_v62  ;;  %v8223_v27 = vld [vmem:[#allocation13_spill] sm:$0xff] }
 0x133   : > { %v6446_v5 = vmax.f32 %v8220_v31, %v6371_v39  ;;  %v1509_v50 = vmax.f32 %v1196_v23, %v1341_v51  ;;  %v1972_v36 = vsel %vm1841_vm4, %v1969_v62, %v1971_v43  ;;  %v497_v3 = vmax.f32 %v6148_v29, %v6195_v56 }
 0x134   : > { %v1036_v48 = vrot.slane %v8221_v19, 1  ;;  %v2136_v49 = vmax.f32 %v1823_v44, %v1970_v60  ;;  %v6455_v55 = vmax.f32 %v1824_v52, %v1972_v36  ;;  %v1037_v38 = vrot.slane %v8222_v61, 1 }
 0x135   : > { %v1822_v4 = vmax.f32 %v1509_v50, %v1654_v17  ;;  %v593_v63 = vmax.f32 %v497_v3, %v6285_v16  ;;  %v8059_v53 = vrot.slane %v8223_v27, 1  ;;  %v1349_v7 = vrot.slane %v8221_v19, 2 }
 0x136   : > { %v1350_v22 = vrot.slane %v8222_v61, 2  ;;  %v2272_v29 = vrot.slane %v2136_v49, 4  ;;  %v8058_v51 = vrot.slane %v6455_v55, 4  ;;  %v6465_v17 = vsel %vm2350_vm5, %v2136_v49, -inf }
 0x137   : > { %v2135_v40 = vmax.f32 %v1822_v4, %v1967_v30  ;;  %v6470_v13 = vmax.f32 %v2488_v57, %v6465_v17  ;;  %v6475_v31 = vmax.f32 %v2602_v20, %v6465_v17  ;;  %v6478_v30 = vld [vmem:[%s4844_s11 + $0x2d8] sm:$0xf]  ;;  %v689_v57 = vmax.f32 %v593_v63, %v6377_v33 }
 0x138   : > { %v2274_v52 = vsel %vm1841_vm4, %v2272_v29, %v8058_v51  ;;  %v8225_v36 = vmax.f32 %v6293_v6, %v6386_v24  ;;  %v8226_v49 = vrot.slane %v6367_v8, 4  ;;  %v1040_v29 = vsel %vm902_vm1, %v1037_v38, %v8059_v53 }
 0x139   : > { %8224 = vst [vmem:[#allocation9_spill] sm:$0xff] %v6475_v31  ;;  %v2270_v50 = vrot.slane %v2135_v40, 4  ;;  %v6482_v44 = vsel %vm2361_vm6, %v2135_v40, -inf  ;;  %2342 = vst [vmem:[%s4858_s15 + $0x388] sm:$0xff] %v2274_v52  ;;  %v1038_v40 = vsel %vm902_vm1, %v1036_v48, %v1037_v38  ;;  %v1351_v52 = vsel %vm1215_vm2, %v1349_v7, %v1350_v22 }
 0x13a   : > { %v6489_v60 = vmax.f32 %v2601_v41, %v6482_v44  ;;  %v2490_v20 = vmax.f32 %v6386_v24, %v6482_v44  ;;  %v6498_v3 = vmax.f32 %v8225_v36, %v6482_v44  ;;  %v2604_v4 = vmax.f32 %v6396_v12, %v6482_v44 }
 0x13b   : > { %v2271_v63 = vsel %vm1841_vm4, %v8226_v49, %v2270_v50  ;;  %v785_v41 = vmax.f32 %v689_v57, %v6478_v30  ;;  %v1200_v6 = vmax.f32 %v8221_v19, %v1038_v40  ;;  %v1201_v24 = vmax.f32 %v8222_v61, %v1040_v29 }
 0x13c   : > { %2341 = vst [vmem:[%s4858_s15 + $0x368] sm:$0xff] %v2271_v63  ;;  %v8060_v12 = vrot.slane %v8223_v27, 2  ;;  %v1662_v38 = vrot.slane %v8221_v19, 3  ;;  %v1663_v63 = vrot.slane %v8222_v61, 3  ;;  %v8227_v40 = vrot.slane %v5206_v46, 1 }
 0x13d   : > { %v1034_v36 = vrot.slane %v785_v41, 1  ;;  %v1347_v51 = vrot.slane %v785_v41, 2  ;;  %v1660_v50 = vrot.slane %v785_v41, 3  ;;  %v1973_v49 = vrot.slane %v785_v41, 4 }
 0x13e   : > { %v1353_v48 = vsel %vm1215_vm2, %v1350_v22, %v8060_v12  ;;  %v1513_v57 = vmax.f32 %v1200_v6, %v1351_v52  ;;  %v8228_v7 = vrot.slane %v5206_v46, 2  ;;  %v8229_v62 = vrot.slane %v5206_v46, 3 }
 0x13f   : > { %v1035_v29 = vsel %vm902_vm1, %v8227_v40, %v1034_v36  ;;  %v1974_v23 = vsel %vm1841_vm4, %v1971_v43, %v1973_v49  ;;  %v1514_v6 = vmax.f32 %v1201_v24, %v1353_v48  ;;  %v1664_v52 = vsel %vm1528_vm3, %v1662_v38, %v1663_v63 }
 0x140   : > { %v1348_v53 = vsel %vm1215_vm2, %v8228_v7, %v1347_v51  ;;  %v1661_v41 = vsel %vm1528_vm3, %v8229_v62, %v1660_v50  ;;  %v1199_v22 = vmax.f32 %v5206_v46, %v1035_v29  ;;  %v1665_v12 = vrot.slane %v8223_v27, 3  ;;  %v8230_v29 = vld [vmem:[#allocation17_spill] sm:$0xff] }
 0x141   : > { %v1826_v31 = vmax.f32 %v1513_v57, %v1664_v52  ;;  %v1975_v36 = vrot.slane %v8221_v19, 4  ;;  %v1976_v40 = vrot.slane %v8222_v61, 4  ;;  %v1978_v51 = vrot.slane %v8223_v27, 4 }
 0x142   : > { %v1512_v7 = vmax.f32 %v1199_v22, %v1348_v53  ;;  %v1666_v62 = vsel %vm1528_vm3, %v1663_v63, %v1665_v12  ;;  %v2486_v46 = vmax.f32 %v6191_v25, %v6281_v32  ;;  %v2489_v43 = vmax.f32 %v6281_v32, %v6367_v8 }
 0x143   : > { %v1827_v24 = vmax.f32 %v1514_v6, %v1666_v62  ;;  %v1977_v50 = vsel %vm1841_vm4, %v1975_v36, %v1976_v40  ;;  %v1979_v19 = vsel %vm1841_vm4, %v1976_v40, %v1978_v51  ;;  %v2492_v61 = vmax.f32 %v6367_v8, %v6455_v55  ;;  %v8231_v6 = vld [vmem:[#allocation16_spill] sm:$0xff] }
 0x144   : > { %v1825_v53 = vmax.f32 %v1512_v7, %v1661_v41  ;;  %v2139_v49 = vmax.f32 %v1826_v31, %v1977_v50  ;;  %v2546_v48 = vmax.f32 %v2486_v46, %v6367_v8  ;;  %v2549_v57 = vmax.f32 %v2489_v43, %v6455_v55 }
 0x145   : > { %v6551_v38 = vmax.f32 %v1827_v24, %v1979_v19  ;;  %v501_v63 = vmax.f32 %v6195_v56, %v6285_v16  ;;  %v2750_v22 = vrot.slane %v8230_v29, 1  ;;  %v2751_v52 = vrot.slane %v8231_v6, 1 }
 0x146   : > { %v2138_v36 = vmax.f32 %v1825_v53, %v1974_v23  ;;  %v2277_v40 = vrot.slane %v2139_v49, 4  ;;  %v2425_v62 = vsel %vm2350_vm5, %v2139_v49, -inf  ;;  %v2606_v31 = vmax.f32 %v2546_v48, %v6455_v55 }
 0x147   : > { %v8065_v41 = vrot.slane %v6551_v38, 4  ;;  %v8232_v7 = vmax.f32 %v6371_v39, %v6465_v17  ;;  %v6567_v56 = vmax.f32 %v2492_v61, %v6551_v38  ;;  %v6570_v16 = vmax.f32 %v6470_v13, %v2425_v62 }
 0x148   : > { %v2275_v23 = vrot.slane %v2138_v36, 4  ;;  %v6574_v43 = vsel %vm2361_vm6, %v2138_v36, -inf  ;;  %v6577_v24 = vmax.f32 %v2549_v57, %v6551_v38  ;;  %v8235_v39 = vmax.f32 %v6446_v5, %v6465_v17  ;;  %v212_v36 = vld [vmem:[%s4844_s11 + $0x2f8] sm:$0xf] }
 0x149   : > { %v6564_v46 = vmax.f32 %v8232_v7, %v2425_v62  ;;  %8234 = vst [vmem:[#allocation11_spill] sm:$0xff] %v6567_v56  ;;  %v6587_v13 = vmax.f32 %v2490_v20, %v6574_v43  ;;  %v6592_v53 = vmax.f32 %v2604_v4, %v6574_v43  ;;  %v8236_v49 = vrot.slane %v6455_v55, 4 }
 0x14a   : > { %v6582_v50 = vmax.f32 %v8235_v39, %v2425_v62  ;;  %v2279_v5 = vsel %vm1841_vm4, %v2277_v40, %v8065_v41  ;;  %v6601_v17 = vmax.f32 %v2606_v31, %v6551_v38  ;;  %v597_v20 = vmax.f32 %v501_v63, %v6377_v33 }
 0x14b   : > { %8233 = vst [vmem:[#allocation10_spill] sm:$0xff] %v6564_v46  ;;  %v2276_v48 = vsel %vm1841_vm4, %v8236_v49, %v2275_v23  ;;  %2344 = vst [vmem:[%s4858_s15 + $0x3c8] sm:$0xff] %v2279_v5  ;;  %v2752_v4 = vsel %vm902_vm1, %v2750_v22, %v2751_v52  ;;  %v8062_v62 = vrot.slane %v5483_v26, 1  ;;  %v8064_v7 = vrot.slane %v5518_v28, 1 }
 0x14c   : > { %2343 = vst [vmem:[%s4858_s15 + $0x3a8] sm:$0xff] %v2276_v48  ;;  %v693_v23 = vmax.f32 %v597_v20, %v6478_v30  ;;  %v8063_v40 = vrot.slane %v5597_v21, 1  ;;  %v8066_v31 = vrot.slane %v5585_v35, 1  ;;  %v2906_v39 = vmax.f32 %v8230_v29, %v2752_v4 }
 0x14d   : > { %v2754_v33 = vsel %vm902_vm1, %v2751_v52, %v8062_v62  ;;  %v2970_v63 = vrot.slane %v8230_v29, 2  ;;  %v2971_v22 = vrot.slane %v8231_v6, 2  ;;  %v8067_v49 = vrot.slane %v5483_v26, 2 }
 0x14e   : > { %v789_v48 = vmax.f32 %v693_v23, %v212_v36  ;;  %v2759_v30 = vsel %vm902_vm1, %v8064_v7, %v8063_v40  ;;  %v8237_v5 = vrot.slane %v5704_v42, 1  ;;  %v2907_v52 = vmax.f32 %v8231_v6, %v2754_v33 }
 0x14f   : > { %v2910_v4 = vmax.f32 %v5518_v28, %v2759_v30  ;;  %v2972_v36 = vsel %vm1215_vm2, %v2970_v63, %v2971_v22  ;;  %v2974_v23 = vsel %vm1215_vm2, %v2971_v22, %v8067_v49  ;;  %v8069_v61 = vrot.slane %v5518_v28, 2 }
 0x150   : > { %v2764_v20 = vsel %vm902_vm1, %v8066_v31, %v8237_v5  ;;  %v1041_v62 = vrot.slane %v789_v48, 1  ;;  %v1354_v40 = vrot.slane %v789_v48, 2  ;;  %v1667_v7 = vrot.slane %v789_v48, 3 }
 0x151   : > { %v2913_v57 = vmax.f32 %v5585_v35, %v2764_v20  ;;  %v1980_v41 = vrot.slane %v789_v48, 4  ;;  %v8068_v5 = vrot.slane %v5597_v21, 2  ;;  %v8070_v33 = vrot.slane %v5585_v35, 2 }
 0x152   : > { %v3126_v31 = vmax.f32 %v2906_v39, %v2972_v36  ;;  %v8238_v30 = vrot.slane %v8223_v27, 1  ;;  %v8239_v63 = vrot.slane %v8223_v27, 2  ;;  %v1668_v22 = vsel %vm1528_vm3, %v1665_v12, %v1667_v7 }
 0x153   : > { %v1981_v48 = vsel %vm1841_vm4, %v1978_v51, %v1980_v41  ;;  %v8240_v39 = vrot.slane %v5704_v42, 2  ;;  %v3127_v36 = vmax.f32 %v2907_v52, %v2974_v23  ;;  %v3191_v51 = vrot.slane %v8231_v6, 3 }
 0x154   : > { %v1042_v20 = vsel %vm902_vm1, %v8238_v30, %v1041_v62  ;;  %v1355_v19 = vsel %vm1215_vm2, %v8239_v63, %v1354_v40  ;;  %v2979_v62 = vsel %vm1215_vm2, %v8069_v61, %v8068_v5  ;;  %v3190_v30 = vrot.slane %v8230_v29, 3 }
 0x155   : > { %v1202_v49 = vmax.f32 %v8223_v27, %v1042_v20  ;;  %v2984_v40 = vsel %vm1215_vm2, %v8070_v33, %v8240_v39  ;;  %v3130_v12 = vmax.f32 %v2910_v4, %v2979_v62  ;;  %v3193_v41 = vrot.slane %v5483_v26, 3 }
 0x156   : > { %v3133_v7 = vmax.f32 %v2913_v57, %v2984_v40  ;;  %v3196_v20 = vrot.slane %v5518_v28, 3  ;;  %v8071_v63 = vrot.slane %v5597_v21, 3  ;;  %v3192_v5 = vsel %vm1528_vm3, %v3190_v30, %v3191_v51 }
 0x157   : > { %v1515_v27 = vmax.f32 %v1202_v49, %v1355_v19  ;;  %v8075_v61 = vrot.slane %v5585_v35, 3  ;;  %v8072_v39 = vrot.slane %v5704_v42, 3  ;;  %v3410_v52 = vrot.slane %v8230_v29, 4 }
 0x158   : > { %v3194_v4 = vsel %vm1528_vm3, %v3191_v51, %v3193_v41  ;;  %v3199_v19 = vsel %vm1528_vm3, %v3196_v20, %v8071_v63  ;;  %v3346_v49 = vmax.f32 %v3126_v31, %v3192_v5  ;;  %v3411_v29 = vrot.slane %v8231_v6, 4 }
 0x159   : > { %v1828_v57 = vmax.f32 %v1515_v27, %v1668_v22  ;;  %v3204_v23 = vsel %vm1528_vm3, %v8075_v61, %v8072_v39  ;;  %v3347_v62 = vmax.f32 %v3127_v36, %v3194_v4  ;;  %v3350_v40 = vmax.f32 %v3130_v12, %v3199_v19 }
 0x15a   : > { %v3353_v30 = vmax.f32 %v3133_v7, %v3204_v23  ;;  %v3413_v51 = vrot.slane %v5483_v26, 4  ;;  %v3416_v27 = vrot.slane %v5518_v28, 4  ;;  %v3412_v33 = vsel %vm1841_vm4, %v3410_v52, %v3411_v29 }
 0x15b   : > { %v2141_v22 = vmax.f32 %v1828_v57, %v1981_v48  ;;  %v3418_v31 = vrot.slane %v5597_v21, 4  ;;  %v8074_v5 = vrot.slane %v5585_v35, 4  ;;  %v8073_v63 = vrot.slane %v5704_v42, 4 }
 0x15c   : > { %v3414_v6 = vsel %vm1841_vm4, %v3411_v29, %v3413_v51  ;;  %v3566_v48 = vmax.f32 %v3346_v49, %v3412_v33  ;;  %v8241_v12 = vmax.f32 %v6482_v44, %v6574_v43  ;;  %v8243_v57 = vmax.f32 %v6498_v3, %v6574_v43 }
 0x15d   : > { %v2280_v39 = vrot.slane %v2141_v22, 4  ;;  %v2427_v36 = vsel %vm2361_vm6, %v2141_v22, -inf  ;;  %v3419_v19 = vsel %vm1841_vm4, %v3416_v27, %v3418_v31  ;;  %v8244_v23 = vrot.slane %v6551_v38, 4 }
 0x15e   : > { %v6697_v7 = vmax.f32 %v8241_v12, %v2427_v36  ;;  %v6700_v52 = vmax.f32 %v6587_v13, %v2427_v36  ;;  %v6705_v4 = vmax.f32 %v8243_v57, %v2427_v36  ;;  %v3424_v44 = vsel %vm1841_vm4, %v8074_v5, %v8073_v63  ;;  %v8255_v5 = vld [vmem:[#allocation20_spill] sm:$0xff] }
 0x15f   : > { %v2281_v29 = vsel %vm1841_vm4, %v8244_v23, %v2280_v39  ;;  %v3567_v33 = vmax.f32 %v3347_v62, %v3414_v6  ;;  %v6716_v13 = vmax.f32 %v3350_v40, %v3419_v19  ;;  %v6724_v22 = vmax.f32 %v3353_v30, %v3424_v44  ;;  %v8248_v23 = vld [vmem:[#allocation19_spill] sm:$0xff] }
 0x160   : > { %8242 = vst [vmem:[#allocation12_spill] sm:$0xff] %v6697_v7  ;;  %2345 = vst [vmem:[%s4858_s15 + $0x3e8] sm:$0xff] %v2281_v29  ;;  %v3668_v36 = vrot.slane %v3566_v48, 2  ;;  %v8247_v40 = vrot.slane %v5483_v26, 1  ;;  %v6735_v19 = vsel %vm3812_vm7, %v3566_v48, -inf  ;;  %v2755_v29 = vrot.slane %v8248_v23, 1 }
 0x161   : > { %8245 = vst [vmem:[#allocation13_spill] sm:$0xff] %v6716_v13  ;;  %8246 = vst [vmem:[#allocation17_spill] sm:$0xff] %v6724_v22  ;;  %v3669_v12 = vrot.slane %v3567_v33, 2  ;;  %v3897_v62 = vmax.f32 %v3567_v33, %v6716_v13  ;;  %v8250_v33 = vrot.slane %v5483_v26, 2  ;;  %v2975_v49 = vrot.slane %v8248_v23, 2 }
 0x162   : > { %v2908_v6 = vmax.f32 %v5483_v26, %v8247_v40  ;;  %v8251_v39 = vrot.slane %v5518_v28, 1  ;;  %v3415_v43 = vrot.slane %v8248_v23, 4  ;;  %v3674_v30 = vrot.slane %v6716_v13, 2 }
 0x163   : > { %v3670_v57 = vsel %vm1215_vm2, %v3668_v36, %v3669_v12  ;;  %v6742_v44 = vmax.f32 %v3897_v62, %v6724_v22  ;;  %v3195_v36 = vrot.slane %v8248_v23, 3  ;;  %v2760_v61 = vrot.slane %v8255_v5, 1 }
 0x164   : > { %3780 = vst [vmem:[%s4858_s15 + $0x10] sm:$0xff] %v3670_v57  ;;  %v3128_v40 = vmax.f32 %v2908_v6, %v8250_v33  ;;  %v2757_v48 = vsel %vm902_vm1, %v2755_v29, %v8251_v39  ;;  %v8252_v57 = vrot.slane %v5597_v21, 1  ;;  %v8253_v6 = vrot.slane %v5518_v28, 2 }
 0x165   : > { %8249 = vst [vmem:[#allocation16_spill] sm:$0xff] %v6742_v44  ;;  %v2909_v26 = vmax.f32 %v8248_v23, %v2757_v48  ;;  %v3197_v3 = vsel %vm1528_vm3, %v3195_v36, %v3196_v20  ;;  %v3417_v39 = vsel %vm1841_vm4, %v3415_v43, %v3416_v27  ;;  %v8254_v29 = vrot.slane %v5597_v21, 2 }
 0x166   : > { %v2911_v62 = vmax.f32 %v5597_v21, %v8252_v57  ;;  %v3348_v38 = vmax.f32 %v3128_v40, %v3193_v41  ;;  %v2977_v33 = vsel %vm1215_vm2, %v2975_v49, %v8253_v6  ;;  %v2980_v57 = vrot.slane %v8255_v5, 2 }
 0x167   : > { %v3129_v40 = vmax.f32 %v2909_v26, %v2977_v33  ;;  %v3200_v23 = vrot.slane %v8255_v5, 3  ;;  %v3420_v48 = vrot.slane %v8255_v5, 4  ;;  %v8256_v49 = vrot.slane %v5597_v21, 3 }
 0x168   : > { %v3131_v63 = vmax.f32 %v2911_v62, %v8254_v29  ;;  %v3568_v41 = vmax.f32 %v3348_v38, %v3413_v51  ;;  %v8257_v20 = vrot.slane %v5585_v35, 1  ;;  %v8258_v43 = vrot.slane %v5585_v35, 2 }
 0x169   : > { %v3679_v62 = vrot.slane %v6724_v22, 2  ;;  %v3349_v26 = vmax.f32 %v3129_v40, %v3197_v3  ;;  %v8262_v3 = vld [vmem:[#allocation18_spill] sm:$0xff] }
 0x16a   : > { %v3351_v28 = vmax.f32 %v3131_v63, %v8256_v49  ;;  %v2762_v27 = vsel %vm902_vm1, %v2760_v61, %v8257_v20  ;;  %v2982_v36 = vsel %vm1215_vm2, %v2980_v57, %v8258_v43  ;;  %v3671_v51 = vrot.slane %v3568_v41, 2  ;;  %v8263_v40 = vld [vmem:[#allocation14_spill] sm:$0xff] }
 0x16b   : > { %v3838_v38 = vsel %vm3823_vm8, %v3568_v41, -inf  ;;  %v2912_v6 = vmax.f32 %v8255_v5, %v2762_v27  ;;  %v8259_v63 = vrot.slane %v5585_v35, 3  ;;  %v8260_v61 = vrot.slane %v5585_v35, 4  ;;  %v8264_v5 = vld [vmem:[#allocation15_spill] sm:$0xff] }
 0x16c   : > { %v3571_v21 = vmax.f32 %v3351_v28, %v3418_v31  ;;  %v8261_v57 = vrot.slane %v5704_v42, 1  ;;  %v3672_v20 = vsel %vm1215_vm2, %v3669_v12, %v3671_v51  ;;  %v3569_v43 = vmax.f32 %v3349_v26, %v3417_v39 }
 0x16d   : > { %v3202_v33 = vsel %vm1528_vm3, %v3200_v23, %v8259_v63  ;;  %v3422_v29 = vsel %vm1841_vm4, %v3420_v48, %v8260_v61  ;;  %v3132_v41 = vmax.f32 %v2912_v6, %v2982_v36  ;;  %v8265_v31 = vmax.f32 %v8263_v40, %v8264_v5  ;;  %3781 = vst [vmem:[%s4858_s15 + $0x30] sm:$0xff] %v3672_v20 }
 0x16e   : > { %v2914_v49 = vmax.f32 %v5704_v42, %v8261_v57  ;;  %v3676_v23 = vrot.slane %v3571_v21, 2  ;;  %v6799_v35 = vsel %vm3823_vm8, %v3571_v21, -inf  ;;  %v8266_v48 = vrot.slane %v5704_v42, 2 }
 0x16f   : > { %v2516_v28 = vmax.f32 %v8265_v31, %v8262_v3  ;;  %v2765_v12 = vrot.slane %v5679_v59, 1  ;;  %v3673_v39 = vrot.slane %v3569_v43, 2  ;;  %v6806_v36 = vsel %vm3812_vm7, %v3569_v43, -inf }
 0x170   : > { %v3134_v27 = vmax.f32 %v2914_v49, %v8266_v48  ;;  %v3898_v51 = vmax.f32 %v3838_v38, %v6799_v35  ;;  %v3352_v26 = vmax.f32 %v3132_v41, %v3202_v33  ;;  %v3896_v6 = vmax.f32 %v6735_v19, %v6806_v36  ;;  %v8269_v19 = vld [vmem:[#allocation21_spill] sm:$0xff] }
 0x171   : > { %v3677_v21 = vsel %vm1215_vm2, %v3674_v30, %v3676_v23  ;;  %v8267_v63 = vrot.slane %v5704_v42, 3  ;;  %v2576_v57 = vmax.f32 %v2516_v28, %v5561_v37  ;;  %v3675_v49 = vsel %vm1215_vm2, %v3673_v39, %v3674_v30 }
 0x172   : > { %3783 = vst [vmem:[%s4858_s15 + $0x70] sm:$0xff] %v3677_v21  ;;  %v3572_v20 = vmax.f32 %v3352_v26, %v3422_v29  ;;  %v2768_v43 = vrot.slane %v5768_v11, 1  ;;  %v2985_v40 = vrot.slane %v5679_v59, 2  ;;  %3782 = vst [vmem:[%s4858_s15 + $0x50] sm:$0xff] %v3675_v49  ;;  %v8268_v38 = vrot.slane %v5704_v42, 4 }
 0x173   : > { %v3354_v61 = vmax.f32 %v3134_v27, %v8267_v63  ;;  %v2636_v41 = vmax.f32 %v2576_v57, %v8269_v19  ;;  %v2988_v31 = vrot.slane %v5768_v11, 2  ;;  %v3205_v23 = vrot.slane %v5679_v59, 3 }
 0x174   : > { %v3678_v28 = vrot.slane %v3572_v20, 2  ;;  %v6827_v30 = vsel %vm3812_vm7, %v3572_v20, -inf  ;;  %v3208_v29 = vrot.slane %v5768_v11, 3  ;;  %v3425_v48 = vrot.slane %v5679_v59, 4 }
 0x175   : > { %v3574_v33 = vmax.f32 %v3354_v61, %v8268_v38  ;;  %v3899_v42 = vmax.f32 %v6806_v36, %v6827_v30  ;;  %v6834_v27 = vmax.f32 %v3896_v6, %v6827_v30  ;;  %v2766_v57 = vrot.slane %v2636_v41, 1 }
 0x176   : > { %v3680_v21 = vsel %vm1215_vm2, %v3678_v28, %v3679_v62  ;;  %v2986_v49 = vrot.slane %v2636_v41, 2  ;;  %v3206_v6 = vrot.slane %v2636_v41, 3  ;;  %v3426_v20 = vrot.slane %v2636_v41, 4 }
 0x177   : > { %8270 = vst [vmem:[#allocation19_spill] sm:$0xff] %v6834_v27  ;;  %v3681_v39 = vrot.slane %v3574_v33, 2  ;;  %v6838_v26 = vsel %vm3823_vm8, %v3574_v33, -inf  ;;  %3784 = vst [vmem:[%s4858_s15 + $0x90] sm:$0xff] %v3680_v21  ;;  %v2767_v38 = vsel %vm902_vm1, %v2765_v12, %v2766_v57  ;;  %v2769_v33 = vsel %vm902_vm1, %v2766_v57, %v2768_v43 }
 0x178   : > { %v3901_v63 = vmax.f32 %v6799_v35, %v6838_v26  ;;  %v6844_v61 = vmax.f32 %v3898_v51, %v6838_v26  ;;  %v3428_v28 = vrot.slane %v5768_v11, 4  ;;  %v2917_v22 = vmax.f32 %v5768_v11, %v2768_v43  ;;  %v8273_v43 = vld [vmem:[#allocation22_spill] sm:$0xff] }
 0x179   : > { %v3682_v36 = vsel %vm1215_vm2, %v3679_v62, %v3681_v39  ;;  %v2915_v35 = vmax.f32 %v5679_v59, %v2767_v38  ;;  %v2916_v51 = vmax.f32 %v2636_v41, %v2769_v33  ;;  %v2987_v13 = vsel %vm1215_vm2, %v2985_v40, %v2986_v49 }
 0x17a   : > { %8271 = vst [vmem:[#allocation20_spill] sm:$0xff] %v6844_v61  ;;  %3785 = vst [vmem:[%s4858_s15 + $0xb0] sm:$0xff] %v3682_v36  ;;  %v2989_v21 = vsel %vm1215_vm2, %v2986_v49, %v2988_v31  ;;  %v3207_v62 = vsel %vm1528_vm3, %v3205_v23, %v3206_v6  ;;  %v3209_v39 = vsel %vm1528_vm3, %v3206_v6, %v3208_v29  ;;  %v2770_v40 = vrot.slane %v8273_v43, 1 }
 0x17b   : > { %v3427_v36 = vsel %vm1841_vm4, %v3425_v48, %v3426_v20  ;;  %v3429_v12 = vsel %vm1841_vm4, %v3426_v20, %v3428_v28  ;;  %v3135_v57 = vmax.f32 %v2915_v35, %v2987_v13  ;;  %v3136_v44 = vmax.f32 %v2916_v51, %v2989_v21 }
 0x17c   : > { %v3137_v7 = vmax.f32 %v2917_v22, %v2988_v31  ;;  %v8272_v59 = vmax.f32 %v8264_v5, %v8262_v3  ;;  %v2773_v41 = vrot.slane %v5874_v14, 1  ;;  %v2990_v23 = vrot.slane %v8273_v43, 2 }
 0x17d   : > { %v2993_v49 = vrot.slane %v5874_v14, 2  ;;  %v3355_v6 = vmax.f32 %v3135_v57, %v3207_v62  ;;  %v3356_v48 = vmax.f32 %v3136_v44, %v3209_v39  ;;  %v3210_v22 = vrot.slane %v8273_v43, 3 }
 0x17e   : > { %v2519_v11 = vmax.f32 %v8272_v59, %v5561_v37  ;;  %v3357_v38 = vmax.f32 %v3137_v7, %v3208_v29  ;;  %v3213_v31 = vrot.slane %v5874_v14, 3  ;;  %v3430_v5 = vrot.slane %v8273_v43, 4 }
 0x17f   : > { %v3433_v20 = vrot.slane %v5874_v14, 4  ;;  %v3575_v33 = vmax.f32 %v3355_v6, %v3427_v36  ;;  %v6873_v35 = vmax.f32 %v3356_v48, %v3429_v12  ;;  %v2920_v62 = vmax.f32 %v5874_v14, %v2773_v41 }
 0x180   : > { %v2579_v13 = vmax.f32 %v2519_v11, %v8269_v19  ;;  %v3577_v51 = vmax.f32 %v3357_v38, %v3428_v28  ;;  %v2462_v7 = vmax.f32 %v8262_v3, %v5561_v37  ;;  %v2775_v44 = vrot.slane %v5857_v34, 1 }
 0x181   : > { %8274 = vst [vmem:[#allocation18_spill] sm:$0xff] %v6873_v35  ;;  %v2778_v29 = vrot.slane %v5940_v18, 1  ;;  %v3683_v39 = vrot.slane %v3575_v33, 2  ;;  %v3684_v57 = vrot.slane %v6873_v35, 2  ;;  %v6884_v36 = vsel %vm3812_vm7, %v3575_v33, -inf }
 0x182   : > { %v2639_v21 = vmax.f32 %v2579_v13, %v5747_v54  ;;  %v3686_v28 = vrot.slane %v3577_v51, 2  ;;  %v3902_v14 = vmax.f32 %v6827_v30, %v6884_v36  ;;  %v6889_v12 = vmax.f32 %v3899_v42, %v6884_v36 }
 0x183   : > { %v6893_v3 = vmax.f32 %v6834_v27, %v6884_v36  ;;  %v6897_v59 = vsel %vm3823_vm8, %v3577_v51, -inf  ;;  %v3685_v11 = vsel %vm1215_vm2, %v3683_v39, %v3684_v57  ;;  %v3140_v35 = vmax.f32 %v2920_v62, %v2993_v49 }
 0x184   : > { %v3687_v6 = vsel %vm1215_vm2, %v3684_v57, %v3686_v28  ;;  %v3904_v48 = vmax.f32 %v6838_v26, %v6897_v59  ;;  %v6904_v30 = vmax.f32 %v3901_v63, %v6897_v59  ;;  %3786 = vst [vmem:[%s4858_s15 + $0xd0] sm:$0xff] %v3685_v11  ;;  %v6910_v42 = vmax.f32 %v6844_v61, %v6897_v59 }
 0x185   : > { %3787 = vst [vmem:[%s4858_s15 + $0xf0] sm:$0xff] %v3687_v6  ;;  %v2771_v38 = vrot.slane %v2639_v21, 1  ;;  %v2991_v13 = vrot.slane %v2639_v21, 2  ;;  %v3211_v33 = vrot.slane %v2639_v21, 3  ;;  %v3431_v51 = vrot.slane %v2639_v21, 4 }
 0x186   : > { %8275 = vst [vmem:[#allocation14_spill] sm:$0xff] %v6904_v30  ;;  %8276 = vst [vmem:[#allocation15_spill] sm:$0xff] %v6910_v42  ;;  %v2522_v39 = vmax.f32 %v2462_v7, %v8269_v19  ;;  %v2995_v57 = vrot.slane %v5857_v34, 2  ;;  %v3360_v56 = vmax.f32 %v3140_v35, %v3213_v31 }
 0x187   : > { %v2772_v26 = vsel %vm902_vm1, %v2770_v40, %v2771_v38  ;;  %v2774_v63 = vsel %vm902_vm1, %v2771_v38, %v2773_v41  ;;  %v2992_v28 = vsel %vm1215_vm2, %v2990_v23, %v2991_v13  ;;  %v2994_v11 = vsel %vm1215_vm2, %v2991_v13, %v2993_v49 }
 0x188   : > { %v2918_v6 = vmax.f32 %v8273_v43, %v2772_v26  ;;  %v2919_v42 = vmax.f32 %v2639_v21, %v2774_v63  ;;  %v3212_v61 = vsel %vm1528_vm3, %v3210_v22, %v3211_v33  ;;  %v3214_v27 = vsel %vm1528_vm3, %v3211_v33, %v3213_v31 }
 0x189   : > { %v3432_v62 = vsel %vm1841_vm4, %v3430_v5, %v3431_v51  ;;  %v3434_v7 = vsel %vm1841_vm4, %v3431_v51, %v3433_v20  ;;  %v2582_v40 = vmax.f32 %v2522_v39, %v5747_v54  ;;  %v2998_v23 = vrot.slane %v5940_v18, 2 }
 0x18a   : > { %v3138_v46 = vmax.f32 %v2918_v6, %v2992_v28  ;;  %v3139_v41 = vmax.f32 %v2919_v42, %v2994_v11  ;;  %v3215_v49 = vrot.slane %v5857_v34, 3  ;;  %v3580_v38 = vmax.f32 %v3360_v56, %v3433_v20 }
 0x18b   : > { %v2642_v43 = vmax.f32 %v2582_v40, %v5831_v47  ;;  %v3218_v22 = vrot.slane %v5940_v18, 3  ;;  %v3435_v21 = vrot.slane %v5857_v34, 4  ;;  %v3438_v33 = vrot.slane %v5940_v18, 4 }
 0x18c   : > { %v3358_v13 = vmax.f32 %v3138_v46, %v3212_v61  ;;  %v3359_v5 = vmax.f32 %v3139_v41, %v3214_v27  ;;  %v2923_v31 = vmax.f32 %v5940_v18, %v2778_v29  ;;  %v3691_v35 = vrot.slane %v3580_v38, 2 }
 0x18d   : > { %v6933_v42 = vsel %vm3823_vm8, %v3580_v38, -inf  ;;  %v2776_v51 = vrot.slane %v2642_v43, 1  ;;  %v2996_v39 = vrot.slane %v2642_v43, 2  ;;  %v3216_v38 = vrot.slane %v2642_v43, 3 }
 0x18e   : > { %v3578_v56 = vmax.f32 %v3358_v13, %v3432_v62  ;;  %v6935_v20 = vmax.f32 %v3359_v5, %v3434_v7  ;;  %v3907_v26 = vmax.f32 %v6897_v59, %v6933_v42  ;;  %v6940_v46 = vmax.f32 %v3904_v48, %v6933_v42 }
 0x18f   : > { %v2777_v18 = vsel %vm902_vm1, %v2775_v44, %v2776_v51  ;;  %v2779_v61 = vsel %vm902_vm1, %v2776_v51, %v2778_v29  ;;  %v2997_v63 = vsel %vm1215_vm2, %v2995_v57, %v2996_v39  ;;  %v3143_v13 = vmax.f32 %v2923_v31, %v2998_v23 }
 0x190   : > { %8277 = vst [vmem:[#allocation21_spill] sm:$0xff] %v6940_v46  ;;  %v3688_v28 = vrot.slane %v3578_v56, 2  ;;  %v3689_v11 = vrot.slane %v6935_v20, 2  ;;  %v6950_v6 = vsel %vm3812_vm7, %v3578_v56, -inf  ;;  %v2921_v48 = vmax.f32 %v5857_v34, %v2777_v18  ;;  %v8278_v56 = vld [vmem:[#allocation4_spill] sm:$0xff] }
 0x191   : > { %v3905_v62 = vmax.f32 %v6884_v36, %v6950_v6  ;;  %v6956_v7 = vmax.f32 %v3902_v14, %v6950_v6  ;;  %v3995_v44 = vmax.f32 %v6889_v12, %v6950_v6  ;;  %v6962_v29 = vmax.f32 %v6893_v3, %v6950_v6 }
 0x192   : > { %v3690_v57 = vsel %vm1215_vm2, %v3688_v28, %v3689_v11  ;;  %v3692_v40 = vsel %vm1215_vm2, %v3689_v11, %v3691_v35  ;;  %v2922_v41 = vmax.f32 %v2642_v43, %v2779_v61  ;;  %v2999_v34 = vsel %vm1215_vm2, %v2996_v39, %v2998_v23 }
 0x193   : > { %3788 = vst [vmem:[%s4858_s15 + $0x110] sm:$0xff] %v3690_v57  ;;  %3789 = vst [vmem:[%s4858_s15 + $0x130] sm:$0xff] %v3692_v40  ;;  %v3141_v36 = vmax.f32 %v2921_v48, %v2997_v63  ;;  %v3436_v14 = vrot.slane %v2642_v43, 4  ;;  %v2465_v12 = vmax.f32 %v5561_v37, %v8269_v19  ;;  %v2780_v51 = vrot.slane %v5961_v58, 1 }
 0x194   : > { %v3142_v5 = vmax.f32 %v2922_v41, %v2999_v34  ;;  %v2783_v18 = vrot.slane %v8278_v56, 1  ;;  %v3217_v28 = vsel %vm1528_vm3, %v3215_v49, %v3216_v38  ;;  %v3219_v35 = vsel %vm1528_vm3, %v3216_v38, %v3218_v22 }
 0x195   : > { %v3437_v39 = vsel %vm1841_vm4, %v3435_v21, %v3436_v14  ;;  %v3439_v61 = vsel %vm1841_vm4, %v3436_v14, %v3438_v33  ;;  %v3361_v63 = vmax.f32 %v3141_v36, %v3217_v28  ;;  %v3363_v43 = vmax.f32 %v3143_v13, %v3218_v22 }
 0x196   : > { %v3362_v11 = vmax.f32 %v3142_v5, %v3219_v35  ;;  %v2525_v23 = vmax.f32 %v2465_v12, %v5747_v54  ;;  %v3000_v31 = vrot.slane %v5961_v58, 2  ;;  %v3003_v37 = vrot.slane %v8278_v56, 2 }
 0x197   : > { %v3220_v48 = vrot.slane %v5961_v58, 3  ;;  %v3223_v57 = vrot.slane %v8278_v56, 3  ;;  %v3581_v49 = vmax.f32 %v3361_v63, %v3437_v39  ;;  %v3583_v41 = vmax.f32 %v3363_v43, %v3438_v33  ;;  %v8281_v63 = vld [vmem:[#allocation23_spill] sm:$0xff] }
 0x198   : > { %v6982_v40 = vmax.f32 %v3362_v11, %v3439_v61  ;;  %v2585_v21 = vmax.f32 %v2525_v23, %v5831_v47  ;;  %v3440_v34 = vrot.slane %v5961_v58, 4  ;;  %v3443_v22 = vrot.slane %v8278_v56, 4 }
 0x199   : > { %v2926_v36 = vmax.f32 %v8278_v56, %v2783_v18  ;;  %v2468_v38 = vmax.f32 %v8269_v19, %v5747_v54  ;;  %v3693_v14 = vrot.slane %v3581_v49, 2  ;;  %v6993_v5 = vsel %vm3812_vm7, %v3581_v49, -inf }
 0x19a   : > { %8279 = vst [vmem:[#allocation22_spill] sm:$0xff] %v6982_v40  ;;  %v3694_v13 = vrot.slane %v6982_v40, 2  ;;  %v3696_v33 = vrot.slane %v3583_v41, 2  ;;  %v6998_v28 = vmax.f32 %v3905_v62, %v6993_v5  ;;  %v7003_v35 = vmax.f32 %v3995_v44, %v6993_v5 }
 0x19b   : > { %v7009_v61 = vsel %vm3823_vm8, %v3583_v41, -inf  ;;  %v2645_v11 = vmax.f32 %v2585_v21, %v8281_v63  ;;  %v3146_v23 = vmax.f32 %v2926_v36, %v3003_v37  ;;  %v2788_v27 = vrot.slane %v6131_v10, 1 }
 0x19c   : > { %8280 = vst [vmem:[#allocation4_spill] sm:$0xff] %v7003_v35  ;;  %v3695_v19 = vsel %vm1215_vm2, %v3693_v14, %v3694_v13  ;;  %v3697_v39 = vsel %vm1215_vm2, %v3694_v13, %v3696_v33  ;;  %v3910_v62 = vmax.f32 %v6933_v42, %v7009_v61  ;;  %v7020_v44 = vmax.f32 %v3907_v26, %v7009_v61 }
 0x19d   : > { %3790 = vst [vmem:[%s4858_s15 + $0x150] sm:$0xff] %v3695_v19  ;;  %3791 = vst [vmem:[%s4858_s15 + $0x170] sm:$0xff] %v3697_v39  ;;  %v2781_v49 = vrot.slane %v2645_v11, 1  ;;  %v3001_v41 = vrot.slane %v2645_v11, 2  ;;  %v3221_v14 = vrot.slane %v2645_v11, 3  ;;  %v3441_v13 = vrot.slane %v2645_v11, 4 }
 0x19e   : > { %8282 = vst [vmem:[#allocation23_spill] sm:$0xff] %v7020_v44  ;;  %v3366_v21 = vmax.f32 %v3146_v23, %v3223_v57  ;;  %v2528_v33 = vmax.f32 %v2468_v38, %v5831_v47  ;;  %v8283_v19 = vld [vmem:[#allocation3_spill] sm:$0xff] }
 0x19f   : > { %v2785_v39 = vrot.slane %v8283_v19, 1  ;;  %v2782_v56 = vsel %vm902_vm1, %v2780_v51, %v2781_v49  ;;  %v2784_v59 = vsel %vm902_vm1, %v2781_v49, %v2783_v18  ;;  %v3002_v26 = vsel %vm1215_vm2, %v3000_v31, %v3001_v41 }
 0x1a0   : > { %v3004_v43 = vsel %vm1215_vm2, %v3001_v41, %v3003_v37  ;;  %v2924_v36 = vmax.f32 %v5961_v58, %v2782_v56  ;;  %v2925_v12 = vmax.f32 %v2645_v11, %v2784_v59  ;;  %v3222_v46 = vsel %vm1528_vm3, %v3220_v48, %v3221_v14  ;;  %v8285_v48 = vld [vmem:[#allocation2_spill] sm:$0xff] }
 0x1a1   : > { %v3224_v23 = vsel %vm1528_vm3, %v3221_v14, %v3223_v57  ;;  %v3442_v38 = vsel %vm1841_vm4, %v3440_v34, %v3441_v13  ;;  %v3444_v30 = vsel %vm1841_vm4, %v3441_v13, %v3443_v22  ;;  %v3586_v40 = vmax.f32 %v3366_v21, %v3443_v22 }
 0x1a2   : > { %v2588_v51 = vmax.f32 %v2528_v33, %v8281_v63  ;;  %v3144_v35 = vmax.f32 %v2924_v36, %v3002_v26  ;;  %v3145_v18 = vmax.f32 %v2925_v12, %v3004_v43  ;;  %v3005_v31 = vrot.slane %v8283_v19, 2 }
 0x1a3   : > { %v3008_v37 = vrot.slane %v6131_v10, 2  ;;  %v3701_v49 = vrot.slane %v3586_v40, 2  ;;  %v7041_v58 = vsel %vm3823_vm8, %v3586_v40, -inf  ;;  %v3225_v34 = vrot.slane %v8283_v19, 3 }
 0x1a4   : > { %8284 = vst [vmem:[#allocation3_spill] sm:$0xff] %v7041_v58  ;;  %v2648_v57 = vmax.f32 %v2588_v51, %v8285_v48  ;;  %v3364_v56 = vmax.f32 %v3144_v35, %v3222_v46  ;;  %v3365_v11 = vmax.f32 %v3145_v18, %v3224_v23  ;;  %v7048_v12 = vmax.f32 %v3910_v62, %v7041_v58 }
 0x1a5   : > { %v3228_v33 = vrot.slane %v6131_v10, 3  ;;  %v3445_v46 = vrot.slane %v8283_v19, 4  ;;  %v8288_v51 = vmax.f32 %v6950_v6, %v6993_v5 }
 0x1a6   : > { %8286 = vst [vmem:[#allocation2_spill] sm:$0xff] %v7048_v12  ;;  %v2786_v41 = vrot.slane %v2648_v57, 1  ;;  %v3006_v14 = vrot.slane %v2648_v57, 2  ;;  %v3226_v13 = vrot.slane %v2648_v57, 3  ;;  %v3584_v40 = vmax.f32 %v3364_v56, %v3442_v38 }
 0x1a7   : > { %v7052_v21 = vmax.f32 %v3365_v11, %v3444_v30  ;;  %v8289_v56 = vmax.f32 %v6956_v7, %v6993_v5  ;;  %v2929_v7 = vmax.f32 %v6131_v10, %v2788_v27 }
 0x1a8   : > { %v2787_v35 = vsel %vm902_vm1, %v2785_v39, %v2786_v41  ;;  %v2789_v59 = vsel %vm902_vm1, %v2786_v41, %v2788_v27  ;;  %v3007_v62 = vsel %vm1215_vm2, %v3005_v31, %v3006_v14  ;;  %v3009_v26 = vsel %vm1215_vm2, %v3006_v14, %v3008_v37 }
 0x1a9   : > { %8287 = vst [vmem:[#allocation24_spill] sm:$0xff] %v7052_v21  ;;  %v3698_v36 = vrot.slane %v3584_v40, 2  ;;  %v3699_v23 = vrot.slane %v7052_v21, 2  ;;  %v7063_v30 = vsel %vm3812_vm7, %v3584_v40, -inf  ;;  %v2927_v38 = vmax.f32 %v8283_v19, %v2787_v35 }
 0x1aa   : > { %v3911_v39 = vmax.f32 %v6993_v5, %v7063_v30  ;;  %v7072_v18 = vmax.f32 %v8288_v51, %v7063_v30  ;;  %v4001_v31 = vmax.f32 %v6998_v28, %v7063_v30  ;;  %v7080_v11 = vmax.f32 %v8289_v56, %v7063_v30 }
 0x1ab   : > { %v3700_v19 = vsel %vm1215_vm2, %v3698_v36, %v3699_v23  ;;  %v3702_v41 = vsel %vm1215_vm2, %v3699_v23, %v3701_v49  ;;  %v2928_v14 = vmax.f32 %v2648_v57, %v2789_v59  ;;  %v3147_v40 = vmax.f32 %v2927_v38, %v3007_v62  ;;  %v8290_v62 = vld [vmem:[#allocation6_spill] sm:$0xff] }
 0x1ac   : > { %3792 = vst [vmem:[%s4858_s15 + $0x190] sm:$0xff] %v3700_v19  ;;  %3793 = vst [vmem:[%s4858_s15 + $0x1b0] sm:$0xff] %v3702_v41  ;;  %v3227_v6 = vsel %vm1528_vm3, %v3225_v34, %v3226_v13  ;;  %v3229_v35 = vsel %vm1528_vm3, %v3226_v13, %v3228_v33  ;;  %v3446_v51 = vrot.slane %v2648_v57, 4  ;;  %v3448_v28 = vrot.slane %v6131_v10, 4 }
 0x1ad   : > { %v3148_v43 = vmax.f32 %v2928_v14, %v3009_v26  ;;  %v3367_v22 = vmax.f32 %v3147_v40, %v3227_v6  ;;  %v2471_v5 = vmax.f32 %v5747_v54, %v5831_v47  ;;  %v2790_v36 = vrot.slane %v8290_v62, 1 }
 0x1ae   : > { %v3447_v49 = vsel %vm1841_vm4, %v3445_v46, %v3446_v51  ;;  %v3449_v59 = vsel %vm1841_vm4, %v3446_v51, %v3448_v28  ;;  %v2793_v34 = vrot.slane %v6240_v45, 1  ;;  %v3149_v57 = vmax.f32 %v2929_v7, %v3008_v37 }
 0x1af   : > { %v3368_v23 = vmax.f32 %v3148_v43, %v3229_v35  ;;  %v3587_v13 = vmax.f32 %v3367_v22, %v3447_v49  ;;  %v2531_v38 = vmax.f32 %v2471_v5, %v8281_v63  ;;  %v3010_v26 = vrot.slane %v8290_v62, 2 }
 0x1b0   : > { %v3013_v10 = vrot.slane %v6240_v45, 2  ;;  %v3230_v27 = vrot.slane %v8290_v62, 3  ;;  %v3233_v54 = vrot.slane %v6240_v45, 3  ;;  %v3369_v43 = vmax.f32 %v3149_v57, %v3228_v33 }
 0x1b1   : > { %v7101_v46 = vmax.f32 %v3368_v23, %v3449_v59  ;;  %v3703_v56 = vrot.slane %v3587_v13, 2  ;;  %v7105_v19 = vsel %vm3812_vm7, %v3587_v13, -inf  ;;  %v2591_v35 = vmax.f32 %v2531_v38, %v8285_v48  ;;  %v8293_v59 = vld [vmem:[#allocation5_spill] sm:$0xff] }
 0x1b2   : > { %v7110_v22 = vmax.f32 %v3911_v39, %v7105_v19  ;;  %v7115_v14 = vmax.f32 %v4001_v31, %v7105_v19  ;;  %v3589_v6 = vmax.f32 %v3369_v43, %v3448_v28  ;;  %v3450_v33 = vrot.slane %v8290_v62, 4 }
 0x1b3   : > { %8291 = vst [vmem:[#allocation6_spill] sm:$0xff] %v7101_v46  ;;  %v3704_v40 = vrot.slane %v7101_v46, 2  ;;  %v3453_v51 = vrot.slane %v6240_v45, 4  ;;  %v2932_v7 = vmax.f32 %v6240_v45, %v2793_v34  ;;  %v2474_v39 = vmax.f32 %v5831_v47, %v8281_v63  ;;  %v8296_v46 = vld [vmem:[#allocation7_spill] sm:$0xff] }
 0x1b4   : > { %8292 = vst [vmem:[#allocation25_spill] sm:$0xff] %v7115_v14  ;;  %v2795_v5 = vrot.slane %v6216_v2, 1  ;;  %v3706_v49 = vrot.slane %v3589_v6, 2  ;;  %v7128_v28 = vsel %vm3823_vm8, %v3589_v6, -inf  ;;  %v2651_v23 = vmax.f32 %v2591_v35, %v8293_v59 }
 0x1b5   : > { %v3705_v31 = vsel %vm1215_vm2, %v3703_v56, %v3704_v40  ;;  %v3916_v13 = vmax.f32 %v7041_v58, %v7128_v28  ;;  %v8294_v45 = vmax.f32 %v7009_v61, %v7041_v58  ;;  %v3152_v38 = vmax.f32 %v2932_v7, %v3013_v10 }
 0x1b6   : > { %3794 = vst [vmem:[%s4858_s15 + $0x1d0] sm:$0xff] %v3705_v31  ;;  %v3707_v56 = vsel %vm1215_vm2, %v3704_v40, %v3706_v49  ;;  %v2791_v43 = vrot.slane %v2651_v23, 1  ;;  %v3011_v6 = vrot.slane %v2651_v23, 2  ;;  %v3231_v41 = vrot.slane %v2651_v23, 3 }
 0x1b7   : > { %v7138_v47 = vmax.f32 %v8294_v45, %v7128_v28  ;;  %3795 = vst [vmem:[%s4858_s15 + $0x1f0] sm:$0xff] %v3707_v56  ;;  %v3451_v35 = vrot.slane %v2651_v23, 4  ;;  %v3372_v31 = vmax.f32 %v3152_v38, %v3233_v54  ;;  %v2534_v37 = vmax.f32 %v2474_v39, %v8285_v48 }
 0x1b8   : > { %v2798_v44 = vrot.slane %v8296_v46, 1  ;;  %v2792_v21 = vsel %vm902_vm1, %v2790_v36, %v2791_v43  ;;  %v2794_v45 = vsel %vm902_vm1, %v2791_v43, %v2793_v34  ;;  %v3012_v14 = vsel %vm1215_vm2, %v3010_v26, %v3011_v6 }
 0x1b9   : > { %8295 = vst [vmem:[#allocation5_spill] sm:$0xff] %v7138_v47  ;;  %v3014_v7 = vsel %vm1215_vm2, %v3011_v6, %v3013_v10  ;;  %v2930_v40 = vmax.f32 %v8290_v62, %v2792_v21  ;;  %v2931_v49 = vmax.f32 %v2651_v23, %v2794_v45  ;;  %v3232_v57 = vsel %vm1528_vm3, %v3230_v27, %v3231_v41 }
 0x1ba   : > { %v3234_v56 = vsel %vm1528_vm3, %v3231_v41, %v3233_v54  ;;  %v3452_v38 = vsel %vm1841_vm4, %v3450_v33, %v3451_v35  ;;  %v3454_v39 = vsel %vm1841_vm4, %v3451_v35, %v3453_v51  ;;  %v3592_v12 = vmax.f32 %v3372_v31, %v3453_v51 }
 0x1bb   : > { %v2594_v36 = vmax.f32 %v2534_v37, %v8293_v59  ;;  %v3150_v58 = vmax.f32 %v2930_v40, %v3012_v14  ;;  %v3151_v34 = vmax.f32 %v2931_v49, %v3014_v7  ;;  %v3015_v26 = vrot.slane %v6216_v2, 2 }
 0x1bc   : > { %v3018_v10 = vrot.slane %v8296_v46, 2  ;;  %v3711_v43 = vrot.slane %v3592_v12, 2  ;;  %v7160_v21 = vsel %vm3823_vm8, %v3592_v12, -inf  ;;  %v3235_v27 = vrot.slane %v6216_v2, 3 }
 0x1bd   : > { %v2654_v62 = vmax.f32 %v2594_v36, %v6191_v25  ;;  %v3370_v54 = vmax.f32 %v3150_v58, %v3232_v57  ;;  %v3371_v41 = vmax.f32 %v3151_v34, %v3234_v56  ;;  %v3919_v37 = vmax.f32 %v7128_v28, %v7160_v21 }
 0x1be   : > { %v7167_v14 = vmax.f32 %v3916_v13, %v7160_v21  ;;  %v3238_v31 = vrot.slane %v8296_v46, 3  ;;  %v3455_v58 = vrot.slane %v6216_v2, 4 }
 0x1bf   : > { %v2796_v51 = vrot.slane %v2654_v62, 1  ;;  %v3016_v23 = vrot.slane %v2654_v62, 2  ;;  %v3236_v6 = vrot.slane %v2654_v62, 3  ;;  %v3590_v12 = vmax.f32 %v3370_v54, %v3452_v38 }
 0x1c0   : > { %8297 = vst [vmem:[#allocation7_spill] sm:$0xff] %v7167_v14  ;;  %v7171_v35 = vmax.f32 %v3371_v41, %v3454_v39  ;;  %v8298_v39 = vmax.f32 %v7063_v30, %v7105_v19 }
 0x1c1   : > { %v2797_v57 = vsel %vm902_vm1, %v2795_v5, %v2796_v51  ;;  %v2799_v45 = vsel %vm902_vm1, %v2796_v51, %v2798_v44  ;;  %v3017_v13 = vsel %vm1215_vm2, %v3015_v26, %v3016_v23  ;;  %v3019_v7 = vsel %vm1215_vm2, %v3016_v23, %v3018_v10 }
 0x1c2   : > { %v3708_v40 = vrot.slane %v3590_v12, 2  ;;  %v3709_v49 = vrot.slane %v7171_v35, 2  ;;  %v7182_v56 = vsel %vm3812_vm7, %v3590_v12, -inf  ;;  %v2933_v38 = vmax.f32 %v6216_v2, %v2797_v57 }
 0x1c3   : > { %v3917_v5 = vmax.f32 %v7105_v19, %v7182_v56  ;;  %v7191_v36 = vmax.f32 %v8298_v39, %v7182_v56  ;;  %v4007_v34 = vmax.f32 %v7110_v22, %v7182_v56  ;;  %v8299_v26 = vmax.f32 %v7072_v18, %v7105_v19 }
 0x1c4   : > { %v3710_v2 = vsel %vm1215_vm2, %v3708_v40, %v3709_v49  ;;  %v3712_v41 = vsel %vm1215_vm2, %v3709_v49, %v3711_v43  ;;  %v2934_v51 = vmax.f32 %v2654_v62, %v2799_v45  ;;  %v3153_v23 = vmax.f32 %v2933_v38, %v3017_v13  ;;  %v8300_v13 = vld [vmem:[#allocation8_spill] sm:$0xff] }
 0x1c5   : > { %v7199_v54 = vmax.f32 %v8299_v26, %v7182_v56  ;;  %3796 = vst [vmem:[%s4858_s15 + $0x210] sm:$0xff] %v3710_v2  ;;  %3797 = vst [vmem:[%s4858_s15 + $0x230] sm:$0xff] %v3712_v41  ;;  %v3237_v30 = vsel %vm1528_vm3, %v3235_v27, %v3236_v6  ;;  %v3239_v12 = vsel %vm1528_vm3, %v3236_v6, %v3238_v31  ;;  %v3456_v57 = vrot.slane %v2654_v62, 4 }
 0x1c6   : > { %v3458_v22 = vrot.slane %v8296_v46, 4  ;;  %v3154_v39 = vmax.f32 %v2934_v51, %v3019_v7  ;;  %v3373_v33 = vmax.f32 %v3153_v23, %v3237_v30  ;;  %v2935_v18 = vmax.f32 %v8296_v46, %v2798_v44 }
 0x1c7   : > { %v2477_v19 = vmax.f32 %v8281_v63, %v8285_v48  ;;  %v3457_v43 = vsel %vm1841_vm4, %v3455_v58, %v3456_v57  ;;  %v2800_v40 = vrot.slane %v8300_v13, 1  ;;  %v2803_v27 = vrot.slane %v6404_v0, 1 }
 0x1c8   : > { %v3459_v45 = vsel %vm1841_vm4, %v3456_v57, %v3458_v22  ;;  %v3374_v49 = vmax.f32 %v3154_v39, %v3239_v12  ;;  %v3593_v6 = vmax.f32 %v3373_v33, %v3457_v43  ;;  %v3155_v62 = vmax.f32 %v2935_v18, %v3018_v10 }
 0x1c9   : > { %v2537_v38 = vmax.f32 %v2477_v19, %v8293_v59  ;;  %v3020_v7 = vrot.slane %v8300_v13, 2  ;;  %v3023_v44 = vrot.slane %v6404_v0, 2  ;;  %v3240_v46 = vrot.slane %v8300_v13, 3 }
 0x1ca   : > { %v3243_v63 = vrot.slane %v6404_v0, 3  ;;  %v7220_v58 = vmax.f32 %v3374_v49, %v3459_v45  ;;  %v3713_v26 = vrot.slane %v3593_v6, 2  ;;  %v7224_v2 = vsel %vm3812_vm7, %v3593_v6, -inf }
 0x1cb   : > { %v3375_v41 = vmax.f32 %v3155_v62, %v3238_v31  ;;  %v7229_v33 = vmax.f32 %v3917_v5, %v7224_v2  ;;  %v7234_v23 = vmax.f32 %v4007_v34, %v7224_v2  ;;  %v2597_v57 = vmax.f32 %v2537_v38, %v6191_v25 }
 0x1cc   : > { %8301 = vst [vmem:[#allocation8_spill] sm:$0xff] %v7220_v58  ;;  %v3714_v30 = vrot.slane %v7220_v58, 2  ;;  %v3460_v31 = vrot.slane %v8300_v13, 4  ;;  %v3463_v39 = vrot.slane %v6404_v0, 4  ;;  %v2938_v18 = vmax.f32 %v6404_v0, %v2803_v27 }
 0x1cd   : > { %v3595_v12 = vmax.f32 %v3375_v41, %v3458_v22  ;;  %v2480_v5 = vmax.f32 %v8285_v48, %v8293_v59  ;;  %v2805_v19 = vrot.slane %v6374_v15, 1  ;;  %v2657_v45 = vmax.f32 %v2597_v57, %v6281_v32 }
 0x1ce   : > { %v3715_v34 = vsel %vm1215_vm2, %v3713_v26, %v3714_v30  ;;  %v3158_v6 = vmax.f32 %v2938_v18, %v3023_v44  ;;  %v2808_v51 = vrot.slane %v6489_v60, 1 }
 0x1cf   : > { %v3716_v43 = vrot.slane %v3595_v12, 2  ;;  %v7247_v22 = vsel %vm3823_vm8, %v3595_v12, -inf  ;;  %3798 = vst [vmem:[%s4858_s15 + $0x250] sm:$0xff] %v3715_v34  ;;  %v2801_v38 = vrot.slane %v2657_v45, 1  ;;  %v3021_v26 = vrot.slane %v2657_v45, 2 }
 0x1d0   : > { %v3922_v49 = vmax.f32 %v7160_v21, %v7247_v22  ;;  %v7257_v0 = vmax.f32 %v3919_v37, %v7247_v22  ;;  %v3241_v41 = vrot.slane %v2657_v45, 3  ;;  %v3461_v12 = vrot.slane %v2657_v45, 4 }
 0x1d1   : > { %v3717_v62 = vsel %vm1215_vm2, %v3714_v30, %v3716_v43  ;;  %v3378_v57 = vmax.f32 %v3158_v6, %v3243_v63  ;;  %v2540_v34 = vmax.f32 %v2480_v5, %v6191_v25  ;;  %v2802_v10 = vsel %vm902_vm1, %v2800_v40, %v2801_v38 }
 0x1d2   : > { %3799 = vst [vmem:[%s4858_s15 + $0x270] sm:$0xff] %v3717_v62  ;;  %v2804_v37 = vsel %vm902_vm1, %v2801_v38, %v2803_v27  ;;  %v3022_v47 = vsel %vm1215_vm2, %v3020_v7, %v3021_v26  ;;  %v3024_v18 = vsel %vm1215_vm2, %v3021_v26, %v3023_v44  ;;  %v2936_v30 = vmax.f32 %v8300_v13, %v2802_v10 }
 0x1d3   : > { %v2937_v43 = vmax.f32 %v2657_v45, %v2804_v37  ;;  %v3242_v48 = vsel %vm1528_vm3, %v3240_v46, %v3241_v41  ;;  %v3244_v62 = vsel %vm1528_vm3, %v3241_v41, %v3243_v63  ;;  %v3462_v6 = vsel %vm1841_vm4, %v3460_v31, %v3461_v12 }
 0x1d4   : > { %v3464_v5 = vsel %vm1841_vm4, %v3461_v12, %v3463_v39  ;;  %v3598_v14 = vmax.f32 %v3378_v57, %v3463_v39  ;;  %v2600_v40 = vmax.f32 %v2540_v34, %v6281_v32  ;;  %v3156_v58 = vmax.f32 %v2936_v30, %v3022_v47 }
 0x1d5   : > { %v3157_v27 = vmax.f32 %v2937_v43, %v3024_v18  ;;  %v3025_v7 = vrot.slane %v6374_v15, 2  ;;  %v3028_v44 = vrot.slane %v6489_v60, 2  ;;  %v3245_v63 = vrot.slane %v6374_v15, 3 }
 0x1d6   : > { %v3721_v38 = vrot.slane %v3598_v14, 2  ;;  %v7279_v13 = vsel %vm3823_vm8, %v3598_v14, -inf  ;;  %v2660_v46 = vmax.f32 %v2600_v40, %v6367_v8  ;;  %v3376_v10 = vmax.f32 %v3156_v58, %v3242_v48 }
 0x1d7   : > { %v3377_v31 = vmax.f32 %v3157_v27, %v3244_v62  ;;  %v3925_v39 = vmax.f32 %v7247_v22, %v7279_v13  ;;  %v7286_v47 = vmax.f32 %v3922_v49, %v7279_v13  ;;  %v3248_v34 = vrot.slane %v6489_v60, 3 }
 0x1d8   : > { %v2806_v26 = vrot.slane %v2660_v46, 1  ;;  %v3026_v41 = vrot.slane %v2660_v46, 2  ;;  %v3246_v12 = vrot.slane %v2660_v46, 3  ;;  %v3596_v14 = vmax.f32 %v3376_v10, %v3462_v6 }
 0x1d9   : > { %v7290_v57 = vmax.f32 %v3377_v31, %v3464_v5  ;;  %v3465_v58 = vrot.slane %v6374_v15, 4  ;;  %v8302_v5 = vmax.f32 %v7182_v56, %v7224_v2 }
 0x1da   : > { %v2807_v48 = vsel %vm902_vm1, %v2805_v19, %v2806_v26  ;;  %v2809_v37 = vsel %vm902_vm1, %v2806_v26, %v2808_v51  ;;  %v3027_v49 = vsel %vm1215_vm2, %v3025_v7, %v3026_v41  ;;  %v3029_v18 = vsel %vm1215_vm2, %v3026_v41, %v3028_v44 }
 0x1db   : > { %v3718_v30 = vrot.slane %v3596_v14, 2  ;;  %v3719_v43 = vrot.slane %v7290_v57, 2  ;;  %v7301_v62 = vsel %vm3812_vm7, %v3596_v14, -inf  ;;  %v2939_v6 = vmax.f32 %v6374_v15, %v2807_v48 }
 0x1dc   : > { %v3923_v19 = vmax.f32 %v7224_v2, %v7301_v62  ;;  %v7310_v40 = vmax.f32 %v8302_v5, %v7301_v62  ;;  %v4013_v27 = vmax.f32 %v7229_v33, %v7301_v62  ;;  %v8303_v7 = vmax.f32 %v7191_v36, %v7224_v2 }
 0x1dd   : > { %v3720_v15 = vsel %vm1215_vm2, %v3718_v30, %v3719_v43  ;;  %v3722_v31 = vsel %vm1215_vm2, %v3719_v43, %v3721_v38  ;;  %v2940_v26 = vmax.f32 %v2660_v46, %v2809_v37  ;;  %v3159_v41 = vmax.f32 %v2939_v6, %v3027_v49  ;;  %v8304_v49 = vld [vmem:[#allocation9_spill] sm:$0xff] }
 0x1de   : > { %v7318_v10 = vmax.f32 %v8303_v7, %v7301_v62  ;;  %3800 = vst [vmem:[%s4858_s15 + $0x290] sm:$0xff] %v3720_v15  ;;  %3801 = vst [vmem:[%s4858_s15 + $0x2b0] sm:$0xff] %v3722_v31  ;;  %v3247_v56 = vsel %vm1528_vm3, %v3245_v63, %v3246_v12  ;;  %v3249_v14 = vsel %vm1528_vm3, %v3246_v12, %v3248_v34  ;;  %v3466_v48 = vrot.slane %v2660_v46, 4 }
 0x1df   : > { %v3468_v33 = vrot.slane %v6489_v60, 4  ;;  %v3160_v5 = vmax.f32 %v2940_v26, %v3029_v18  ;;  %v3379_v45 = vmax.f32 %v3159_v41, %v3247_v56  ;;  %v2941_v36 = vmax.f32 %v6489_v60, %v2808_v51 }
 0x1e0   : > { %v2483_v2 = vmax.f32 %v8293_v59, %v6191_v25  ;;  %v3467_v38 = vsel %vm1841_vm4, %v3465_v58, %v3466_v48  ;;  %v2810_v30 = vrot.slane %v8304_v49, 1  ;;  %v3030_v63 = vrot.slane %v8304_v49, 2 }
 0x1e1   : > { %v3469_v37 = vsel %vm1841_vm4, %v3466_v48, %v3468_v33  ;;  %v3380_v43 = vmax.f32 %v3160_v5, %v3249_v14  ;;  %v3599_v12 = vmax.f32 %v3379_v45, %v3467_v38  ;;  %v3161_v46 = vmax.f32 %v2941_v36, %v3028_v44 }
 0x1e2   : > { %v2543_v6 = vmax.f32 %v2483_v2, %v6281_v32  ;;  %v3033_v18 = vrot.slane %v6592_v53, 2  ;;  %v3250_v60 = vrot.slane %v8304_v49, 3  ;;  %v3253_v51 = vrot.slane %v6592_v53, 3 }
 0x1e3   : > { %v3470_v25 = vrot.slane %v8304_v49, 4  ;;  %v7339_v59 = vmax.f32 %v3380_v43, %v3469_v37  ;;  %v3723_v58 = vrot.slane %v3599_v12, 2  ;;  %v7343_v7 = vsel %vm3812_vm7, %v3599_v12, -inf }
 0x1e4   : > { %v3381_v15 = vmax.f32 %v3161_v46, %v3248_v34  ;;  %v7348_v32 = vmax.f32 %v3923_v19, %v7343_v7  ;;  %v7353_v31 = vmax.f32 %v4013_v27, %v7343_v7  ;;  %v2603_v56 = vmax.f32 %v2543_v6, %v6367_v8 }
 0x1e5   : > { %v3724_v26 = vrot.slane %v7339_v59, 2  ;;  %v3473_v34 = vrot.slane %v6592_v53, 4  ;;  %v8305_v14 = vrot.slane %v6592_v53, 1  ;;  %v2815_v19 = vrot.slane %v6582_v50, 1 }
 0x1e6   : > { %v3601_v41 = vmax.f32 %v3381_v15, %v3468_v33  ;;  %v2816_v5 = vrot.slane %v6601_v17, 1  ;;  %v3035_v36 = vrot.slane %v6582_v50, 2  ;;  %v2663_v8 = vmax.f32 %v2603_v56, %v6455_v55 }
 0x1e7   : > { %v2944_v48 = vmax.f32 %v6592_v53, %v8305_v14  ;;  %v3725_v27 = vsel %vm1215_vm2, %v3723_v58, %v3724_v26  ;;  %v8306_v14 = vrot.slane %v6705_v4, 1  ;;  %v8307_v45 = vrot.slane %v6592_v53, 1 }
 0x1e8   : > { %v3726_v2 = vrot.slane %v3601_v41, 2  ;;  %v7367_v33 = vsel %vm3823_vm8, %v3601_v41, -inf  ;;  %3802 = vst [vmem:[%s4858_s15 + $0x2d0] sm:$0xff] %v3725_v27  ;;  %v2811_v6 = vrot.slane %v2663_v8, 1  ;;  %v3031_v58 = vrot.slane %v2663_v8, 2 }
 0x1e9   : > { %v3928_v38 = vmax.f32 %v7279_v13, %v7367_v33  ;;  %v7377_v37 = vmax.f32 %v3925_v39, %v7367_v33  ;;  %v3164_v12 = vmax.f32 %v2944_v48, %v3033_v18  ;;  %v3251_v15 = vrot.slane %v2663_v8, 3 }
 0x1ea   : > { %v3727_v46 = vsel %vm1215_vm2, %v3724_v26, %v3726_v2  ;;  %v3471_v55 = vrot.slane %v2663_v8, 4  ;;  %v2817_v56 = vsel %vm902_vm1, %v2815_v19, %v2816_v5  ;;  %v2819_v27 = vsel %vm902_vm1, %v2816_v5, %v8306_v14 }
 0x1eb   : > { %3803 = vst [vmem:[%s4858_s15 + $0x2f0] sm:$0xff] %v3727_v46  ;;  %v3384_v41 = vmax.f32 %v3164_v12, %v3253_v51  ;;  %v2812_v39 = vsel %vm902_vm1, %v2810_v30, %v2811_v6  ;;  %v2814_v48 = vsel %vm902_vm1, %v2811_v6, %v8307_v45  ;;  %v3032_v26 = vsel %vm1215_vm2, %v3030_v63, %v3031_v58 }
 0x1ec   : > { %v3034_v2 = vsel %vm1215_vm2, %v3031_v58, %v3033_v18  ;;  %v2942_v46 = vmax.f32 %v8304_v49, %v2812_v39  ;;  %v2943_v43 = vmax.f32 %v2663_v8, %v2814_v48  ;;  %v3252_v12 = vsel %vm1528_vm3, %v3250_v60, %v3251_v15 }
 0x1ed   : > { %v3254_v19 = vsel %vm1528_vm3, %v3251_v15, %v3253_v51  ;;  %v3472_v44 = vsel %vm1841_vm4, %v3470_v25, %v3471_v55  ;;  %v3474_v5 = vsel %vm1841_vm4, %v3471_v55, %v3473_v34  ;;  %v3604_v30 = vmax.f32 %v3384_v41, %v3473_v34 }
 0x1ee   : > { %v2945_v53 = vmax.f32 %v6582_v50, %v2817_v56  ;;  %v3162_v14 = vmax.f32 %v2942_v46, %v3032_v26  ;;  %v3163_v45 = vmax.f32 %v2943_v43, %v3034_v2  ;;  %v2946_v63 = vmax.f32 %v6601_v17, %v2819_v27 }
 0x1ef   : > { %v3036_v18 = vrot.slane %v6601_v17, 2  ;;  %v3731_v6 = vrot.slane %v3604_v30, 2  ;;  %v7403_v49 = vsel %vm3823_vm8, %v3604_v30, -inf  ;;  %v3255_v60 = vrot.slane %v6582_v50, 3 }
 0x1f0   : > { %v3256_v51 = vrot.slane %v6601_v17, 3  ;;  %v3382_v25 = vmax.f32 %v3162_v14, %v3252_v12  ;;  %v3383_v8 = vmax.f32 %v3163_v45, %v3254_v19  ;;  %v3931_v34 = vmax.f32 %v7367_v33, %v7403_v49 }
 0x1f1   : > { %v7410_v43 = vmax.f32 %v3928_v38, %v7403_v49  ;;  %v3037_v15 = vsel %vm1215_vm2, %v3035_v36, %v3036_v18  ;;  %v8308_v55 = vrot.slane %v6705_v4, 2  ;;  %v3258_v2 = vrot.slane %v6705_v4, 3 }
 0x1f2   : > { %v3257_v56 = vsel %vm1528_vm3, %v3255_v60, %v3256_v51  ;;  %v3602_v27 = vmax.f32 %v3382_v25, %v3472_v44  ;;  %v7419_v39 = vmax.f32 %v3383_v8, %v3474_v5  ;;  %v3165_v48 = vmax.f32 %v2945_v53, %v3037_v15 }
 0x1f3   : > { %v3039_v41 = vsel %vm1215_vm2, %v3036_v18, %v8308_v55  ;;  %v3475_v38 = vrot.slane %v6582_v50, 4  ;;  %v3476_v46 = vrot.slane %v6601_v17, 4  ;;  %v3478_v36 = vrot.slane %v6705_v4, 4 }
 0x1f4   : > { %v3166_v26 = vmax.f32 %v2946_v63, %v3039_v41  ;;  %v3728_v12 = vrot.slane %v3602_v27, 2  ;;  %v3729_v19 = vrot.slane %v7419_v39, 2  ;;  %v7428_v44 = vsel %vm3812_vm7, %v3602_v27, -inf }
 0x1f5   : > { %v3385_v5 = vmax.f32 %v3165_v48, %v3257_v56  ;;  %v3929_v30 = vmax.f32 %v7343_v7, %v7428_v44  ;;  %v8309_v50 = vmax.f32 %v7301_v62, %v7343_v7  ;;  %v4019_v17 = vmax.f32 %v7348_v32, %v7428_v44 }
 0x1f6   : > { %v8310_v14 = vmax.f32 %v7310_v40, %v7343_v7  ;;  %v3730_v63 = vsel %vm1215_vm2, %v3728_v12, %v3729_v19  ;;  %v3732_v18 = vsel %vm1215_vm2, %v3729_v19, %v3731_v6  ;;  %v3259_v60 = vsel %vm1528_vm3, %v3256_v51, %v3258_v2 }
 0x1f7   : > { %v7436_v53 = vmax.f32 %v8309_v50, %v7428_v44  ;;  %v3477_v25 = vsel %vm1841_vm4, %v3475_v38, %v3476_v46  ;;  %3804 = vst [vmem:[%s4858_s15 + $0x310] sm:$0xff] %v3730_v63  ;;  %3805 = vst [vmem:[%s4858_s15 + $0x330] sm:$0xff] %v3732_v18  ;;  %v3386_v62 = vmax.f32 %v3166_v26, %v3259_v60  ;;  %v8311_v15 = vrot.slane %v6705_v4, 1 }
 0x1f8   : > { %v7444_v45 = vmax.f32 %v8310_v14, %v7428_v44  ;;  %v3479_v8 = vsel %vm1841_vm4, %v3476_v46, %v3478_v36  ;;  %v3605_v32 = vmax.f32 %v3385_v5, %v3477_v25  ;;  %v2820_v7 = vrot.slane %v6570_v16, 1 }
 0x1f9   : > { %v2947_v40 = vmax.f32 %v6705_v4, %v8311_v15  ;;  %v2821_v55 = vrot.slane %v6577_v24, 1  ;;  %v3040_v6 = vrot.slane %v6570_v16, 2  ;;  %v3041_v51 = vrot.slane %v6577_v24, 2 }
 0x1fa   : > { %v7460_v41 = vmax.f32 %v3386_v62, %v3479_v8  ;;  %v3733_v56 = vrot.slane %v3605_v32, 2  ;;  %v7464_v27 = vsel %vm3812_vm7, %v3605_v32, -inf  ;;  %v8312_v48 = vrot.slane %v6705_v4, 2 }
 0x1fb   : > { %v7469_v38 = vmax.f32 %v4019_v17, %v7464_v27  ;;  %v2822_v46 = vsel %vm902_vm1, %v2820_v7, %v2821_v55  ;;  %v8313_v12 = vrot.slane %v6700_v52, 1  ;;  %v3042_v5 = vsel %vm1215_vm2, %v3040_v6, %v3041_v51 }
 0x1fc   : > { %v3167_v26 = vmax.f32 %v2947_v40, %v8312_v48  ;;  %v3734_v50 = vrot.slane %v7460_v41, 2  ;;  %v2948_v63 = vmax.f32 %v6570_v16, %v2822_v46  ;;  %v8314_v18 = vrot.slane %v6700_v52, 2 }
 0x1fd   : > { %v2824_v19 = vsel %vm902_vm1, %v2821_v55, %v8313_v12  ;;  %v3260_v60 = vrot.slane %v6570_v16, 3  ;;  %v3261_v25 = vrot.slane %v6577_v24, 3  ;;  %v3263_v62 = vrot.slane %v6700_v52, 3 }
 0x1fe   : > { %v3387_v14 = vmax.f32 %v3167_v26, %v3258_v2  ;;  %v2949_v4 = vmax.f32 %v6577_v24, %v2824_v19  ;;  %v3044_v17 = vsel %vm1215_vm2, %v3041_v51, %v8314_v18  ;;  %v3735_v8 = vsel %vm1215_vm2, %v3733_v56, %v3734_v50 }
 0x1ff   : > { %v3168_v15 = vmax.f32 %v2948_v63, %v3042_v5  ;;  %3806 = vst [vmem:[%s4858_s15 + $0x350] sm:$0xff] %v3735_v8  ;;  %v3262_v2 = vsel %vm1528_vm3, %v3260_v60, %v3261_v25  ;;  %v3264_v7 = vsel %vm1528_vm3, %v3261_v25, %v3263_v62  ;;  %v3480_v55 = vrot.slane %v6570_v16, 4 }
 0x200   : > { %v3607_v32 = vmax.f32 %v3387_v14, %v3478_v36  ;;  %v3169_v40 = vmax.f32 %v2949_v4, %v3044_v17  ;;  %v3481_v6 = vrot.slane %v6577_v24, 4  ;;  %v3483_v46 = vrot.slane %v6700_v52, 4 }
 0x201   : > { %v3388_v26 = vmax.f32 %v3168_v15, %v3262_v2  ;;  %v3932_v12 = vmax.f32 %v7428_v44, %v7464_v27  ;;  %v7500_v19 = vmax.f32 %v3929_v30, %v7464_v27  ;;  %v4022_v5 = vmax.f32 %v7436_v53, %v7464_v27  ;;  %v8318_v2 = vld [vmem:[#allocation10_spill] sm:$0xff] }
 0x202   : > { %v3736_v51 = vrot.slane %v3607_v32, 2  ;;  %v7493_v48 = vsel %vm3823_vm8, %v3607_v32, -inf  ;;  %v3389_v56 = vmax.f32 %v3169_v40, %v3264_v7  ;;  %v3482_v36 = vsel %vm1841_vm4, %v3480_v55, %v3481_v6  ;;  %v8319_v55 = vld [vmem:[#allocation11_spill] sm:$0xff] }
 0x203   : > { %v3608_v24 = vmax.f32 %v3388_v26, %v3482_v36  ;;  %v8315_v14 = vrot.slane %v6700_v52, 1  ;;  %v3484_v4 = vsel %vm1841_vm4, %v3481_v6, %v3483_v46  ;;  %v3934_v18 = vmax.f32 %v7403_v49, %v7493_v48 }
 0x204   : > { %v3737_v16 = vsel %vm1215_vm2, %v3734_v50, %v3736_v51  ;;  %v7516_v44 = vmax.f32 %v3931_v34, %v7493_v48  ;;  %v4024_v30 = vmax.f32 %v7410_v43, %v7493_v48  ;;  %v7520_v53 = vmax.f32 %v3389_v56, %v3484_v4  ;;  %v8320_v51 = vld [vmem:[#allocation12_spill] sm:$0xff] }
 0x205   : > { %v2950_v63 = vmax.f32 %v6700_v52, %v8315_v14  ;;  %3807 = vst [vmem:[%s4858_s15 + $0x370] sm:$0xff] %v3737_v16  ;;  %v3738_v50 = vrot.slane %v3608_v24, 2  ;;  %v7524_v17 = vsel %vm3812_vm7, %v3608_v24, -inf  ;;  %v8317_v60 = vrot.slane %v6700_v52, 2 }
 0x206   : > { %8316 = vst [vmem:[#allocation9_spill] sm:$0xff] %v7520_v53  ;;  %v3935_v8 = vmax.f32 %v7464_v27, %v7524_v17  ;;  %v3980_v34 = vmax.f32 %v3932_v12, %v7524_v17  ;;  %v4025_v32 = vmax.f32 %v7500_v19, %v7524_v17  ;;  %v7534_v43 = vmax.f32 %v4022_v5, %v7524_v17 }
 0x207   : > { %v3170_v25 = vmax.f32 %v2950_v63, %v8317_v60  ;;  %v3739_v15 = vrot.slane %v7520_v53, 2  ;;  %v2825_v7 = vrot.slane %v8318_v2, 1  ;;  %v2826_v52 = vrot.slane %v8319_v55, 1 }
 0x208   : > { %v3045_v6 = vrot.slane %v8318_v2, 2  ;;  %v3046_v27 = vrot.slane %v8319_v55, 2  ;;  %v3048_v26 = vrot.slane %v8320_v51, 2  ;;  %v3265_v56 = vrot.slane %v8318_v2, 3 }
 0x209   : > { %v3390_v40 = vmax.f32 %v3170_v25, %v3263_v62  ;;  %v3740_v36 = vsel %vm1215_vm2, %v3738_v50, %v3739_v15  ;;  %v2827_v19 = vsel %vm902_vm1, %v2825_v7, %v2826_v52  ;;  %v8321_v16 = vrot.slane %v8320_v51, 1 }
 0x20a   : > { %3808 = vst [vmem:[%s4858_s15 + $0x390] sm:$0xff] %v3740_v36  ;;  %v2951_v24 = vmax.f32 %v8318_v2, %v2827_v19  ;;  %v3047_v14 = vsel %vm1215_vm2, %v3045_v6, %v3046_v27  ;;  %v3049_v63 = vsel %vm1215_vm2, %v3046_v27, %v3048_v26  ;;  %v3266_v50 = vrot.slane %v8319_v55, 3 }
 0x20b   : > { %v3610_v12 = vmax.f32 %v3390_v40, %v3483_v46  ;;  %v2829_v62 = vsel %vm902_vm1, %v2826_v52, %v8321_v16  ;;  %v3268_v17 = vrot.slane %v8320_v51, 3  ;;  %v3485_v19 = vrot.slane %v8318_v2, 4 }
 0x20c   : > { %v2952_v5 = vmax.f32 %v8319_v55, %v2829_v62  ;;  %v3171_v6 = vmax.f32 %v2951_v24, %v3047_v14  ;;  %v3267_v27 = vsel %vm1528_vm3, %v3265_v56, %v3266_v50  ;;  %v3486_v16 = vrot.slane %v8319_v55, 4  ;;  %v8324_v14 = vld [vmem:[#allocation16_spill] sm:$0xff] }
 0x20d   : > { %v3741_v4 = vrot.slane %v3610_v12, 2  ;;  %v3880_v46 = vsel %vm3823_vm8, %v3610_v12, -inf  ;;  %v3269_v12 = vsel %vm1528_vm3, %v3266_v50, %v3268_v17  ;;  %v3488_v62 = vrot.slane %v8320_v51, 4 }
 0x20e   : > { %v3937_v60 = vmax.f32 %v7493_v48, %v3880_v46  ;;  %v3982_v25 = vmax.f32 %v3934_v18, %v3880_v46  ;;  %v4027_v40 = vmax.f32 %v7516_v44, %v3880_v46  ;;  %v7559_v7 = vmax.f32 %v4024_v30, %v3880_v46 }
 0x20f   : > { %v3742_v52 = vsel %vm1215_vm2, %v3739_v15, %v3741_v4  ;;  %v3172_v36 = vmax.f32 %v2952_v5, %v3049_v63  ;;  %v3391_v18 = vmax.f32 %v3171_v6, %v3267_v27  ;;  %v8322_v44 = vrot.slane %v8320_v51, 1  ;;  %v8323_v15 = vld [vmem:[#allocation19_spill] sm:$0xff] }
 0x210   : > { %3809 = vst [vmem:[%s4858_s15 + $0x3b0] sm:$0xff] %v3742_v52  ;;  %v4130_v24 = vrot.slane %v8323_v15, 1  ;;  %v3487_v5 = vsel %vm1841_vm4, %v3485_v19, %v3486_v16  ;;  %v3489_v56 = vsel %vm1841_vm4, %v3486_v16, %v3488_v62  ;;  %v4131_v63 = vrot.slane %v8324_v14, 1 }
 0x211   : > { %v3392_v58 = vmax.f32 %v3172_v36, %v3269_v12  ;;  %v2953_v30 = vmax.f32 %v8320_v51, %v8322_v44  ;;  %v4274_v2 = vrot.slane %v8323_v15, 2  ;;  %v3611_v4 = vmax.f32 %v3391_v18, %v3487_v5 }
 0x212   : > { %v4275_v50 = vrot.slane %v8324_v14, 2  ;;  %v4132_v52 = vsel %vm902_vm1, %v4130_v24, %v4131_v63  ;;  %v4418_v51 = vrot.slane %v8323_v15, 3  ;;  %v4419_v6 = vrot.slane %v8324_v14, 3 }
 0x213   : > { %v7576_v55 = vmax.f32 %v3392_v58, %v3489_v56  ;;  %v3173_v46 = vmax.f32 %v2953_v30, %v3048_v26  ;;  %v4562_v36 = vrot.slane %v8323_v15, 4  ;;  %v3743_v27 = vrot.slane %v3611_v4, 2 }
 0x214   : > { %v3881_v19 = vsel %vm3812_vm7, %v3611_v4, -inf  ;;  %v4242_v44 = vmax.f32 %v8323_v15, %v4132_v52  ;;  %v4276_v5 = vsel %vm1215_vm2, %v4274_v2, %v4275_v50  ;;  %v4420_v56 = vsel %vm1528_vm3, %v4418_v51, %v4419_v6 }
 0x215   : > { %8325 = vst [vmem:[#allocation10_spill] sm:$0xff] %v7576_v55  ;;  %v3744_v12 = vrot.slane %v7576_v55, 2  ;;  %v3393_v58 = vmax.f32 %v3173_v46, %v3268_v17  ;;  %v7586_v16 = vmax.f32 %v3935_v8, %v3881_v19  ;;  %v7588_v26 = vmax.f32 %v3980_v34, %v3881_v19  ;;  %v8328_v8 = vld [vmem:[#allocation20_spill] sm:$0xff] }
 0x216   : > { %v7590_v18 = vmax.f32 %v4025_v32, %v3881_v19  ;;  %v4386_v55 = vmax.f32 %v4242_v44, %v4276_v5  ;;  %v4563_v1 = vrot.slane %v8324_v14, 4  ;;  %v4133_v17 = vrot.slane %v8328_v8, 1  ;;  %v8333_v5 = vld [vmem:[#allocation15_spill] sm:$0xff] }
 0x217   : > { %8326 = vst [vmem:[#allocation11_spill] sm:$0xff] %v7586_v16  ;;  %8327 = vst [vmem:[#allocation12_spill] sm:$0xff] %v7588_v26  ;;  %v3745_v30 = vsel %vm1215_vm2, %v3743_v27, %v3744_v12  ;;  %v3613_v24 = vmax.f32 %v3393_v58, %v3488_v62  ;;  %v4277_v34 = vrot.slane %v8328_v8, 2  ;;  %v4421_v4 = vrot.slane %v8328_v8, 3 }
 0x218   : > { %3810 = vst [vmem:[%s4858_s15 + $0x3d0] sm:$0xff] %v3745_v30  ;;  %v4565_v62 = vrot.slane %v8328_v8, 4  ;;  %v4530_v51 = vmax.f32 %v4386_v55, %v4420_v56  ;;  %v4564_v19 = vsel %vm1841_vm4, %v4562_v36, %v4563_v1  ;;  %v4134_v58 = vsel %vm902_vm1, %v4131_v63, %v4133_v17 }
 0x219   : > { %v3746_v32 = vrot.slane %v3613_v24, 2  ;;  %v3883_v15 = vsel %vm3823_vm8, %v3613_v24, -inf  ;;  %v4278_v9 = vsel %vm1215_vm2, %v4275_v50, %v4277_v34  ;;  %v4243_v30 = vmax.f32 %v8324_v14, %v4134_v58  ;;  %v8332_v24 = vld [vmem:[#allocation18_spill] sm:$0xff] }
 0x21a   : > { %v7604_v2 = vmax.f32 %v3937_v60, %v3883_v15  ;;  %v7606_v46 = vmax.f32 %v3982_v25, %v3883_v15  ;;  %v7608_v52 = vmax.f32 %v4027_v40, %v3883_v15  ;;  %v4674_v44 = vmax.f32 %v4530_v51, %v4564_v19 }
 0x21b   : > { %v3747_v27 = vsel %vm1215_vm2, %v3744_v12, %v3746_v32  ;;  %v4422_v60 = vsel %vm1528_vm3, %v4419_v6, %v4421_v4  ;;  %v4566_v25 = vsel %vm1841_vm4, %v4563_v1, %v4565_v62  ;;  %v3993_v40 = vmax.f32 %v8324_v14, %v8332_v24 }
 0x21c   : > { %8329 = vst [vmem:[#allocation19_spill] sm:$0xff] %v7604_v2  ;;  %8330 = vst [vmem:[#allocation16_spill] sm:$0xff] %v7606_v46  ;;  %v4135_v55 = vrot.slane %v6893_v3, 1  ;;  %v4279_v12 = vrot.slane %v6893_v3, 2  ;;  %v4423_v36 = vrot.slane %v6893_v3, 3  ;;  %v4387_v63 = vmax.f32 %v4243_v30, %v4278_v9 }
 0x21d   : > { %8331 = vst [vmem:[#allocation20_spill] sm:$0xff] %v7608_v52  ;;  %3811 = vst [vmem:[%s4858_s15 + $0x3f0] sm:$0xff] %v3747_v27  ;;  %v4567_v50 = vrot.slane %v6893_v3, 4  ;;  %v4138_v56 = vrot.slane %v8333_v5, 1  ;;  %v4282_v8 = vrot.slane %v8333_v5, 2  ;;  %v4136_v6 = vrot.slane %v3993_v40, 1 }
 0x21e   : > { %4706 = vst [vmem:[%s4858_s15 + $0x18] sm:$0xff] %v4674_v44  ;;  %v4280_v17 = vrot.slane %v3993_v40, 2  ;;  %v4424_v1 = vrot.slane %v3993_v40, 3  ;;  %v4568_v34 = vrot.slane %v3993_v40, 4  ;;  %v4531_v32 = vmax.f32 %v4387_v63, %v4422_v60 }
 0x21f   : > { %v4426_v14 = vrot.slane %v8333_v5, 3  ;;  %v4570_v15 = vrot.slane %v8333_v5, 4  ;;  %v4041_v4 = vmax.f32 %v3993_v40, %v6935_v20  ;;  %v4137_v62 = vsel %vm902_vm1, %v4135_v55, %v4136_v6 }
 0x220   : > { %v4281_v51 = vsel %vm1215_vm2, %v4279_v12, %v4280_v17  ;;  %v4425_v27 = vsel %vm1528_vm3, %v4423_v36, %v4424_v1  ;;  %v4569_v19 = vsel %vm1841_vm4, %v4567_v50, %v4568_v34  ;;  %v4675_v58 = vmax.f32 %v4531_v32, %v4566_v25 }
 0x221   : > { %v4244_v9 = vmax.f32 %v6893_v3, %v4137_v62  ;;  %v4139_v44 = vsel %vm902_vm1, %v4136_v6, %v4138_v56  ;;  %v4283_v30 = vsel %vm1215_vm2, %v4280_v17, %v4282_v8  ;;  %v4427_v63 = vsel %vm1528_vm3, %v4424_v1, %v4426_v14 }
 0x222   : > { %v4245_v60 = vmax.f32 %v3993_v40, %v4139_v44  ;;  %v4571_v2 = vsel %vm1841_vm4, %v4568_v34, %v4570_v15  ;;  %v4140_v55 = vrot.slane %v6962_v29, 1  ;;  %4707 = vst [vmem:[%s4858_s15 + $0x38] sm:$0xff] %v4675_v58  ;;  %v4141_v16 = vrot.slane %v4041_v4, 1  ;;  %v8335_v58 = vld [vmem:[#allocation17_spill] sm:$0xff] }
 0x223   : > { %v4388_v12 = vmax.f32 %v4244_v9, %v4281_v51  ;;  %v4284_v36 = vrot.slane %v6962_v29, 2  ;;  %v4285_v50 = vrot.slane %v4041_v4, 2  ;;  %v4428_v3 = vrot.slane %v6962_v29, 3 }
 0x224   : > { %v4389_v25 = vmax.f32 %v4245_v60, %v4283_v30  ;;  %v4429_v32 = vrot.slane %v4041_v4, 3  ;;  %v4572_v56 = vrot.slane %v6962_v29, 4  ;;  %v4142_v40 = vsel %vm902_vm1, %v4140_v55, %v4141_v16  ;;  %v8337_v30 = vld [vmem:[#allocation4_spill] sm:$0xff] }
 0x225   : > { %v4532_v8 = vmax.f32 %v4388_v12, %v4425_v27  ;;  %v4286_v6 = vsel %vm1215_vm2, %v4284_v36, %v4285_v50  ;;  %v4573_v17 = vrot.slane %v4041_v4, 4  ;;  %v4246_v34 = vmax.f32 %v6962_v29, %v4142_v40  ;;  %v8334_v27 = vld [vmem:[#allocation13_spill] sm:$0xff] }
 0x226   : > { %v4533_v1 = vmax.f32 %v4389_v25, %v4427_v63  ;;  %v4430_v14 = vsel %vm1528_vm3, %v4428_v3, %v4429_v32  ;;  %v4042_v15 = vmax.f32 %v8333_v5, %v6933_v42  ;;  %v8336_v9 = vmax.f32 %v8334_v27, %v8335_v58 }
 0x227   : > { %v4676_v62 = vmax.f32 %v4532_v8, %v4569_v19  ;;  %v4574_v51 = vsel %vm1841_vm4, %v4572_v56, %v4573_v17  ;;  %v4145_v60 = vrot.slane %v8337_v30, 1  ;;  %v4390_v63 = vmax.f32 %v4246_v34, %v4286_v6  ;;  %v8338_v34 = vld [vmem:[#allocation22_spill] sm:$0xff] }
 0x228   : > { %v3948_v44 = vmax.f32 %v8336_v9, %v8332_v24  ;;  %v4677_v55 = vmax.f32 %v4533_v1, %v4571_v2  ;;  %v4143_v12 = vrot.slane %v4042_v15, 1  ;;  %v4287_v29 = vrot.slane %v4042_v15, 2  ;;  %v8339_v9 = vld [vmem:[#allocation14_spill] sm:$0xff] }
 0x229   : > { %4708 = vst [vmem:[%s4858_s15 + $0x58] sm:$0xff] %v4676_v62  ;;  %v4431_v36 = vrot.slane %v4042_v15, 3  ;;  %v4575_v25 = vrot.slane %v4042_v15, 4  ;;  %v4289_v5 = vrot.slane %v8337_v30, 2  ;;  %v4534_v19 = vmax.f32 %v4390_v63, %v4430_v14 }
 0x22a   : > { %v3996_v3 = vmax.f32 %v3948_v44, %v6935_v20  ;;  %4709 = vst [vmem:[%s4858_s15 + $0x78] sm:$0xff] %v4677_v55  ;;  %v4144_v56 = vsel %vm902_vm1, %v4141_v16, %v4143_v12  ;;  %v4288_v8 = vsel %vm1215_vm2, %v4285_v50, %v4287_v29  ;;  %v4433_v40 = vrot.slane %v8337_v30, 3 }
 0x22b   : > { %v4247_v2 = vmax.f32 %v4041_v4, %v4144_v56  ;;  %v4432_v6 = vsel %vm1528_vm3, %v4429_v32, %v4431_v36  ;;  %v4576_v1 = vsel %vm1841_vm4, %v4573_v17, %v4575_v25  ;;  %v4678_v62 = vmax.f32 %v4534_v19, %v4574_v51 }
 0x22c   : > { %v4044_v15 = vmax.f32 %v3996_v3, %v8338_v34  ;;  %v4577_v27 = vrot.slane %v8337_v30, 4  ;;  %v8340_v14 = vmax.f32 %v8339_v9, %v6933_v42  ;;  %v3903_v16 = vmax.f32 %v8335_v58, %v8332_v24 }
 0x22d   : > { %v4391_v50 = vmax.f32 %v4247_v2, %v4288_v8  ;;  %4710 = vst [vmem:[%s4858_s15 + $0x98] sm:$0xff] %v4678_v62 }
 0x22e   : > { %v4045_v44 = vmax.f32 %v8340_v14, %v7009_v61  ;;  %v4146_v55 = vrot.slane %v4044_v15, 1  ;;  %v4290_v4 = vrot.slane %v4044_v15, 2  ;;  %v4434_v63 = vrot.slane %v4044_v15, 3 }
 0x22f   : > { %v4578_v32 = vrot.slane %v4044_v15, 4  ;;  %v4535_v51 = vmax.f32 %v4391_v50, %v4432_v6  ;;  %v4438_v14 = vrot.slane %v7080_v11, 3  ;;  %v4582_v50 = vrot.slane %v7080_v11, 4 }
 0x230   : > { %v4148_v17 = vrot.slane %v4045_v44, 1  ;;  %v4292_v12 = vrot.slane %v4045_v44, 2  ;;  %v4436_v29 = vrot.slane %v4045_v44, 3  ;;  %v4147_v36 = vsel %vm902_vm1, %v4145_v60, %v4146_v55 }
 0x231   : > { %v4291_v25 = vsel %vm1215_vm2, %v4289_v5, %v4290_v4  ;;  %v4435_v42 = vsel %vm1528_vm3, %v4433_v40, %v4434_v63  ;;  %v4248_v3 = vmax.f32 %v8337_v30, %v4147_v36  ;;  %v4579_v58 = vsel %vm1841_vm4, %v4577_v27, %v4578_v32 }
 0x232   : > { %v4149_v19 = vsel %vm902_vm1, %v4146_v55, %v4148_v17  ;;  %v4293_v56 = vsel %vm1215_vm2, %v4290_v4, %v4292_v12  ;;  %v4679_v8 = vmax.f32 %v4535_v51, %v4576_v1  ;;  %v4437_v62 = vsel %vm1528_vm3, %v4434_v63, %v4436_v29  ;;  %v8342_v55 = vld [vmem:[#allocation21_spill] sm:$0xff] }
 0x233   : > { %v4249_v2 = vmax.f32 %v4044_v15, %v4149_v19  ;;  %v4580_v6 = vrot.slane %v4045_v44, 4  ;;  %v4392_v9 = vmax.f32 %v4248_v3, %v4291_v25  ;;  %v3951_v60 = vmax.f32 %v3903_v16, %v6935_v20  ;;  %v8341_v44 = vld [vmem:[#allocation3_spill] sm:$0xff]  ;;  %v8344_v12 = vld [vmem:[#allocation25_spill] sm:$0xff]  ;;  %v8345_v25 = vld [vmem:[#allocation24_spill] sm:$0xff] }
 0x234   : > { %v4150_v5 = vrot.slane %v7080_v11, 1  ;;  %v4294_v40 = vrot.slane %v7080_v11, 2  ;;  %4711 = vst [vmem:[%s4858_s15 + $0xb8] sm:$0xff] %v4679_v8  ;;  %v8343_v16 = vmax.f32 %v8342_v55, %v7009_v61  ;;  %v3906_v63 = vmax.f32 %v8332_v24, %v6935_v20 }
 0x235   : > { %v4393_v30 = vmax.f32 %v4249_v2, %v4293_v56  ;;  %v4581_v27 = vsel %vm1841_vm4, %v4578_v32, %v4580_v6  ;;  %v4536_v1 = vmax.f32 %v4392_v9, %v4435_v42  ;;  %v3999_v15 = vmax.f32 %v3951_v60, %v8338_v34 }
 0x236   : > { %v4048_v4 = vmax.f32 %v8343_v16, %v8341_v44  ;;  %v4155_v29 = vrot.slane %v8344_v12, 1  ;;  %v4299_v32 = vrot.slane %v8344_v12, 2  ;;  %v4443_v51 = vrot.slane %v8344_v12, 3 }
 0x237   : > { %v4537_v17 = vmax.f32 %v4393_v30, %v4437_v62  ;;  %v4680_v36 = vmax.f32 %v4536_v1, %v4579_v58  ;;  %v4047_v42 = vmax.f32 %v3999_v15, %v8345_v25  ;;  %v3954_v2 = vmax.f32 %v3906_v63, %v8338_v34  ;;  %v8346_v58 = vld [vmem:[#allocation23_spill] sm:$0xff] }
 0x238   : > { %v4153_v3 = vrot.slane %v4048_v4, 1  ;;  %v4297_v19 = vrot.slane %v4048_v4, 2  ;;  %v4441_v8 = vrot.slane %v4048_v4, 3  ;;  %v4585_v61 = vrot.slane %v4048_v4, 4 }
 0x239   : > { %v4681_v56 = vmax.f32 %v4537_v17, %v4581_v27  ;;  %4712 = vst [vmem:[%s4858_s15 + $0xd8] sm:$0xff] %v4680_v36  ;;  %v4151_v24 = vrot.slane %v4047_v42, 1  ;;  %v4295_v62 = vrot.slane %v4047_v42, 2  ;;  %v4439_v6 = vrot.slane %v4047_v42, 3 }
 0x23a   : > { %v4583_v9 = vrot.slane %v4047_v42, 4  ;;  %v4002_v60 = vmax.f32 %v3954_v2, %v8345_v25  ;;  %v4587_v30 = vrot.slane %v8344_v12, 4  ;;  %v8347_v1 = vmax.f32 %v8346_v58, %v8341_v44 }
 0x23b   : > { %4713 = vst [vmem:[%s4858_s15 + $0xf8] sm:$0xff] %v4681_v56  ;;  %v3909_v27 = vmax.f32 %v6935_v20, %v8338_v34  ;;  %v4152_v55 = vsel %vm902_vm1, %v4150_v5, %v4151_v24  ;;  %v4296_v16 = vsel %vm1215_vm2, %v4294_v40, %v4295_v62  ;;  %v4440_v4 = vsel %vm1528_vm3, %v4438_v14, %v4439_v6  ;;  %v8348_v20 = vld [vmem:[#allocation6_spill] sm:$0xff] }
 0x23c   : > { %v4051_v15 = vmax.f32 %v8347_v1, %v7128_v28  ;;  %v4584_v63 = vsel %vm1841_vm4, %v4582_v50, %v4583_v9  ;;  %v4250_v17 = vmax.f32 %v7080_v11, %v4152_v55  ;;  %v4154_v36 = vsel %vm902_vm1, %v4151_v24, %v4153_v3 }
 0x23d   : > { %v4298_v56 = vsel %vm1215_vm2, %v4295_v62, %v4297_v19  ;;  %v4442_v44 = vsel %vm1528_vm3, %v4439_v6, %v4441_v8  ;;  %v4251_v2 = vmax.f32 %v4047_v42, %v4154_v36  ;;  %v4586_v58 = vsel %vm1841_vm4, %v4583_v9, %v4585_v61 }
 0x23e   : > { %v4050_v1 = vmax.f32 %v4002_v60, %v8348_v20  ;;  %v4158_v5 = vrot.slane %v4051_v15, 1  ;;  %v4394_v46 = vmax.f32 %v4250_v17, %v4296_v16  ;;  %v4302_v40 = vrot.slane %v4051_v15, 2  ;;  %v8349_v17 = vld [vmem:[#allocation2_spill] sm:$0xff] }
 0x23f   : > { %v4446_v26 = vrot.slane %v4051_v15, 3  ;;  %v4590_v14 = vrot.slane %v4051_v15, 4  ;;  %v4395_v52 = vmax.f32 %v4251_v2, %v4298_v56  ;;  %v3957_v19 = vmax.f32 %v3909_v27, %v8345_v25 }
 0x240   : > { %v4156_v50 = vrot.slane %v4050_v1, 1  ;;  %v4300_v53 = vrot.slane %v4050_v1, 2  ;;  %v4444_v11 = vrot.slane %v4050_v1, 3  ;;  %v4538_v55 = vmax.f32 %v4394_v46, %v4440_v4 }
 0x241   : > { %v4588_v3 = vrot.slane %v4050_v1, 4  ;;  %v4160_v42 = vrot.slane %v7199_v54, 1  ;;  %v4539_v8 = vmax.f32 %v4395_v52, %v4442_v44  ;;  %v3912_v44 = vmax.f32 %v8338_v34, %v8345_v25 }
 0x242   : > { %v4157_v61 = vsel %vm902_vm1, %v4155_v29, %v4156_v50  ;;  %v4301_v24 = vsel %vm1215_vm2, %v4299_v32, %v4300_v53  ;;  %v4445_v62 = vsel %vm1528_vm3, %v4443_v51, %v4444_v11  ;;  %v4682_v6 = vmax.f32 %v4538_v55, %v4584_v63 }
 0x243   : > { %v4252_v9 = vmax.f32 %v8344_v12, %v4157_v61  ;;  %v4589_v60 = vsel %vm1841_vm4, %v4587_v30, %v4588_v3  ;;  %v4159_v46 = vsel %vm902_vm1, %v4156_v50, %v4158_v5  ;;  %v4683_v15 = vmax.f32 %v4539_v8, %v4586_v58 }
 0x244   : > { %v4253_v16 = vmax.f32 %v4050_v1, %v4159_v46  ;;  %v4303_v27 = vsel %vm1215_vm2, %v4300_v53, %v4302_v40  ;;  %v4447_v52 = vsel %vm1528_vm3, %v4444_v11, %v4446_v26  ;;  %4714 = vst [vmem:[%s4858_s15 + $0x118] sm:$0xff] %v4682_v6  ;;  %v4591_v4 = vsel %vm1841_vm4, %v4588_v3, %v4590_v14 }
 0x245   : > { %v4396_v29 = vmax.f32 %v4252_v9, %v4301_v24  ;;  %v4005_v32 = vmax.f32 %v3957_v19, %v8348_v20  ;;  %v4304_v51 = vrot.slane %v7199_v54, 2  ;;  %4715 = vst [vmem:[%s4858_s15 + $0x138] sm:$0xff] %v4683_v15  ;;  %v4448_v30 = vrot.slane %v7199_v54, 3 }
 0x246   : > { %v4397_v12 = vmax.f32 %v4253_v16, %v4303_v27  ;;  %v4592_v63 = vrot.slane %v7199_v54, 4  ;;  %v8350_v53 = vmax.f32 %v8349_v17, %v7128_v28  ;;  %v4165_v2 = vrot.slane %v7234_v23, 1 }
 0x247   : > { %v4540_v26 = vmax.f32 %v4396_v29, %v4445_v62  ;;  %v4053_v56 = vmax.f32 %v4005_v32, %v7171_v35  ;;  %v3960_v8 = vmax.f32 %v3912_v44, %v8348_v20  ;;  %v4309_v27 = vrot.slane %v7234_v23, 2 }
 0x248   : > { %v4054_v36 = vmax.f32 %v8350_v53, %v7160_v21  ;;  %v4541_v58 = vmax.f32 %v4397_v12, %v4447_v52  ;;  %v4597_v32 = vrot.slane %v7234_v23, 4  ;;  %v8352_v12 = vld [vmem:[#allocation5_spill] sm:$0xff]  ;;  %v3915_v17 = vmax.f32 %v8345_v25, %v8348_v20 }
 0x249   : > { %v4684_v14 = vmax.f32 %v4540_v26, %v4589_v60  ;;  %v4161_v50 = vrot.slane %v4053_v56, 1  ;;  %v4305_v11 = vrot.slane %v4053_v56, 2  ;;  %v4449_v55 = vrot.slane %v4053_v56, 3 }
 0x24a   : > { %v4163_v1 = vrot.slane %v4054_v36, 1  ;;  %v4307_v5 = vrot.slane %v4054_v36, 2  ;;  %v4451_v40 = vrot.slane %v4054_v36, 3  ;;  %v4685_v28 = vmax.f32 %v4541_v58, %v4591_v4 }
 0x24b   : > { %v4593_v3 = vrot.slane %v4053_v56, 4  ;;  %v4595_v19 = vrot.slane %v4054_v36, 4  ;;  %4716 = vst [vmem:[%s4858_s15 + $0x158] sm:$0xff] %v4684_v14  ;;  %v4162_v61 = vsel %vm902_vm1, %v4160_v42, %v4161_v50  ;;  %v4306_v34 = vsel %vm1215_vm2, %v4304_v51, %v4305_v11 }
 0x24c   : > { %v4450_v24 = vsel %vm1528_vm3, %v4448_v30, %v4449_v55  ;;  %v4164_v62 = vsel %vm902_vm1, %v4161_v50, %v4163_v1  ;;  %4717 = vst [vmem:[%s4858_s15 + $0x178] sm:$0xff] %v4685_v28  ;;  %v4254_v6 = vmax.f32 %v7199_v54, %v4162_v61  ;;  %v4308_v46 = vsel %vm1215_vm2, %v4305_v11, %v4307_v5  ;;  %v8351_v54 = vld [vmem:[#allocation8_spill] sm:$0xff] }
 0x24d   : > { %v4594_v9 = vsel %vm1841_vm4, %v4592_v63, %v4593_v3  ;;  %v4255_v60 = vmax.f32 %v4053_v56, %v4164_v62  ;;  %v4452_v15 = vsel %vm1528_vm3, %v4449_v55, %v4451_v40  ;;  %v4596_v16 = vsel %vm1841_vm4, %v4593_v3, %v4595_v19 }
 0x24e   : > { %v4008_v42 = vmax.f32 %v3960_v8, %v7171_v35  ;;  %v4398_v52 = vmax.f32 %v4254_v6, %v4306_v34  ;;  %v4453_v4 = vrot.slane %v7234_v23, 3  ;;  %v8353_v30 = vmax.f32 %v8352_v12, %v7160_v21 }
 0x24f   : > { %v4399_v29 = vmax.f32 %v4255_v60, %v4308_v46  ;;  %v4170_v53 = vrot.slane %v7318_v10, 1  ;;  %v4314_v56 = vrot.slane %v7318_v10, 2  ;;  %v4458_v44 = vrot.slane %v7318_v10, 3  ;;  %v8354_v46 = vld [vmem:[#allocation7_spill] sm:$0xff] }
 0x250   : > { %v4056_v51 = vmax.f32 %v4008_v42, %v8351_v54  ;;  %v4057_v63 = vmax.f32 %v8353_v30, %v7247_v22  ;;  %v4542_v36 = vmax.f32 %v4398_v52, %v4450_v24  ;;  %v3963_v6 = vmax.f32 %v3915_v17, %v7171_v35 }
 0x251   : > { %v4543_v26 = vmax.f32 %v4399_v29, %v4452_v15  ;;  %v8355_v15 = vmax.f32 %v8354_v46, %v7247_v22  ;;  %v4175_v29 = vrot.slane %v7353_v31, 1 }
 0x252   : > { %v4166_v58 = vrot.slane %v4056_v51, 1  ;;  %v4310_v1 = vrot.slane %v4056_v51, 2  ;;  %v4454_v5 = vrot.slane %v4056_v51, 3  ;;  %v4598_v40 = vrot.slane %v4056_v51, 4 }
 0x253   : > { %v4686_v14 = vmax.f32 %v4542_v36, %v4594_v9  ;;  %v4687_v21 = vmax.f32 %v4543_v26, %v4596_v16  ;;  %v4168_v50 = vrot.slane %v4057_v63, 1  ;;  %v4312_v11 = vrot.slane %v4057_v63, 2 }
 0x254   : > { %v4167_v25 = vsel %vm902_vm1, %v4165_v2, %v4166_v58  ;;  %v4311_v55 = vsel %vm1215_vm2, %v4309_v27, %v4310_v1  ;;  %v4455_v28 = vsel %vm1528_vm3, %v4453_v4, %v4454_v5  ;;  %v4599_v3 = vsel %vm1841_vm4, %v4597_v32, %v4598_v40 }
 0x255   : > { %4718 = vst [vmem:[%s4858_s15 + $0x198] sm:$0xff] %v4686_v14  ;;  %4719 = vst [vmem:[%s4858_s15 + $0x1b8] sm:$0xff] %v4687_v21  ;;  %v4256_v19 = vmax.f32 %v7234_v23, %v4167_v25  ;;  %v4169_v8 = vsel %vm902_vm1, %v4166_v58, %v4168_v50  ;;  %v4313_v61 = vsel %vm1215_vm2, %v4310_v1, %v4312_v11  ;;  %v4456_v34 = vrot.slane %v4057_v63, 3 }
 0x256   : > { %v4257_v24 = vmax.f32 %v4056_v51, %v4169_v8  ;;  %v4600_v62 = vrot.slane %v4057_v63, 4  ;;  %v4602_v2 = vrot.slane %v7318_v10, 4  ;;  %v4060_v16 = vmax.f32 %v8355_v15, %v7279_v13 }
 0x257   : > { %v4400_v9 = vmax.f32 %v4256_v19, %v4311_v55  ;;  %v4457_v60 = vsel %vm1528_vm3, %v4454_v5, %v4456_v34  ;;  %v3918_v23 = vmax.f32 %v8348_v20, %v7171_v35  ;;  %v4011_v52 = vmax.f32 %v3963_v6, %v8351_v54 }
 0x258   : > { %v4401_v42 = vmax.f32 %v4257_v24, %v4313_v61  ;;  %v4601_v27 = vsel %vm1841_vm4, %v4598_v40, %v4600_v62  ;;  %v4173_v32 = vrot.slane %v4060_v16, 1  ;;  %v4317_v51 = vrot.slane %v4060_v16, 2 }
 0x259   : > { %v4544_v4 = vmax.f32 %v4400_v9, %v4455_v28  ;;  %v4461_v12 = vrot.slane %v4060_v16, 3  ;;  %v4059_v63 = vmax.f32 %v4011_v52, %v7290_v57  ;;  %v4605_v22 = vrot.slane %v4060_v16, 4 }
 0x25a   : > { %v4545_v30 = vmax.f32 %v4401_v42, %v4457_v60  ;;  %v3966_v17 = vmax.f32 %v3918_v23, %v8351_v54  ;;  %v4319_v36 = vrot.slane %v7353_v31, 2  ;;  %v4463_v26 = vrot.slane %v7353_v31, 3 }
 0x25b   : > { %v4688_v20 = vmax.f32 %v4544_v4, %v4599_v3  ;;  %v4607_v58 = vrot.slane %v7353_v31, 4  ;;  %v4171_v5 = vrot.slane %v4059_v63, 1  ;;  %v4315_v40 = vrot.slane %v4059_v63, 2 }
 0x25c   : > { %v4689_v1 = vmax.f32 %v4545_v30, %v4601_v27  ;;  %v4459_v14 = vrot.slane %v4059_v63, 3  ;;  %v4603_v21 = vrot.slane %v4059_v63, 4  ;;  %v4014_v50 = vmax.f32 %v3966_v17, %v7290_v57 }
 0x25d   : > { %4720 = vst [vmem:[%s4858_s15 + $0x1d8] sm:$0xff] %v4688_v20  ;;  %v8356_v11 = vmax.f32 %v7257_v0, %v7279_v13  ;;  %v3921_v55 = vmax.f32 %v7171_v35, %v8351_v54  ;;  %v4172_v28 = vsel %vm902_vm1, %v4170_v53, %v4171_v5  ;;  %v4316_v3 = vsel %vm1215_vm2, %v4314_v56, %v4315_v40 }
 0x25e   : > { %4721 = vst [vmem:[%s4858_s15 + $0x1f8] sm:$0xff] %v4689_v1  ;;  %v4460_v19 = vsel %vm1528_vm3, %v4458_v44, %v4459_v14  ;;  %v4174_v8 = vsel %vm902_vm1, %v4171_v5, %v4173_v32  ;;  %v4258_v61 = vmax.f32 %v7318_v10, %v4172_v28  ;;  %v4604_v34 = vsel %vm1841_vm4, %v4602_v2, %v4603_v21 }
 0x25f   : > { %v4063_v25 = vmax.f32 %v8356_v11, %v7367_v33  ;;  %v4259_v24 = vmax.f32 %v4059_v63, %v4174_v8  ;;  %v4318_v0 = vsel %vm1215_vm2, %v4315_v40, %v4317_v51  ;;  %v4462_v13 = vsel %vm1528_vm3, %v4459_v14, %v4461_v12 }
 0x260   : > { %v4606_v35 = vsel %vm1841_vm4, %v4603_v21, %v4605_v22  ;;  %v4062_v62 = vmax.f32 %v4014_v50, %v7339_v59  ;;  %v4402_v6 = vmax.f32 %v4258_v61, %v4316_v3  ;;  %v3969_v42 = vmax.f32 %v3921_v55, %v7290_v57 }
 0x261   : > { %v4178_v53 = vrot.slane %v4063_v25, 1  ;;  %v4403_v56 = vmax.f32 %v4259_v24, %v4318_v0  ;;  %v4322_v9 = vrot.slane %v4063_v25, 2  ;;  %v4466_v44 = vrot.slane %v4063_v25, 3 }
 0x262   : > { %v4176_v60 = vrot.slane %v4062_v62, 1  ;;  %v4320_v46 = vrot.slane %v4062_v62, 2  ;;  %v4464_v15 = vrot.slane %v4062_v62, 3  ;;  %v4608_v10 = vrot.slane %v4062_v62, 4 }
 0x263   : > { %v4546_v16 = vmax.f32 %v4402_v6, %v4460_v19  ;;  %v4547_v2 = vmax.f32 %v4403_v56, %v4462_v13  ;;  %v4610_v23 = vrot.slane %v4063_v25, 4  ;;  %v4612_v40 = vrot.slane %v7444_v45, 4 }
 0x264   : > { %v4177_v27 = vsel %vm902_vm1, %v4175_v29, %v4176_v60  ;;  %v4321_v52 = vsel %vm1215_vm2, %v4319_v36, %v4320_v46  ;;  %v4465_v4 = vsel %vm1528_vm3, %v4463_v26, %v4464_v15  ;;  %v4609_v32 = vsel %vm1841_vm4, %v4607_v58, %v4608_v10 }
 0x265   : > { %v4690_v51 = vmax.f32 %v4546_v16, %v4604_v34  ;;  %v4691_v12 = vmax.f32 %v4547_v2, %v4606_v35  ;;  %v4260_v30 = vmax.f32 %v7353_v31, %v4177_v27  ;;  %v4179_v63 = vsel %vm902_vm1, %v4176_v60, %v4178_v53 }
 0x266   : > { %v4261_v22 = vmax.f32 %v4062_v62, %v4179_v63  ;;  %v4323_v17 = vsel %vm1215_vm2, %v4320_v46, %v4322_v9  ;;  %v4467_v20 = vsel %vm1528_vm3, %v4464_v15, %v4466_v44  ;;  %v4611_v1 = vsel %vm1841_vm4, %v4608_v10, %v4610_v23 }
 0x267   : > { %4722 = vst [vmem:[%s4858_s15 + $0x218] sm:$0xff] %v4690_v51  ;;  %4723 = vst [vmem:[%s4858_s15 + $0x238] sm:$0xff] %v4691_v12  ;;  %v4404_v29 = vmax.f32 %v4260_v30, %v4321_v52  ;;  %v4017_v36 = vmax.f32 %v3969_v42, %v7339_v59  ;;  %v4180_v26 = vrot.slane %v7444_v45, 1  ;;  %v4324_v58 = vrot.slane %v7444_v45, 2 }
 0x268   : > { %v4405_v5 = vmax.f32 %v4261_v22, %v4323_v17  ;;  %v4468_v31 = vrot.slane %v7444_v45, 3  ;;  %v8357_v14 = vmax.f32 %v7286_v47, %v7367_v33  ;;  %v3924_v25 = vmax.f32 %v8351_v54, %v7290_v57 }
 0x269   : > { %v4548_v50 = vmax.f32 %v4404_v29, %v4465_v4  ;;  %v4065_v11 = vmax.f32 %v4017_v36, %v7419_v39  ;;  %v4185_v55 = vrot.slane %v7469_v38, 1  ;;  %v4329_v16 = vrot.slane %v7469_v38, 2 }
 0x26a   : > { %v4066_v21 = vmax.f32 %v8357_v14, %v7403_v49  ;;  %v4549_v28 = vmax.f32 %v4405_v5, %v4467_v20  ;;  %v3972_v35 = vmax.f32 %v3924_v25, %v7339_v59  ;;  %v4473_v42 = vrot.slane %v7469_v38, 3 }
 0x26b   : > { %v4692_v61 = vmax.f32 %v4548_v50, %v4609_v32  ;;  %v4181_v34 = vrot.slane %v4065_v11, 1  ;;  %v4325_v24 = vrot.slane %v4065_v11, 2  ;;  %v4469_v0 = vrot.slane %v4065_v11, 3 }
 0x26c   : > { %v4183_v3 = vrot.slane %v4066_v21, 1  ;;  %v4327_v19 = vrot.slane %v4066_v21, 2  ;;  %v4471_v8 = vrot.slane %v4066_v21, 3  ;;  %v4693_v47 = vmax.f32 %v4549_v28, %v4611_v1 }
 0x26d   : > { %v4613_v33 = vrot.slane %v4065_v11, 4  ;;  %v4615_v13 = vrot.slane %v4066_v21, 4  ;;  %4724 = vst [vmem:[%s4858_s15 + $0x258] sm:$0xff] %v4692_v61  ;;  %v4182_v62 = vsel %vm902_vm1, %v4180_v26, %v4181_v34  ;;  %v4326_v54 = vsel %vm1215_vm2, %v4324_v58, %v4325_v24 }
 0x26e   : > { %v4470_v53 = vsel %vm1528_vm3, %v4468_v31, %v4469_v0  ;;  %v4184_v6 = vsel %vm902_vm1, %v4181_v34, %v4183_v3  ;;  %4725 = vst [vmem:[%s4858_s15 + $0x278] sm:$0xff] %v4693_v47  ;;  %v4262_v56 = vmax.f32 %v7444_v45, %v4182_v62  ;;  %v4328_v60 = vsel %vm1215_vm2, %v4325_v24, %v4327_v19  ;;  %v8359_v62 = vld [vmem:[#allocation9_spill] sm:$0xff] }
 0x26f   : > { %v4614_v9 = vsel %vm1841_vm4, %v4612_v40, %v4613_v33  ;;  %v4263_v44 = vmax.f32 %v4065_v11, %v4184_v6  ;;  %v4472_v46 = vsel %vm1528_vm3, %v4469_v0, %v4471_v8  ;;  %v4616_v15 = vsel %vm1841_vm4, %v4613_v33, %v4615_v13 }
 0x270   : > { %v4020_v10 = vmax.f32 %v3972_v35, %v7419_v39  ;;  %v4406_v2 = vmax.f32 %v4262_v56, %v4326_v54  ;;  %v4617_v27 = vrot.slane %v7469_v38, 4  ;;  %v8358_v52 = vmax.f32 %v7377_v37, %v7403_v49 }
 0x271   : > { %v4407_v23 = vmax.f32 %v4263_v44, %v4328_v60  ;;  %v3927_v32 = vmax.f32 %v7290_v57, %v7339_v59  ;;  %v4190_v51 = vrot.slane %v7534_v43, 1  ;;  %v4334_v63 = vrot.slane %v7534_v43, 2  ;;  %v8360_v60 = vld [vmem:[#allocation20_spill] sm:$0xff] }
 0x272   : > { %v4068_v45 = vmax.f32 %v4020_v10, %v7460_v41  ;;  %v4069_v4 = vmax.f32 %v8358_v52, %v7493_v48  ;;  %v4550_v12 = vmax.f32 %v4406_v2, %v4470_v53  ;;  %v4478_v22 = vrot.slane %v7534_v43, 3 }
 0x273   : > { %v4551_v30 = vmax.f32 %v4407_v23, %v4472_v46  ;;  %v3975_v25 = vmax.f32 %v3927_v32, %v7419_v39  ;;  %v4193_v19 = vrot.slane %v7559_v7, 1  ;;  %v4337_v8 = vrot.slane %v7559_v7, 2 }
 0x274   : > { %v4186_v17 = vrot.slane %v4068_v45, 1  ;;  %v4330_v20 = vrot.slane %v4068_v45, 2  ;;  %v4474_v1 = vrot.slane %v4068_v45, 3  ;;  %v4618_v29 = vrot.slane %v4068_v45, 4 }
 0x275   : > { %v4694_v36 = vmax.f32 %v4550_v12, %v4614_v9  ;;  %v4695_v37 = vmax.f32 %v4551_v30, %v4616_v15  ;;  %v4188_v49 = vrot.slane %v4069_v4, 1  ;;  %v4332_v48 = vrot.slane %v4069_v4, 2 }
 0x276   : > { %v4187_v57 = vsel %vm902_vm1, %v4185_v55, %v4186_v17  ;;  %v4331_v26 = vsel %vm1215_vm2, %v4329_v16, %v4330_v20  ;;  %v4475_v58 = vsel %vm1528_vm3, %v4473_v42, %v4474_v1  ;;  %v4619_v5 = vsel %vm1841_vm4, %v4617_v27, %v4618_v29 }
 0x277   : > { %4726 = vst [vmem:[%s4858_s15 + $0x298] sm:$0xff] %v4694_v36  ;;  %4727 = vst [vmem:[%s4858_s15 + $0x2b8] sm:$0xff] %v4695_v37  ;;  %v4264_v31 = vmax.f32 %v7469_v38, %v4187_v57  ;;  %v4189_v40 = vsel %vm902_vm1, %v4186_v17, %v4188_v49  ;;  %v4333_v14 = vsel %vm1215_vm2, %v4330_v20, %v4332_v48  ;;  %v4476_v21 = vrot.slane %v4069_v4, 3  ;;  %v8362_v49 = vld [vmem:[#allocation12_spill] sm:$0xff] }
 0x278   : > { %v4265_v50 = vmax.f32 %v4068_v45, %v4189_v40  ;;  %v4620_v11 = vrot.slane %v4069_v4, 4  ;;  %v4622_v55 = vrot.slane %v7534_v43, 4  ;;  %v4023_v34 = vmax.f32 %v3975_v25, %v7460_v41 }
 0x279   : > { %v4408_v28 = vmax.f32 %v4264_v31, %v4331_v26  ;;  %v4477_v3 = vsel %vm1528_vm3, %v4474_v1, %v4476_v21  ;;  %v4481_v24 = vrot.slane %v7559_v7, 3  ;;  %v4625_v47 = vrot.slane %v7559_v7, 4 }
 0x27a   : > { %v4409_v61 = vmax.f32 %v4265_v50, %v4333_v14  ;;  %v4621_v38 = vsel %vm1841_vm4, %v4618_v29, %v4620_v11  ;;  %v3930_v33 = vmax.f32 %v7339_v59, %v7419_v39  ;;  %v4195_v13 = vrot.slane %v7590_v18, 1  ;;  %v8361_v29 = vld [vmem:[#allocation10_spill] sm:$0xff] }
 0x27b   : > { %v4552_v0 = vmax.f32 %v4408_v28, %v4475_v58  ;;  %v4071_v54 = vmax.f32 %v4023_v34, %v8359_v62  ;;  %v4339_v53 = vrot.slane %v7590_v18, 2  ;;  %v4483_v6 = vrot.slane %v7590_v18, 3 }
 0x27c   : > { %v4553_v35 = vmax.f32 %v4409_v61, %v4477_v3  ;;  %v3978_v9 = vmax.f32 %v3930_v33, %v7460_v41  ;;  %v4627_v44 = vrot.slane %v7590_v18, 4  ;;  %v4198_v7 = vrot.slane %v8360_v60, 1 }
 0x27d   : > { %v4696_v56 = vmax.f32 %v4552_v0, %v4619_v5  ;;  %v4191_v15 = vrot.slane %v4071_v54, 1  ;;  %v4335_v59 = vrot.slane %v4071_v54, 2  ;;  %v4479_v10 = vrot.slane %v4071_v54, 3 }
 0x27e   : > { %v4697_v46 = vmax.f32 %v4553_v35, %v4621_v38  ;;  %v4623_v16 = vrot.slane %v4071_v54, 4  ;;  %v4026_v2 = vmax.f32 %v3978_v9, %v8359_v62  ;;  %v4342_v23 = vrot.slane %v8360_v60, 2 }
 0x27f   : > { %4728 = vst [vmem:[%s4858_s15 + $0x2d8] sm:$0xff] %v4696_v56  ;;  %v4486_v42 = vrot.slane %v8360_v60, 3  ;;  %v4192_v27 = vsel %vm902_vm1, %v4190_v51, %v4191_v15  ;;  %v4336_v45 = vsel %vm1215_vm2, %v4334_v63, %v4335_v59  ;;  %v4480_v52 = vsel %vm1528_vm3, %v4478_v22, %v4479_v10 }
 0x280   : > { %4729 = vst [vmem:[%s4858_s15 + $0x2f8] sm:$0xff] %v4697_v46  ;;  %v4194_v4 = vsel %vm902_vm1, %v4191_v15, %v4193_v19  ;;  %v4266_v32 = vmax.f32 %v7534_v43, %v4192_v27  ;;  %v4624_v12 = vsel %vm1841_vm4, %v4622_v55, %v4623_v16  ;;  %v4338_v17 = vsel %vm1215_vm2, %v4335_v59, %v4337_v8 }
 0x281   : > { %v4267_v30 = vmax.f32 %v4071_v54, %v4194_v4  ;;  %v4482_v20 = vsel %vm1528_vm3, %v4479_v10, %v4481_v24  ;;  %v4626_v1 = vsel %vm1841_vm4, %v4623_v16, %v4625_v47  ;;  %v4074_v36 = vmax.f32 %v4026_v2, %v8361_v29 }
 0x282   : > { %v4630_v51 = vrot.slane %v8360_v60, 4  ;;  %v4410_v63 = vmax.f32 %v4266_v32, %v4336_v45  ;;  %v3933_v22 = vmax.f32 %v7419_v39, %v7460_v41  ;;  %v4200_v43 = vrot.slane %v8362_v49, 1  ;;  %v8364_v32 = vld [vmem:[#allocation11_spill] sm:$0xff] }
 0x283   : > { %v4411_v37 = vmax.f32 %v4267_v30, %v4338_v17  ;;  %v4196_v48 = vrot.slane %v4074_v36, 1  ;;  %v4340_v57 = vrot.slane %v4074_v36, 2  ;;  %v4484_v26 = vrot.slane %v4074_v36, 3 }
 0x284   : > { %v4628_v58 = vrot.slane %v4074_v36, 4  ;;  %v4554_v5 = vmax.f32 %v4410_v63, %v4480_v52  ;;  %v3981_v40 = vmax.f32 %v3933_v22, %v8359_v62  ;;  %v4344_v14 = vrot.slane %v8362_v49, 2 }
 0x285   : > { %v4555_v31 = vmax.f32 %v4411_v37, %v4482_v20  ;;  %v4197_v21 = vsel %vm902_vm1, %v4195_v13, %v4196_v48  ;;  %v4341_v50 = vsel %vm1215_vm2, %v4339_v53, %v4340_v57  ;;  %v4485_v39 = vsel %vm1528_vm3, %v4483_v6, %v4484_v26 }
 0x286   : > { %v4629_v11 = vsel %vm1841_vm4, %v4627_v44, %v4628_v58  ;;  %v4698_v25 = vmax.f32 %v4554_v5, %v4624_v12  ;;  %v4268_v28 = vmax.f32 %v7590_v18, %v4197_v21  ;;  %v4199_v3 = vsel %vm902_vm1, %v4196_v48, %v4198_v7  ;;  %v8363_v18 = vld [vmem:[#allocation16_spill] sm:$0xff] }
 0x287   : > { %v4699_v55 = vmax.f32 %v4555_v31, %v4626_v1  ;;  %v4269_v19 = vmax.f32 %v4074_v36, %v4199_v3  ;;  %v4343_v8 = vsel %vm1215_vm2, %v4340_v57, %v4342_v23  ;;  %v4487_v61 = vsel %vm1528_vm3, %v4484_v26, %v4486_v42  ;;  %v8365_v36 = vld [vmem:[#allocation19_spill] sm:$0xff] }
 0x288   : > { %v4631_v38 = vsel %vm1841_vm4, %v4628_v58, %v4630_v51  ;;  %4730 = vst [vmem:[%s4858_s15 + $0x318] sm:$0xff] %v4698_v25  ;;  %v4412_v34 = vmax.f32 %v4268_v28, %v4341_v50  ;;  %v4029_v24 = vmax.f32 %v3981_v40, %v8361_v29  ;;  %v4488_v0 = vrot.slane %v8362_v49, 3 }
 0x289   : > { %4731 = vst [vmem:[%s4858_s15 + $0x338] sm:$0xff] %v4699_v55  ;;  %v4632_v47 = vrot.slane %v8362_v49, 4  ;;  %v4413_v33 = vmax.f32 %v4269_v19, %v4343_v8  ;;  %v4203_v13 = vrot.slane %v8363_v18, 1  ;;  %v4347_v35 = vrot.slane %v8363_v18, 2 }
 0x28a   : > { %v4491_v54 = vrot.slane %v8363_v18, 3  ;;  %v4556_v53 = vmax.f32 %v4412_v34, %v4485_v39  ;;  %v4201_v6 = vrot.slane %v4029_v24, 1  ;;  %v4345_v56 = vrot.slane %v4029_v24, 2 }
 0x28b   : > { %v4489_v9 = vrot.slane %v4029_v24, 3  ;;  %v4557_v44 = vmax.f32 %v4413_v33, %v4487_v61  ;;  %v4633_v60 = vrot.slane %v4029_v24, 4  ;;  %v3936_v7 = vmax.f32 %v7460_v41, %v8359_v62 }
 0x28c   : > { %v4700_v46 = vmax.f32 %v4556_v53, %v4629_v11  ;;  %v4202_v15 = vsel %vm902_vm1, %v4200_v43, %v4201_v6  ;;  %v4346_v59 = vsel %vm1215_vm2, %v4344_v14, %v4345_v56  ;;  %v4635_v10 = vrot.slane %v8363_v18, 4 }
 0x28d   : > { %v4701_v16 = vmax.f32 %v4557_v44, %v4631_v38  ;;  %v4270_v2 = vmax.f32 %v8362_v49, %v4202_v15  ;;  %v4490_v23 = vsel %vm1528_vm3, %v4488_v0, %v4489_v9  ;;  %v4204_v42 = vsel %vm902_vm1, %v4201_v6, %v4203_v13 }
 0x28e   : > { %4732 = vst [vmem:[%s4858_s15 + $0x358] sm:$0xff] %v4700_v46  ;;  %v4634_v27 = vsel %vm1841_vm4, %v4632_v47, %v4633_v60  ;;  %v4271_v45 = vmax.f32 %v4029_v24, %v4204_v42  ;;  %v4348_v41 = vsel %vm1215_vm2, %v4345_v56, %v4347_v35  ;;  %v4492_v62 = vsel %vm1528_vm3, %v4489_v9, %v4491_v54 }
 0x28f   : > { %4733 = vst [vmem:[%s4858_s15 + $0x378] sm:$0xff] %v4701_v16  ;;  %v4414_v52 = vmax.f32 %v4270_v2, %v4346_v59  ;;  %v3984_v4 = vmax.f32 %v3936_v7, %v8361_v29  ;;  %v4205_v12 = vrot.slane %v8364_v32, 1  ;;  %v4349_v30 = vrot.slane %v8364_v32, 2 }
 0x290   : > { %v4415_v17 = vmax.f32 %v4271_v45, %v4348_v41  ;;  %v4636_v20 = vsel %vm1841_vm4, %v4633_v60, %v4635_v10  ;;  %v4493_v1 = vrot.slane %v8364_v32, 3  ;;  %v4208_v51 = vrot.slane %v8365_v36, 1 }
 0x291   : > { %v4558_v63 = vmax.f32 %v4414_v52, %v4490_v23  ;;  %v4206_v37 = vrot.slane %v3984_v4, 1  ;;  %v4350_v22 = vrot.slane %v3984_v4, 2  ;;  %v4494_v49 = vrot.slane %v3984_v4, 3 }
 0x292   : > { %v4559_v43 = vmax.f32 %v4415_v17, %v4492_v62  ;;  %v4637_v29 = vrot.slane %v8364_v32, 4  ;;  %v4352_v48 = vrot.slane %v8365_v36, 2  ;;  %v4496_v57 = vrot.slane %v8365_v36, 3 }
 0x293   : > { %v4702_v26 = vmax.f32 %v4558_v63, %v4634_v27  ;;  %v4207_v58 = vsel %vm902_vm1, %v4205_v12, %v4206_v37  ;;  %v4351_v5 = vsel %vm1215_vm2, %v4349_v30, %v4350_v22  ;;  %v4638_v31 = vrot.slane %v3984_v4, 4 }
 0x294   : > { %v4703_v40 = vmax.f32 %v4559_v43, %v4636_v20  ;;  %v4272_v14 = vmax.f32 %v8364_v32, %v4207_v58  ;;  %v4209_v21 = vsel %vm902_vm1, %v4206_v37, %v4208_v51  ;;  %v4495_v50 = vsel %vm1528_vm3, %v4493_v1, %v4494_v49 }
 0x295   : > { %4734 = vst [vmem:[%s4858_s15 + $0x398] sm:$0xff] %v4702_v26  ;;  %v4273_v39 = vmax.f32 %v3984_v4, %v4209_v21  ;;  %v4353_v11 = vsel %vm1215_vm2, %v4350_v22, %v4352_v48  ;;  %v4640_v25 = vrot.slane %v8365_v36, 4  ;;  %v4497_v28 = vsel %vm1528_vm3, %v4494_v49, %v4496_v57 }
 0x296   : > { %4735 = vst [vmem:[%s4858_s15 + $0x3b8] sm:$0xff] %v4703_v40  ;;  %v4416_v55 = vmax.f32 %v4272_v14, %v4351_v5  ;;  %v4639_v3 = vsel %vm1841_vm4, %v4637_v29, %v4638_v31 }
 0x297   : > { %v4417_v19 = vmax.f32 %v4273_v39, %v4353_v11  ;;  %v4641_v61 = vsel %vm1841_vm4, %v4638_v31, %v4640_v25 }
 0x298   : > { %v4560_v8 = vmax.f32 %v4416_v55, %v4495_v50 }
 0x299   : > { %v4561_v38 = vmax.f32 %v4417_v19, %v4497_v28 }
 0x29a   : > { %v4704_v34 = vmax.f32 %v4560_v8, %v4639_v3 }
 0x29b   : > { %v4705_v24 = vmax.f32 %v4561_v38, %v4641_v61 }
 0x29c   : > { %4736 = vst [vmem:[%s4858_s15 + $0x3d8] sm:$0xff] %v4704_v34 }
 0x29d   : > { %4737 = vst [vmem:[%s4858_s15 + $0x3f8] sm:$0xff] %v4705_v24 }
 0x29e PF: > { %s11_s6 = sadd.s32 1, %s4819_s6  }
 0x29f   : > { %p8_p4 = scmp.ge.s32.totalorder %s11_s6, 4  }
 0x2a1   :  { %10 = sbr.rel (!%p8_p4) target bundleno = 1 (0x1), region = 54 }

</bundles_post_ra>
